<compile_context>
chip_gen: v5e
topology: v5e:2x2
jax: 0.10.0
libtpu: 0.0.40
codegen_flags: <defaults>
</compile_context>

<pallas_src>
import functools

import jax
import jax.numpy as jnp
from jax.experimental import pallas as pl
from jax.experimental.pallas import tpu as pltpu


def _round_up(a, m):
    return (a + m - 1) // m * m


# ----------------------------------------------------------------------------
# Kernel 1: SAGEConv (mean aggregation): out = (A @ x) @ Wl + x @ Wr + b
# Tiled over output rows (parallel) and the N reduction axis (arbitrary).
# A@x is bf16 x bf16 with an f32 VMEM accumulator; projections run in f32.
# ----------------------------------------------------------------------------
def sage_kernel(a_ref, xk_ref, xi_ref, wl_ref, wr_ref, b_ref, out_ref, acc_ref):
    k = pl.program_id(1)

    @pl.when(k == 0)
    def _():
        acc_ref[...] = jnp.zeros_like(acc_ref)

    acc_ref[...] += jnp.dot(a_ref[...], xk_ref[...],
                            preferred_element_type=jnp.float32)

    @pl.when(k == pl.num_programs(1) - 1)
    def _():
        # Keep the accumulator f32 through the projection (correctness review).
        out = (
            jnp.dot(acc_ref[...], wl_ref[...],
                    preferred_element_type=jnp.float32)
            + jnp.dot(xi_ref[...], wr_ref[...],
                      preferred_element_type=jnp.float32)
            + b_ref[...]
        )
        out_ref[...] = out.astype(out_ref.dtype)


def sage_conv(a, x_bf, x_f32, w_l, w_r, b_l, *, tm, tk):
    Np = a.shape[0]
    Dp = x_bf.shape[1]
    Gp = w_l.shape[1]
    return pl.pallas_call(
        sage_kernel,
        out_shape=jax.ShapeDtypeStruct((Np, Gp), jnp.float32),
        grid=(Np // tm, Np // tk),
        in_specs=[
            pl.BlockSpec((tm, tk), lambda i, k: (i, k)),   # A tile (bf16)
            pl.BlockSpec((tk, Dp), lambda i, k: (k, 0)),   # x rows for A@x (bf16)
            pl.BlockSpec((tm, Dp), lambda i, k: (i, 0)),   # x rows, self term (f32)
            pl.BlockSpec((Dp, Gp), lambda i, k: (0, 0)),   # W_l (f32)
            pl.BlockSpec((Dp, Gp), lambda i, k: (0, 0)),   # W_r (f32)
            pl.BlockSpec((1, Gp), lambda i, k: (0, 0)),    # bias
        ],
        out_specs=pl.BlockSpec((tm, Gp), lambda i, k: (i, 0)),
        scratch_shapes=[pltpu.VMEM((tm, Dp), jnp.float32)],
        compiler_params=pltpu.CompilerParams(
            dimension_semantics=("parallel", "arbitrary"),
            vmem_limit_bytes=48 * 1024 * 1024),
    )(a, x_bf, x_f32, w_l, w_r, b_l)


# ----------------------------------------------------------------------------
# Kernel 2: fused multi-layer LSTM + edge predictor.
# Layout: edges on LANES, gate axis (4H) / features / hidden on SUBLANES.
#   layer 0:   pre = [W_ih0 | W_hh0] @ [x_t ; h0]        (one K=Fp+H dot)
#   layer l>0: pre = [W_ih_l | W_hh_l] @ [h_{l-1} ; h_l] (one K=2H dot)
# Gate rows are pre-permuted to (i, f, o, g): one sigmoid over [3H, te],
# one tanh over [H, te]. h/c never touch HBM; only [1, te] scores are written.
# ----------------------------------------------------------------------------
def fused_lstm_pred_kernel(xT_ref, w0_ref, b0_ref, w_rest_ref, b_rest_ref,
                           srcT_ref, tgtT_ref, wsrc_ref, wtgt_ref, wlstm_ref,
                           bpred_ref, out_ref, x0h_scr, hh_scr,
                           *, num_layers, hidden, seq_len, feat_pad):
    H = hidden
    Fp = feat_pad
    te = out_ref.shape[-1]
    bf16 = jnp.bfloat16
    f32 = jnp.float32

    # Hoisted weights / biases (resident across the serial recurrence; never
    # re-broadcast inside the loop).
    w0 = w0_ref[...]                                              # [4H, Fp+H] bf16
    b0 = jnp.broadcast_to(b0_ref[...], (4 * H, te))
    w_r = [w_rest_ref[l] for l in range(num_layers - 1)]          # [4H, 2H] bf16
    b_r = [jnp.broadcast_to(b_rest_ref[l], (4 * H, te))
           for l in range(num_layers - 1)]

    # Predictor terms independent of the recurrence: hoisted above the loop so
    # the XLU sublane reductions overlap early-step compute instead of
    # serializing into the epilogue.
    pred_base = (jnp.sum(srcT_ref[...] * wsrc_ref[...], axis=0, keepdims=True)
                 + jnp.sum(tgtT_ref[...] * wtgt_ref[...], axis=0, keepdims=True)
                 + bpred_ref[0, 0])

    def gate_math(pre, c):
        # Gate rows were permuted to (i, f, o, g) at init: one contiguous
        # sigmoid over 3H sublanes and one tanh over H sublanes.
        sig = jax.nn.sigmoid(pre[0:3 * H])
        g_g = jnp.tanh(pre[3 * H:4 * H])
        c_new = sig[H:2 * H] * c + sig[0:H] * g_g
        h_new = sig[2 * H:3 * H] * jnp.tanh(c_new)
        return h_new, c_new

    def step(t, carry):
        hs, cs = carry
        # Layer 0: fused [W_ih0 | W_hh0] @ [x_t ; h0] -- single K=(Fp+H) matmul.
        x0h_scr[0:Fp, :] = xT_ref[t]
        x0h_scr[Fp:Fp + H, :] = hs[0].astype(bf16)
        pre0 = jnp.dot(w0, x0h_scr[...], preferred_element_type=f32) + b0
        h, c = gate_math(pre0, cs[0])
        new_hs, new_cs = [h], [c]
        for l in range(num_layers - 1):
            # Layers >= 1: fused [W_ih | W_hh] @ [h_{l-1} ; h_l] -- K=2H matmul.
            hh_scr[0:H, :] = h.astype(bf16)
            hh_scr[H:2 * H, :] = hs[l + 1].astype(bf16)
            pre = jnp.dot(w_r[l], hh_scr[...], preferred_element_type=f32) + b_r[l]
            h, c = gate_math(pre, cs[l + 1])
            new_hs.append(h)
            new_cs.append(c)
        return tuple(new_hs), tuple(new_cs)

    zeros = tuple(jnp.zeros((H, te), f32) for _ in range(num_layers))
    carry = (zeros, zeros)
    if seq_len <= 16:
        # Fully unrolled at trace time: maximum LLO scheduling visibility.
        for t in range(seq_len):
            carry = step(t, carry)
    else:
        # Serially dependent recurrence: low unroll avoids spilling [4H, te]
        # intermediates (matters most on v5e's single vst slot).
        carry = jax.lax.fori_loop(0, seq_len, step, carry, unroll=2)
    h_top = carry[0][-1]                                          # [H, te]

    # Lane-dense [1, te] output store; only the recurrence-dependent term left.
    out_ref[...] = (pred_base
                    + jnp.sum(h_top * wlstm_ref[...], axis=0, keepdims=True)
                    ).astype(out_ref.dtype)


def fused_lstm_predictor(xT, w0, b0, w_rest, b_rest, srcT, tgtT,
                         wsrc, wtgt, wlstm, bpred, *, num_layers, hidden,
                         seq_len, te):
    T, Fp, Ep = xT.shape
    fourH, K0 = w0.shape
    G = srcT.shape[0]
    H = hidden
    Lm1 = num_layers - 1
    kernel = functools.partial(fused_lstm_pred_kernel, num_layers=num_layers,
                               hidden=H, seq_len=seq_len, feat_pad=Fp)
    return pl.pallas_call(
        kernel,
        out_shape=jax.ShapeDtypeStruct((1, Ep), jnp.float32),
        grid=(Ep // te,),
        in_specs=[
            pl.BlockSpec((T, Fp, te), lambda e: (0, 0, e)),         # edge feats^T (bf16)
            pl.BlockSpec((fourH, K0), lambda e: (0, 0)),            # packed [Wih0|Whh0]
            pl.BlockSpec((fourH, 1), lambda e: (0, 0)),             # layer-0 bias
            pl.BlockSpec((Lm1, fourH, 2 * H), lambda e: (0, 0, 0)), # packed [Wih|Whh] l>=1
            pl.BlockSpec((Lm1, fourH, 1), lambda e: (0, 0, 0)),     # biases l>=1
            pl.BlockSpec((G, te), lambda e: (0, e)),                # source embeddings^T
            pl.BlockSpec((G, te), lambda e: (0, e)),                # target embeddings^T
            pl.BlockSpec((G, 1), lambda e: (0, 0)),                 # predictor w_src
            pl.BlockSpec((G, 1), lambda e: (0, 0)),                 # predictor w_tgt
            pl.BlockSpec((H, 1), lambda e: (0, 0)),                 # predictor w_lstm
            pl.BlockSpec(memory_space=pltpu.MemorySpace.SMEM),      # predictor bias
        ],
        out_specs=pl.BlockSpec((1, te), lambda e: (0, e)),
        scratch_shapes=[pltpu.VMEM((Fp + H, te), jnp.bfloat16),     # [x_t ; h0] operand
                        pltpu.VMEM((2 * H, te), jnp.bfloat16)],     # [h_{l-1}; h_l] operand
        compiler_params=pltpu.CompilerParams(
            dimension_semantics=("parallel",),
            vmem_limit_bytes=48 * 1024 * 1024),
    )(xT, w0, b0, w_rest, b_rest, srcT, tgtT, wsrc, wtgt, wlstm, bpred)


# ----------------------------------------------------------------------------
# Parameters (PyTorch-equivalent init, gate rows permuted to (i,f,o,g),
# recurrent weights packed [W_ih | W_hh]).
# ----------------------------------------------------------------------------
def init_params(key, *, num_nodes, embedding_dim, lstm_hidden, lstm_layers,
                gcn_hidden, edge_attr_dim):
    assert lstm_layers >= 2, "fused LSTM kernel is written for >= 2 layers"
    D, G, H, F = embedding_dim, gcn_hidden, lstm_hidden, edge_attr_dim
    keys = jax.random.split(key, 10 + 4 * (lstm_layers - 1))
    ki = iter(keys)
    p = {}
    # PyTorch gate order (i, f, g, o)  ->  kernel order (i, f, o, g)
    perm = jnp.concatenate([jnp.arange(0, 2 * H), jnp.arange(3 * H, 4 * H),
                            jnp.arange(2 * H, 3 * H)])
    # nn.Embedding: N(0, 1)
    p["node_emb"] = jax.random.normal(next(ki), (num_nodes, D), jnp.float32)
    # SAGEConv: lin_l (bias), lin_r (no bias); stored pre-transposed [in, out]
    s = D ** -0.5
    p["sage_wl"] = jax.random.uniform(next(ki), (D, G), jnp.float32, -s, s)
    p["sage_wr"] = jax.random.uniform(next(ki), (D, G), jnp.float32, -s, s)
    p["sage_bl"] = jax.random.uniform(next(ki), (1, G), jnp.float32, -s, s)
    # LSTM, PyTorch layout: weight_ih [4H, In], weight_hh [4H, H]
    sh = H ** -0.5
    wih0 = jax.random.uniform(next(ki), (4 * H, F), jnp.float32, -sh, sh)
    whh0 = jax.random.uniform(next(ki), (4 * H, H), jnp.float32, -sh, sh)
    b_ih0 = jax.random.uniform(next(ki), (4 * H,), jnp.float32, -sh, sh)
    b_hh0 = jax.random.uniform(next(ki), (4 * H,), jnp.float32, -sh, sh)
    p["lstm_wih0"] = wih0[perm]                            # [4H, F]
    p["lstm_whh0"] = whh0[perm]                            # [4H, H]
    p["lstm_b0"] = (b_ih0 + b_hh0)[perm].reshape(4 * H, 1)
    w_rest, b_rest = [], []
    for _ in range(lstm_layers - 1):
        wih = jax.random.uniform(next(ki), (4 * H, H), jnp.float32, -sh, sh)
        whh = jax.random.uniform(next(ki), (4 * H, H), jnp.float32, -sh, sh)
        bi = jax.random.uniform(next(ki), (4 * H,), jnp.float32, -sh, sh)
        bh = jax.random.uniform(next(ki), (4 * H,), jnp.float32, -sh, sh)
        # Pack [W_ih | W_hh] -> one K=2H matmul per layer-step in the kernel.
        w_rest.append(jnp.concatenate([wih[perm], whh[perm]], axis=1))
        b_rest.append((bi + bh)[perm].reshape(4 * H, 1))
    p["lstm_w_rest"] = jnp.stack(w_rest)                   # [L-1, 4H, 2H]
    p["lstm_b_rest"] = jnp.stack(b_rest)                   # [L-1, 4H, 1]
    # edge_predictor: Linear(2G + H, 1) split into column vectors
    fan_in = 2 * G + H
    sp = fan_in ** -0.5
    w_full = jax.random.uniform(next(ki), (fan_in, 1), jnp.float32, -sp, sp)
    p["pred_w_src"] = w_full[:G]
    p["pred_w_tgt"] = w_full[G:2 * G]
    p["pred_w_lstm"] = w_full[2 * G:]
    p["pred_b"] = jax.random.uniform(next(ki), (1, 1), jnp.float32, -sp, sp)
    return p


# ----------------------------------------------------------------------------
# Forward glue
# ----------------------------------------------------------------------------
@functools.partial(jax.jit, static_argnames=("num_nodes",))
def forward(params, sender, receiver, edge_features, edge_index, *, num_nodes):
    N = num_nodes
    D = params["node_emb"].shape[1]
    G = params["sage_wl"].shape[1]
    H = params["lstm_whh0"].shape[1]
    E, T, F = edge_features.shape
    L = params["lstm_w_rest"].shape[0] + 1

    # --- dense row-normalized adjacency for SAGE mean aggregation -----------
    # TODO(synk): for realistically sparse graphs replace this dense O(N^2)
    # build + matmul with a scalar-prefetch gather/segment-sum Pallas kernel
    # over edge_index so HBM traffic drops to O(E*D).
    src, dst = edge_index[0], edge_index[1]
    adj = jnp.zeros((N, N), jnp.float32).at[dst, src].add(1.0)
    deg = adj.sum(axis=1, keepdims=True)
    adj = jnp.where(deg > 0, adj / jnp.maximum(deg, 1.0), 0.0)

    # --- SAGEConv: bf16 only on the big A@x operands, f32 projections --------
    TM = TK = 512 if N > 1024 else 256      # keeps >=2 parallel tiles when N > TM
    Np, Dp, Gp = _round_up(N, TM), _round_up(D, 128), _round_up(G, 128)
    adj_p = jnp.pad(adj.astype(jnp.bfloat16), ((0, Np - N), (0, Np - N)))
    x_bf = jnp.pad(params["node_emb"].astype(jnp.bfloat16),
                   ((0, Np - N), (0, Dp - D)))
    x_f32 = jnp.pad(params["node_emb"], ((0, Np - N), (0, Dp - D)))
    wl_p = jnp.pad(params["sage_wl"], ((0, Dp - D), (0, Gp - G)))
    wr_p = jnp.pad(params["sage_wr"], ((0, Dp - D), (0, Gp - G)))
    bl_p = jnp.pad(params["sage_bl"], ((0, 0), (0, Gp - G)))
    gcn_out = sage_conv(adj_p, x_bf, x_f32, wl_p, wr_p, bl_p, tm=TM, tk=TK)[:N, :G]

    # --- fused multi-layer LSTM + edge predictor -----------------------------
    te = min(_round_up(E, 128), 256)        # lane-dense edge tiles
    Ep = _round_up(E, te)
    Fp = _round_up(F, 16)                   # bf16 sublane-packing alignment
    # edge features transposed: time-major, features on sublanes, edges on lanes
    xT = jnp.pad(edge_features.transpose(1, 2, 0).astype(jnp.bfloat16),
                 ((0, 0), (0, Fp - F), (0, Ep - E)))
    # packed layer-0 weight [W_ih0 (zero-padded to Fp cols) | W_hh0]
    w0 = jnp.concatenate(
        [jnp.pad(params["lstm_wih0"], ((0, 0), (0, Fp - F))),
         params["lstm_whh0"]], axis=1).astype(jnp.bfloat16)        # [4H, Fp+H]
    srcT = jnp.pad(gcn_out[sender].T, ((0, 0), (0, Ep - E)))
    tgtT = jnp.pad(gcn_out[receiver].T, ((0, 0), (0, Ep - E)))
    scores = fused_lstm_predictor(
        xT, w0, params["lstm_b0"],
        params["lstm_w_rest"].astype(jnp.bfloat16), params["lstm_b_rest"],
        srcT, tgtT,
        params["pred_w_src"], params["pred_w_tgt"], params["pred_w_lstm"],
        params["pred_b"],
        num_layers=L, hidden=H, seq_len=T, te=te)
    return scores[0, :E]


# ----------------------------------------------------------------------------
# Pure-JAX f32 reference (same gate-permuted / packed parameterization)
# ----------------------------------------------------------------------------
def reference_forward(params, sender, receiver, edge_features, edge_index, num_nodes):
    N = num_nodes
    H = params["lstm_whh0"].shape[1]
    L = params["lstm_w_rest"].shape[0] + 1
    x = params["node_emb"]
    src, dst = edge_index[0], edge_index[1]
    adj = jnp.zeros((N, N), jnp.float32).at[dst, src].add(1.0)
    deg = adj.sum(axis=1, keepdims=True)
    adj = jnp.where(deg > 0, adj / jnp.maximum(deg, 1.0), 0.0)
    gcn = (adj @ x) @ params["sage_wl"] + x @ params["sage_wr"] + params["sage_bl"]

    E, T, F = edge_features.shape

    def cell(pre, c):                       # gate order (i, f, o, g)
        i = jax.nn.sigmoid(pre[:, 0:H])
        f = jax.nn.sigmoid(pre[:, H:2 * H])
        o = jax.nn.sigmoid(pre[:, 2 * H:3 * H])
        g = jnp.tanh(pre[:, 3 * H:4 * H])
        c_new = f * c + i * g
        return o * jnp.tanh(c_new), c_new

    hs = [jnp.zeros((E, H), jnp.float32) for _ in range(L)]
    cs = [jnp.zeros((E, H), jnp.float32) for _ in range(L)]
    for t in range(T):
        pre = (edge_features[:, t, :] @ params["lstm_wih0"].T
               + hs[0] @ params["lstm_whh0"].T + params["lstm_b0"][:, 0])
        hs[0], cs[0] = cell(pre, cs[0])
        for l in range(L - 1):
            w = params["lstm_w_rest"][l]
            pre = (hs[l] @ w[:, :H].T + hs[l + 1] @ w[:, H:].T
                   + params["lstm_b_rest"][l][:, 0])
            hs[l + 1], cs[l + 1] = cell(pre, cs[l + 1])
    scores = (gcn[sender] @ params["pred_w_src"]
              + gcn[receiver] @ params["pred_w_tgt"]
              + hs[-1] @ params["pred_w_lstm"] + params["pred_b"][0, 0])
    return scores[:, 0]


if __name__ == "__main__":
    NUM_NODES = 16
    EMBEDDING_DIM = 16
    LSTM_HIDDEN = 32
    LSTM_LAYERS = 2
    GCN_HIDDEN = 32
    EDGE_ATTR_DIM = 4
    NUM_EDGES = 8         # batch of edges to score
    NUM_GRAPH_EDGES = 20  # edges defining the graph structure
    SEQ_LEN = 8

    key = jax.random.PRNGKey(0)
    kp, k1, k2, k3, k4 = jax.random.split(key, 5)

    params = init_params(
        kp,
        num_nodes=NUM_NODES,
        embedding_dim=EMBEDDING_DIM,
        lstm_hidden=LSTM_HIDDEN,
        lstm_layers=LSTM_LAYERS,
        gcn_hidden=GCN_HIDDEN,
        edge_attr_dim=EDGE_ATTR_DIM,
    )

    sender = jax.random.randint(k1, (NUM_EDGES,), 0, NUM_NODES, jnp.int32)
    receiver = jax.random.randint(k2, (NUM_EDGES,), 0, NUM_NODES, jnp.int32)
    edge_features = jax.random.normal(
        k3, (NUM_EDGES, SEQ_LEN, EDGE_ATTR_DIM), jnp.float32)
    edge_index = jax.random.randint(
        k4, (2, NUM_GRAPH_EDGES), 0, NUM_NODES, jnp.int32)

    out = forward(params, sender, receiver, edge_features, edge_index,
                  num_nodes=NUM_NODES)
    out = jax.block_until_ready(out)
    assert out.shape == (NUM_EDGES,), out.shape
    assert out.dtype == jnp.float32
    assert bool(jnp.all(jnp.isfinite(out)))

    # Numerical sanity check against a pure-JAX f32 reference (loose tolerance
    # for the bf16 MXU operands).
    ref = reference_forward(params, sender, receiver, edge_features,
                            edge_index, NUM_NODES)
    max_err = float(jnp.max(jnp.abs(out - ref)))
    assert max_err < 5e-2, f"max |err| vs f32 reference = {max_err}"
    print("KERNEL_OK")
</pallas_src>

<mosaic_0001>
module attributes {stable_mosaic.version = 11 : i64} {
  func.func @sage_kernel(%arg0: i32, %arg1: i32, %arg2: memref<256x256xbf16, #tpu.memory_space<vmem>>, %arg3: memref<256x128xbf16, #tpu.memory_space<vmem>>, %arg4: memref<256x128xf32, #tpu.memory_space<vmem>>, %arg5: memref<128x128xf32, #tpu.memory_space<vmem>>, %arg6: memref<128x128xf32, #tpu.memory_space<vmem>>, %arg7: memref<1x128xf32, #tpu.memory_space<vmem>>, %arg8: memref<256x128xf32, #tpu.memory_space<vmem>>, %arg9: memref<256x128xf32, #tpu.memory_space<vmem>>) attributes {dimension_semantics = [#tpu.dimension_semantics<parallel>, #tpu.dimension_semantics<arbitrary>], iteration_bounds = array<i64: 1, 1>, scalar_prefetch = 0 : i64, scratch_operands = 1 : i64, tpu.core_type = #tpu.core_type<tc>, window_params = [{transform_indices = @transform_0, window_bounds = array<i64: 256, 256>}, {transform_indices = @transform_1, window_bounds = array<i64: 256, 128>}, {transform_indices = @transform_2, window_bounds = array<i64: 256, 128>}, {pipeline_mode = #tpu.pipeline_mode<synchronous>, transform_indices = @transform_3, window_bounds = array<i64: 128, 128>}, {pipeline_mode = #tpu.pipeline_mode<synchronous>, transform_indices = @transform_4, window_bounds = array<i64: 128, 128>}, {pipeline_mode = #tpu.pipeline_mode<synchronous>, transform_indices = @transform_5, window_bounds = array<i64: 1, 128>}, {transform_indices = @transform_6, window_bounds = array<i64: 256, 128>}]} {
    %c0_i32 = arith.constant 0 : i32
    %0 = arith.cmpi eq, %arg1, %c0_i32 : i32
    %1 = arith.extui %0 : i1 to i32
    %c0_i32_0 = arith.constant 0 : i32
    %2 = arith.cmpi ne, %1, %c0_i32_0 : i32
    scf.if %2 {
      %cst_10 = arith.constant 0.000000e+00 : f32
      %12 = vector.broadcast %cst_10 : f32 to vector<256x128xf32>
      %c0_11 = arith.constant 0 : index
      %c0_12 = arith.constant 0 : index
      %13 = vector.load %arg9[%c0_11, %c0_12] : memref<256x128xf32, #tpu.memory_space<vmem>>, vector<256x128xf32>
      tpu.vector_store %arg9[%c0_11, %c0_12], %12 {strides = array<i32>} : memref<256x128xf32, #tpu.memory_space<vmem>>, vector<256x128xf32>,
    } else {
    }
    %c0 = arith.constant 0 : index
    %c0_1 = arith.constant 0 : index
    %3 = vector.load %arg9[%c0, %c0_1] : memref<256x128xf32, #tpu.memory_space<vmem>>, vector<256x128xf32>
    %c0_2 = arith.constant 0 : index
    %c0_3 = arith.constant 0 : index
    %4 = vector.load %arg2[%c0_2, %c0_3] : memref<256x256xbf16, #tpu.memory_space<vmem>>, vector<256x256xbf16>
    %c0_4 = arith.constant 0 : index
    %c0_5 = arith.constant 0 : index
    %5 = vector.load %arg3[%c0_4, %c0_5] : memref<256x128xbf16, #tpu.memory_space<vmem>>, vector<256x128xbf16>
    %cst = arith.constant dense<0.000000e+00> : vector<256x128xf32>
    %6 = tpu.matmul %4, %5, %cst {dimension_numbers = #tpu.dot_dimension_numbers<[1], [0], [0], [1], [0, 0, 1, 1], [], []>} : vector<256x256xbf16>, vector<256x128xbf16>, vector<256x128xf32> -> vector<256x128xf32>
    %7 = arith.addf %3, %6 : vector<256x128xf32>
    %c0_6 = arith.constant 0 : index
    %c0_7 = arith.constant 0 : index
    %8 = vector.load %arg9[%c0_6, %c0_7] : memref<256x128xf32, #tpu.memory_space<vmem>>, vector<256x128xf32>
    tpu.vector_store %arg9[%c0_6, %c0_7], %7 {strides = array<i32>} : memref<256x128xf32, #tpu.memory_space<vmem>>, vector<256x128xf32>,
    %c0_i32_8 = arith.constant 0 : i32
    %9 = arith.cmpi eq, %arg1, %c0_i32_8 : i32
    %10 = arith.extui %9 : i1 to i32
    %c0_i32_9 = arith.constant 0 : i32
    %11 = arith.cmpi ne, %10, %c0_i32_9 : i32
    scf.if %11 {
      %c0_10 = arith.constant 0 : index
      %c0_11 = arith.constant 0 : index
      %12 = vector.load %arg9[%c0_10, %c0_11] : memref<256x128xf32, #tpu.memory_space<vmem>>, vector<256x128xf32>
      %c0_12 = arith.constant 0 : index
      %c0_13 = arith.constant 0 : index
      %13 = vector.load %arg5[%c0_12, %c0_13] : memref<128x128xf32, #tpu.memory_space<vmem>>, vector<128x128xf32>
      %cst_14 = arith.constant dense<0.000000e+00> : vector<256x128xf32>
      %14 = tpu.matmul %12, %13, %cst_14 {dimension_numbers = #tpu.dot_dimension_numbers<[1], [0], [0], [1], [0, 0, 1, 1], [], []>} : vector<256x128xf32>, vector<128x128xf32>, vector<256x128xf32> -> vector<256x128xf32>
      %c0_15 = arith.constant 0 : index
      %c0_16 = arith.constant 0 : index
      %15 = vector.load %arg4[%c0_15, %c0_16] : memref<256x128xf32, #tpu.memory_space<vmem>>, vector<256x128xf32>
      %c0_17 = arith.constant 0 : index
      %c0_18 = arith.constant 0 : index
      %16 = vector.load %arg6[%c0_17, %c0_18] : memref<128x128xf32, #tpu.memory_space<vmem>>, vector<128x128xf32>
      %cst_19 = arith.constant dense<0.000000e+00> : vector<256x128xf32>
      %17 = tpu.matmul %15, %16, %cst_19 {dimension_numbers = #tpu.dot_dimension_numbers<[1], [0], [0], [1], [0, 0, 1, 1], [], []>} : vector<256x128xf32>, vector<128x128xf32>, vector<256x128xf32> -> vector<256x128xf32>
      %18 = arith.addf %14, %17 : vector<256x128xf32>
      %c0_20 = arith.constant 0 : index
      %c0_21 = arith.constant 0 : index
      %19 = vector.load %arg7[%c0_20, %c0_21] : memref<1x128xf32, #tpu.memory_space<vmem>>, vector<1x128xf32>
      %20 = vector.broadcast %19 : vector<1x128xf32> to vector<256x128xf32>
      %21 = arith.addf %18, %20 : vector<256x128xf32>
      %c0_22 = arith.constant 0 : index
      %c0_23 = arith.constant 0 : index
      %22 = vector.load %arg8[%c0_22, %c0_23] : memref<256x128xf32, #tpu.memory_space<vmem>>, vector<256x128xf32>
      tpu.vector_store %arg8[%c0_22, %c0_23], %21 {strides = array<i32>} : memref<256x128xf32, #tpu.memory_space<vmem>>, vector<256x128xf32>,
    } else {
    }
    return
  }
  func.func @transform_0(%arg0: i32, %arg1: i32) -> (i32, i32) {
    %c0_i32 = arith.constant 0 : i32
    return %arg0, %arg1 : i32, i32
  }
  func.func @transform_1(%arg0: i32, %arg1: i32) -> (i32, i32) {
    %c0_i32 = arith.constant 0 : i32
    %c0_i32_0 = arith.constant 0 : i32
    return %arg1, %c0_i32 : i32, i32
  }
  func.func @transform_2(%arg0: i32, %arg1: i32) -> (i32, i32) {
    %c0_i32 = arith.constant 0 : i32
    %c0_i32_0 = arith.constant 0 : i32
    return %arg0, %c0_i32 : i32, i32
  }
  func.func @transform_3(%arg0: i32, %arg1: i32) -> (i32, i32) {
    %c0_i32 = arith.constant 0 : i32
    %c0_i32_0 = arith.constant 0 : i32
    %c0_i32_1 = arith.constant 0 : i32
    return %c0_i32, %c0_i32_0 : i32, i32
  }
  func.func @transform_4(%arg0: i32, %arg1: i32) -> (i32, i32) {
    %c0_i32 = arith.constant 0 : i32
    %c0_i32_0 = arith.constant 0 : i32
    %c0_i32_1 = arith.constant 0 : i32
    return %c0_i32, %c0_i32_0 : i32, i32
  }
  func.func @transform_5(%arg0: i32, %arg1: i32) -> (i32, i32) {
    %c0_i32 = arith.constant 0 : i32
    %c0_i32_0 = arith.constant 0 : i32
    %c0_i32_1 = arith.constant 0 : i32
    return %c0_i32, %c0_i32_0 : i32, i32
  }
  func.func @transform_6(%arg0: i32, %arg1: i32) -> (i32, i32) {
    %c0_i32 = arith.constant 0 : i32
    %c0_i32_0 = arith.constant 0 : i32
    return %arg0, %c0_i32 : i32, i32
  }
}

module attributes {stable_mosaic.version = 11 : i64} {
  func.func @fused_lstm_pred_kernel(%arg0: i32, %arg1: memref<8x16x128xbf16, #tpu.memory_space<vmem>>, %arg2: memref<128x48xbf16, #tpu.memory_space<vmem>>, %arg3: memref<128x1xf32, #tpu.memory_space<vmem>>, %arg4: memref<1x128x64xbf16, #tpu.memory_space<vmem>>, %arg5: memref<1x128x1xf32, #tpu.memory_space<vmem>>, %arg6: memref<32x128xf32, #tpu.memory_space<vmem>>, %arg7: memref<32x128xf32, #tpu.memory_space<vmem>>, %arg8: memref<32x1xf32, #tpu.memory_space<vmem>>, %arg9: memref<32x1xf32, #tpu.memory_space<vmem>>, %arg10: memref<32x1xf32, #tpu.memory_space<vmem>>, %arg11: memref<1x1xf32, #tpu.memory_space<smem>>, %arg12: memref<1x128xf32, #tpu.memory_space<vmem>>, %arg13: memref<48x128xbf16, #tpu.memory_space<vmem>>, %arg14: memref<64x128xbf16, #tpu.memory_space<vmem>>) attributes {dimension_semantics = [#tpu.dimension_semantics<parallel>], iteration_bounds = array<i64: 1>, scalar_prefetch = 0 : i64, scratch_operands = 2 : i64, tpu.core_type = #tpu.core_type<tc>, window_params = [{transform_indices = @transform_0, window_bounds = array<i64: 8, 16, 128>}, {pipeline_mode = #tpu.pipeline_mode<synchronous>, transform_indices = @transform_1, window_bounds = array<i64: 128, 48>}, {pipeline_mode = #tpu.pipeline_mode<synchronous>, transform_indices = @transform_2, window_bounds = array<i64: 128, 1>}, {pipeline_mode = #tpu.pipeline_mode<synchronous>, transform_indices = @transform_3, window_bounds = array<i64: 1, 128, 64>}, {pipeline_mode = #tpu.pipeline_mode<synchronous>, transform_indices = @transform_4, window_bounds = array<i64: 1, 128, 1>}, {transform_indices = @transform_5, window_bounds = array<i64: 32, 128>}, {transform_indices = @transform_6, window_bounds = array<i64: 32, 128>}, {pipeline_mode = #tpu.pipeline_mode<synchronous>, transform_indices = @transform_7, window_bounds = array<i64: 32, 1>}, {pipeline_mode = #tpu.pipeline_mode<synchronous>, transform_indices = @transform_8, window_bounds = array<i64: 32, 1>}, {pipeline_mode = #tpu.pipeline_mode<synchronous>, transform_indices = @transform_9, window_bounds = array<i64: 32, 1>}, {transform_indices = @transform_10, window_bounds = array<i64: 1, 1>}, {transform_indices = @transform_11, window_bounds = array<i64: 1, 128>}]} {
    %c0 = arith.constant 0 : index
    %c0_0 = arith.constant 0 : index
    %0 = vector.load %arg2[%c0, %c0_0] : memref<128x48xbf16, #tpu.memory_space<vmem>>, vector<128x48xbf16>
    %c0_1 = arith.constant 0 : index
    %c0_2 = arith.constant 0 : index
    %1 = vector.load %arg3[%c0_1, %c0_2] : memref<128x1xf32, #tpu.memory_space<vmem>>, vector<128x1xf32>
    %2 = vector.shape_cast %1 : vector<128x1xf32> to vector<128x1xf32>
    %3 = vector.broadcast %2 : vector<128x1xf32> to vector<128x128xf32>
    %c0_3 = arith.constant 0 : index
    %c0_4 = arith.constant 0 : index
    %c0_5 = arith.constant 0 : index
    %4 = vector.load %arg4[%c0_3, %c0_4, %c0_5] : memref<1x128x64xbf16, #tpu.memory_space<vmem>>, vector<1x128x64xbf16>
    %5 = vector.shape_cast %4 : vector<1x128x64xbf16> to vector<128x64xbf16>
    %c0_6 = arith.constant 0 : index
    %c0_7 = arith.constant 0 : index
    %c0_8 = arith.constant 0 : index
    %6 = vector.load %arg5[%c0_6, %c0_7, %c0_8] : memref<1x128x1xf32, #tpu.memory_space<vmem>>, vector<1x128x1xf32>
    %7 = vector.shape_cast %6 : vector<1x128x1xf32> to vector<128x1xf32>
    %8 = vector.shape_cast %7 : vector<128x1xf32> to vector<128x1xf32>
    %9 = vector.broadcast %8 : vector<128x1xf32> to vector<128x128xf32>
    %c0_9 = arith.constant 0 : index
    %c0_10 = arith.constant 0 : index
    %10 = vector.load %arg6[%c0_9, %c0_10] : memref<32x128xf32, #tpu.memory_space<vmem>>, vector<32x128xf32>
    %c0_11 = arith.constant 0 : index
    %c0_12 = arith.constant 0 : index
    %11 = vector.load %arg8[%c0_11, %c0_12] : memref<32x1xf32, #tpu.memory_space<vmem>>, vector<32x1xf32>
    %12 = vector.broadcast %11 : vector<32x1xf32> to vector<32x128xf32>
    %13 = arith.mulf %10, %12 : vector<32x128xf32>
    %cst = arith.constant dense<0.000000e+00> : vector<128xf32>
    %14 = vector.multi_reduction <add>, %13, %cst [0] : vector<32x128xf32> to vector<128xf32>
    %15 = vector.shape_cast %14 : vector<128xf32> to vector<1x128xf32>
    %c0_13 = arith.constant 0 : index
    %c0_14 = arith.constant 0 : index
    %16 = vector.load %arg7[%c0_13, %c0_14] : memref<32x128xf32, #tpu.memory_space<vmem>>, vector<32x128xf32>
    %c0_15 = arith.constant 0 : index
    %c0_16 = arith.constant 0 : index
    %17 = vector.load %arg9[%c0_15, %c0_16] : memref<32x1xf32, #tpu.memory_space<vmem>>, vector<32x1xf32>
    %18 = vector.broadcast %17 : vector<32x1xf32> to vector<32x128xf32>
    %19 = arith.mulf %16, %18 : vector<32x128xf32>
    %cst_17 = arith.constant dense<0.000000e+00> : vector<128xf32>
    %20 = vector.multi_reduction <add>, %19, %cst_17 [0] : vector<32x128xf32> to vector<128xf32>
    %21 = vector.shape_cast %20 : vector<128xf32> to vector<1x128xf32>
    %22 = arith.addf %15, %21 : vector<1x128xf32>
    %c0_18 = arith.constant 0 : index
    %c0_19 = arith.constant 0 : index
    %23 = memref.load %arg11[%c0_18, %c0_19] : memref<1x1xf32, #tpu.memory_space<smem>>
    %24 = vector.broadcast %23 : f32 to vector<1x128xf32>
    %25 = arith.addf %22, %24 : vector<1x128xf32>
    %cst_20 = arith.constant 0.000000e+00 : f32
    %26 = vector.broadcast %cst_20 : f32 to vector<32x128xf32>
    %cst_21 = arith.constant 0.000000e+00 : f32
    %27 = vector.broadcast %cst_21 : f32 to vector<32x128xf32>
    %c0_22 = arith.constant 0 : index
    %c0_23 = arith.constant 0 : index
    %c0_24 = arith.constant 0 : index
    %28 = vector.load %arg1[%c0_22, %c0_23, %c0_24] : memref<8x16x128xbf16, #tpu.memory_space<vmem>>, vector<1x16x128xbf16>
    %29 = vector.shape_cast %28 : vector<1x16x128xbf16> to vector<16x128xbf16>
    %c0_25 = arith.constant 0 : index
    %c0_26 = arith.constant 0 : index
    %30 = vector.load %arg13[%c0_25, %c0_26] : memref<48x128xbf16, #tpu.memory_space<vmem>>, vector<16x128xbf16>
    tpu.vector_store %arg13[%c0_25, %c0_26], %29 {strides = array<i32>} : memref<48x128xbf16, #tpu.memory_space<vmem>>, vector<16x128xbf16>,
    %31 = arith.truncf %26 : vector<32x128xf32> to vector<32x128xbf16>
    %c16 = arith.constant 16 : index
    %c0_27 = arith.constant 0 : index
    %32 = vector.load %arg13[%c16, %c0_27] : memref<48x128xbf16, #tpu.memory_space<vmem>>, vector<32x128xbf16>
    tpu.vector_store %arg13[%c16, %c0_27], %31 {strides = array<i32>} : memref<48x128xbf16, #tpu.memory_space<vmem>>, vector<32x128xbf16>,
    %c0_28 = arith.constant 0 : index
    %c0_29 = arith.constant 0 : index
    %33 = vector.load %arg13[%c0_28, %c0_29] : memref<48x128xbf16, #tpu.memory_space<vmem>>, vector<48x128xbf16>
    %cst_30 = arith.constant dense<0.000000e+00> : vector<128x128xf32>
    %34 = tpu.matmul %0, %33, %cst_30 {dimension_numbers = #tpu.dot_dimension_numbers<[1], [0], [0], [1], [0, 0, 1, 1], [], []>} : vector<128x48xbf16>, vector<48x128xbf16>, vector<128x128xf32> -> vector<128x128xf32>
    %35 = arith.addf %34, %3 : vector<128x128xf32>
    %36 = vector.extract_strided_slice %35 {offsets = [0, 0], sizes = [96, 128], strides = [1, 1]} : vector<128x128xf32> to vector<96x128xf32>
    %37 = arith.negf %36 : vector<96x128xf32>
    %38 = math.exp %37 : vector<96x128xf32>
    %cst_31 = arith.constant 1.000000e+00 : f32
    %39 = vector.broadcast %cst_31 : f32 to vector<96x128xf32>
    %40 = arith.addf %39, %38 : vector<96x128xf32>
    %41 = arith.divf %39, %40 : vector<96x128xf32>
    %42 = vector.extract_strided_slice %35 {offsets = [96, 0], sizes = [32, 128], strides = [1, 1]} : vector<128x128xf32> to vector<32x128xf32>
    %43 = math.tanh %42 : vector<32x128xf32>
    %44 = vector.extract_strided_slice %41 {offsets = [32, 0], sizes = [32, 128], strides = [1, 1]} : vector<96x128xf32> to vector<32x128xf32>
    %45 = arith.mulf %44, %26 : vector<32x128xf32>
    %46 = vector.extract_strided_slice %41 {offsets = [0, 0], sizes = [32, 128], strides = [1, 1]} : vector<96x128xf32> to vector<32x128xf32>
    %47 = arith.mulf %46, %43 : vector<32x128xf32>
    %48 = arith.addf %45, %47 : vector<32x128xf32>
    %49 = vector.extract_strided_slice %41 {offsets = [64, 0], sizes = [32, 128], strides = [1, 1]} : vector<96x128xf32> to vector<32x128xf32>
    %50 = math.tanh %48 : vector<32x128xf32>
    %51 = arith.mulf %49, %50 : vector<32x128xf32>
    %52 = arith.truncf %51 : vector<32x128xf32> to vector<32x128xbf16>
    %c0_32 = arith.constant 0 : index
    %c0_33 = arith.constant 0 : index
    %53 = vector.load %arg14[%c0_32, %c0_33] : memref<64x128xbf16, #tpu.memory_space<vmem>>, vector<32x128xbf16>
    tpu.vector_store %arg14[%c0_32, %c0_33], %52 {strides = array<i32>} : memref<64x128xbf16, #tpu.memory_space<vmem>>, vector<32x128xbf16>,
    %54 = arith.truncf %27 : vector<32x128xf32> to vector<32x128xbf16>
    %c32 = arith.constant 32 : index
    %c0_34 = arith.constant 0 : index
    %55 = vector.load %arg14[%c32, %c0_34] : memref<64x128xbf16, #tpu.memory_space<vmem>>, vector<32x128xbf16>
    tpu.vector_store %arg14[%c32, %c0_34], %54 {strides = array<i32>} : memref<64x128xbf16, #tpu.memory_space<vmem>>, vector<32x128xbf16>,
    %c0_35 = arith.constant 0 : index
    %c0_36 = arith.constant 0 : index
    %56 = vector.load %arg14[%c0_35, %c0_36] : memref<64x128xbf16, #tpu.memory_space<vmem>>, vector<64x128xbf16>
    %cst_37 = arith.constant dense<0.000000e+00> : vector<128x128xf32>
    %57 = tpu.matmul %5, %56, %cst_37 {dimension_numbers = #tpu.dot_dimension_numbers<[1], [0], [0], [1], [0, 0, 1, 1], [], []>} : vector<128x64xbf16>, vector<64x128xbf16>, vector<128x128xf32> -> vector<128x128xf32>
    %58 = arith.addf %57, %9 : vector<128x128xf32>
    %59 = vector.extract_strided_slice %58 {offsets = [0, 0], sizes = [96, 128], strides = [1, 1]} : vector<128x128xf32> to vector<96x128xf32>
    %60 = arith.negf %59 : vector<96x128xf32>
    %61 = math.exp %60 : vector<96x128xf32>
    %cst_38 = arith.constant 1.000000e+00 : f32
    %62 = vector.broadcast %cst_38 : f32 to vector<96x128xf32>
    %63 = arith.addf %62, %61 : vector<96x128xf32>
    %64 = arith.divf %62, %63 : vector<96x128xf32>
    %65 = vector.extract_strided_slice %58 {offsets = [96, 0], sizes = [32, 128], strides = [1, 1]} : vector<128x128xf32> to vector<32x128xf32>
    %66 = math.tanh %65 : vector<32x128xf32>
    %67 = vector.extract_strided_slice %64 {offsets = [32, 0], sizes = [32, 128], strides = [1, 1]} : vector<96x128xf32> to vector<32x128xf32>
    %68 = arith.mulf %67, %27 : vector<32x128xf32>
    %69 = vector.extract_strided_slice %64 {offsets = [0, 0], sizes = [32, 128], strides = [1, 1]} : vector<96x128xf32> to vector<32x128xf32>
    %70 = arith.mulf %69, %66 : vector<32x128xf32>
    %71 = arith.addf %68, %70 : vector<32x128xf32>
    %72 = vector.extract_strided_slice %64 {offsets = [64, 0], sizes = [32, 128], strides = [1, 1]} : vector<96x128xf32> to vector<32x128xf32>
    %73 = math.tanh %71 : vector<32x128xf32>
    %74 = arith.mulf %72, %73 : vector<32x128xf32>
    %c1 = arith.constant 1 : index
    %c0_39 = arith.constant 0 : index
    %c0_40 = arith.constant 0 : index
    %75 = vector.load %arg1[%c1, %c0_39, %c0_40] : memref<8x16x128xbf16, #tpu.memory_space<vmem>>, vector<1x16x128xbf16>
    %76 = vector.shape_cast %75 : vector<1x16x128xbf16> to vector<16x128xbf16>
    %c0_41 = arith.constant 0 : index
    %c0_42 = arith.constant 0 : index
    %77 = vector.load %arg13[%c0_41, %c0_42] : memref<48x128xbf16, #tpu.memory_space<vmem>>, vector<16x128xbf16>
    tpu.vector_store %arg13[%c0_41, %c0_42], %76 {strides = array<i32>} : memref<48x128xbf16, #tpu.memory_space<vmem>>, vector<16x128xbf16>,
    %78 = arith.truncf %51 : vector<32x128xf32> to vector<32x128xbf16>
    %c16_43 = arith.constant 16 : index
    %c0_44 = arith.constant 0 : index
    %79 = vector.load %arg13[%c16_43, %c0_44] : memref<48x128xbf16, #tpu.memory_space<vmem>>, vector<32x128xbf16>
    tpu.vector_store %arg13[%c16_43, %c0_44], %78 {strides = array<i32>} : memref<48x128xbf16, #tpu.memory_space<vmem>>, vector<32x128xbf16>,
    %c0_45 = arith.constant 0 : index
    %c0_46 = arith.constant 0 : index
    %80 = vector.load %arg13[%c0_45, %c0_46] : memref<48x128xbf16, #tpu.memory_space<vmem>>, vector<48x128xbf16>
    %cst_47 = arith.constant dense<0.000000e+00> : vector<128x128xf32>
    %81 = tpu.matmul %0, %80, %cst_47 {dimension_numbers = #tpu.dot_dimension_numbers<[1], [0], [0], [1], [0, 0, 1, 1], [], []>} : vector<128x48xbf16>, vector<48x128xbf16>, vector<128x128xf32> -> vector<128x128xf32>
    %82 = arith.addf %81, %3 : vector<128x128xf32>
    %83 = vector.extract_strided_slice %82 {offsets = [0, 0], sizes = [96, 128], strides = [1, 1]} : vector<128x128xf32> to vector<96x128xf32>
    %84 = arith.negf %83 : vector<96x128xf32>
    %85 = math.exp %84 : vector<96x128xf32>
    %cst_48 = arith.constant 1.000000e+00 : f32
    %86 = vector.broadcast %cst_48 : f32 to vector<96x128xf32>
    %87 = arith.addf %86, %85 : vector<96x128xf32>
    %88 = arith.divf %86, %87 : vector<96x128xf32>
    %89 = vector.extract_strided_slice %82 {offsets = [96, 0], sizes = [32, 128], strides = [1, 1]} : vector<128x128xf32> to vector<32x128xf32>
    %90 = math.tanh %89 : vector<32x128xf32>
    %91 = vector.extract_strided_slice %88 {offsets = [32, 0], sizes = [32, 128], strides = [1, 1]} : vector<96x128xf32> to vector<32x128xf32>
    %92 = arith.mulf %91, %48 : vector<32x128xf32>
    %93 = vector.extract_strided_slice %88 {offsets = [0, 0], sizes = [32, 128], strides = [1, 1]} : vector<96x128xf32> to vector<32x128xf32>
    %94 = arith.mulf %93, %90 : vector<32x128xf32>
    %95 = arith.addf %92, %94 : vector<32x128xf32>
    %96 = vector.extract_strided_slice %88 {offsets = [64, 0], sizes = [32, 128], strides = [1, 1]} : vector<96x128xf32> to vector<32x128xf32>
    %97 = math.tanh %95 : vector<32x128xf32>
    %98 = arith.mulf %96, %97 : vector<32x128xf32>
    %99 = arith.truncf %98 : vector<32x128xf32> to vector<32x128xbf16>
    %c0_49 = arith.constant 0 : index
    %c0_50 = arith.constant 0 : index
    %100 = vector.load %arg14[%c0_49, %c0_50] : memref<64x128xbf16, #tpu.memory_space<vmem>>, vector<32x128xbf16>
    tpu.vector_store %arg14[%c0_49, %c0_50], %99 {strides = array<i32>} : memref<64x128xbf16, #tpu.memory_space<vmem>>, vector<32x128xbf16>,
    %101 = arith.truncf %74 : vector<32x128xf32> to vector<32x128xbf16>
    %c32_51 = arith.constant 32 : index
    %c0_52 = arith.constant 0 : index
    %102 = vector.load %arg14[%c32_51, %c0_52] : memref<64x128xbf16, #tpu.memory_space<vmem>>, vector<32x128xbf16>
    tpu.vector_store %arg14[%c32_51, %c0_52], %101 {strides = array<i32>} : memref<64x128xbf16, #tpu.memory_space<vmem>>, vector<32x128xbf16>,
    %c0_53 = arith.constant 0 : index
    %c0_54 = arith.constant 0 : index
    %103 = vector.load %arg14[%c0_53, %c0_54] : memref<64x128xbf16, #tpu.memory_space<vmem>>, vector<64x128xbf16>
    %cst_55 = arith.constant dense<0.000000e+00> : vector<128x128xf32>
    %104 = tpu.matmul %5, %103, %cst_55 {dimension_numbers = #tpu.dot_dimension_numbers<[1], [0], [0], [1], [0, 0, 1, 1], [], []>} : vector<128x64xbf16>, vector<64x128xbf16>, vector<128x128xf32> -> vector<128x128xf32>
    %105 = arith.addf %104, %9 : vector<128x128xf32>
    %106 = vector.extract_strided_slice %105 {offsets = [0, 0], sizes = [96, 128], strides = [1, 1]} : vector<128x128xf32> to vector<96x128xf32>
    %107 = arith.negf %106 : vector<96x128xf32>
    %108 = math.exp %107 : vector<96x128xf32>
    %cst_56 = arith.constant 1.000000e+00 : f32
    %109 = vector.broadcast %cst_56 : f32 to vector<96x128xf32>
    %110 = arith.addf %109, %108 : vector<96x128xf32>
    %111 = arith.divf %109, %110 : vector<96x128xf32>
    %112 = vector.extract_strided_slice %105 {offsets = [96, 0], sizes = [32, 128], strides = [1, 1]} : vector<128x128xf32> to vector<32x128xf32>
    %113 = math.tanh %112 : vector<32x128xf32>
    %114 = vector.extract_strided_slice %111 {offsets = [32, 0], sizes = [32, 128], strides = [1, 1]} : vector<96x128xf32> to vector<32x128xf32>
    %115 = arith.mulf %114, %71 : vector<32x128xf32>
    %116 = vector.extract_strided_slice %111 {offsets = [0, 0], sizes = [32, 128], strides = [1, 1]} : vector<96x128xf32> to vector<32x128xf32>
    %117 = arith.mulf %116, %113 : vector<32x128xf32>
    %118 = arith.addf %115, %117 : vector<32x128xf32>
    %119 = vector.extract_strided_slice %111 {offsets = [64, 0], sizes = [32, 128], strides = [1, 1]} : vector<96x128xf32> to vector<32x128xf32>
    %120 = math.tanh %118 : vector<32x128xf32>
    %121 = arith.mulf %119, %120 : vector<32x128xf32>
    %c2 = arith.constant 2 : index
    %c0_57 = arith.constant 0 : index
    %c0_58 = arith.constant 0 : index
    %122 = vector.load %arg1[%c2, %c0_57, %c0_58] : memref<8x16x128xbf16, #tpu.memory_space<vmem>>, vector<1x16x128xbf16>
    %123 = vector.shape_cast %122 : vector<1x16x128xbf16> to vector<16x128xbf16>
    %c0_59 = arith.constant 0 : index
    %c0_60 = arith.constant 0 : index
    %124 = vector.load %arg13[%c0_59, %c0_60] : memref<48x128xbf16, #tpu.memory_space<vmem>>, vector<16x128xbf16>
    tpu.vector_store %arg13[%c0_59, %c0_60], %123 {strides = array<i32>} : memref<48x128xbf16, #tpu.memory_space<vmem>>, vector<16x128xbf16>,
    %125 = arith.truncf %98 : vector<32x128xf32> to vector<32x128xbf16>
    %c16_61 = arith.constant 16 : index
    %c0_62 = arith.constant 0 : index
    %126 = vector.load %arg13[%c16_61, %c0_62] : memref<48x128xbf16, #tpu.memory_space<vmem>>, vector<32x128xbf16>
    tpu.vector_store %arg13[%c16_61, %c0_62], %125 {strides = array<i32>} : memref<48x128xbf16, #tpu.memory_space<vmem>>, vector<32x128xbf16>,
    %c0_63 = arith.constant 0 : index
    %c0_64 = arith.constant 0 : index
    %127 = vector.load %arg13[%c0_63, %c0_64] : memref<48x128xbf16, #tpu.memory_space<vmem>>, vector<48x128xbf16>
    %cst_65 = arith.constant dense<0.000000e+00> : vector<128x128xf32>
    %128 = tpu.matmul %0, %127, %cst_65 {dimension_numbers = #tpu.dot_dimension_numbers<[1], [0], [0], [1], [0, 0, 1, 1], [], []>} : vector<128x48xbf16>, vector<48x128xbf16>, vector<128x128xf32> -> vector<128x128xf32>
    %129 = arith.addf %128, %3 : vector<128x128xf32>
    %130 = vector.extract_strided_slice %129 {offsets = [0, 0], sizes = [96, 128], strides = [1, 1]} : vector<128x128xf32> to vector<96x128xf32>
    %131 = arith.negf %130 : vector<96x128xf32>
    %132 = math.exp %131 : vector<96x128xf32>
    %cst_66 = arith.constant 1.000000e+00 : f32
    %133 = vector.broadcast %cst_66 : f32 to vector<96x128xf32>
    %134 = arith.addf %133, %132 : vector<96x128xf32>
    %135 = arith.divf %133, %134 : vector<96x128xf32>
    %136 = vector.extract_strided_slice %129 {offsets = [96, 0], sizes = [32, 128], strides = [1, 1]} : vector<128x128xf32> to vector<32x128xf32>
    %137 = math.tanh %136 : vector<32x128xf32>
    %138 = vector.extract_strided_slice %135 {offsets = [32, 0], sizes = [32, 128], strides = [1, 1]} : vector<96x128xf32> to vector<32x128xf32>
    %139 = arith.mulf %138, %95 : vector<32x128xf32>
    %140 = vector.extract_strided_slice %135 {offsets = [0, 0], sizes = [32, 128], strides = [1, 1]} : vector<96x128xf32> to vector<32x128xf32>
    %141 = arith.mulf %140, %137 : vector<32x128xf32>
    %142 = arith.addf %139, %141 : vector<32x128xf32>
    %143 = vector.extract_strided_slice %135 {offsets = [64, 0], sizes = [32, 128], strides = [1, 1]} : vector<96x128xf32> to vector<32x128xf32>
    %144 = math.tanh %142 : vector<32x128xf32>
    %145 = arith.mulf %143, %144 : vector<32x128xf32>
    %146 = arith.truncf %145 : vector<32x128xf32> to vector<32x128xbf16>
    %c0_67 = arith.constant 0 : index
    %c0_68 = arith.constant 0 : index
    %147 = vector.load %arg14[%c0_67, %c0_68] : memref<64x128xbf16, #tpu.memory_space<vmem>>, vector<32x128xbf16>
    tpu.vector_store %arg14[%c0_67, %c0_68], %146 {strides = array<i32>} : memref<64x128xbf16, #tpu.memory_space<vmem>>, vector<32x128xbf16>,
    %148 = arith.truncf %121 : vector<32x128xf32> to vector<32x128xbf16>
    %c32_69 = arith.constant 32 : index
    %c0_70 = arith.constant 0 : index
    %149 = vector.load %arg14[%c32_69, %c0_70] : memref<64x128xbf16, #tpu.memory_space<vmem>>, vector<32x128xbf16>
    tpu.vector_store %arg14[%c32_69, %c0_70], %148 {strides = array<i32>} : memref<64x128xbf16, #tpu.memory_space<vmem>>, vector<32x128xbf16>,
    %c0_71 = arith.constant 0 : index
    %c0_72 = arith.constant 0 : index
    %150 = vector.load %arg14[%c0_71, %c0_72] : memref<64x128xbf16, #tpu.memory_space<vmem>>, vector<64x128xbf16>
    %cst_73 = arith.constant dense<0.000000e+00> : vector<128x128xf32>
    %151 = tpu.matmul %5, %150, %cst_73 {dimension_numbers = #tpu.dot_dimension_numbers<[1], [0], [0], [1], [0, 0, 1, 1], [], []>} : vector<128x64xbf16>, vector<64x128xbf16>, vector<128x128xf32> -> vector<128x128xf32>
    %152 = arith.addf %151, %9 : vector<128x128xf32>
    %153 = vector.extract_strided_slice %152 {offsets = [0, 0], sizes = [96, 128], strides = [1, 1]} : vector<128x128xf32> to vector<96x128xf32>
    %154 = arith.negf %153 : vector<96x128xf32>
    %155 = math.exp %154 : vector<96x128xf32>
    %cst_74 = arith.constant 1.000000e+00 : f32
    %156 = vector.broadcast %cst_74 : f32 to vector<96x128xf32>
    %157 = arith.addf %156, %155 : vector<96x128xf32>
    %158 = arith.divf %156, %157 : vector<96x128xf32>
    %159 = vector.extract_strided_slice %152 {offsets = [96, 0], sizes = [32, 128], strides = [1, 1]} : vector<128x128xf32> to vector<32x128xf32>
    %160 = math.tanh %159 : vector<32x128xf32>
    %161 = vector.extract_strided_slice %158 {offsets = [32, 0], sizes = [32, 128], strides = [1, 1]} : vector<96x128xf32> to vector<32x128xf32>
    %162 = arith.mulf %161, %118 : vector<32x128xf32>
    %163 = vector.extract_strided_slice %158 {offsets = [0, 0], sizes = [32, 128], strides = [1, 1]} : vector<96x128xf32> to vector<32x128xf32>
    %164 = arith.mulf %163, %160 : vector<32x128xf32>
    %165 = arith.addf %162, %164 : vector<32x128xf32>
    %166 = vector.extract_strided_slice %158 {offsets = [64, 0], sizes = [32, 128], strides = [1, 1]} : vector<96x128xf32> to vector<32x128xf32>
    %167 = math.tanh %165 : vector<32x128xf32>
    %168 = arith.mulf %166, %167 : vector<32x128xf32>
    %c3 = arith.constant 3 : index
    %c0_75 = arith.constant 0 : index
    %c0_76 = arith.constant 0 : index
    %169 = vector.load %arg1[%c3, %c0_75, %c0_76] : memref<8x16x128xbf16, #tpu.memory_space<vmem>>, vector<1x16x128xbf16>
    %170 = vector.shape_cast %169 : vector<1x16x128xbf16> to vector<16x128xbf16>
    %c0_77 = arith.constant 0 : index
    %c0_78 = arith.constant 0 : index
    %171 = vector.load %arg13[%c0_77, %c0_78] : memref<48x128xbf16, #tpu.memory_space<vmem>>, vector<16x128xbf16>
    tpu.vector_store %arg13[%c0_77, %c0_78], %170 {strides = array<i32>} : memref<48x128xbf16, #tpu.memory_space<vmem>>, vector<16x128xbf16>,
    %172 = arith.truncf %145 : vector<32x128xf32> to vector<32x128xbf16>
    %c16_79 = arith.constant 16 : index
    %c0_80 = arith.constant 0 : index
    %173 = vector.load %arg13[%c16_79, %c0_80] : memref<48x128xbf16, #tpu.memory_space<vmem>>, vector<32x128xbf16>
    tpu.vector_store %arg13[%c16_79, %c0_80], %172 {strides = array<i32>} : memref<48x128xbf16, #tpu.memory_space<vmem>>, vector<32x128xbf16>,
    %c0_81 = arith.constant 0 : index
    %c0_82 = arith.constant 0 : index
    %174 = vector.load %arg13[%c0_81, %c0_82] : memref<48x128xbf16, #tpu.memory_space<vmem>>, vector<48x128xbf16>
    %cst_83 = arith.constant dense<0.000000e+00> : vector<128x128xf32>
    %175 = tpu.matmul %0, %174, %cst_83 {dimension_numbers = #tpu.dot_dimension_numbers<[1], [0], [0], [1], [0, 0, 1, 1], [], []>} : vector<128x48xbf16>, vector<48x128xbf16>, vector<128x128xf32> -> vector<128x128xf32>
    %176 = arith.addf %175, %3 : vector<128x128xf32>
    %177 = vector.extract_strided_slice %176 {offsets = [0, 0], sizes = [96, 128], strides = [1, 1]} : vector<128x128xf32> to vector<96x128xf32>
    %178 = arith.negf %177 : vector<96x128xf32>
    %179 = math.exp %178 : vector<96x128xf32>
    %cst_84 = arith.constant 1.000000e+00 : f32
    %180 = vector.broadcast %cst_84 : f32 to vector<96x128xf32>
    %181 = arith.addf %180, %179 : vector<96x128xf32>
    %182 = arith.divf %180, %181 : vector<96x128xf32>
    %183 = vector.extract_strided_slice %176 {offsets = [96, 0], sizes = [32, 128], strides = [1, 1]} : vector<128x128xf32> to vector<32x128xf32>
    %184 = math.tanh %183 : vector<32x128xf32>
    %185 = vector.extract_strided_slice %182 {offsets = [32, 0], sizes = [32, 128], strides = [1, 1]} : vector<96x128xf32> to vector<32x128xf32>
    %186 = arith.mulf %185, %142 : vector<32x128xf32>
    %187 = vector.extract_strided_slice %182 {offsets = [0, 0], sizes = [32, 128], strides = [1, 1]} : vector<96x128xf32> to vector<32x128xf32>
    %188 = arith.mulf %187, %184 : vector<32x128xf32>
    %189 = arith.addf %186, %188 : vector<32x128xf32>
    %190 = vector.extract_strided_slice %182 {offsets = [64, 0], sizes = [32, 128], strides = [1, 1]} : vector<96x128xf32> to vector<32x128xf32>
    %191 = math.tanh %189 : vector<32x128xf32>
    %192 = arith.mulf %190, %191 : vector<32x128xf32>
    %193 = arith.truncf %192 : vector<32x128xf32> to vector<32x128xbf16>
    %c0_85 = arith.constant 0 : index
    %c0_86 = arith.constant 0 : index
    %194 = vector.load %arg14[%c0_85, %c0_86] : memref<64x128xbf16, #tpu.memory_space<vmem>>, vector<32x128xbf16>
    tpu.vector_store %arg14[%c0_85, %c0_86], %193 {strides = array<i32>} : memref<64x128xbf16, #tpu.memory_space<vmem>>, vector<32x128xbf16>,
    %195 = arith.truncf %168 : vector<32x128xf32> to vector<32x128xbf16>
    %c32_87 = arith.constant 32 : index
    %c0_88 = arith.constant 0 : index
    %196 = vector.load %arg14[%c32_87, %c0_88] : memref<64x128xbf16, #tpu.memory_space<vmem>>, vector<32x128xbf16>
    tpu.vector_store %arg14[%c32_87, %c0_88], %195 {strides = array<i32>} : memref<64x128xbf16, #tpu.memory_space<vmem>>, vector<32x128xbf16>,
    %c0_89 = arith.constant 0 : index
    %c0_90 = arith.constant 0 : index
    %197 = vector.load %arg14[%c0_89, %c0_90] : memref<64x128xbf16, #tpu.memory_space<vmem>>, vector<64x128xbf16>
    %cst_91 = arith.constant dense<0.000000e+00> : vector<128x128xf32>
    %198 = tpu.matmul %5, %197, %cst_91 {dimension_numbers = #tpu.dot_dimension_numbers<[1], [0], [0], [1], [0, 0, 1, 1], [], []>} : vector<128x64xbf16>, vector<64x128xbf16>, vector<128x128xf32> -> vector<128x128xf32>
    %199 = arith.addf %198, %9 : vector<128x128xf32>
    %200 = vector.extract_strided_slice %199 {offsets = [0, 0], sizes = [96, 128], strides = [1, 1]} : vector<128x128xf32> to vector<96x128xf32>
    %201 = arith.negf %200 : vector<96x128xf32>
    %202 = math.exp %201 : vector<96x128xf32>
    %cst_92 = arith.constant 1.000000e+00 : f32
    %203 = vector.broadcast %cst_92 : f32 to vector<96x128xf32>
    %204 = arith.addf %203, %202 : vector<96x128xf32>
    %205 = arith.divf %203, %204 : vector<96x128xf32>
    %206 = vector.extract_strided_slice %199 {offsets = [96, 0], sizes = [32, 128], strides = [1, 1]} : vector<128x128xf32> to vector<32x128xf32>
    %207 = math.tanh %206 : vector<32x128xf32>
    %208 = vector.extract_strided_slice %205 {offsets = [32, 0], sizes = [32, 128], strides = [1, 1]} : vector<96x128xf32> to vector<32x128xf32>
    %209 = arith.mulf %208, %165 : vector<32x128xf32>
    %210 = vector.extract_strided_slice %205 {offsets = [0, 0], sizes = [32, 128], strides = [1, 1]} : vector<96x128xf32> to vector<32x128xf32>
    %211 = arith.mulf %210, %207 : vector<32x128xf32>
    %212 = arith.addf %209, %211 : vector<32x128xf32>
    %213 = vector.extract_strided_slice %205 {offsets = [64, 0], sizes = [32, 128], strides = [1, 1]} : vector<96x128xf32> to vector<32x128xf32>
    %214 = math.tanh %212 : vector<32x128xf32>
    %215 = arith.mulf %213, %214 : vector<32x128xf32>
    %c4 = arith.constant 4 : index
    %c0_93 = arith.constant 0 : index
    %c0_94 = arith.constant 0 : index
    %216 = vector.load %arg1[%c4, %c0_93, %c0_94] : memref<8x16x128xbf16, #tpu.memory_space<vmem>>, vector<1x16x128xbf16>
    %217 = vector.shape_cast %216 : vector<1x16x128xbf16> to vector<16x128xbf16>
    %c0_95 = arith.constant 0 : index
    %c0_96 = arith.constant 0 : index
    %218 = vector.load %arg13[%c0_95, %c0_96] : memref<48x128xbf16, #tpu.memory_space<vmem>>, vector<16x128xbf16>
    tpu.vector_store %arg13[%c0_95, %c0_96], %217 {strides = array<i32>} : memref<48x128xbf16, #tpu.memory_space<vmem>>, vector<16x128xbf16>,
    %219 = arith.truncf %192 : vector<32x128xf32> to vector<32x128xbf16>
    %c16_97 = arith.constant 16 : index
    %c0_98 = arith.constant 0 : index
    %220 = vector.load %arg13[%c16_97, %c0_98] : memref<48x128xbf16, #tpu.memory_space<vmem>>, vector<32x128xbf16>
    tpu.vector_store %arg13[%c16_97, %c0_98], %219 {strides = array<i32>} : memref<48x128xbf16, #tpu.memory_space<vmem>>, vector<32x128xbf16>,
    %c0_99 = arith.constant 0 : index
    %c0_100 = arith.constant 0 : index
    %221 = vector.load %arg13[%c0_99, %c0_100] : memref<48x128xbf16, #tpu.memory_space<vmem>>, vector<48x128xbf16>
    %cst_101 = arith.constant dense<0.000000e+00> : vector<128x128xf32>
    %222 = tpu.matmul %0, %221, %cst_101 {dimension_numbers = #tpu.dot_dimension_numbers<[1], [0], [0], [1], [0, 0, 1, 1], [], []>} : vector<128x48xbf16>, vector<48x128xbf16>, vector<128x128xf32> -> vector<128x128xf32>
    %223 = arith.addf %222, %3 : vector<128x128xf32>
    %224 = vector.extract_strided_slice %223 {offsets = [0, 0], sizes = [96, 128], strides = [1, 1]} : vector<128x128xf32> to vector<96x128xf32>
    %225 = arith.negf %224 : vector<96x128xf32>
    %226 = math.exp %225 : vector<96x128xf32>
    %cst_102 = arith.constant 1.000000e+00 : f32
    %227 = vector.broadcast %cst_102 : f32 to vector<96x128xf32>
    %228 = arith.addf %227, %226 : vector<96x128xf32>
    %229 = arith.divf %227, %228 : vector<96x128xf32>
    %230 = vector.extract_strided_slice %223 {offsets = [96, 0], sizes = [32, 128], strides = [1, 1]} : vector<128x128xf32> to vector<32x128xf32>
    %231 = math.tanh %230 : vector<32x128xf32>
    %232 = vector.extract_strided_slice %229 {offsets = [32, 0], sizes = [32, 128], strides = [1, 1]} : vector<96x128xf32> to vector<32x128xf32>
    %233 = arith.mulf %232, %189 : vector<32x128xf32>
    %234 = vector.extract_strided_slice %229 {offsets = [0, 0], sizes = [32, 128], strides = [1, 1]} : vector<96x128xf32> to vector<32x128xf32>
    %235 = arith.mulf %234, %231 : vector<32x128xf32>
    %236 = arith.addf %233, %235 : vector<32x128xf32>
    %237 = vector.extract_strided_slice %229 {offsets = [64, 0], sizes = [32, 128], strides = [1, 1]} : vector<96x128xf32> to vector<32x128xf32>
    %238 = math.tanh %236 : vector<32x128xf32>
    %239 = arith.mulf %237, %238 : vector<32x128xf32>
    %240 = arith.truncf %239 : vector<32x128xf32> to vector<32x128xbf16>
    %c0_103 = arith.constant 0 : index
    %c0_104 = arith.constant 0 : index
    %241 = vector.load %arg14[%c0_103, %c0_104] : memref<64x128xbf16, #tpu.memory_space<vmem>>, vector<32x128xbf16>
    tpu.vector_store %arg14[%c0_103, %c0_104], %240 {strides = array<i32>} : memref<64x128xbf16, #tpu.memory_space<vmem>>, vector<32x128xbf16>,
    %242 = arith.truncf %215 : vector<32x128xf32> to vector<32x128xbf16>
    %c32_105 = arith.constant 32 : index
    %c0_106 = arith.constant 0 : index
    %243 = vector.load %arg14[%c32_105, %c0_106] : memref<64x128xbf16, #tpu.memory_space<vmem>>, vector<32x128xbf16>
    tpu.vector_store %arg14[%c32_105, %c0_106], %242 {strides = array<i32>} : memref<64x128xbf16, #tpu.memory_space<vmem>>, vector<32x128xbf16>,
    %c0_107 = arith.constant 0 : index
    %c0_108 = arith.constant 0 : index
    %244 = vector.load %arg14[%c0_107, %c0_108] : memref<64x128xbf16, #tpu.memory_space<vmem>>, vector<64x128xbf16>
    %cst_109 = arith.constant dense<0.000000e+00> : vector<128x128xf32>
    %245 = tpu.matmul %5, %244, %cst_109 {dimension_numbers = #tpu.dot_dimension_numbers<[1], [0], [0], [1], [0, 0, 1, 1], [], []>} : vector<128x64xbf16>, vector<64x128xbf16>, vector<128x128xf32> -> vector<128x128xf32>
    %246 = arith.addf %245, %9 : vector<128x128xf32>
    %247 = vector.extract_strided_slice %246 {offsets = [0, 0], sizes = [96, 128], strides = [1, 1]} : vector<128x128xf32> to vector<96x128xf32>
    %248 = arith.negf %247 : vector<96x128xf32>
    %249 = math.exp %248 : vector<96x128xf32>
    %cst_110 = arith.constant 1.000000e+00 : f32
    %250 = vector.broadcast %cst_110 : f32 to vector<96x128xf32>
    %251 = arith.addf %250, %249 : vector<96x128xf32>
    %252 = arith.divf %250, %251 : vector<96x128xf32>
    %253 = vector.extract_strided_slice %246 {offsets = [96, 0], sizes = [32, 128], strides = [1, 1]} : vector<128x128xf32> to vector<32x128xf32>
    %254 = math.tanh %253 : vector<32x128xf32>
    %255 = vector.extract_strided_slice %252 {offsets = [32, 0], sizes = [32, 128], strides = [1, 1]} : vector<96x128xf32> to vector<32x128xf32>
    %256 = arith.mulf %255, %212 : vector<32x128xf32>
    %257 = vector.extract_strided_slice %252 {offsets = [0, 0], sizes = [32, 128], strides = [1, 1]} : vector<96x128xf32> to vector<32x128xf32>
    %258 = arith.mulf %257, %254 : vector<32x128xf32>
    %259 = arith.addf %256, %258 : vector<32x128xf32>
    %260 = vector.extract_strided_slice %252 {offsets = [64, 0], sizes = [32, 128], strides = [1, 1]} : vector<96x128xf32> to vector<32x128xf32>
    %261 = math.tanh %259 : vector<32x128xf32>
    %262 = arith.mulf %260, %261 : vector<32x128xf32>
    %c5 = arith.constant 5 : index
    %c0_111 = arith.constant 0 : index
    %c0_112 = arith.constant 0 : index
    %263 = vector.load %arg1[%c5, %c0_111, %c0_112] : memref<8x16x128xbf16, #tpu.memory_space<vmem>>, vector<1x16x128xbf16>
    %264 = vector.shape_cast %263 : vector<1x16x128xbf16> to vector<16x128xbf16>
    %c0_113 = arith.constant 0 : index
    %c0_114 = arith.constant 0 : index
    %265 = vector.load %arg13[%c0_113, %c0_114] : memref<48x128xbf16, #tpu.memory_space<vmem>>, vector<16x128xbf16>
    tpu.vector_store %arg13[%c0_113, %c0_114], %264 {strides = array<i32>} : memref<48x128xbf16, #tpu.memory_space<vmem>>, vector<16x128xbf16>,
    %266 = arith.truncf %239 : vector<32x128xf32> to vector<32x128xbf16>
    %c16_115 = arith.constant 16 : index
    %c0_116 = arith.constant 0 : index
    %267 = vector.load %arg13[%c16_115, %c0_116] : memref<48x128xbf16, #tpu.memory_space<vmem>>, vector<32x128xbf16>
    tpu.vector_store %arg13[%c16_115, %c0_116], %266 {strides = array<i32>} : memref<48x128xbf16, #tpu.memory_space<vmem>>, vector<32x128xbf16>,
    %c0_117 = arith.constant 0 : index
    %c0_118 = arith.constant 0 : index
    %268 = vector.load %arg13[%c0_117, %c0_118] : memref<48x128xbf16, #tpu.memory_space<vmem>>, vector<48x128xbf16>
    %cst_119 = arith.constant dense<0.000000e+00> : vector<128x128xf32>
    %269 = tpu.matmul %0, %268, %cst_119 {dimension_numbers = #tpu.dot_dimension_numbers<[1], [0], [0], [1], [0, 0, 1, 1], [], []>} : vector<128x48xbf16>, vector<48x128xbf16>, vector<128x128xf32> -> vector<128x128xf32>
    %270 = arith.addf %269, %3 : vector<128x128xf32>
    %271 = vector.extract_strided_slice %270 {offsets = [0, 0], sizes = [96, 128], strides = [1, 1]} : vector<128x128xf32> to vector<96x128xf32>
    %272 = arith.negf %271 : vector<96x128xf32>
    %273 = math.exp %272 : vector<96x128xf32>
    %cst_120 = arith.constant 1.000000e+00 : f32
    %274 = vector.broadcast %cst_120 : f32 to vector<96x128xf32>
    %275 = arith.addf %274, %273 : vector<96x128xf32>
    %276 = arith.divf %274, %275 : vector<96x128xf32>
    %277 = vector.extract_strided_slice %270 {offsets = [96, 0], sizes = [32, 128], strides = [1, 1]} : vector<128x128xf32> to vector<32x128xf32>
    %278 = math.tanh %277 : vector<32x128xf32>
    %279 = vector.extract_strided_slice %276 {offsets = [32, 0], sizes = [32, 128], strides = [1, 1]} : vector<96x128xf32> to vector<32x128xf32>
    %280 = arith.mulf %279, %236 : vector<32x128xf32>
    %281 = vector.extract_strided_slice %276 {offsets = [0, 0], sizes = [32, 128], strides = [1, 1]} : vector<96x128xf32> to vector<32x128xf32>
    %282 = arith.mulf %281, %278 : vector<32x128xf32>
    %283 = arith.addf %280, %282 : vector<32x128xf32>
    %284 = vector.extract_strided_slice %276 {offsets = [64, 0], sizes = [32, 128], strides = [1, 1]} : vector<96x128xf32> to vector<32x128xf32>
    %285 = math.tanh %283 : vector<32x128xf32>
    %286 = arith.mulf %284, %285 : vector<32x128xf32>
    %287 = arith.truncf %286 : vector<32x128xf32> to vector<32x128xbf16>
    %c0_121 = arith.constant 0 : index
    %c0_122 = arith.constant 0 : index
    %288 = vector.load %arg14[%c0_121, %c0_122] : memref<64x128xbf16, #tpu.memory_space<vmem>>, vector<32x128xbf16>
    tpu.vector_store %arg14[%c0_121, %c0_122], %287 {strides = array<i32>} : memref<64x128xbf16, #tpu.memory_space<vmem>>, vector<32x128xbf16>,
    %289 = arith.truncf %262 : vector<32x128xf32> to vector<32x128xbf16>
    %c32_123 = arith.constant 32 : index
    %c0_124 = arith.constant 0 : index
    %290 = vector.load %arg14[%c32_123, %c0_124] : memref<64x128xbf16, #tpu.memory_space<vmem>>, vector<32x128xbf16>
    tpu.vector_store %arg14[%c32_123, %c0_124], %289 {strides = array<i32>} : memref<64x128xbf16, #tpu.memory_space<vmem>>, vector<32x128xbf16>,
    %c0_125 = arith.constant 0 : index
    %c0_126 = arith.constant 0 : index
    %291 = vector.load %arg14[%c0_125, %c0_126] : memref<64x128xbf16, #tpu.memory_space<vmem>>, vector<64x128xbf16>
    %cst_127 = arith.constant dense<0.000000e+00> : vector<128x128xf32>
    %292 = tpu.matmul %5, %291, %cst_127 {dimension_numbers = #tpu.dot_dimension_numbers<[1], [0], [0], [1], [0, 0, 1, 1], [], []>} : vector<128x64xbf16>, vector<64x128xbf16>, vector<128x128xf32> -> vector<128x128xf32>
    %293 = arith.addf %292, %9 : vector<128x128xf32>
    %294 = vector.extract_strided_slice %293 {offsets = [0, 0], sizes = [96, 128], strides = [1, 1]} : vector<128x128xf32> to vector<96x128xf32>
    %295 = arith.negf %294 : vector<96x128xf32>
    %296 = math.exp %295 : vector<96x128xf32>
    %cst_128 = arith.constant 1.000000e+00 : f32
    %297 = vector.broadcast %cst_128 : f32 to vector<96x128xf32>
    %298 = arith.addf %297, %296 : vector<96x128xf32>
    %299 = arith.divf %297, %298 : vector<96x128xf32>
    %300 = vector.extract_strided_slice %293 {offsets = [96, 0], sizes = [32, 128], strides = [1, 1]} : vector<128x128xf32> to vector<32x128xf32>
    %301 = math.tanh %300 : vector<32x128xf32>
    %302 = vector.extract_strided_slice %299 {offsets = [32, 0], sizes = [32, 128], strides = [1, 1]} : vector<96x128xf32> to vector<32x128xf32>
    %303 = arith.mulf %302, %259 : vector<32x128xf32>
    %304 = vector.extract_strided_slice %299 {offsets = [0, 0], sizes = [32, 128], strides = [1, 1]} : vector<96x128xf32> to vector<32x128xf32>
    %305 = arith.mulf %304, %301 : vector<32x128xf32>
    %306 = arith.addf %303, %305 : vector<32x128xf32>
    %307 = vector.extract_strided_slice %299 {offsets = [64, 0], sizes = [32, 128], strides = [1, 1]} : vector<96x128xf32> to vector<32x128xf32>
    %308 = math.tanh %306 : vector<32x128xf32>
    %309 = arith.mulf %307, %308 : vector<32x128xf32>
    %c6 = arith.constant 6 : index
    %c0_129 = arith.constant 0 : index
    %c0_130 = arith.constant 0 : index
    %310 = vector.load %arg1[%c6, %c0_129, %c0_130] : memref<8x16x128xbf16, #tpu.memory_space<vmem>>, vector<1x16x128xbf16>
    %311 = vector.shape_cast %310 : vector<1x16x128xbf16> to vector<16x128xbf16>
    %c0_131 = arith.constant 0 : index
    %c0_132 = arith.constant 0 : index
    %312 = vector.load %arg13[%c0_131, %c0_132] : memref<48x128xbf16, #tpu.memory_space<vmem>>, vector<16x128xbf16>
    tpu.vector_store %arg13[%c0_131, %c0_132], %311 {strides = array<i32>} : memref<48x128xbf16, #tpu.memory_space<vmem>>, vector<16x128xbf16>,
    %313 = arith.truncf %286 : vector<32x128xf32> to vector<32x128xbf16>
    %c16_133 = arith.constant 16 : index
    %c0_134 = arith.constant 0 : index
    %314 = vector.load %arg13[%c16_133, %c0_134] : memref<48x128xbf16, #tpu.memory_space<vmem>>, vector<32x128xbf16>
    tpu.vector_store %arg13[%c16_133, %c0_134], %313 {strides = array<i32>} : memref<48x128xbf16, #tpu.memory_space<vmem>>, vector<32x128xbf16>,
    %c0_135 = arith.constant 0 : index
    %c0_136 = arith.constant 0 : index
    %315 = vector.load %arg13[%c0_135, %c0_136] : memref<48x128xbf16, #tpu.memory_space<vmem>>, vector<48x128xbf16>
    %cst_137 = arith.constant dense<0.000000e+00> : vector<128x128xf32>
    %316 = tpu.matmul %0, %315, %cst_137 {dimension_numbers = #tpu.dot_dimension_numbers<[1], [0], [0], [1], [0, 0, 1, 1], [], []>} : vector<128x48xbf16>, vector<48x128xbf16>, vector<128x128xf32> -> vector<128x128xf32>
    %317 = arith.addf %316, %3 : vector<128x128xf32>
    %318 = vector.extract_strided_slice %317 {offsets = [0, 0], sizes = [96, 128], strides = [1, 1]} : vector<128x128xf32> to vector<96x128xf32>
    %319 = arith.negf %318 : vector<96x128xf32>
    %320 = math.exp %319 : vector<96x128xf32>
    %cst_138 = arith.constant 1.000000e+00 : f32
    %321 = vector.broadcast %cst_138 : f32 to vector<96x128xf32>
    %322 = arith.addf %321, %320 : vector<96x128xf32>
    %323 = arith.divf %321, %322 : vector<96x128xf32>
    %324 = vector.extract_strided_slice %317 {offsets = [96, 0], sizes = [32, 128], strides = [1, 1]} : vector<128x128xf32> to vector<32x128xf32>
    %325 = math.tanh %324 : vector<32x128xf32>
    %326 = vector.extract_strided_slice %323 {offsets = [32, 0], sizes = [32, 128], strides = [1, 1]} : vector<96x128xf32> to vector<32x128xf32>
    %327 = arith.mulf %326, %283 : vector<32x128xf32>
    %328 = vector.extract_strided_slice %323 {offsets = [0, 0], sizes = [32, 128], strides = [1, 1]} : vector<96x128xf32> to vector<32x128xf32>
    %329 = arith.mulf %328, %325 : vector<32x128xf32>
    %330 = arith.addf %327, %329 : vector<32x128xf32>
    %331 = vector.extract_strided_slice %323 {offsets = [64, 0], sizes = [32, 128], strides = [1, 1]} : vector<96x128xf32> to vector<32x128xf32>
    %332 = math.tanh %330 : vector<32x128xf32>
    %333 = arith.mulf %331, %332 : vector<32x128xf32>
    %334 = arith.truncf %333 : vector<32x128xf32> to vector<32x128xbf16>
    %c0_139 = arith.constant 0 : index
    %c0_140 = arith.constant 0 : index
    %335 = vector.load %arg14[%c0_139, %c0_140] : memref<64x128xbf16, #tpu.memory_space<vmem>>, vector<32x128xbf16>
    tpu.vector_store %arg14[%c0_139, %c0_140], %334 {strides = array<i32>} : memref<64x128xbf16, #tpu.memory_space<vmem>>, vector<32x128xbf16>,
    %336 = arith.truncf %309 : vector<32x128xf32> to vector<32x128xbf16>
    %c32_141 = arith.constant 32 : index
    %c0_142 = arith.constant 0 : index
    %337 = vector.load %arg14[%c32_141, %c0_142] : memref<64x128xbf16, #tpu.memory_space<vmem>>, vector<32x128xbf16>
    tpu.vector_store %arg14[%c32_141, %c0_142], %336 {strides = array<i32>} : memref<64x128xbf16, #tpu.memory_space<vmem>>, vector<32x128xbf16>,
    %c0_143 = arith.constant 0 : index
    %c0_144 = arith.constant 0 : index
    %338 = vector.load %arg14[%c0_143, %c0_144] : memref<64x128xbf16, #tpu.memory_space<vmem>>, vector<64x128xbf16>
    %cst_145 = arith.constant dense<0.000000e+00> : vector<128x128xf32>
    %339 = tpu.matmul %5, %338, %cst_145 {dimension_numbers = #tpu.dot_dimension_numbers<[1], [0], [0], [1], [0, 0, 1, 1], [], []>} : vector<128x64xbf16>, vector<64x128xbf16>, vector<128x128xf32> -> vector<128x128xf32>
    %340 = arith.addf %339, %9 : vector<128x128xf32>
    %341 = vector.extract_strided_slice %340 {offsets = [0, 0], sizes = [96, 128], strides = [1, 1]} : vector<128x128xf32> to vector<96x128xf32>
    %342 = arith.negf %341 : vector<96x128xf32>
    %343 = math.exp %342 : vector<96x128xf32>
    %cst_146 = arith.constant 1.000000e+00 : f32
    %344 = vector.broadcast %cst_146 : f32 to vector<96x128xf32>
    %345 = arith.addf %344, %343 : vector<96x128xf32>
    %346 = arith.divf %344, %345 : vector<96x128xf32>
    %347 = vector.extract_strided_slice %340 {offsets = [96, 0], sizes = [32, 128], strides = [1, 1]} : vector<128x128xf32> to vector<32x128xf32>
    %348 = math.tanh %347 : vector<32x128xf32>
    %349 = vector.extract_strided_slice %346 {offsets = [32, 0], sizes = [32, 128], strides = [1, 1]} : vector<96x128xf32> to vector<32x128xf32>
    %350 = arith.mulf %349, %306 : vector<32x128xf32>
    %351 = vector.extract_strided_slice %346 {offsets = [0, 0], sizes = [32, 128], strides = [1, 1]} : vector<96x128xf32> to vector<32x128xf32>
    %352 = arith.mulf %351, %348 : vector<32x128xf32>
    %353 = arith.addf %350, %352 : vector<32x128xf32>
    %354 = vector.extract_strided_slice %346 {offsets = [64, 0], sizes = [32, 128], strides = [1, 1]} : vector<96x128xf32> to vector<32x128xf32>
    %355 = math.tanh %353 : vector<32x128xf32>
    %356 = arith.mulf %354, %355 : vector<32x128xf32>
    %c7 = arith.constant 7 : index
    %c0_147 = arith.constant 0 : index
    %c0_148 = arith.constant 0 : index
    %357 = vector.load %arg1[%c7, %c0_147, %c0_148] : memref<8x16x128xbf16, #tpu.memory_space<vmem>>, vector<1x16x128xbf16>
    %358 = vector.shape_cast %357 : vector<1x16x128xbf16> to vector<16x128xbf16>
    %c0_149 = arith.constant 0 : index
    %c0_150 = arith.constant 0 : index
    %359 = vector.load %arg13[%c0_149, %c0_150] : memref<48x128xbf16, #tpu.memory_space<vmem>>, vector<16x128xbf16>
    tpu.vector_store %arg13[%c0_149, %c0_150], %358 {strides = array<i32>} : memref<48x128xbf16, #tpu.memory_space<vmem>>, vector<16x128xbf16>,
    %360 = arith.truncf %333 : vector<32x128xf32> to vector<32x128xbf16>
    %c16_151 = arith.constant 16 : index
    %c0_152 = arith.constant 0 : index
    %361 = vector.load %arg13[%c16_151, %c0_152] : memref<48x128xbf16, #tpu.memory_space<vmem>>, vector<32x128xbf16>
    tpu.vector_store %arg13[%c16_151, %c0_152], %360 {strides = array<i32>} : memref<48x128xbf16, #tpu.memory_space<vmem>>, vector<32x128xbf16>,
    %c0_153 = arith.constant 0 : index
    %c0_154 = arith.constant 0 : index
    %362 = vector.load %arg13[%c0_153, %c0_154] : memref<48x128xbf16, #tpu.memory_space<vmem>>, vector<48x128xbf16>
    %cst_155 = arith.constant dense<0.000000e+00> : vector<128x128xf32>
    %363 = tpu.matmul %0, %362, %cst_155 {dimension_numbers = #tpu.dot_dimension_numbers<[1], [0], [0], [1], [0, 0, 1, 1], [], []>} : vector<128x48xbf16>, vector<48x128xbf16>, vector<128x128xf32> -> vector<128x128xf32>
    %364 = arith.addf %363, %3 : vector<128x128xf32>
    %365 = vector.extract_strided_slice %364 {offsets = [0, 0], sizes = [96, 128], strides = [1, 1]} : vector<128x128xf32> to vector<96x128xf32>
    %366 = arith.negf %365 : vector<96x128xf32>
    %367 = math.exp %366 : vector<96x128xf32>
    %cst_156 = arith.constant 1.000000e+00 : f32
    %368 = vector.broadcast %cst_156 : f32 to vector<96x128xf32>
    %369 = arith.addf %368, %367 : vector<96x128xf32>
    %370 = arith.divf %368, %369 : vector<96x128xf32>
    %371 = vector.extract_strided_slice %364 {offsets = [96, 0], sizes = [32, 128], strides = [1, 1]} : vector<128x128xf32> to vector<32x128xf32>
    %372 = math.tanh %371 : vector<32x128xf32>
    %373 = vector.extract_strided_slice %370 {offsets = [32, 0], sizes = [32, 128], strides = [1, 1]} : vector<96x128xf32> to vector<32x128xf32>
    %374 = arith.mulf %373, %330 : vector<32x128xf32>
    %375 = vector.extract_strided_slice %370 {offsets = [0, 0], sizes = [32, 128], strides = [1, 1]} : vector<96x128xf32> to vector<32x128xf32>
    %376 = arith.mulf %375, %372 : vector<32x128xf32>
    %377 = arith.addf %374, %376 : vector<32x128xf32>
    %378 = vector.extract_strided_slice %370 {offsets = [64, 0], sizes = [32, 128], strides = [1, 1]} : vector<96x128xf32> to vector<32x128xf32>
    %379 = math.tanh %377 : vector<32x128xf32>
    %380 = arith.mulf %378, %379 : vector<32x128xf32>
    %381 = arith.truncf %380 : vector<32x128xf32> to vector<32x128xbf16>
    %c0_157 = arith.constant 0 : index
    %c0_158 = arith.constant 0 : index
    %382 = vector.load %arg14[%c0_157, %c0_158] : memref<64x128xbf16, #tpu.memory_space<vmem>>, vector<32x128xbf16>
    tpu.vector_store %arg14[%c0_157, %c0_158], %381 {strides = array<i32>} : memref<64x128xbf16, #tpu.memory_space<vmem>>, vector<32x128xbf16>,
    %383 = arith.truncf %356 : vector<32x128xf32> to vector<32x128xbf16>
    %c32_159 = arith.constant 32 : index
    %c0_160 = arith.constant 0 : index
    %384 = vector.load %arg14[%c32_159, %c0_160] : memref<64x128xbf16, #tpu.memory_space<vmem>>, vector<32x128xbf16>
    tpu.vector_store %arg14[%c32_159, %c0_160], %383 {strides = array<i32>} : memref<64x128xbf16, #tpu.memory_space<vmem>>, vector<32x128xbf16>,
    %c0_161 = arith.constant 0 : index
    %c0_162 = arith.constant 0 : index
    %385 = vector.load %arg14[%c0_161, %c0_162] : memref<64x128xbf16, #tpu.memory_space<vmem>>, vector<64x128xbf16>
    %cst_163 = arith.constant dense<0.000000e+00> : vector<128x128xf32>
    %386 = tpu.matmul %5, %385, %cst_163 {dimension_numbers = #tpu.dot_dimension_numbers<[1], [0], [0], [1], [0, 0, 1, 1], [], []>} : vector<128x64xbf16>, vector<64x128xbf16>, vector<128x128xf32> -> vector<128x128xf32>
    %387 = arith.addf %386, %9 : vector<128x128xf32>
    %388 = vector.extract_strided_slice %387 {offsets = [0, 0], sizes = [96, 128], strides = [1, 1]} : vector<128x128xf32> to vector<96x128xf32>
    %389 = arith.negf %388 : vector<96x128xf32>
    %390 = math.exp %389 : vector<96x128xf32>
    %cst_164 = arith.constant 1.000000e+00 : f32
    %391 = vector.broadcast %cst_164 : f32 to vector<96x128xf32>
    %392 = arith.addf %391, %390 : vector<96x128xf32>
    %393 = arith.divf %391, %392 : vector<96x128xf32>
    %394 = vector.extract_strided_slice %387 {offsets = [96, 0], sizes = [32, 128], strides = [1, 1]} : vector<128x128xf32> to vector<32x128xf32>
    %395 = math.tanh %394 : vector<32x128xf32>
    %396 = vector.extract_strided_slice %393 {offsets = [32, 0], sizes = [32, 128], strides = [1, 1]} : vector<96x128xf32> to vector<32x128xf32>
    %397 = arith.mulf %396, %353 : vector<32x128xf32>
    %398 = vector.extract_strided_slice %393 {offsets = [0, 0], sizes = [32, 128], strides = [1, 1]} : vector<96x128xf32> to vector<32x128xf32>
    %399 = arith.mulf %398, %395 : vector<32x128xf32>
    %400 = arith.addf %397, %399 : vector<32x128xf32>
    %401 = vector.extract_strided_slice %393 {offsets = [64, 0], sizes = [32, 128], strides = [1, 1]} : vector<96x128xf32> to vector<32x128xf32>
    %402 = math.tanh %400 : vector<32x128xf32>
    %403 = arith.mulf %401, %402 : vector<32x128xf32>
    %c0_165 = arith.constant 0 : index
    %c0_166 = arith.constant 0 : index
    %404 = vector.load %arg10[%c0_165, %c0_166] : memref<32x1xf32, #tpu.memory_space<vmem>>, vector<32x1xf32>
    %405 = vector.broadcast %404 : vector<32x1xf32> to vector<32x128xf32>
    %406 = arith.mulf %403, %405 : vector<32x128xf32>
    %cst_167 = arith.constant dense<0.000000e+00> : vector<128xf32>
    %407 = vector.multi_reduction <add>, %406, %cst_167 [0] : vector<32x128xf32> to vector<128xf32>
    %408 = vector.shape_cast %407 : vector<128xf32> to vector<1x128xf32>
    %409 = arith.addf %25, %408 : vector<1x128xf32>
    %c0_168 = arith.constant 0 : index
    %c0_169 = arith.constant 0 : index
    %410 = vector.load %arg12[%c0_168, %c0_169] : memref<1x128xf32, #tpu.memory_space<vmem>>, vector<1x128xf32>
    tpu.vector_store %arg12[%c0_168, %c0_169], %409 {strides = array<i32>} : memref<1x128xf32, #tpu.memory_space<vmem>>, vector<1x128xf32>,
    return
  }
  func.func @transform_0(%arg0: i32) -> (i32, i32, i32) {
    %c0_i32 = arith.constant 0 : i32
    %c0_i32_0 = arith.constant 0 : i32
    %c0_i32_1 = arith.constant 0 : i32
    return %c0_i32, %c0_i32_0, %arg0 : i32, i32, i32
  }
  func.func @transform_1(%arg0: i32) -> (i32, i32) {
    %c0_i32 = arith.constant 0 : i32
    %c0_i32_0 = arith.constant 0 : i32
    %c0_i32_1 = arith.constant 0 : i32
    return %c0_i32, %c0_i32_0 : i32, i32
  }
  func.func @transform_2(%arg0: i32) -> (i32, i32) {
    %c0_i32 = arith.constant 0 : i32
    %c0_i32_0 = arith.constant 0 : i32
    %c0_i32_1 = arith.constant 0 : i32
    return %c0_i32, %c0_i32_0 : i32, i32
  }
  func.func @transform_3(%arg0: i32) -> (i32, i32, i32) {
    %c0_i32 = arith.constant 0 : i32
    %c0_i32_0 = arith.constant 0 : i32
    %c0_i32_1 = arith.constant 0 : i32
    %c0_i32_2 = arith.constant 0 : i32
    return %c0_i32, %c0_i32_0, %c0_i32_1 : i32, i32, i32
  }
  func.func @transform_4(%arg0: i32) -> (i32, i32, i32) {
    %c0_i32 = arith.constant 0 : i32
    %c0_i32_0 = arith.constant 0 : i32
    %c0_i32_1 = arith.constant 0 : i32
    %c0_i32_2 = arith.constant 0 : i32
    return %c0_i32, %c0_i32_0, %c0_i32_1 : i32, i32, i32
  }
  func.func @transform_5(%arg0: i32) -> (i32, i32) {
    %c0_i32 = arith.constant 0 : i32
    %c0_i32_0 = arith.constant 0 : i32
    return %c0_i32, %arg0 : i32, i32
  }
  func.func @transform_6(%arg0: i32) -> (i32, i32) {
    %c0_i32 = arith.constant 0 : i32
    %c0_i32_0 = arith.constant 0 : i32
    return %c0_i32, %arg0 : i32, i32
  }
  func.func @transform_7(%arg0: i32) -> (i32, i32) {
    %c0_i32 = arith.constant 0 : i32
    %c0_i32_0 = arith.constant 0 : i32
    %c0_i32_1 = arith.constant 0 : i32
    return %c0_i32, %c0_i32_0 : i32, i32
  }
  func.func @transform_8(%arg0: i32) -> (i32, i32) {
    %c0_i32 = arith.constant 0 : i32
    %c0_i32_0 = arith.constant 0 : i32
    %c0_i32_1 = arith.constant 0 : i32
    return %c0_i32, %c0_i32_0 : i32, i32
  }
  func.func @transform_9(%arg0: i32) -> (i32, i32) {
    %c0_i32 = arith.constant 0 : i32
    %c0_i32_0 = arith.constant 0 : i32
    %c0_i32_1 = arith.constant 0 : i32
    return %c0_i32, %c0_i32_0 : i32, i32
  }
  func.func @transform_10(%arg0: i32) -> (i32, i32) {
    %c0_i32 = arith.constant 0 : i32
    %c0_i32_0 = arith.constant 0 : i32
    %c0_i32_1 = arith.constant 0 : i32
    return %c0_i32, %c0_i32_0 : i32, i32
  }
  func.func @transform_11(%arg0: i32) -> (i32, i32) {
    %c0_i32 = arith.constant 0 : i32
    %c0_i32_0 = arith.constant 0 : i32
    return %c0_i32, %arg0 : i32, i32
  }
}

</mosaic_0001>

<bundles_post_ra>
// kernel: forward.2
= control target key start
LH: loop header
LB: loop body
LE: loop exit
PB: predicated region body
PF: predicated region fallthrough
CT: control target
= control target key end

     0   :  { %s1891_s1 = inlined_call_operand.vmem [shape: bf16[256,128], index: 1, kind: input, shape index: {}]   ;;  %s1892_s0 = inlined_call_operand.vmem [shape: bf16[256,256], index: 0, kind: input, shape index: {}]   ;;  %s1893_s4 = inlined_call_operand.vmem [shape: f32[128,128], index: 4, kind: input, shape index: {}]   ;;  %s1894_s3 = inlined_call_operand.vmem [shape: f32[128,128], index: 3, kind: input, shape index: {}]   ;;  %s1895_s2 = inlined_call_operand.vmem [shape: f32[256,128], index: 2, kind: input, shape index: {}]   ;;  %s1896_s5 = inlined_call_operand.vmem [shape: f32[1,128], index: 5, kind: input, shape index: {}]   ;;  %s1897_s6 = inlined_call_operand.vmem [shape: f32[256,128], index: 6, kind: output, shape index: {}]  }
   0x1   :  { %v1281_v0 = vld [vmem:[%s1891_s1 + $0x38] sm:$0xff]  ;;  %v1280_v2 = vld [vmem:[%s1891_s1 + $0x30] sm:$0xff]  ;;  %v1279_v4 = vld [vmem:[%s1891_s1 + $0x28] sm:$0xff] }
   0x2   :  { %v1289_v1 = vld [vmem:[%s1891_s1 + $0x78] sm:$0xff]  ;;  %411 = vmatpush.bf16.msra.mxu0 %v1281_v0  ;;  %v1288_v3 = vld [vmem:[%s1891_s1 + $0x70] sm:$0xff]  ;;  %v1287_v5 = vld [vmem:[%s1891_s1 + $0x68] sm:$0xff] }
   0x3   :  { %500 = vmatpush.bf16.msra.mxu1 %v1289_v1  ;;  %v1278_v6 = vld [vmem:[%s1891_s1 + $0x20] sm:$0xff]  ;;  %v1277_v8 = vld [vmem:[%s1891_s1 + $0x18] sm:$0xff]  ;;  %v1276_v10 = vld [vmem:[%s1891_s1 + $0x10] sm:$0xff] }
   0x4   :  { %v1286_v7 = vld [vmem:[%s1891_s1 + $0x60] sm:$0xff]  ;;  %v1285_v9 = vld [vmem:[%s1891_s1 + $0x58] sm:$0xff]  ;;  %v1284_v11 = vld [vmem:[%s1891_s1 + $0x50] sm:$0xff] }
   0x5   :  { %v1275_v12 = vld [vmem:[%s1891_s1 + $0x8] sm:$0xff]  ;;  %v1274_v14 = vld [vmem:[%s1891_s1] sm:$0xff]  ;;  %v1060_v22 = vld [vmem:[%s1892_s0 + $0x10] sm:$0xf] }
   0x6   :  { %412 = vmatpush.bf16.msra.mxu0 %v1280_v2  ;;  %v1283_v13 = vld [vmem:[%s1891_s1 + $0x48] sm:$0xff]  ;;  %v1282_v15 = vld [vmem:[%s1891_s1 + $0x40] sm:$0xff]  ;;  %v1245_v23 = vld [vmem:[%s1892_s0 + $0x14] sm:$0xf0] }
   0x7   :  { %501 = vmatpush.bf16.msra.mxu1 %v1288_v3  ;;  %v1052_v16 = vld [vmem:[%s1892_s0] sm:$0xf]  ;;  %v1243_v17 = vld [vmem:[%s1892_s0 + $0x4] sm:$0xf0]  ;;  %v1242_v18 = vld [vmem:[%s1892_s0 + $0x4] sm:$0xf]  ;;  %v1061_v26 = vor.u32 %v1245_v23, %v1060_v22 }
   0x8   :  { %v1054_v19 = vld [vmem:[%s1892_s0 + $0x8] sm:$0xf0]  ;;  %v1053_v20 = vor.u32 %v1243_v17, %v1052_v16  ;;  %v1244_v24 = vld [vmem:[%s1892_s0 + $0x14] sm:$0xf]  ;;  %v1062_v25 = vld [vmem:[%s1892_s0 + $0x18] sm:$0xf0] }
   0x9   :  { %v1057_v21 = vor.u32 %v1242_v18, %v1054_v19  ;;  %v1065_v27 = vor.u32 %v1244_v24, %v1062_v25  ;;  %v1068_v28 = vld [vmem:[%s1892_s0 + $0x20] sm:$0xf]  ;;  %v1247_v29 = vld [vmem:[%s1892_s0 + $0x24] sm:$0xf0]  ;;  %v1246_v30 = vld [vmem:[%s1892_s0 + $0x24] sm:$0xf] }
   0xa   :  { %413 = vmatpush.bf16.msra.mxu0 %v1279_v4  ;;  %v1070_v31 = vld [vmem:[%s1892_s0 + $0x28] sm:$0xf0]  ;;  %v1069_v32 = vor.u32 %v1247_v29, %v1068_v28  ;;  %v1076_v34 = vld [vmem:[%s1892_s0 + $0x30] sm:$0xf]  ;;  %v1249_v35 = vld [vmem:[%s1892_s0 + $0x34] sm:$0xf0] }
   0xb   :  { %502 = vmatpush.bf16.msra.mxu1 %v1287_v5  ;;  %v1073_v33 = vor.u32 %v1246_v30, %v1070_v31  ;;  %v1248_v36 = vld [vmem:[%s1892_s0 + $0x34] sm:$0xf]  ;;  %v1078_v37 = vld [vmem:[%s1892_s0 + $0x38] sm:$0xf0]  ;;  %v1077_v38 = vor.u32 %v1249_v35, %v1076_v34  ;;  %v1084_v40 = vld [vmem:[%s1892_s0 + $0x40] sm:$0xf] }
   0xc   :  { %v1081_v39 = vor.u32 %v1248_v36, %v1078_v37  ;;  %v1251_v41 = vld [vmem:[%s1892_s0 + $0x44] sm:$0xf0]  ;;  %v1250_v42 = vld [vmem:[%s1892_s0 + $0x44] sm:$0xf]  ;;  %v1086_v43 = vld [vmem:[%s1892_s0 + $0x48] sm:$0xf0] }
   0xd   :  { %v1085_v44 = vor.u32 %v1251_v41, %v1084_v40  ;;  %v1089_v45 = vor.u32 %v1250_v42, %v1086_v43  ;;  %v751_v46 = vld [vmem:[%s1893_s4 + $0x78] sm:$0xff]  ;;  %v750_v48 = vld [vmem:[%s1893_s4 + $0x70] sm:$0xff]  ;;  %v749_v50 = vld [vmem:[%s1893_s4 + $0x68] sm:$0xff] }
   0xe   :  { %414 = vmatpush.bf16.msra.mxu0 %v1278_v6  ;;  %v703_v47 = vld [vmem:[%s1894_s3 + $0x78] sm:$0xff]  ;;  %752 = vmatpush.msra.mxu2 %v751_v46  ;;  %v702_v49 = vld [vmem:[%s1894_s3 + $0x70] sm:$0xff]  ;;  %v701_v51 = vld [vmem:[%s1894_s3 + $0x68] sm:$0xff] }
   0xf   :  { %503 = vmatpush.bf16.msra.mxu1 %v1286_v7  ;;  %865 = vmatpush.msra.mxu3 %v703_v47  ;;  %v748_v52 = vld [vmem:[%s1893_s4 + $0x60] sm:$0xff]  ;;  %v747_v54 = vld [vmem:[%s1893_s4 + $0x58] sm:$0xff]  ;;  %v1092_v56 = vld [vmem:[%s1892_s0 + $0x50] sm:$0xf] }
  0x10   :  { %753 = vmatpush.msra.mxu2 %v750_v48  ;;  %v700_v53 = vld [vmem:[%s1894_s3 + $0x60] sm:$0xff]  ;;  %v699_v55 = vld [vmem:[%s1894_s3 + $0x58] sm:$0xff]  ;;  %v746_v57 = vld [vmem:[%s1893_s4 + $0x50] sm:$0xff] }
  0x11   :  { %866 = vmatpush.msra.mxu3 %v702_v49  ;;  %v698_v58 = vld [vmem:[%s1894_s3 + $0x50] sm:$0xff]  ;;  %v1253_v59 = vld [vmem:[%s1892_s0 + $0x54] sm:$0xf0]  ;;  %v1094_v61 = vld [vmem:[%s1892_s0 + $0x58] sm:$0xf0] }
  0x12   :  { %415 = vmatpush.bf16.msra.mxu0 %v1277_v8  ;;  %754 = vmatpush.msra.mxu2 %v749_v50  ;;  %v1252_v60 = vld [vmem:[%s1892_s0 + $0x54] sm:$0xf]  ;;  %v745_v62 = vld [vmem:[%s1893_s4 + $0x48] sm:$0xff]  ;;  %v1093_v0 = vor.u32 %v1253_v59, %v1092_v56  ;;  %v744_v2 = vld [vmem:[%s1893_s4 + $0x40] sm:$0xff] }
  0x13   :  { %504 = vmatpush.bf16.msra.mxu1 %v1285_v9  ;;  %867 = vmatpush.msra.mxu3 %v701_v51  ;;  %v697_v63 = vld [vmem:[%s1894_s3 + $0x48] sm:$0xff]  ;;  %v1097_v1 = vor.u32 %v1252_v60, %v1094_v61  ;;  %v696_v3 = vld [vmem:[%s1894_s3 + $0x40] sm:$0xff]  ;;  %v743_v4 = vld [vmem:[%s1893_s4 + $0x38] sm:$0xff] }
  0x14   :  { %755 = vmatpush.msra.mxu2 %v748_v52  ;;  %v695_v5 = vld [vmem:[%s1894_s3 + $0x38] sm:$0xff]  ;;  %v742_v6 = vld [vmem:[%s1893_s4 + $0x30] sm:$0xff]  ;;  %v741_v8 = vld [vmem:[%s1893_s4 + $0x28] sm:$0xff] }
  0x15   :  { %868 = vmatpush.msra.mxu3 %v700_v53  ;;  %v694_v7 = vld [vmem:[%s1894_s3 + $0x30] sm:$0xff]  ;;  %v693_v9 = vld [vmem:[%s1894_s3 + $0x28] sm:$0xff]  ;;  %v1254_v18 = vld [vmem:[%s1892_s0 + $0x64] sm:$0xf] }
  0x16   :  { %416 = vmatpush.bf16.msra.mxu0 %v1276_v10  ;;  %756 = vmatpush.msra.mxu2 %v747_v54  ;;  %v740_v10 = vld [vmem:[%s1893_s4 + $0x20] sm:$0xff]  ;;  %v690_v16 = vld [vmem:[%s1894_s3 + $0x10] sm:$0xff]  ;;  %v1255_v17 = vld [vmem:[%s1892_s0 + $0x64] sm:$0xf0] }
  0x17   :  { %505 = vmatpush.bf16.msra.mxu1 %v1284_v11  ;;  %869 = vmatpush.msra.mxu3 %v699_v55  ;;  %v692_v11 = vld [vmem:[%s1894_s3 + $0x20] sm:$0xff]  ;;  %v1102_v19 = vld [vmem:[%s1892_s0 + $0x68] sm:$0xf0]  ;;  %v1108_v28 = vld [vmem:[%s1892_s0 + $0x70] sm:$0xf] }
  0x18   :  { %757 = vmatpush.msra.mxu2 %v746_v57  ;;  %v737_v22 = vld [vmem:[%s1893_s4 + $0x8] sm:$0xff]  ;;  %v736_v24 = vld [vmem:[%s1893_s4] sm:$0xff]  ;;  %v1257_v29 = vld [vmem:[%s1892_s0 + $0x74] sm:$0xf0] }
  0x19   :  { %870 = vmatpush.msra.mxu3 %v698_v58  ;;  %v689_v23 = vld [vmem:[%s1894_s3 + $0x8] sm:$0xff]  ;;  %v688_v25 = vld [vmem:[%s1894_s3] sm:$0xff]  ;;  %v1256_v30 = vld [vmem:[%s1892_s0 + $0x74] sm:$0xf] }
  0x1a   :  { %417 = vmatpush.bf16.msra.mxu0 %v1275_v12  ;;  %758 = vmatpush.msra.mxu2 %v745_v62  ;;  %v739_v12 = vld [vmem:[%s1893_s4 + $0x18] sm:$0xff]  ;;  %v706_v34 = vld [vmem:[%s1895_s2 + $0x10] sm:$0xff]  ;;  %v1116_v36 = vld [vmem:[%s1892_s0 + $0x80] sm:$0xf] }
  0x1b   :  { %506 = vmatpush.bf16.msra.mxu1 %v1283_v13  ;;  %871 = vmatpush.msra.mxu3 %v697_v63  ;;  %v691_v13 = vld [vmem:[%s1894_s3 + $0x18] sm:$0xff]  ;;  %v1259_v37 = vld [vmem:[%s1892_s0 + $0x84] sm:$0xf0]  ;;  %v1124_v50 = vld [vmem:[%s1892_s0 + $0x90] sm:$0xf] }
  0x1c   :  { %759 = vmatpush.msra.mxu2 %v744_v2  ;;  %v1110_v31 = vld [vmem:[%s1892_s0 + $0x78] sm:$0xf0]  ;;  %v1117_v40 = vor.u32 %v1259_v37, %v1116_v36  ;;  %v709_v49 = vld [vmem:[%s1895_s2 + $0x28] sm:$0xff]  ;;  %v1261_v51 = vld [vmem:[%s1892_s0 + $0x94] sm:$0xf0] }
  0x1d   :  { %872 = vmatpush.msra.mxu3 %v696_v3  ;;  %v707_v35 = vld [vmem:[%s1895_s2 + $0x18] sm:$0xff]  ;;  %v1260_v52 = vld [vmem:[%s1892_s0 + $0x94] sm:$0xf]  ;;  %v1125_v54 = vor.u32 %v1261_v51, %v1124_v50  ;;  %v1262_v2 = vld [vmem:[%s1892_s0 + $0xa4] sm:$0xf] }
  0x1e   :  { %418 = vmatpush.bf16.msra.mxu0 %v1274_v14  ;;  %760 = vmatpush.msra.mxu2 %v743_v4  ;;  %v1100_v14 = vld [vmem:[%s1892_s0 + $0x60] sm:$0xf]  ;;  %v1126_v53 = vld [vmem:[%s1892_s0 + $0x98] sm:$0xf0]  ;;  %v710_v59 = vld [vmem:[%s1895_s2 + $0x30] sm:$0xff] }
  0x1f   :  { %507 = vmatpush.bf16.msra.mxu1 %v1282_v15  ;;  %873 = vmatpush.msra.mxu3 %v695_v5  ;;  %v738_v15 = vld [vmem:[%s1893_s4 + $0x10] sm:$0xff]  ;;  %v1129_v55 = vor.u32 %v1260_v52, %v1126_v53  ;;  %v711_v63 = vld [vmem:[%s1895_s2 + $0x38] sm:$0xff]  ;;  %v1134_v3 = vld [vmem:[%s1892_s0 + $0xa8] sm:$0xf0] }
  0x20   :  { %761 = vmatpush.msra.mxu2 %v742_v6  ;;  %v1137_v5 = vor.u32 %v1262_v2, %v1134_v3  ;;  %v716_v37 = vld [vmem:[%s1895_s2 + $0x60] sm:$0xff]  ;;  %v718_v51 = vld [vmem:[%s1895_s2 + $0x70] sm:$0xff] }
  0x21   :  { %419 = vmatmul.bf16.vlgmr.msra.gmra.mxu0 %v1053_v20  ;;  %874 = vmatpush.msra.mxu3 %v694_v7  ;;  %v1101_v20 = vor.u32 %v1255_v17, %v1100_v14  ;;  %v1140_v14 = vld [vmem:[%s1892_s0 + $0xb0] sm:$0xf]  ;;  %v1142_v17 = vld [vmem:[%s1892_s0 + $0xb8] sm:$0xf0] }
  0x22   :  { %508 = vmatmul.bf16.vlgmr.msra.gmra.mxu1 %v1057_v21  ;;  %762 = vmatpush.msra.mxu2 %v741_v8  ;;  %v1105_v21 = vor.u32 %v1254_v18, %v1102_v19 }
  0x23   :  { %875 = vmatpush.msra.mxu3 %v693_v9  ;;  %v712_v9 = vld [vmem:[%s1895_s2 + $0x40] sm:$0xff] }
  0x24   :  { %763 = vmatpush.msra.mxu2 %v740_v10 }
  0x25   :  { %876 = vmatpush.msra.mxu3 %v692_v11 }
  0x26   :  { %764 = vmatpush.msra.mxu2 %v739_v12 }
  0x27   :  { %877 = vmatpush.msra.mxu3 %v691_v13  ;;  %v713_v13 = vld [vmem:[%s1895_s2 + $0x48] sm:$0xff] }
  0x28   :  { %765 = vmatpush.msra.mxu2 %v738_v15  ;;  %v1265_v15 = vld [vmem:[%s1892_s0 + $0xb4] sm:$0xf0] }
  0x29   :  { %878 = vmatpush.msra.mxu3 %v690_v16  ;;  %v1264_v16 = vld [vmem:[%s1892_s0 + $0xb4] sm:$0xf]  ;;  %v1141_v18 = vor.u32 %v1265_v15, %v1140_v14 }
  0x2a   :  { %766 = vmatpush.msra.mxu2 %v737_v22  ;;  %v1145_v19 = vor.u32 %v1264_v16, %v1142_v17  ;;  %v722_v17 = vld [vmem:[%s1895_s2 + $0x90] sm:$0xff] }
  0x2b   :  { %879 = vmatpush.msra.mxu3 %v689_v23  ;;  %v714_v23 = vld [vmem:[%s1895_s2 + $0x50] sm:$0xff] }
  0x2c   :  { %767 = vmatpush.msra.mxu2 %v736_v24 }
  0x2d   :  { %880 = vmatpush.msra.mxu3 %v688_v25 }
  0x31   :  { %424 = vmatmul.bf16.gmra.mxu0 %v1061_v26  ;;  %v704_v26 = vld [vmem:[%s1895_s2] sm:$0xff] }
  0x32   :  { %513 = vmatmul.bf16.gmra.mxu1 %v1065_v27  ;;  %768 = vmatmul.f32.vlgmr.msra.gmra.mxu2 %v704_v26  ;;  %v705_v27 = vld [vmem:[%s1895_s2 + $0x8] sm:$0xff] }
  0x3a   :  { %771 = vmatmul.f32.gmra.mxu2 %v705_v27  ;;  %v715_v27 = vld [vmem:[%s1895_s2 + $0x58] sm:$0xff] }
  0x41   :  { %429 = vmatmul.bf16.gmra.mxu0 %v1069_v32  ;;  %v1109_v32 = vor.u32 %v1257_v29, %v1108_v28  ;;  %v1148_v28 = vld [vmem:[%s1892_s0 + $0xc0] sm:$0xf]  ;;  %v1267_v29 = vld [vmem:[%s1892_s0 + $0xc4] sm:$0xf0] }
  0x42   :  { %518 = vmatmul.bf16.gmra.mxu1 %v1073_v33  ;;  %v1113_v33 = vor.u32 %v1256_v30, %v1110_v31  ;;  %774 = vmatmul.f32.gmra.mxu2 %v706_v34  ;;  %v1266_v30 = vld [vmem:[%s1892_s0 + $0xc4] sm:$0xf]  ;;  %v1150_v31 = vld [vmem:[%s1892_s0 + $0xc8] sm:$0xf0] }
  0x4a   :  { %777 = vmatmul.f32.gmra.mxu2 %v707_v35 }
  0x51   :  { %434 = vmatmul.bf16.gmra.mxu0 %v1077_v38  ;;  %v1258_v38 = vld [vmem:[%s1892_s0 + $0x84] sm:$0xf] }
  0x52   :  { %523 = vmatmul.bf16.gmra.mxu1 %v1081_v39  ;;  %v1118_v39 = vld [vmem:[%s1892_s0 + $0x88] sm:$0xf0] }
  0x53   :  { %v1121_v41 = vor.u32 %v1258_v38, %v1118_v39 }
  0x61   :  { %439 = vmatmul.bf16.gmra.mxu0 %v1085_v44 }
  0x62   :  { %528 = vmatmul.bf16.gmra.mxu1 %v1089_v45  ;;  %v708_v45 = vld [vmem:[%s1895_s2 + $0x20] sm:$0xff] }
  0x63   :  { %780 = vmatmul.f32.gmra.mxu2 %v708_v45  ;;  %v1158_v45 = vld [vmem:[%s1892_s0 + $0xd8] sm:$0xf0] }
  0x6b   :  { %783 = vmatmul.f32.gmra.mxu2 %v709_v49 }
  0x71   :  { %444 = vmatmul.bf16.gmra.mxu0 %v1093_v0  ;;  %v1132_v0 = vld [vmem:[%s1892_s0 + $0xa0] sm:$0xf] }
  0x72   :  { %533 = vmatmul.bf16.gmra.mxu1 %v1097_v1  ;;  %v1263_v1 = vld [vmem:[%s1892_s0 + $0xa4] sm:$0xf0] }
  0x73   :  { %786 = vmatmul.f32.gmra.mxu2 %v710_v59  ;;  %v1133_v4 = vor.u32 %v1263_v1, %v1132_v0  ;;  %v1166_v59 = vld [vmem:[%s1892_s0 + $0xe8] sm:$0xf0]  ;;  %v720_v1 = vld [vmem:[%s1895_s2 + $0x80] sm:$0xff] }
  0x7b   :  { %789 = vmatmul.f32.gmra.mxu2 %v711_v63 }
  0x81   :  { %449 = vmatmul.bf16.gmra.mxu0 %v1101_v20 }
  0x82   :  { %538 = vmatmul.bf16.gmra.mxu1 %v1105_v21 }
  0x83   :  { %792 = vmatmul.f32.gmra.mxu2 %v712_v9  ;;  %v1272_v9 = vld [vmem:[%s1892_s0 + $0xf4] sm:$0xf] }
  0x8b   :  { %795 = vmatmul.f32.gmra.mxu2 %v713_v13 }
  0x91   :  { %454 = vmatmul.bf16.gmra.mxu0 %v1109_v32  ;;  %v1149_v32 = vor.u32 %v1267_v29, %v1148_v28  ;;  %v1728_v28 = vld [vmem:[%s1896_s5] ss:$0 sm:$0xff] }
  0x92   :  { %543 = vmatmul.bf16.gmra.mxu1 %v1113_v33  ;;  %v1153_v33 = vor.u32 %v1266_v30, %v1150_v31 }
  0x93   :  { %798 = vmatmul.f32.gmra.mxu2 %v714_v23 }
  0x9b   :  { %801 = vmatmul.f32.gmra.mxu2 %v715_v27  ;;  %v724_v27 = vld [vmem:[%s1895_s2 + $0xa0] sm:$0xff] }
  0x9e   :  { %v420_v42 = vpop.f32.mrf.mxu0 }
  0x9f   :  { %v509_v43 = vpop.f32.mrf.mxu1 }
  0xa0   :  { %v510_v44 = vadd.f32 %v509_v43, %v420_v42  ;;  %v1156_v42 = vld [vmem:[%s1892_s0 + $0xd0] sm:$0xf]  ;;  %v1269_v43 = vld [vmem:[%s1892_s0 + $0xd4] sm:$0xf0] }
  0xa1   :  { %459 = vmatmul.bf16.gmra.mxu0 %v1117_v40 }
  0xa2   :  { %548 = vmatmul.bf16.gmra.mxu1 %v1121_v41  ;;  %881 = vmatmul.f32.vlgmr.msra.gmra.mxu3 %v510_v44  ;;  %v717_v41 = vld [vmem:[%s1895_s2 + $0x68] sm:$0xff]  ;;  %v1268_v44 = vld [vmem:[%s1892_s0 + $0xd4] sm:$0xf] }
  0xa3   :  { %804 = vmatmul.f32.gmra.mxu2 %v716_v37 }
  0xa6   :  { %v422_v46 = vpop.f32.mrf.mxu0 }
  0xa7   :  { %v511_v47 = vpop.f32.mrf.mxu1 }
  0xa8   :  { %v512_v48 = vadd.f32 %v511_v47, %v422_v46  ;;  %v1157_v46 = vor.u32 %v1269_v43, %v1156_v42  ;;  %v1161_v47 = vor.u32 %v1268_v44, %v1158_v45  ;;  %v726_v44 = vld [vmem:[%s1895_s2 + $0xb0] sm:$0xff] }
  0xaa   :  { %884 = vmatmul.f32.gmra.mxu3 %v512_v48 }
  0xab   :  { %807 = vmatmul.f32.gmra.mxu2 %v717_v41 }
  0xae   :  { %v425_v56 = vpop.f32.mrf.mxu0 }
  0xaf   :  { %v514_v57 = vpop.f32.mrf.mxu1 }
  0xb0   :  { %v515_v58 = vadd.f32 %v514_v57, %v425_v56  ;;  %v1164_v56 = vld [vmem:[%s1892_s0 + $0xe0] sm:$0xf]  ;;  %v1271_v57 = vld [vmem:[%s1892_s0 + $0xe4] sm:$0xf0] }
  0xb1   :  { %464 = vmatmul.bf16.gmra.mxu0 %v1125_v54 }
  0xb2   :  { %553 = vmatmul.bf16.gmra.mxu1 %v1129_v55  ;;  %887 = vmatmul.f32.gmra.mxu3 %v515_v58  ;;  %v719_v55 = vld [vmem:[%s1895_s2 + $0x78] sm:$0xff]  ;;  %v1270_v58 = vld [vmem:[%s1892_s0 + $0xe4] sm:$0xf] }
  0xb3   :  { %810 = vmatmul.f32.gmra.mxu2 %v718_v51 }
  0xb5   :  { %v769_v2 = vpop.f32.mrf.mxu2 }
  0xb6   :  { %v427_v60 = vpop.f32.mrf.mxu0 }
  0xb7   :  { %v516_v61 = vpop.f32.mrf.mxu1 }
  0xb8   :  { %v517_v62 = vadd.f32 %v516_v61, %v427_v60  ;;  %v1165_v60 = vor.u32 %v1271_v57, %v1164_v56  ;;  %v1169_v61 = vor.u32 %v1270_v58, %v1166_v59 }
  0xba   :  { %890 = vmatmul.f32.gmra.mxu3 %v517_v62 }
  0xbb   :  { %813 = vmatmul.f32.gmra.mxu2 %v719_v55 }
  0xbd   :  { %v772_v13 = vpop.f32.mrf.mxu2 }
  0xbe   :  { %v430_v6 = vpop.f32.mrf.mxu0 }
  0xbf   :  { %v519_v7 = vpop.f32.mrf.mxu1 }
  0xc0   :  { %v520_v8 = vadd.f32 %v519_v7, %v430_v6  ;;  %v1172_v6 = vld [vmem:[%s1892_s0 + $0xf0] sm:$0xf]  ;;  %v721_v7 = vld [vmem:[%s1895_s2 + $0x88] sm:$0xff] }
  0xc1   :  { %469 = vmatmul.bf16.gmra.mxu0 %v1133_v4 }
  0xc2   :  { %558 = vmatmul.bf16.gmra.mxu1 %v1137_v5  ;;  %893 = vmatmul.f32.gmra.mxu3 %v520_v8  ;;  %v1273_v8 = vld [vmem:[%s1892_s0 + $0xf4] sm:$0xf0] }
  0xc3   :  { %816 = vmatmul.f32.gmra.mxu2 %v720_v1 }
  0xc6   :  { %v432_v10 = vpop.f32.mrf.mxu0 }
  0xc7   :  { %v521_v11 = vpop.f32.mrf.mxu1 }
  0xc8   :  { %v522_v12 = vadd.f32 %v521_v11, %v432_v10  ;;  %v1174_v10 = vld [vmem:[%s1892_s0 + $0xf8] sm:$0xf0]  ;;  %v1173_v11 = vor.u32 %v1273_v8, %v1172_v6 }
  0xca   :  { %896 = vmatmul.f32.gmra.mxu3 %v522_v12  ;;  %v1177_v12 = vor.u32 %v1272_v9, %v1174_v10 }
  0xcb   :  { %819 = vmatmul.f32.gmra.mxu2 %v721_v7 }
  0xce   :  { %v435_v20 = vpop.f32.mrf.mxu0 }
  0xcf   :  { %v524_v21 = vpop.f32.mrf.mxu1 }
  0xd0   :  { %v525_v22 = vadd.f32 %v524_v21, %v435_v20 }
  0xd1   :  { %474 = vmatmul.bf16.gmra.mxu0 %v1141_v18  ;;  %v775_v18 = vpop.f32.mrf.mxu2 }
  0xd2   :  { %563 = vmatmul.bf16.gmra.mxu1 %v1145_v19  ;;  %899 = vmatmul.f32.gmra.mxu3 %v525_v22  ;;  %v723_v22 = vld [vmem:[%s1895_s2 + $0x98] sm:$0xff] }
  0xd3   :  { %822 = vmatmul.f32.gmra.mxu2 %v722_v17 }
  0xd6   :  { %v437_v24 = vpop.f32.mrf.mxu0 }
  0xd7   :  { %v526_v25 = vpop.f32.mrf.mxu1 }
  0xd8   :  { %v527_v26 = vadd.f32 %v526_v25, %v437_v24 }
  0xd9   :  { %v778_v23 = vpop.f32.mrf.mxu2 }
  0xda   :  { %902 = vmatmul.f32.gmra.mxu3 %v527_v26 }
  0xdb   :  { %825 = vmatmul.f32.gmra.mxu2 %v723_v22 }
  0xde   :  { %v440_v34 = vpop.f32.mrf.mxu0 }
  0xdf   :  { %v529_v35 = vpop.f32.mrf.mxu1 }
  0xe0   :  { %v530_v36 = vadd.f32 %v529_v35, %v440_v34 }
  0xe1   :  { %479 = vmatmul.bf16.gmra.mxu0 %v1149_v32 }
  0xe2   :  { %568 = vmatmul.bf16.gmra.mxu1 %v1153_v33  ;;  %905 = vmatmul.f32.gmra.mxu3 %v530_v36  ;;  %v725_v36 = vld [vmem:[%s1895_s2 + $0xa8] sm:$0xff] }
  0xe3   :  { %828 = vmatmul.f32.gmra.mxu2 %v724_v27 }
  0xe6   :  { %v442_v38 = vpop.f32.mrf.mxu0  ;;  %v781_v30 = vpop.f32.mrf.mxu2 }
  0xe7   :  { %v531_v39 = vpop.f32.mrf.mxu1 }
  0xe8   :  { %v532_v40 = vadd.f32 %v531_v39, %v442_v38 }
  0xea   :  { %908 = vmatmul.f32.gmra.mxu3 %v532_v40 }
  0xeb   :  { %831 = vmatmul.f32.gmra.mxu2 %v725_v36 }
  0xee   :  { %v445_v48 = vpop.f32.mrf.mxu0  ;;  %v784_v38 = vpop.f32.mrf.mxu2 }
  0xef   :  { %v534_v49 = vpop.f32.mrf.mxu1 }
  0xf0   :  { %v535_v50 = vadd.f32 %v534_v49, %v445_v48 }
  0xf1   :  { %484 = vmatmul.bf16.gmra.mxu0 %v1157_v46 }
  0xf2   :  { %573 = vmatmul.bf16.gmra.mxu1 %v1161_v47  ;;  %911 = vmatmul.f32.gmra.mxu3 %v535_v50 }
  0xf3   :  { %834 = vmatmul.f32.gmra.mxu2 %v726_v44 }
  0xf6   :  { %v447_v52 = vpop.f32.mrf.mxu0  ;;  %v787_v46 = vpop.f32.mrf.mxu2 }
  0xf7   :  { %v536_v53 = vpop.f32.mrf.mxu1 }
  0xf8   :  { %v537_v54 = vadd.f32 %v536_v53, %v447_v52  ;;  %v727_v52 = vld [vmem:[%s1895_s2 + $0xb8] sm:$0xff] }
  0xfa   :  { %914 = vmatmul.f32.gmra.mxu3 %v537_v54 }
  0xfb   :  { %837 = vmatmul.f32.gmra.mxu2 %v727_v52 }
  0xfe   :  { %v450_v62 = vpop.f32.mrf.mxu0  ;;  %v790_v54 = vpop.f32.mrf.mxu2 }
  0xff   :  { %v539_v63 = vpop.f32.mrf.mxu1 }
 0x100   :  { %v540_v0 = vadd.f32 %v539_v63, %v450_v62 }
 0x101   :  { %489 = vmatmul.bf16.gmra.mxu0 %v1165_v60  ;;  %v728_v60 = vld [vmem:[%s1895_s2 + $0xc0] sm:$0xff] }
 0x102   :  { %578 = vmatmul.bf16.gmra.mxu1 %v1169_v61  ;;  %917 = vmatmul.f32.gmra.mxu3 %v540_v0 }
 0x103   :  { %840 = vmatmul.f32.gmra.mxu2 %v728_v60 }
 0x106   :  { %v452_v3 = vpop.f32.mrf.mxu0  ;;  %v793_v62 = vpop.f32.mrf.mxu2 }
 0x107   :  { %v541_v4 = vpop.f32.mrf.mxu1 }
 0x108   :  { %v542_v5 = vadd.f32 %v541_v4, %v452_v3  ;;  %v729_v4 = vld [vmem:[%s1895_s2 + $0xc8] sm:$0xff] }
 0x10a   :  { %920 = vmatmul.f32.gmra.mxu3 %v542_v5 }
 0x10b   :  { %843 = vmatmul.f32.gmra.mxu2 %v729_v4 }
 0x10e   :  { %v455_v14 = vpop.f32.mrf.mxu0  ;;  %v796_v6 = vpop.f32.mrf.mxu2 }
 0x10f   :  { %v544_v15 = vpop.f32.mrf.mxu1 }
 0x110   :  { %v545_v16 = vadd.f32 %v544_v15, %v455_v14 }
 0x111   :  { %494 = vmatmul.bf16.gmra.mxu0 %v1173_v11 }
 0x112   :  { %583 = vmatmul.bf16.gmra.mxu1 %v1177_v12  ;;  %923 = vmatmul.f32.gmra.mxu3 %v545_v16  ;;  %v730_v12 = vld [vmem:[%s1895_s2 + $0xd0] sm:$0xff] }
 0x113   :  { %846 = vmatmul.f32.gmra.mxu2 %v730_v12 }
 0x116   :  { %v457_v19 = vpop.f32.mrf.mxu0  ;;  %v799_v14 = vpop.f32.mrf.mxu2 }
 0x117   :  { %v546_v20 = vpop.f32.mrf.mxu1 }
 0x118   :  { %v547_v21 = vadd.f32 %v546_v20, %v457_v19  ;;  %v731_v20 = vld [vmem:[%s1895_s2 + $0xd8] sm:$0xff] }
 0x11a   :  { %926 = vmatmul.f32.gmra.mxu3 %v547_v21 }
 0x11b   :  { %849 = vmatmul.f32.gmra.mxu2 %v731_v20 }
 0x11e   :  { %v460_v24 = vpop.f32.mrf.mxu0  ;;  %v802_v22 = vpop.f32.mrf.mxu2 }
 0x11f   :  { %v549_v25 = vpop.f32.mrf.mxu1 }
 0x120   :  { %v550_v26 = vadd.f32 %v549_v25, %v460_v24 }
 0x122   :  { %929 = vmatmul.f32.gmra.mxu3 %v550_v26 }
 0x125   :  { %v882_v29 = vpop.f32.mrf.mxu3 }
 0x126   :  { %v883_v31 = vadd.f32 %v882_v29, %v769_v2  ;;  %v462_v32 = vpop.f32.mrf.mxu0  ;;  %v732_v29 = vld [vmem:[%s1895_s2 + $0xe0] sm:$0xff] }
 0x127   :  { %v551_v33 = vpop.f32.mrf.mxu1  ;;  %852 = vmatmul.f32.gmra.mxu2 %v732_v29 }
 0x128   :  { %v552_v34 = vadd.f32 %v551_v33, %v462_v32  ;;  %v982_v35 = vadd.f32 %v1728_v28, %v883_v31  ;;  %v805_v31 = vpop.f32.mrf.mxu2 }
 0x12a   :  { %1014 = vst [vmem:[%s1897_s6] sm:$0xff] %v982_v35  ;;  %932 = vmatmul.f32.gmra.mxu3 %v552_v34 }
 0x12d   :  { %v885_v37 = vpop.f32.mrf.mxu3 }
 0x12e   :  { %v886_v39 = vadd.f32 %v885_v37, %v772_v13  ;;  %v465_v40 = vpop.f32.mrf.mxu0  ;;  %v733_v37 = vld [vmem:[%s1895_s2 + $0xe8] sm:$0xff] }
 0x12f   :  { %v554_v41 = vpop.f32.mrf.mxu1  ;;  %855 = vmatmul.f32.gmra.mxu2 %v733_v37 }
 0x130   :  { %v555_v42 = vadd.f32 %v554_v41, %v465_v40  ;;  %v983_v43 = vadd.f32 %v1728_v28, %v886_v39  ;;  %v808_v39 = vpop.f32.mrf.mxu2 }
 0x132   :  { %1015 = vst [vmem:[%s1897_s6 + $0x8] sm:$0xff] %v983_v43  ;;  %935 = vmatmul.f32.gmra.mxu3 %v555_v42 }
 0x135   :  { %v888_v45 = vpop.f32.mrf.mxu3 }
 0x136   :  { %v889_v47 = vadd.f32 %v888_v45, %v775_v18  ;;  %v467_v48 = vpop.f32.mrf.mxu0  ;;  %v734_v45 = vld [vmem:[%s1895_s2 + $0xf0] sm:$0xff] }
 0x137   :  { %v556_v49 = vpop.f32.mrf.mxu1  ;;  %858 = vmatmul.f32.gmra.mxu2 %v734_v45 }
 0x138   :  { %v557_v50 = vadd.f32 %v556_v49, %v467_v48  ;;  %v984_v51 = vadd.f32 %v1728_v28, %v889_v47  ;;  %v811_v47 = vpop.f32.mrf.mxu2 }
 0x13a   :  { %1016 = vst [vmem:[%s1897_s6 + $0x10] sm:$0xff] %v984_v51  ;;  %938 = vmatmul.f32.gmra.mxu3 %v557_v50 }
 0x13d   :  { %v891_v53 = vpop.f32.mrf.mxu3 }
 0x13e   :  { %v892_v55 = vadd.f32 %v891_v53, %v778_v23  ;;  %v470_v56 = vpop.f32.mrf.mxu0  ;;  %v735_v53 = vld [vmem:[%s1895_s2 + $0xf8] sm:$0xff] }
 0x13f   :  { %v559_v57 = vpop.f32.mrf.mxu1  ;;  %861 = vmatmul.f32.gmra.mxu2 %v735_v53 }
 0x140   :  { %v560_v58 = vadd.f32 %v559_v57, %v470_v56  ;;  %v985_v59 = vadd.f32 %v1728_v28, %v892_v55  ;;  %v814_v55 = vpop.f32.mrf.mxu2 }
 0x142   :  { %1017 = vst [vmem:[%s1897_s6 + $0x18] sm:$0xff] %v985_v59  ;;  %941 = vmatmul.f32.gmra.mxu3 %v560_v58 }
 0x145   :  { %v894_v61 = vpop.f32.mrf.mxu3 }
 0x146   :  { %v895_v63 = vadd.f32 %v894_v61, %v781_v30  ;;  %v472_v0 = vpop.f32.mrf.mxu0 }
 0x147   :  { %v561_v1 = vpop.f32.mrf.mxu1 }
 0x148   :  { %v562_v2 = vadd.f32 %v561_v1, %v472_v0  ;;  %v986_v3 = vadd.f32 %v1728_v28, %v895_v63 }
 0x14a   :  { %1018 = vst [vmem:[%s1897_s6 + $0x20] sm:$0xff] %v986_v3  ;;  %944 = vmatmul.f32.gmra.mxu3 %v562_v2 }
 0x14d   :  { %v897_v5 = vpop.f32.mrf.mxu3 }
 0x14e   :  { %v898_v7 = vadd.f32 %v897_v5, %v784_v38  ;;  %v475_v8 = vpop.f32.mrf.mxu0 }
 0x14f   :  { %v564_v9 = vpop.f32.mrf.mxu1 }
 0x150   :  { %v565_v10 = vadd.f32 %v564_v9, %v475_v8  ;;  %v987_v11 = vadd.f32 %v1728_v28, %v898_v7 }
 0x152   :  { %1019 = vst [vmem:[%s1897_s6 + $0x28] sm:$0xff] %v987_v11  ;;  %947 = vmatmul.f32.gmra.mxu3 %v565_v10 }
 0x155   :  { %v900_v13 = vpop.f32.mrf.mxu3 }
 0x156   :  { %v901_v15 = vadd.f32 %v900_v13, %v787_v46  ;;  %v477_v16 = vpop.f32.mrf.mxu0 }
 0x157   :  { %v566_v17 = vpop.f32.mrf.mxu1 }
 0x158   :  { %v567_v18 = vadd.f32 %v566_v17, %v477_v16  ;;  %v988_v19 = vadd.f32 %v1728_v28, %v901_v15 }
 0x15a   :  { %1020 = vst [vmem:[%s1897_s6 + $0x30] sm:$0xff] %v988_v19  ;;  %950 = vmatmul.f32.gmra.mxu3 %v567_v18 }
 0x15d   :  { %v903_v21 = vpop.f32.mrf.mxu3 }
 0x15e   :  { %v904_v23 = vadd.f32 %v903_v21, %v790_v54  ;;  %v480_v24 = vpop.f32.mrf.mxu0 }
 0x15f   :  { %v569_v25 = vpop.f32.mrf.mxu1 }
 0x160   :  { %v570_v26 = vadd.f32 %v569_v25, %v480_v24  ;;  %v989_v27 = vadd.f32 %v1728_v28, %v904_v23 }
 0x162   :  { %1021 = vst [vmem:[%s1897_s6 + $0x38] sm:$0xff] %v989_v27  ;;  %953 = vmatmul.f32.gmra.mxu3 %v570_v26 }
 0x165   :  { %v906_v30 = vpop.f32.mrf.mxu3 }
 0x166   :  { %v907_v32 = vadd.f32 %v906_v30, %v793_v62  ;;  %v482_v33 = vpop.f32.mrf.mxu0  ;;  %v817_v62 = vpop.f32.mrf.mxu2 }
 0x167   :  { %v571_v34 = vpop.f32.mrf.mxu1 }
 0x168   :  { %v572_v35 = vadd.f32 %v571_v34, %v482_v33  ;;  %v990_v36 = vadd.f32 %v1728_v28, %v907_v32 }
 0x16a   :  { %1022 = vst [vmem:[%s1897_s6 + $0x40] sm:$0xff] %v990_v36  ;;  %956 = vmatmul.f32.gmra.mxu3 %v572_v35 }
 0x16d   :  { %v909_v38 = vpop.f32.mrf.mxu3 }
 0x16e   :  { %v910_v40 = vadd.f32 %v909_v38, %v796_v6  ;;  %v485_v41 = vpop.f32.mrf.mxu0  ;;  %v820_v9 = vpop.f32.mrf.mxu2 }
 0x16f   :  { %v574_v42 = vpop.f32.mrf.mxu1 }
 0x170   :  { %v575_v43 = vadd.f32 %v574_v42, %v485_v41  ;;  %v991_v44 = vadd.f32 %v1728_v28, %v910_v40 }
 0x172   :  { %1023 = vst [vmem:[%s1897_s6 + $0x48] sm:$0xff] %v991_v44  ;;  %959 = vmatmul.f32.gmra.mxu3 %v575_v43 }
 0x175   :  { %v912_v46 = vpop.f32.mrf.mxu3 }
 0x176   :  { %v913_v48 = vadd.f32 %v912_v46, %v799_v14  ;;  %v487_v49 = vpop.f32.mrf.mxu0  ;;  %v823_v17 = vpop.f32.mrf.mxu2 }
 0x177   :  { %v576_v50 = vpop.f32.mrf.mxu1 }
 0x178   :  { %v577_v51 = vadd.f32 %v576_v50, %v487_v49  ;;  %v992_v52 = vadd.f32 %v1728_v28, %v913_v48 }
 0x17a   :  { %1024 = vst [vmem:[%s1897_s6 + $0x50] sm:$0xff] %v992_v52  ;;  %962 = vmatmul.f32.gmra.mxu3 %v577_v51 }
 0x17d   :  { %v915_v54 = vpop.f32.mrf.mxu3 }
 0x17e   :  { %v916_v56 = vadd.f32 %v915_v54, %v802_v22  ;;  %v490_v57 = vpop.f32.mrf.mxu0  ;;  %v826_v21 = vpop.f32.mrf.mxu2 }
 0x17f   :  { %v579_v58 = vpop.f32.mrf.mxu1 }
 0x180   :  { %v580_v59 = vadd.f32 %v579_v58, %v490_v57  ;;  %v993_v60 = vadd.f32 %v1728_v28, %v916_v56 }
 0x182   :  { %1025 = vst [vmem:[%s1897_s6 + $0x58] sm:$0xff] %v993_v60  ;;  %965 = vmatmul.f32.gmra.mxu3 %v580_v59 }
 0x185   :  { %v918_v61 = vpop.f32.mrf.mxu3 }
 0x186   :  { %v919_v63 = vadd.f32 %v918_v61, %v805_v31  ;;  %v492_v0 = vpop.f32.mrf.mxu0  ;;  %v829_v26 = vpop.f32.mrf.mxu2 }
 0x187   :  { %v581_v1 = vpop.f32.mrf.mxu1 }
 0x188   :  { %v582_v2 = vadd.f32 %v581_v1, %v492_v0  ;;  %v994_v3 = vadd.f32 %v1728_v28, %v919_v63 }
 0x18a   :  { %1026 = vst [vmem:[%s1897_s6 + $0x60] sm:$0xff] %v994_v3  ;;  %968 = vmatmul.f32.gmra.mxu3 %v582_v2 }
 0x18d   :  { %v921_v4 = vpop.f32.mrf.mxu3 }
 0x18e   :  { %v922_v5 = vadd.f32 %v921_v4, %v808_v39  ;;  %v495_v6 = vpop.f32.mrf.mxu0  ;;  %v832_v32 = vpop.f32.mrf.mxu2 }
 0x18f   :  { %v584_v7 = vpop.f32.mrf.mxu1 }
 0x190   :  { %v585_v8 = vadd.f32 %v584_v7, %v495_v6  ;;  %v995_v10 = vadd.f32 %v1728_v28, %v922_v5 }
 0x192   :  { %1027 = vst [vmem:[%s1897_s6 + $0x68] sm:$0xff] %v995_v10  ;;  %971 = vmatmul.f32.gmra.mxu3 %v585_v8 }
 0x195   :  { %v924_v11 = vpop.f32.mrf.mxu3 }
 0x196   :  { %v925_v12 = vadd.f32 %v924_v11, %v811_v47  ;;  %v497_v13 = vpop.f32.mrf.mxu0  ;;  %v835_v37 = vpop.f32.mrf.mxu2 }
 0x197   :  { %v586_v14 = vpop.f32.mrf.mxu1 }
 0x198   :  { %v587_v15 = vadd.f32 %v586_v14, %v497_v13  ;;  %v996_v16 = vadd.f32 %v1728_v28, %v925_v12 }
 0x19a   :  { %1028 = vst [vmem:[%s1897_s6 + $0x70] sm:$0xff] %v996_v16  ;;  %974 = vmatmul.f32.gmra.mxu3 %v587_v15 }
 0x19d   :  { %v927_v18 = vpop.f32.mrf.mxu3 }
 0x19e   :  { %v928_v19 = vadd.f32 %v927_v18, %v814_v55  ;;  %v838_v41 = vpop.f32.mrf.mxu2 }
 0x1a0   :  { %v997_v20 = vadd.f32 %v1728_v28, %v928_v19 }
 0x1a2   :  { %1029 = vst [vmem:[%s1897_s6 + $0x78] sm:$0xff] %v997_v20 }
 0x1a5   :  { %v930_v22 = vpop.f32.mrf.mxu3 }
 0x1a6   :  { %v931_v23 = vadd.f32 %v930_v22, %v817_v62  ;;  %v841_v46 = vpop.f32.mrf.mxu2 }
 0x1a8   :  { %v998_v24 = vadd.f32 %v1728_v28, %v931_v23 }
 0x1aa   :  { %1030 = vst [vmem:[%s1897_s6 + $0x80] sm:$0xff] %v998_v24 }
 0x1ad   :  { %v933_v25 = vpop.f32.mrf.mxu3 }
 0x1ae   :  { %v934_v27 = vadd.f32 %v933_v25, %v820_v9  ;;  %v844_v51 = vpop.f32.mrf.mxu2 }
 0x1b0   :  { %v999_v29 = vadd.f32 %v1728_v28, %v934_v27 }
 0x1b2   :  { %1031 = vst [vmem:[%s1897_s6 + $0x88] sm:$0xff] %v999_v29 }
 0x1b5   :  { %v936_v30 = vpop.f32.mrf.mxu3 }
 0x1b6   :  { %v937_v31 = vadd.f32 %v936_v30, %v823_v17  ;;  %v847_v56 = vpop.f32.mrf.mxu2 }
 0x1b8   :  { %v1000_v33 = vadd.f32 %v1728_v28, %v937_v31 }
 0x1ba   :  { %1032 = vst [vmem:[%s1897_s6 + $0x90] sm:$0xff] %v1000_v33 }
 0x1bd   :  { %v939_v34 = vpop.f32.mrf.mxu3 }
 0x1be   :  { %v940_v35 = vadd.f32 %v939_v34, %v826_v21  ;;  %v850_v60 = vpop.f32.mrf.mxu2 }
 0x1c0   :  { %v1001_v36 = vadd.f32 %v1728_v28, %v940_v35 }
 0x1c2   :  { %1033 = vst [vmem:[%s1897_s6 + $0x98] sm:$0xff] %v1001_v36 }
 0x1c5   :  { %v942_v38 = vpop.f32.mrf.mxu3 }
 0x1c6   :  { %v943_v39 = vadd.f32 %v942_v38, %v829_v26  ;;  %v853_v1 = vpop.f32.mrf.mxu2 }
 0x1c8   :  { %v1002_v40 = vadd.f32 %v1728_v28, %v943_v39 }
 0x1ca   :  { %1034 = vst [vmem:[%s1897_s6 + $0xa0] sm:$0xff] %v1002_v40 }
 0x1cd   :  { %v945_v42 = vpop.f32.mrf.mxu3 }
 0x1ce   :  { %v946_v43 = vadd.f32 %v945_v42, %v832_v32  ;;  %v856_v6 = vpop.f32.mrf.mxu2 }
 0x1d0   :  { %v1003_v44 = vadd.f32 %v1728_v28, %v946_v43 }
 0x1d2   :  { %1035 = vst [vmem:[%s1897_s6 + $0xa8] sm:$0xff] %v1003_v44 }
 0x1d5   :  { %v948_v45 = vpop.f32.mrf.mxu3 }
 0x1d6   :  { %v949_v47 = vadd.f32 %v948_v45, %v835_v37  ;;  %v859_v11 = vpop.f32.mrf.mxu2 }
 0x1d8   :  { %v1004_v48 = vadd.f32 %v1728_v28, %v949_v47 }
 0x1da   :  { %1036 = vst [vmem:[%s1897_s6 + $0xb0] sm:$0xff] %v1004_v48 }
 0x1dd   :  { %v951_v49 = vpop.f32.mrf.mxu3 }
 0x1de   :  { %v952_v50 = vadd.f32 %v951_v49, %v838_v41  ;;  %v862_v15 = vpop.f32.mrf.mxu2 }
 0x1e0   :  { %v1005_v52 = vadd.f32 %v1728_v28, %v952_v50 }
 0x1e2   :  { %1037 = vst [vmem:[%s1897_s6 + $0xb8] sm:$0xff] %v1005_v52 }
 0x1e5   :  { %v954_v53 = vpop.f32.mrf.mxu3 }
 0x1e6   :  { %v955_v54 = vadd.f32 %v954_v53, %v841_v46 }
 0x1e8   :  { %v1006_v55 = vadd.f32 %v1728_v28, %v955_v54 }
 0x1ea   :  { %1038 = vst [vmem:[%s1897_s6 + $0xc0] sm:$0xff] %v1006_v55 }
 0x1ed   :  { %v957_v57 = vpop.f32.mrf.mxu3 }
 0x1ee   :  { %v958_v58 = vadd.f32 %v957_v57, %v844_v51 }
 0x1f0   :  { %v1007_v59 = vadd.f32 %v1728_v28, %v958_v58 }
 0x1f2   :  { %1039 = vst [vmem:[%s1897_s6 + $0xc8] sm:$0xff] %v1007_v59 }
 0x1f5   :  { %v960_v61 = vpop.f32.mrf.mxu3 }
 0x1f6   :  { %v961_v62 = vadd.f32 %v960_v61, %v847_v56 }
 0x1f8   :  { %v1008_v63 = vadd.f32 %v1728_v28, %v961_v62 }
 0x1fa   :  { %1040 = vst [vmem:[%s1897_s6 + $0xd0] sm:$0xff] %v1008_v63 }
 0x1fd   :  { %v963_v0 = vpop.f32.mrf.mxu3 }
 0x1fe   :  { %v964_v2 = vadd.f32 %v963_v0, %v850_v60 }
 0x200   :  { %v1009_v3 = vadd.f32 %v1728_v28, %v964_v2 }
 0x202   :  { %1041 = vst [vmem:[%s1897_s6 + $0xd8] sm:$0xff] %v1009_v3 }
 0x205   :  { %v966_v4 = vpop.f32.mrf.mxu3 }
 0x206   :  { %v967_v5 = vadd.f32 %v966_v4, %v853_v1 }
 0x208   :  { %v1010_v7 = vadd.f32 %v1728_v28, %v967_v5 }
 0x20a   :  { %1042 = vst [vmem:[%s1897_s6 + $0xe0] sm:$0xff] %v1010_v7 }
 0x20d   :  { %v969_v8 = vpop.f32.mrf.mxu3 }
 0x20e   :  { %v970_v9 = vadd.f32 %v969_v8, %v856_v6 }
 0x210   :  { %v1011_v10 = vadd.f32 %v1728_v28, %v970_v9 }
 0x212   :  { %1043 = vst [vmem:[%s1897_s6 + $0xe8] sm:$0xff] %v1011_v10 }
 0x215   :  { %v972_v12 = vpop.f32.mrf.mxu3 }
 0x216   :  { %v973_v13 = vadd.f32 %v972_v12, %v859_v11 }
 0x218   :  { %v1012_v14 = vadd.f32 %v1728_v28, %v973_v13 }
 0x21a   :  { %1044 = vst [vmem:[%s1897_s6 + $0xf0] sm:$0xff] %v1012_v14 }
 0x21d   :  { %v975_v16 = vpop.f32.mrf.mxu3 }
 0x21e   :  { %v976_v17 = vadd.f32 %v975_v16, %v862_v15 }
 0x220   :  { %v1013_v18 = vadd.f32 %v1728_v28, %v976_v17 }
 0x222   :  { %1045 = vst [vmem:[%s1897_s6 + $0xf8] sm:$0xff] %v1013_v18 }

// kernel: forward.3
= control target key start
LH: loop header
LB: loop body
LE: loop exit
PB: predicated region body
PF: predicated region fallthrough
CT: control target
= control target key end

     0   :  { %v8064_v0 = vmov 0   ;;  %vm422_vm0 = vcmask 392192   ;;  %s15072_s2 = inlined_call_operand.vmem [shape: f32[128,1], index: 2, kind: input, shape index: {}]   ;;  %s15073_s0 = inlined_call_operand.vmem [shape: bf16[8,16,128], index: 0, kind: input, shape index: {}]   ;;  %s15074_s1 = inlined_call_operand.vmem [shape: bf16[128,48], index: 1, kind: input, shape index: {}]   ;;  %s15075_s4 = inlined_call_operand.vmem [shape: f32[1,128,1], index: 4, kind: input, shape index: {}]   ;;  %s15076_s7 = inlined_call_operand.vmem [shape: f32[32,1], index: 7, kind: input, shape index: {}]   ;;  %s15077_s8 = inlined_call_operand.vmem [shape: f32[32,1], index: 8, kind: input, shape index: {}]   ;;  %s15078_s9 = inlined_call_operand.vmem [shape: f32[32,1], index: 9, kind: input, shape index: {}]   ;;  %s15079_s3 = inlined_call_operand.vmem [shape: bf16[1,128,64], index: 3, kind: input, shape index: {}]   ;;  %s15080_s5 = inlined_call_operand.vmem [shape: f32[32,128], index: 5, kind: input, shape index: {}]   ;;  %s15081_s6 = inlined_call_operand.vmem [shape: f32[32,128], index: 6, kind: input, shape index: {}]   ;;  %s15082_s10 = inlined_call_operand.<no memory space> [shape: f32[1,1], index: 10, kind: input, shape index: {}]   ;;  %s15083_s11 = inlined_call_operand.vmem [shape: f32[1,128], index: 11, kind: output, shape index: {}]  }
   0x1   :  { %6933 = vset.pattern.permute.xlu0 %v8064_v0  ;;  %354 = vst [vmem:[#allocation2 + $0x8] sm:$0xf] %v8064_v0  ;;  %v58_v1 = vld [vmem:[%s15072_s2 + $0x10] sm:$0xff]  ;;  %6934 = vset.pattern.permute.xlu1 %v8064_v0  ;;  %v350_v3 = vld [vmem:[%s15073_s0] sm:$0xff]   ;;  %v59_v4 = vld [vmem:[%s15072_s2 + $0x18] sm:$0xff] }
   0x2   :  { %v62_v2 = vld [vmem:[%s15072_s2 + $0x30] sm:$0xff]  ;;  %355 = vst [vmem:[#allocation2 + $0xc] sm:$0xf] %v8064_v0  ;;  %84 = vperm.xlu0 %6933, %v58_v1   ;;  %6935 = vset.pattern.permute.xlu2 %v8064_v0  ;;  %v63_v5 = vld [vmem:[%s15072_s2 + $0x38] sm:$0xff]  ;;  %v56_v6 = vld [vmem:[%s15072_s2] sm:$0xff] }
   0x3   :  { %104 = vperm.xlu1 %6934, %v62_v2   ;;  %356 = vst [vmem:[#allocation2 + $0x10] sm:$0xf] %v8064_v0  ;;  %74 = vperm.xlu2 %6935, %v56_v6   ;;  %v6114_v9 = vld [vmem:[%s15073_s0 + $0x8] sm:$0xff]   ;;  %v60_v11 = vld [vmem:[%s15072_s2 + $0x20] sm:$0xff]  ;;  %v67_v15 = vld [vmem:[%s15072_s2 + $0x58] sm:$0xff] }
   0x4   :  { %357 = vst [vmem:[#allocation2 + $0x14] sm:$0xf] %v8064_v0  ;;  %v57_v10 = vld [vmem:[%s15072_s2 + $0x8] sm:$0xff]  ;;  %v8158_v14 = vld [vmem:[%s15074_s1] sm:$0xff]  ;;  %v66_v17 = vld [vmem:[%s15072_s2 + $0x50] sm:$0xff] }
   0x5   :  { %756 = vst [vmem:[#allocation3 + $0x10] sm:$0xf] %v8064_v0  ;;  %v61_v12 = vld [vmem:[%s15072_s2 + $0x28] sm:$0xff]  ;;  %v64_v16 = vld [vmem:[%s15072_s2 + $0x40] sm:$0xff]  ;;  %v70_v19 = vld [vmem:[%s15072_s2 + $0x70] sm:$0xff] }
   0x6   :  { %757 = vst [vmem:[#allocation3 + $0x14] sm:$0xf] %v8064_v0  ;;  %v65_v18 = vld [vmem:[%s15072_s2 + $0x48] sm:$0xff]  ;;  %v71_v20 = vld [vmem:[%s15072_s2 + $0x78] sm:$0xff]  ;;  %v170_v23 = vld [vmem:[%s15075_s4 + $0x10] sm:$0xff] }
   0x7   :  { %758 = vst [vmem:[#allocation3 + $0x18] sm:$0xf] %v8064_v0  ;;  %v8183_v21 = vld [vmem:[%s15074_s1 + $0x8] sm:$0xff]  ;;  %v68_v24 = vld [vmem:[%s15072_s2 + $0x60] sm:$0xff]  ;;  %v171_v25 = vld [vmem:[%s15075_s4 + $0x18] sm:$0xff] }
   0x8   :  { %759 = vst [vmem:[#allocation3 + $0x1c] sm:$0xf] %v8064_v0  ;;  %v69_v22 = vld [vmem:[%s15072_s2 + $0x68] sm:$0xff]  ;;  %v174_v26 = vld [vmem:[%s15075_s4 + $0x30] sm:$0xff]  ;;  %v175_v27 = vld [vmem:[%s15075_s4 + $0x38] sm:$0xff] }
   0x9   :  { %352 = vst [vmem:[#allocation2] sm:$0xff] %v350_v3   ;;  %v6621_v8 = vld [vmem:[#allocation2 + $0x8] sm:$0xff]  ;;  %v8208_v28 = vld [vmem:[%s15074_s1 + $0x10] sm:$0xff]  ;;  %v172_v30 = vld [vmem:[%s15075_s4 + $0x20] sm:$0xff] }
   0xa   :  { %89 = vperm.xlu0 %6933, %v59_v4   ;;  %v169_v29 = vld [vmem:[%s15075_s4 + $0x8] sm:$0xff]  ;;  %v168_v31 = vld [vmem:[%s15075_s4] sm:$0xff]  ;;  %v178_v33 = vld [vmem:[%s15075_s4 + $0x50] sm:$0xff] }
   0xb   :  { %109 = vperm.xlu1 %6934, %v63_v5   ;;  %v6622_v7 = vld [vmem:[#allocation2 + $0x10] sm:$0xff]  ;;  %79 = vperm.xlu2 %6935, %v57_v10   ;;  %v173_v32 = vld [vmem:[%s15075_s4 + $0x28] sm:$0xff]  ;;  %v179_v34 = vld [vmem:[%s15075_s4 + $0x58] sm:$0xff] }
   0xc   :  { %452 = vmatpush.bf16.msra.mxu0 %v6622_v7  ;;  %v8233_v35 = vld [vmem:[%s15074_s1 + $0x18] sm:$0xff]  ;;  %v177_v36 = vld [vmem:[%s15075_s4 + $0x48] sm:$0xff]  ;;  %v182_v37 = vld [vmem:[%s15075_s4 + $0x70] sm:$0xff] }
   0xd   :  { %v176_v38 = vld [vmem:[%s15075_s4 + $0x40] sm:$0xff]  ;;  %v183_v39 = vld [vmem:[%s15075_s4 + $0x78] sm:$0xff]  ;;  %v181_v41 = vld [vmem:[%s15075_s4 + $0x68] sm:$0xff] }
   0xe   :  { %v180_v40 = vld [vmem:[%s15075_s4 + $0x60] sm:$0xff]  ;;  %v269_v43 = vld [vmem:[%s15076_s7 + $0x8] sm:$0xff]  ;;  %v270_v47 = vld [vmem:[%s15076_s7 + $0x10] sm:$0xff] }
   0xf   :  { %v8258_v42 = vld [vmem:[%s15074_s1 + $0x20] sm:$0xff]  ;;  %v310_v46 = vld [vmem:[%s15077_s8 + $0x8] sm:$0xff]  ;;  %v311_v48 = vld [vmem:[%s15077_s8 + $0x10] sm:$0xff] }
  0x10   :  { %v6620_v13 = vld [vmem:[#allocation2] sm:$0xff]  ;;  %453 = vmatpush.bf16.msra.mxu0 %v6621_v8  ;;  %v8283_v49 = vld [vmem:[%s15074_s1 + $0x28] sm:$0xff]  ;;  %v312_v50 = vld [vmem:[%s15077_s8 + $0x18] sm:$0xff] }
  0x11   :  { %1161 = vst [vmem:[#allocation2] sm:$0xff] %v6114_v9   ;;  %v309_v44 = vld [vmem:[%s15077_s8] sm:$0xff]  ;;  %v271_v52 = vld [vmem:[%s15076_s7 + $0x18] sm:$0xff]  ;;  %v5940_v53 = vld [vmem:[%s15078_s9 + $0x8] sm:$0xff] }
  0x12   :  { %94 = vperm.xlu0 %6933, %v60_v11   ;;  %v268_v45 = vld [vmem:[%s15076_s7] sm:$0xff]  ;;  %v5941_v54 = vld [vmem:[%s15078_s9 + $0x10] sm:$0xff]  ;;  %v5942_v55 = vld [vmem:[%s15078_s9 + $0x18] sm:$0xff] }
  0x13   :  { %99 = vperm.xlu1 %6934, %v61_v12   ;;  %124 = vperm.xlu2 %6935, %v66_v17   ;;  %v5939_v51 = vld [vmem:[%s15078_s9] sm:$0xff]  ;;  %v8308_v56 = vld [vmem:[%s15074_s1 + $0x30] sm:$0xff]  ;;  %v8315_v57 = vld [vmem:[%s15074_s1 + $0x38] sm:$0xff] }
  0x14   :  { %454 = vmatpush.bf16.msra.mxu0 %v6620_v13 }
  0x17   :  { %6026 = vmatmul.msk.bf16.vlgmr.msra.gmra.mxu0 %vm422_vm0, %v8158_v14 }
  0x1a   :  { %129 = vperm.xlu0 %6933, %v67_v15  }
  0x1b   :  { %114 = vperm.xlu1 %6934, %v64_v16   ;;  %119 = vperm.xlu2 %6935, %v65_v18  }
  0x22   :  { %144 = vperm.xlu0 %6933, %v70_v19  }
  0x23   :  { %149 = vperm.xlu1 %6934, %v71_v20   ;;  %134 = vperm.xlu2 %6935, %v68_v24  }
  0x27   :  { %6027 = vmatmul.msk.bf16.gmra.mxu0 %vm422_vm0, %v8183_v21 }
  0x2a   :  { %139 = vperm.xlu0 %6933, %v69_v22  }
  0x2b   :  { %196 = vperm.xlu1 %6934, %v170_v23   ;;  %201 = vperm.xlu2 %6935, %v171_v25  }
  0x32   :  { %216 = vperm.xlu0 %6933, %v174_v26  }
  0x33   :  { %221 = vperm.xlu1 %6934, %v175_v27   ;;  %186 = vperm.xlu2 %6935, %v168_v31  }
  0x37   :  { %6028 = vmatmul.msk.bf16.gmra.mxu0 %vm422_vm0, %v8208_v28 }
  0x3a   :  { %191 = vperm.xlu0 %6933, %v169_v29  }
  0x3b   :  { %206 = vperm.xlu1 %6934, %v172_v30   ;;  %211 = vperm.xlu2 %6935, %v173_v32  }
  0x42   :  { %236 = vperm.xlu0 %6933, %v178_v33  }
  0x43   :  { %241 = vperm.xlu1 %6934, %v179_v34   ;;  %226 = vperm.xlu2 %6935, %v176_v38  }
  0x47   :  { %6029 = vmatmul.msk.bf16.gmra.mxu0 %vm422_vm0, %v8233_v35 }
  0x4a   :  { %231 = vperm.xlu0 %6933, %v177_v36  }
  0x4b   :  { %256 = vperm.xlu1 %6934, %v182_v37   ;;  %261 = vperm.xlu2 %6935, %v183_v39  }
  0x52   :  { %246 = vperm.xlu0 %6933, %v180_v40  }
  0x53   :  { %251 = vperm.xlu1 %6934, %v181_v41   ;;  %274 = vperm.xlu2 %6935, %v268_v45  }
  0x57   :  { %6030 = vmatmul.msk.bf16.gmra.mxu0 %vm422_vm0, %v8258_v42 }
  0x5a   :  { %279 = vperm.xlu0 %6933, %v269_v43  }
  0x5b   :  { %315 = vperm.xlu1 %6934, %v309_v44   ;;  %320 = vperm.xlu2 %6935, %v310_v46  }
  0x5d   :  { %v8323_v1 = vpop.permute.xlu2 %74 }
  0x5e   :  { %15323 = vst [vmem:[#allocation7_spill] sm:$0xff] %v8323_v1 }
  0x62   :  { %284 = vperm.xlu0 %6933, %v270_v47  }
  0x63   :  { %325 = vperm.xlu1 %6934, %v311_v48   ;;  %289 = vperm.xlu2 %6935, %v271_v52  }
  0x65   :  { %v8329_v6 = vpop.permute.xlu2 %79 }
  0x66   :  { %15326 = vst [vmem:[#allocation10_spill] sm:$0xff] %v8329_v6 }
  0x67   :  { %6031 = vmatmul.msk.bf16.gmra.mxu0 %vm422_vm0, %v8283_v49 }
  0x6a   :  { %330 = vperm.xlu0 %6933, %v312_v50  }
  0x6b   :  { %5945 = vperm.xlu1 %6934, %v5939_v51   ;;  %5950 = vperm.xlu2 %6935, %v5940_v53  }
  0x6d   :  { %v8340_v23 = vpop.permute.xlu2 %124 }
  0x6e   :  { %15329 = vst [vmem:[#allocation13_spill] sm:$0xff] %v8340_v23 }
  0x72   :  { %5955 = vperm.xlu0 %6933, %v5941_v54  }
  0x73   :  { %5960 = vperm.xlu1 %6934, %v5942_v55  }
  0x74   :  { %v8319_v63 = vpop.permute.xlu0 %84 }
  0x75   :  { %15321 = vst [vmem:[#allocation5_spill] sm:$0xff] %v8319_v63  ;;  %v8321_v0 = vpop.permute.xlu1 %104  ;;  %v8355_v40 = vpop.permute.xlu2 %119 }
  0x76   :  { %15322 = vst [vmem:[#allocation6_spill] sm:$0xff] %v8321_v0 }
  0x77   :  { %6032 = vmatmul.msk.bf16.gmra.mxu0 %vm422_vm0, %v8308_v56  ;;  %15331 = vst [vmem:[#allocation15_spill] sm:$0xff] %v8355_v40 }
  0x7c   :  { %v8325_v3 = vpop.permute.xlu0 %89 }
  0x7d   :  { %15324 = vst [vmem:[#allocation8_spill] sm:$0xff] %v8325_v3  ;;  %v8327_v4 = vpop.permute.xlu1 %109 }
  0x7e   :  { %15325 = vst [vmem:[#allocation9_spill] sm:$0xff] %v8327_v4 }
  0x84   :  { %v8333_v11 = vpop.permute.xlu0 %94 }
  0x85   :  { %15327 = vst [vmem:[#allocation11_spill] sm:$0xff] %v8333_v11  ;;  %v8337_v16 = vpop.permute.xlu1 %99 }
  0x86   :  { %15328 = vst [vmem:[#allocation12_spill] sm:$0xff] %v8337_v16 }
  0x87   :  { %6033 = vmatmul.msk.bf16.gmra.mxu0 %vm422_vm0, %v8315_v57 }
  0x8d   :  { %v8350_v37 = vpop.permute.xlu1 %114 }
  0x8e   :  { %15330 = vst [vmem:[#allocation14_spill] sm:$0xff] %v8350_v37 }
  0x94   :  { %v456_v58 = vpop.f32.mrf.mxu0 }
  0x95   :  { %v457_v7 = vadd.f32 %v456_v58, %v8323_v1 }
  0x97   :  { %v6034_v9 = vmul.f32 -1.442695, %v457_v7 }
  0x99   :  { %6936 = vpow2.f32 %v6034_v9 }
  0x9c   :  { %v458_v59 = vpop.f32.mrf.mxu0 }
  0x9d   :  { %v459_v8 = vadd.f32 %v458_v59, %v8329_v6 }
  0x9f   :  { %v6035_v10 = vmul.f32 -1.442695, %v459_v8  ;;  %v6937_v22 = vpop.eup %6936 }
  0xa0   :  { %v8342_v26 = vadd.f32 1.0, %v6937_v22 }
  0xa1   :  { %6938 = vpow2.f32 %v6035_v10 }
  0xa2   :  { %vm549_vm1 = vweird.f32 %v8342_v26 }
  0xa4   :  { %v461_v60 = vpop.f32.mrf.mxu0 }
  0xa5   :  { %v462_v12 = vadd.f32 %v461_v60, %v8319_v63 }
  0xa7   :  { %v6036_v18 = vmul.f32 -1.442695, %v462_v12  ;;  %v6939_v25 = vpop.eup %6938 }
  0xa8   :  { %v8344_v27 = vadd.f32 1.0, %v6939_v25 }
  0xa9   :  { %6940 = vpow2.f32 %v6036_v18 }
  0xaa   :  { %vm564_vm4 = vweird.f32 %v8344_v27 }
  0xac   :  { %v463_v61 = vpop.f32.mrf.mxu0 }
  0xad   :  { %v464_v29 = vadd.f32 %v463_v61, %v8325_v3  ;;  %v8378_v61 = vpop.permute.xlu0 %129 }
  0xae   :  { %15332 = vst [vmem:[#allocation16_spill] sm:$0xff] %v8378_v61 }
  0xaf   :  { %v6941_v30 = vpop.eup %6940  ;;  %v6037_v33 = vmul.f32 -1.442695, %v464_v29 }
  0xb0   :  { %v8352_v38 = vadd.f32 1.0, %v6941_v30 }
  0xb2   :  { %vm579_vm12 = vweird.f32 %v8352_v38 }
  0xb4   :  { %v466_v62 = vpop.f32.mrf.mxu0 }
  0xb5   :  { %v467_v15 = vadd.f32 %v466_v62, %v8333_v11 }
  0xb7   :  { %v6038_v19 = vmul.f32 -1.442695, %v467_v15 }
  0xb9   :  { %6942 = vpow2.f32 %v6038_v19 }
  0xbc   :  { %v468_v2 = vpop.f32.mrf.mxu0 }
  0xbd   :  { %v469_v17 = vadd.f32 %v468_v2, %v8337_v16 }
  0xbf   :  { %v6039_v20 = vmul.f32 -1.442695, %v469_v17  ;;  %v6943_v31 = vpop.eup %6942 }
  0xc0   :  { %v8357_v41 = vadd.f32 1.0, %v6943_v31  ;;  %v555_v31 = vand.u32 2147483648, %v8342_v26 }
  0xc1   :  { %6944 = vpow2.f32 %v6039_v20 }
  0xc2   :  { %6946 = vrcp.f32 %v8342_v26  ;;  %vm609_vm9 = vweird.f32 %v8357_v41 }
  0xc3   :  { %6948 = vrcp.f32 %v8344_v27 }
  0xc4   :  { %v471_v5 = vpop.f32.mrf.mxu0  ;;  %6950 = vpow2.f32 %v6037_v33 }
  0xc5   :  { %v472_v32 = vadd.f32 %v471_v5, %v8321_v0  ;;  %6952 = vrcp.f32 %v8352_v38 }
  0xc6   :  { %6954 = vrcp.f32 %v8357_v41 }
  0xc7   :  { %v6945_v36 = vpop.eup %6944  ;;  %v6040_v44 = vmul.f32 -1.442695, %v472_v32 }
  0xc8   :  { %v8361_v46 = vadd.f32 1.0, %v6945_v36  ;;  %v8363_v47 = vpop.eup %6946 }
  0xc9   :  { %v8366_v50 = vpop.eup %6948  ;;  %6956 = vpow2.f32 %v6040_v44  ;;  %v545_v54 = vmul.f32 %v8363_v47, %v8342_v26  ;;  %vm550_vm2 = vweird.f32 %v8363_v47 }
  0xca   :  { %6958 = vrcp.f32 %v8361_v46  ;;  %v560_v55 = vmul.f32 %v8366_v50, %v8344_v27  ;;  %v6951_v58 = vpop.eup %6950  ;;  %vm565_vm3 = vweird.f32 %v8366_v50  ;;  %vm8426_vm5 = vmor %vm549_vm1, %vm550_vm2  ;;  %vm624_vm2 = vweird.f32 %v8361_v46 }
  0xcb   :  { %v8374_v59 = vpop.eup %6952  ;;  %v546_v2 = vsub.f32 1.0, %v545_v54  ;;  %v8382_v8 = vadd.f32 1.0, %v6951_v58  ;;  %v8419_v54 = vpop.permute.xlu2 %134  ;;  %vm8438_vm6 = vmor %vm564_vm4, %vm565_vm3 }
  0xcc   :  { %v473_v13 = vpop.f32.mrf.mxu0  ;;  %v8376_v60 = vpop.eup %6954  ;;  %v561_v5 = vsub.f32 1.0, %v560_v55  ;;  %v575_v22 = vmul.f32 %v8374_v59, %v8352_v38  ;;  %15334 = vst [vmem:[#allocation18_spill] sm:$0xff] %v8419_v54  ;;  %vm580_vm13 = vweird.f32 %v8374_v59 }
  0xcd   :  { %v474_v39 = vadd.f32 %v473_v13, %v8327_v4  ;;  %v605_v10 = vmul.f32 %v8376_v60, %v8357_v41  ;;  %v547_v19 = vmul.f32 %v8363_v47, %v546_v2  ;;  %v568_v2 = vand.u32 2147483647, %v8344_v27  ;;  %vm8510_vm4 = vmor %vm579_vm12, %vm580_vm13 }
  0xce   :  { %v562_v20 = vmul.f32 %v8366_v50, %v561_v5  ;;  %v576_v44 = vsub.f32 1.0, %v575_v22  ;;  %v570_v5 = vand.u32 2147483648, %v8344_v27  ;;  %vm610_vm7 = vweird.f32 %v8376_v60 }
  0xcf   :  { %v6041_v48 = vmul.f32 -1.442695, %v474_v39  ;;  %v6957_v62 = vpop.eup %6956  ;;  %v606_v29 = vsub.f32 1.0, %v605_v10  ;;  %v548_v39 = vadd.f32 %v8363_v47, %v547_v19  ;;  %v615_v22 = vand.u32 2147483648, %v8357_v41  ;;  %vm8464_vm11 = vmor %vm609_vm9, %vm610_vm7 }
  0xd0   :  { %v8380_v7 = vpop.eup %6958  ;;  %v8386_v17 = vadd.f32 1.0, %v6957_v62  ;;  %vm569_vm10 = vcmp.eq.f32.partialorder %v568_v2, 8.507059e+37 }
  0xd1   :  { %6960 = vpow2.f32 %v6041_v48  ;;  %v620_v32 = vmul.f32 %v8380_v7, %v8361_v46  ;;  %v563_v48 = vadd.f32 %v8366_v50, %v562_v20  ;;  %v552_v10 = vsel %vm8426_vm5, %v8363_v47, %v548_v39 }
  0xd2   :  { %v616_v2 = vor.u32 1.1754944e-38, %v615_v22  ;;  %vm625_vm15 = vweird.f32 %v8380_v7 }
  0xd3   :  { %v621_v55 = vsub.f32 1.0, %v620_v32  ;;  %v567_v27 = vsel %vm8438_vm6, %v8366_v50, %v563_v48  ;;  %v613_v32 = vand.u32 2147483647, %v8357_v41  ;;  %vm8497_vm3 = vmor %vm624_vm2, %vm625_vm15  ;;  %vm639_vm6 = vweird.f32 %v8386_v17 }
  0xd4   :  { %v476_v24 = vpop.f32.mrf.mxu0 }
  0xd5   :  { %v477_v43 = vadd.f32 %v476_v24, %v8350_v37  ;;  %v622_v50 = vmul.f32 %v8380_v7, %v621_v55  ;;  %vm614_vm1 = vcmp.eq.f32.partialorder %v613_v32, 8.507059e+37  ;;  %v6626_v55 = vld [vmem:[#allocation3 + $0x18] sm:$0xff] }
  0xd6   :  { %861 = vmatpush.bf16.msra.mxu1 %v6626_v55 }
  0xd7   :  { %v6042_v51 = vmul.f32 -1.442695, %v477_v43  ;;  %v6961_v9 = vpop.eup %6960  ;;  %v8410_v43 = vpop.permute.xlu0 %144 }
  0xd8   :  { %v8394_v24 = vadd.f32 1.0, %v6961_v9  ;;  %15333 = vst [vmem:[#allocation17_spill] sm:$0xff] %v8410_v43 }
  0xd9   :  { %6962 = vpow2.f32 %v6042_v51  ;;  %v607_v51 = vmul.f32 %v8376_v60, %v606_v29 }
  0xda   :  { %vm654_vm15 = vweird.f32 %v8394_v24 }
  0xdb   :  { %v608_v19 = vadd.f32 %v8376_v60, %v607_v51 }
  0xdc   :  { %v478_v34 = vpop.f32.mrf.mxu0 }
  0xdd   :  { %v479_v45 = vadd.f32 %v478_v34, %v8355_v40  ;;  %v553_v34 = vand.u32 2147483647, %v8342_v26  ;;  %v583_v26 = vand.u32 2147483647, %v8352_v38  ;;  %v612_v41 = vsel %vm8464_vm11, %v8376_v60, %v608_v19 }
  0xde   :  { %v630_v60 = vand.u32 2147483648, %v8361_v46 }
  0xdf   :  { %v6043_v52 = vmul.f32 -1.442695, %v479_v45  ;;  %v6963_v12 = vpop.eup %6962  ;;  %vm554_vm8 = vcmp.eq.f32.partialorder %v553_v34, 8.507059e+37  ;;  %vm8476_vm14 = vcmp.eq.f32.partialorder %v583_v26, 8.507059e+37  ;;  %v8480_v62 = vpop.permute.xlu0 %139 }
  0xe0   :  { %v8397_v30 = vadd.f32 1.0, %v6963_v12  ;;  %15343 = vst [vmem:[#allocation19_spill] sm:$0xff] %v8480_v62 }
  0xe1   :  { %6964 = vpow2.f32 %v6043_v52  ;;  %v556_v52 = vor.u32 1.1754944e-38, %v555_v31 }
  0xe2   :  { %6966 = vrcp.f32 %v8382_v8  ;;  %vm669_vm13 = vweird.f32 %v8397_v30 }
  0xe3   :  { %6968 = vrcp.f32 %v8386_v17  ;;  %v557_v31 = vsel %vm554_vm8, %v556_v52, %v552_v10  ;;  %v623_v10 = vadd.f32 %v8380_v7, %v622_v50 }
  0xe4   :  { %v481_v53 = vpop.f32.mrf.mxu0  ;;  %6970 = vrcp.f32 %v8394_v24 }
  0xe5   :  { %v482_v18 = vadd.f32 %v481_v53, %v8340_v23  ;;  %6972 = vrcp.f32 %v8397_v30 }
  0xe7   :  { %v6965_v15 = vpop.eup %6964  ;;  %v6044_v36 = vmul.f32 -1.442695, %v482_v18 }
  0xe8   :  { %v8403_v33 = vadd.f32 1.0, %v6965_v15  ;;  %v8417_v53 = vpop.eup %6966  ;;  %v585_v15 = vand.u32 2147483648, %v8352_v38 }
  0xe9   :  { %v8448_v18 = vpop.eup %6968  ;;  %v590_v47 = vmul.f32 %v8417_v53, %v8382_v8  ;;  %vm595_vm7 = vweird.f32 %v8417_v53 }
  0xea   :  { %6974 = vrcp.f32 %v8403_v33  ;;  %v8454_v20 = vpop.eup %6970  ;;  %v586_v34 = vor.u32 1.1754944e-38, %v585_v15  ;;  %v635_v51 = vmul.f32 %v8448_v18, %v8386_v17  ;;  %v628_v15 = vand.u32 2147483647, %v8361_v46 }
  0xeb   :  { %6976 = vpow2.f32 %v6044_v36  ;;  %v8458_v29 = vpop.eup %6972  ;;  %v591_v48 = vsub.f32 1.0, %v590_v47  ;;  %v598_v47 = vand.u32 2147483647, %v8382_v8  ;;  %v650_v22 = vmul.f32 %v8454_v20, %v8394_v24 }
  0xec   :  { %v483_v13 = vpop.f32.mrf.mxu0  ;;  %v636_v19 = vsub.f32 1.0, %v635_v51  ;;  %v627_v46 = vsel %vm8497_vm3, %v8380_v7, %v623_v10  ;;  %v631_v51 = vor.u32 1.1754944e-38, %v630_v60  ;;  %vm629_vm5 = vcmp.eq.f32.partialorder %v628_v15, 8.507059e+37 }
  0xed   :  { %v484_v25 = vadd.f32 %v483_v13, %v8378_v61  ;;  %v577_v13 = vmul.f32 %v8374_v59, %v576_v44  ;;  %v600_v7 = vand.u32 2147483648, %v8382_v8  ;;  %v651_v10 = vsub.f32 1.0, %v650_v22 }
  0xee   :  { %v637_v38 = vmul.f32 %v8448_v18, %v636_v19  ;;  %v643_v15 = vand.u32 2147483647, %v8386_v17  ;;  %vm640_vm8 = vweird.f32 %v8448_v18  ;;  %vm670_vm9 = vweird.f32 %v8458_v29 }
  0xef   :  { %v6045_v45 = vmul.f32 -1.442695, %v484_v25  ;;  %v571_v25 = vor.u32 1.1754944e-38, %v570_v5  ;;  %v578_v52 = vadd.f32 %v8374_v59, %v577_v13  ;;  %v665_v5 = vmul.f32 %v8458_v29, %v8397_v30 }
  0xf0   :  { %v8462_v36 = vpop.eup %6974  ;;  %v617_v13 = vsel %vm614_vm1, %v616_v2, %v612_v41  ;;  %v645_v2 = vand.u32 2147483648, %v8386_v17  ;;  %vm8552_vm12 = vcmp.eq.f32.partialorder %v643_v15, 8.507059e+37  ;;  %vm8573_vm1 = vmor %vm669_vm13, %vm670_vm9  ;;  %vm684_vm2 = vweird.f32 %v8403_v33 }
  0xf1   :  { %6978 = vpow2.f32 %v6045_v45  ;;  %v572_v44 = vsel %vm569_vm10, %v571_v25, %v567_v27  ;;  %v6977_v45 = vpop.eup %6976  ;;  %v680_v26 = vmul.f32 %v8462_v36, %v8403_v33  ;;  %v666_v32 = vsub.f32 1.0, %v665_v5 }
  0xf2   :  { %v8495_v50 = vadd.f32 1.0, %v6977_v45  ;;  %v728_v5 = vmul.f32 0.0, %v617_v13  ;;  %v646_v22 = vor.u32 1.1754944e-38, %v645_v2  ;;  %vm594_vm10 = vweird.f32 %v8382_v8 }
  0xf3   :  { %v681_v41 = vsub.f32 1.0, %v680_v26  ;;  %v667_v60 = vmul.f32 %v8458_v29, %v666_v32  ;;  %vm685_vm11 = vweird.f32 %v8462_v36  ;;  %vm596_vm9 = vmor %vm594_vm10, %vm595_vm7 }
  0xf4   :  { %v486_v58 = vpop.f32.mrf.mxu0  ;;  %vm8587_vm3 = vmor %vm684_vm2, %vm685_vm11  ;;  %vm699_vm13 = vweird.f32 %v8495_v50 }
  0xf5   :  { %v487_v9 = vadd.f32 %v486_v58, %v8419_v54 }
  0xf7   :  { %6980 = vtanh.f32 %v487_v9  ;;  %v6979_v58 = vpop.eup %6978 }
  0xf8   :  { %v8501_v39 = vadd.f32 1.0, %v6979_v58  ;;  %v582_v58 = vsel %vm8510_vm4, %v8374_v59, %v578_v52  ;;  %vm655_vm4 = vweird.f32 %v8454_v20 }
  0xfc   :  { %v488_v9 = vpop.f32.mrf.mxu0 }
  0xfd   :  { %v6981_v12 = vpop.eup %6980  ;;  %v489_v27 = vadd.f32 %v488_v9, %v8480_v62 }
  0xfe   :  { %v732_v9 = vmul.f32 %v6981_v12, %v557_v31  ;;  %v592_v31 = vmul.f32 %v8417_v53, %v591_v48  ;;  %v632_v12 = vsel %vm629_vm5, %v631_v51, %v627_v46  ;;  %v8528_v48 = vsel %vm8476_vm14, %v586_v34, %v582_v58  ;;  %vm8566_vm14 = vmor %vm639_vm6, %vm640_vm8 }
  0xff   :  { %6982 = vtanh.f32 %v489_v27  ;;  %v682_v27 = vmul.f32 %v8462_v36, %v681_v41  ;;  %v729_v25 = vmul.f32 0.0, %v632_v12  ;;  %v652_v34 = vmul.f32 %v8454_v20, %v651_v10  ;;  %vm8611_vm8 = vmor %vm654_vm15, %vm655_vm4 }
 0x100   :  { %6984 = vrcp.f32 %v8495_v50  ;;  %v8524_v26 = vadd.f32 %v732_v9, %v728_v5  ;;  %v8534_v19 = vadd.f32 %v8417_v53, %v592_v31  ;;  %v638_v9 = vadd.f32 %v8448_v18, %v637_v38 }
 0x101   :  { %6986 = vrcp.f32 %v8501_v39  ;;  %v668_v46 = vadd.f32 %v8458_v29, %v667_v60  ;;  %v660_v41 = vand.u32 2147483648, %v8394_v24  ;;  %v683_v58 = vadd.f32 %v8462_v36, %v682_v27 }
 0x102   :  { %v675_v5 = vand.u32 2147483648, %v8397_v30  ;;  %v690_v38 = vand.u32 2147483648, %v8403_v33  ;;  %v673_v60 = vand.u32 2147483647, %v8397_v30  ;;  %v642_v30 = vsel %vm8566_vm14, %v8448_v18, %v638_v9 }
 0x103   :  { %v672_v17 = vsel %vm8573_vm1, %v8458_v29, %v668_v46  ;;  %v653_v15 = vadd.f32 %v8454_v20, %v652_v34  ;;  %v687_v29 = vsel %vm8587_vm3, %v8462_v36, %v683_v58  ;;  %v661_v9 = vor.u32 1.1754944e-38, %v660_v41 }
 0x104   :  { %v491_v59 = vpop.f32.mrf.mxu0  ;;  %v676_v46 = vor.u32 1.1754944e-38, %v675_v5  ;;  %v691_v34 = vor.u32 1.1754944e-38, %v690_v38  ;;  %v658_v10 = vand.u32 2147483647, %v8394_v24  ;;  %vm674_vm5 = vcmp.eq.f32.partialorder %v673_v60, 8.507059e+37 }
 0x105   :  { %v6983_v52 = vpop.eup %6982  ;;  %v492_v13 = vadd.f32 %v491_v59, %v8410_v43  ;;  %v688_v59 = vand.u32 2147483647, %v8403_v33  ;;  %v657_v12 = vsel %vm8611_vm8, %v8454_v20, %v653_v15  ;;  %vm714_vm15 = vweird.f32 %v8501_v39 }
 0x106   :  { %v733_v32 = vmul.f32 %v6983_v52, %v572_v44  ;;  %v6625_v44 = vld [vmem:[#allocation3 + $0x10] sm:$0xff]  ;;  %v8547_v51 = vpop.eup %6984  ;;  %v8580_v52 = vpop.permute.xlu1 %149  ;;  %v677_v41 = vsel %vm674_vm5, %v676_v46, %v672_v17  ;;  %v597_v17 = vsel %vm596_vm9, %v8417_v53, %v8534_v19  ;;  %vm659_vm11 = vcmp.eq.f32.partialorder %v658_v10, 8.507059e+37 }
 0x107   :  { %6988 = vtanh.f32 %v492_v13  ;;  %v8556_v2 = vpop.eup %6986  ;;  %15354 = vst [vmem:[#allocation20_spill] sm:$0xff] %v8580_v52  ;;  %862 = vmatpush.bf16.msra.mxu1 %v6625_v44  ;;  %vm689_vm6 = vcmp.eq.f32.partialorder %v688_v59, 8.507059e+37  ;;  %v647_v44 = vsel %vm8552_vm12, %v646_v22, %v642_v30  ;;  %v662_v30 = vsel %vm659_vm11, %v661_v9, %v657_v12 }
 0x108   :  { %6990 = vtanh.f32 %v8524_v26  ;;  %v8544_v45 = vadd.f32 %v733_v32, %v729_v25  ;;  %v695_v25 = vmul.f32 %v8547_v51, %v8495_v50  ;;  %v710_v32 = vmul.f32 %v8556_v2, %v8501_v39 }
 0x109   :  { %v692_v5 = vsel %vm689_vm6, %v691_v34, %v687_v29  ;;  %v730_v24 = vmul.f32 0.0, %v647_v44  ;;  %vm599_vm12 = vcmp.eq.f32.partialorder %v598_v47, 8.507059e+37  ;;  %v731_v53 = vmul.f32 0.0, %v662_v30 }
 0x10a   :  { %6992 = vtanh.f32 %v8544_v45  ;;  %v696_v31 = vsub.f32 1.0, %v695_v25  ;;  %v711_v22 = vsub.f32 1.0, %v710_v32  ;;  %vm700_vm7 = vweird.f32 %v8547_v51 }
 0x10b   :  { %vm715_vm10 = vweird.f32 %v8556_v2  ;;  %v705_v47 = vand.u32 2147483648, %v8495_v50  ;;  %v720_v32 = vand.u32 2147483648, %v8501_v39  ;;  %vm701_vm14 = vmor %vm699_vm13, %vm700_vm7  ;;  %vm15178_vm4 = vcmask 523264  }
 0x10c   :  { %v493_v13 = vpop.f32.mrf.mxu0  ;;  %v697_v15 = vmul.f32 %v8547_v51, %v696_v31  ;;  %vm716_vm1 = vmor %vm714_vm15, %vm715_vm10 }
 0x10d   :  { %v6989_v33 = vpop.eup %6988  ;;  %v494_v55 = vadd.f32 %v493_v13, %v8580_v52  ;;  %v706_v10 = vor.u32 1.1754944e-38, %v705_v47  ;;  %v721_v44 = vor.u32 1.1754944e-38, %v720_v32 }
 0x10e   :  { %v6991_v18 = vpop.eup %6990  ;;  %v734_v38 = vmul.f32 %v6989_v33, %v8528_v48  ;;  %v601_v48 = vor.u32 1.1754944e-38, %v600_v7  ;;  %v712_v33 = vmul.f32 %v8556_v2, %v711_v22  ;;  %v698_v25 = vadd.f32 %v8547_v51, %v697_v15  ;;  %v6627_v22 = vld [vmem:[#allocation2] sm:$0xff] }
 0x10f   :  { %6994 = vtanh.f32 %v494_v55  ;;  %v744_v60 = vmul.f32 %v6991_v18, %v677_v41  ;;  %v703_v55 = vand.u32 2147483647, %v8495_v50  ;;  %v718_v18 = vand.u32 2147483647, %v8501_v39 }
 0x110   :  { %v6993_v58 = vpop.eup %6992  ;;  %v8627_v20 = vadd.f32 %v734_v38, %v730_v24  ;;  %v602_v29 = vsel %vm599_vm12, %v601_v48, %v597_v17  ;;  %v713_v8 = vadd.f32 %v8556_v2, %v712_v33  ;;  %v702_v9 = vsel %vm701_vm14, %v8547_v51, %v698_v25  ;;  %v8699_v17 = vpop.permute.xlu0 %216 }
 0x111   :  { %v745_v59 = vmul.f32 %v6993_v58, %v692_v5  ;;  %vm704_vm2 = vcmp.eq.f32.partialorder %v703_v55, 8.507059e+37  ;;  %vm719_vm3 = vcmp.eq.f32.partialorder %v718_v18, 8.507059e+37  ;;  %15361 = vst [vmem:[#allocation23_spill] sm:$0xff] %v8699_v17 }
 0x112   :  { %6996 = vtanh.f32 %v8627_v20  ;;  %v717_v46 = vsel %vm716_vm1, %v8556_v2, %v713_v8  ;;  %v707_v58 = vsel %vm704_vm2, %v706_v10, %v702_v9  ;;  %v6612_v2 = vld [vmem:[%s15079_s3] sm:$0xff] }
 0x113   :  { %v6679_v27 = vpack.c.bf16 %v745_v59, %v744_v60  ;;  %v722_v41 = vsel %vm719_vm3, %v721_v44, %v717_v46  ;;  %v6613_v60 = vld [vmem:[%s15079_s3 + $0x8] sm:$0xff]  ;;  %v6614_v59 = vld [vmem:[%s15079_s3 + $0x10] sm:$0xff] }
 0x115   :  { %v6995_v13 = vpop.eup %6994  ;;  %6680 = vst [vmem:[#allocation3] sm:$0xff] %v6679_v27  }
 0x116   :  { %6897 = vst [vmem:[#allocation2 + $0x8] sm:$0xff] %v6679_v27   ;;  %v735_v19 = vmul.f32 %v6995_v13, %v602_v29  ;;  %v8707_v29 = vpop.permute.xlu1 %196 }
 0x117   :  { %15364 = vst [vmem:[#allocation26_spill] sm:$0xff] %v8707_v29 }
 0x118   :  { %v8635_v7 = vadd.f32 %v735_v19, %v731_v53  ;;  %v6997_v34 = vpop.eup %6996  ;;  %v8703_v13 = vpop.permute.xlu0 %191 }
 0x119   :  { %v746_v5 = vmul.f32 %v6997_v34, %v707_v58  ;;  %15363 = vst [vmem:[#allocation25_spill] sm:$0xff] %v8703_v13 }
 0x11a   :  { %15359 = vst [vmem:[#allocation21_spill] sm:$0xff] %v8635_v7  ;;  %6998 = vtanh.f32 %v8635_v7 }
 0x11c   :  { %v6623_v51 = vld [vmem:[#allocation3] sm:$0xff] }
 0x11d   :  { %v6628_v31 = vld [vmem:[#allocation2 + $0x8] sm:$0xff] }
 0x11e   :  { %v8711_v55 = vpop.permute.xlu1 %221 }
 0x11f   :  { %15365 = vst [vmem:[#allocation27_spill] sm:$0xff] %v8711_v55 }
 0x120   :  { %v6999_v36 = vpop.eup %6998 }
 0x121   :  { %v747_v38 = vmul.f32 %v6999_v36, %v722_v41 }
 0x123   :  { %v6684_v50 = vpack.c.bf16 %v747_v38, %v746_v5 }
 0x125   :  { %6896 = vst [vmem:[#allocation3 + $0x8] sm:$0xff] %v6684_v50  }
 0x126   :  { %6898 = vst [vmem:[#allocation2 + $0x10] sm:$0xff] %v6684_v50  }
 0x12c   :  { %v6624_v12 = vld [vmem:[#allocation3 + $0x8] sm:$0xff] }
 0x12d   :  { %v6629_v39 = vld [vmem:[#allocation2 + $0x10] sm:$0xff]  ;;  %863 = vmatpush.bf16.msra.mxu1 %v6624_v12 }
 0x12e   :  { %1196 = vmatpush.bf16.msra.mxu2 %v6629_v39 }
 0x131   :  { %864 = vmatpush.bf16.msra.mxu1 %v6623_v51  ;;  %v8722_v51 = vpop.permute.xlu1 %206 }
 0x132   :  { %1197 = vmatpush.bf16.msra.mxu2 %v6628_v31  ;;  %15366 = vst [vmem:[#allocation28_spill] sm:$0xff] %v8722_v51 }
 0x134   :  { %6094 = vmatmul.msk.bf16.vlgmr.msra.gmra.mxu1 %vm15178_vm4, %v6612_v2 }
 0x136   :  { %1198 = vmatpush.bf16.msra.mxu2 %v6627_v22 }
 0x139   :  { %6128 = vmatmul.msk.bf16.vlgmr.msra.gmra.mxu2 %vm422_vm0, %v8158_v14  ;;  %v6615_v14 = vld [vmem:[%s15079_s3 + $0x18] sm:$0xff] }
 0x144   :  { %6095 = vmatmul.msk.bf16.gmra.mxu1 %vm15178_vm4, %v6613_v60 }
 0x149   :  { %6129 = vmatmul.msk.bf16.gmra.mxu2 %vm422_vm0, %v8183_v21  ;;  %v6616_v21 = vld [vmem:[%s15079_s3 + $0x20] sm:$0xff] }
 0x154   :  { %6096 = vmatmul.msk.bf16.gmra.mxu1 %vm15178_vm4, %v6614_v59 }
 0x159   :  { %6130 = vmatmul.msk.bf16.gmra.mxu2 %vm422_vm0, %v8208_v28  ;;  %v6617_v28 = vld [vmem:[%s15079_s3 + $0x28] sm:$0xff] }
 0x164   :  { %6097 = vmatmul.msk.bf16.gmra.mxu1 %vm15178_vm4, %v6615_v14 }
 0x169   :  { %6131 = vmatmul.msk.bf16.gmra.mxu2 %vm422_vm0, %v8233_v35  ;;  %v6618_v35 = vld [vmem:[%s15079_s3 + $0x30] sm:$0xff] }
 0x174   :  { %6098 = vmatmul.msk.bf16.gmra.mxu1 %vm15178_vm4, %v6616_v21 }
 0x179   :  { %6132 = vmatmul.msk.bf16.gmra.mxu2 %vm422_vm0, %v8258_v42  ;;  %v6619_v42 = vld [vmem:[%s15079_s3 + $0x38] sm:$0xff] }
 0x184   :  { %6099 = vmatmul.msk.bf16.gmra.mxu1 %vm15178_vm4, %v6617_v28 }
 0x189   :  { %6133 = vmatmul.msk.bf16.gmra.mxu2 %vm422_vm0, %v8283_v49  ;;  %v8697_v49 = vpop.permute.xlu2 %201 }
 0x18a   :  { %15360 = vst [vmem:[#allocation22_spill] sm:$0xff] %v8697_v49 }
 0x191   :  { %v8701_v30 = vpop.permute.xlu2 %186 }
 0x192   :  { %15362 = vst [vmem:[#allocation24_spill] sm:$0xff] %v8701_v30 }
 0x194   :  { %6100 = vmatmul.msk.bf16.gmra.mxu1 %vm15178_vm4, %v6618_v35 }
 0x199   :  { %6134 = vmatmul.msk.bf16.gmra.mxu2 %vm422_vm0, %v8308_v56  ;;  %v8734_v35 = vpop.permute.xlu2 %211 }
 0x19a   :  { %15367 = vst [vmem:[#allocation29_spill] sm:$0xff] %v8734_v35 }
 0x1a4   :  { %6101 = vmatmul.msk.bf16.gmra.mxu1 %vm15178_vm4, %v6619_v42 }
 0x1a9   :  { %6135 = vmatmul.msk.bf16.gmra.mxu2 %vm422_vm0, %v8315_v57 }
 0x1b1   :  { %v866_v24 = vpop.f32.mrf.mxu1 }
 0x1b2   :  { %v867_v56 = vadd.f32 %v866_v24, %v8701_v30 }
 0x1b4   :  { %v6102_v53 = vmul.f32 -1.442695, %v867_v56 }
 0x1b6   :  { %7000 = vpow2.f32 %v6102_v53 }
 0x1b9   :  { %v868_v27 = vpop.f32.mrf.mxu1 }
 0x1ba   :  { %v869_v15 = vadd.f32 %v868_v27, %v8703_v13 }
 0x1bc   :  { %v1200_v48 = vpop.f32.mrf.mxu2  ;;  %v6103_v57 = vmul.f32 -1.442695, %v869_v15  ;;  %v7001_v9 = vpop.eup %7000 }
 0x1bd   :  { %v1201_v25 = vadd.f32 %v1200_v48, %v8323_v1  ;;  %v8714_v44 = vadd.f32 1.0, %v7001_v9 }
 0x1be   :  { %7002 = vpow2.f32 %v6103_v57 }
 0x1bf   :  { %v6136_v8 = vmul.f32 -1.442695, %v1201_v25  ;;  %v965_v9 = vand.u32 2147483648, %v8714_v44  ;;  %vm959_vm5 = vweird.f32 %v8714_v44 }
 0x1c1   :  { %v871_v33 = vpop.f32.mrf.mxu1  ;;  %7004 = vpow2.f32 %v6136_v8 }
 0x1c2   :  { %v872_v47 = vadd.f32 %v871_v33, %v8707_v29 }
 0x1c4   :  { %v1202_v19 = vpop.f32.mrf.mxu2  ;;  %v6104_v46 = vmul.f32 -1.442695, %v872_v47  ;;  %v7003_v34 = vpop.eup %7002 }
 0x1c5   :  { %v1203_v10 = vadd.f32 %v1202_v19, %v8329_v6  ;;  %v8717_v58 = vadd.f32 1.0, %v7003_v34 }
 0x1c6   :  { %7006 = vpow2.f32 %v6104_v46 }
 0x1c7   :  { %v6137_v5 = vmul.f32 -1.442695, %v1203_v10  ;;  %v7005_v38 = vpop.eup %7004  ;;  %7008 = vrcp.f32 %v8714_v44  ;;  %vm974_vm9 = vweird.f32 %v8717_v58 }
 0x1c8   :  { %7010 = vrcp.f32 %v8717_v58  ;;  %v8724_v31 = vadd.f32 1.0, %v7005_v38 }
 0x1c9   :  { %v873_v32 = vpop.f32.mrf.mxu1  ;;  %7012 = vpow2.f32 %v6137_v5 }
 0x1ca   :  { %v874_v36 = vadd.f32 %v873_v32, %v8697_v49  ;;  %vm1293_vm10 = vweird.f32 %v8724_v31 }
 0x1cc   :  { %v1205_v18 = vpop.f32.mrf.mxu2  ;;  %v6105_v50 = vmul.f32 -1.442695, %v874_v36  ;;  %v7007_v2 = vpop.eup %7006 }
 0x1cd   :  { %v1206_v39 = vadd.f32 %v1205_v18, %v8319_v63  ;;  %v8727_v14 = vpop.eup %7008  ;;  %v8730_v21 = vadd.f32 1.0, %v7007_v2  ;;  %v963_v18 = vand.u32 2147483647, %v8714_v44 }
 0x1ce   :  { %7014 = vpow2.f32 %v6105_v50  ;;  %v8732_v28 = vpop.eup %7010  ;;  %v955_v56 = vmul.f32 %v8727_v14, %v8714_v44  ;;  %v978_v50 = vand.u32 2147483647, %v8717_v58  ;;  %vm960_vm8 = vweird.f32 %v8727_v14 }
 0x1cf   :  { %v6138_v60 = vmul.f32 -1.442695, %v1206_v39  ;;  %7016 = vrcp.f32 %v8724_v31  ;;  %v7013_v24 = vpop.eup %7012  ;;  %v970_v33 = vmul.f32 %v8732_v28, %v8717_v58  ;;  %vm8767_vm6 = vcmp.eq.f32.partialorder %v963_v18, 8.507059e+37  ;;  %vm8801_vm7 = vmor %vm959_vm5, %vm960_vm8 }
 0x1d0   :  { %v8742_v53 = vadd.f32 1.0, %v7013_v24  ;;  %v956_v8 = vsub.f32 1.0, %v955_v56  ;;  %vm8781_vm11 = vcmp.eq.f32.partialorder %v978_v50, 8.507059e+37  ;;  %vm975_vm12 = vweird.f32 %v8732_v28 }
 0x1d1   :  { %v876_v41 = vpop.f32.mrf.mxu1  ;;  %7018 = vpow2.f32 %v6138_v60  ;;  %v971_v34 = vsub.f32 1.0, %v970_v33  ;;  %v993_v44 = vand.u32 2147483647, %v8730_v21  ;;  %vm8823_vm14 = vmor %vm974_vm9, %vm975_vm12  ;;  %vm989_vm1 = vweird.f32 %v8730_v21 }
 0x1d2   :  { %v877_v22 = vadd.f32 %v876_v41, %v8722_v51  ;;  %7020 = vrcp.f32 %v8730_v21  ;;  %v957_v2 = vmul.f32 %v8727_v14, %v956_v8 }
 0x1d3   :  { %v972_v56 = vmul.f32 %v8732_v28, %v971_v34  ;;  %vm8847_vm3 = vcmp.eq.f32.partialorder %v993_v44, 8.507059e+37 }
 0x1d4   :  { %v1207_v12 = vpop.f32.mrf.mxu2  ;;  %v6106_v42 = vmul.f32 -1.442695, %v877_v22  ;;  %v7015_v15 = vpop.eup %7014  ;;  %v980_v22 = vand.u32 2147483648, %v8717_v58  ;;  %v958_v8 = vadd.f32 %v8727_v14, %v957_v2 }
 0x1d5   :  { %v8744_v57 = vpop.eup %7016  ;;  %v1208_v19 = vadd.f32 %v1207_v12, %v8325_v3  ;;  %v8747_v47 = vadd.f32 1.0, %v7015_v15  ;;  %v973_v50 = vadd.f32 %v8732_v28, %v972_v56  ;;  %v8836_v58 = vpop.permute.xlu0 %236 }
 0x1d6   :  { %7022 = vpow2.f32 %v6106_v42  ;;  %v1289_v10 = vmul.f32 %v8744_v57, %v8724_v31  ;;  %v981_v18 = vor.u32 1.1754944e-38, %v980_v22  ;;  %v995_v22 = vand.u32 2147483648, %v8730_v21  ;;  %15378 = vst [vmem:[#allocation30_spill] sm:$0xff] %v8836_v58 }
 0x1d7   :  { %v7019_v46 = vpop.eup %7018  ;;  %7024 = vrcp.f32 %v8742_v53  ;;  %v6139_v5 = vmul.f32 -1.442695, %v1208_v19  ;;  %vm1294_vm15 = vweird.f32 %v8744_v57  ;;  %vm1004_vm9 = vweird.f32 %v8747_v47 }
 0x1d8   :  { %v8755_v41 = vpop.eup %7020  ;;  %v8762_v60 = vadd.f32 1.0, %v7019_v46  ;;  %v1290_v42 = vsub.f32 1.0, %v1289_v10  ;;  %v1299_v10 = vand.u32 2147483648, %v8724_v31  ;;  %v996_v51 = vor.u32 1.1754944e-38, %v995_v22  ;;  %vm8864_vm5 = vmor %vm1293_vm10, %vm1294_vm15 }
 0x1d9   :  { %v878_v59 = vpop.f32.mrf.mxu1  ;;  %v985_v24 = vmul.f32 %v8755_v41, %v8730_v21  ;;  %vm990_vm2 = vweird.f32 %v8755_v41 }
 0x1da   :  { %v879_v27 = vadd.f32 %v878_v59, %v8734_v35  ;;  %v966_v59 = vor.u32 1.1754944e-38, %v965_v9  ;;  %v1297_v9 = vand.u32 2147483647, %v8724_v31  ;;  %v1327_v21 = vand.u32 2147483647, %v8762_v60 }
 0x1db   :  { %vm1323_vm15 = vweird.f32 %v8762_v60 }
 0x1dc   :  { %v1210_v48 = vpop.f32.mrf.mxu2  ;;  %v6107_v25 = vmul.f32 -1.442695, %v879_v27  ;;  %v7023_v12 = vpop.eup %7022  ;;  %vm8812_vm13 = vcmp.eq.f32.partialorder %v1297_v9, 8.507059e+37  ;;  %v977_v9 = vsel %vm8823_vm14, %v8732_v28, %v973_v50 }
 0x1dd   :  { %v1211_v36 = vadd.f32 %v1210_v48, %v8333_v11  ;;  %v8772_v15 = vadd.f32 1.0, %v7023_v12  ;;  %v8776_v33 = vpop.eup %7024  ;;  %v1291_v12 = vmul.f32 %v8744_v57, %v1290_v42  ;;  %v962_v42 = vsel %vm8801_vm7, %v8727_v14, %v958_v8 }
 0x1de   :  { %7026 = vpow2.f32 %v6107_v25  ;;  %v1300_v14 = vor.u32 1.1754944e-38, %v1299_v10  ;;  %v1314_v8 = vand.u32 2147483648, %v8742_v53  ;;  %v8840_v10 = vsel %vm8767_vm6, %v966_v59, %v962_v42  ;;  %v8854_v59 = vpop.permute.xlu2 %226 }
 0x1df   :  { %7028 = vrcp.f32 %v8747_v47  ;;  %v6140_v27 = vmul.f32 -1.442695, %v1211_v36  ;;  %15381 = vst [vmem:[#allocation31_spill] sm:$0xff] %v8854_v59  ;;  %v8858_v22 = vsel %vm8781_vm11, %v981_v18, %v977_v9  ;;  %vm1308_vm6 = vweird.f32 %v8742_v53  ;;  %vm8900_vm11 = vmor %vm989_vm1, %vm990_vm2 }
 0x1e0   :  { %7030 = vpow2.f32 %v6139_v5  ;;  %v986_v5 = vsub.f32 1.0, %v985_v24  ;;  %v8869_v44 = vor.u32 1.1754944e-38, %v1314_v8  ;;  %vm1309_vm8 = vweird.f32 %v8776_v33 }
 0x1e1   :  { %v881_v32 = vpop.f32.mrf.mxu1  ;;  %7032 = vrcp.f32 %v8762_v60  ;;  %v1023_v3 = vand.u32 2147483647, %v8772_v15  ;;  %vm8946_vm14 = vmor %vm1308_vm6, %vm1309_vm8  ;;  %vm8998_vm8 = vcmp.eq.f32.partialorder %v1327_v21, 8.507059e+37 }
 0x1e2   :  { %v882_v39 = vadd.f32 %v881_v32, %v8699_v17  ;;  %7034 = vpow2.f32 %v6140_v27 }
 0x1e3   :  { %7036 = vrcp.f32 %v8772_v15 }
 0x1e4   :  { %v1212_v38 = vpop.f32.mrf.mxu2  ;;  %v6108_v19 = vmul.f32 -1.442695, %v882_v39  ;;  %v7027_v46 = vpop.eup %7026  ;;  %v1304_v39 = vmul.f32 %v8776_v33, %v8742_v53 }
 0x1e5   :  { %v1213_v34 = vadd.f32 %v1212_v38, %v8337_v16  ;;  %v8790_v36 = vpop.eup %7028  ;;  %v8807_v24 = vadd.f32 1.0, %v7027_v46  ;;  %v1292_v46 = vadd.f32 %v8744_v57, %v1291_v12  ;;  %v1312_v12 = vand.u32 2147483647, %v8742_v53 }
 0x1e6   :  { %7038 = vpow2.f32 %v6108_v19  ;;  %v7031_v56 = vpop.eup %7030  ;;  %v1000_v17 = vmul.f32 %v8790_v36, %v8747_v47  ;;  %v1305_v16 = vsub.f32 1.0, %v1304_v39  ;;  %vm1005_vm7 = vweird.f32 %v8790_v36 }
 0x1e7   :  { %v6141_v35 = vmul.f32 -1.442695, %v1213_v34  ;;  %v987_v34 = vmul.f32 %v8755_v41, %v986_v5  ;;  %v8834_v38 = vpop.eup %7032  ;;  %v8843_v28 = vadd.f32 1.0, %v7031_v56  ;;  %7040 = vrcp.f32 %v8807_v24  ;;  %vm8961_vm1 = vmor %vm1004_vm9, %vm1005_vm7 }
 0x1e8   :  { %v7035_v19 = vpop.eup %7034  ;;  %v1001_v39 = vsub.f32 1.0, %v1000_v17  ;;  %v1306_v8 = vmul.f32 %v8776_v33, %v1305_v16  ;;  %v1319_v42 = vmul.f32 %v8834_v38, %v8762_v60  ;;  %vm8911_vm12 = vcmp.eq.f32.partialorder %v1312_v12, 8.507059e+37 }
 0x1e9   :  { %v8778_v25 = vpop.f32.mrf.mxu1  ;;  %v8852_v48 = vpop.eup %7036  ;;  %7042 = vpow2.f32 %v6141_v35  ;;  %v1296_v35 = vsel %vm8864_vm5, %v8744_v57, %v1292_v46  ;;  %v988_v32 = vadd.f32 %v8755_v41, %v987_v34  ;;  %v8877_v31 = vadd.f32 1.0, %v7035_v19 }
 0x1ea   :  { %v884_v18 = vadd.f32 %v8778_v25, %v8711_v55  ;;  %v1015_v57 = vmul.f32 %v8852_v48, %v8772_v15  ;;  %7044 = vrcp.f32 %v8843_v28  ;;  %v8894_v25 = vsel %vm8812_vm13, %v1300_v14, %v1296_v35 }
 0x1eb   :  { %v1002_v19 = vmul.f32 %v8790_v36, %v1001_v39  ;;  %v992_v27 = vsel %vm8900_vm11, %v8755_v41, %v988_v32  ;;  %v1025_v39 = vand.u32 2147483648, %v8772_v15  ;;  %7046 = vrcp.f32 %v8877_v31  ;;  %v8925_v32 = vpop.permute.xlu0 %231 }
 0x1ec   :  { %v1215_v2 = vpop.f32.mrf.mxu2  ;;  %v7039_v56 = vpop.eup %7038  ;;  %v1320_v11 = vsub.f32 1.0, %v1319_v42  ;;  %v1016_v49 = vsub.f32 1.0, %v1015_v57  ;;  %15390 = vst [vmem:[#allocation32_spill] sm:$0xff] %v8925_v32  ;;  %vm1019_vm13 = vweird.f32 %v8772_v15  ;;  %vm1324_vm2 = vweird.f32 %v8834_v38 }
 0x1ed   :  { %v1216_v46 = vadd.f32 %v1215_v2, %v8321_v0  ;;  %v8890_v34 = vadd.f32 1.0, %v7039_v56  ;;  %v8906_v55 = vpop.eup %7040  ;;  %v1329_v56 = vand.u32 2147483648, %v8762_v60  ;;  %v6109_v0 = vmul.f32 -1.442695, %v884_v18 }
 0x1ee   :  { %v8931_v18 = vsel %vm8847_vm3, %v996_v51, %v992_v27  ;;  %v8950_v5 = vor.u32 1.1754944e-38, %v1025_v39  ;;  %vm8980_vm3 = vcmp.eq.f32.partialorder %v1023_v3, 8.507059e+37  ;;  %vm1020_vm5 = vweird.f32 %v8852_v48 }
 0x1ef   :  { %v7043_v35 = vpop.eup %7042  ;;  %v6142_v16 = vmul.f32 -1.442695, %v1216_v46  ;;  %7048 = vrcp.f32 %v8890_v34  ;;  %vm1034_vm6 = vweird.f32 %v8807_v24  ;;  %vm9021_vm9 = vmor %vm1019_vm13, %vm1020_vm5  ;;  %vm1035_vm7 = vweird.f32 %v8906_v55 }
 0x1f0   :  { %v8934_v42 = vpop.eup %7044  ;;  %v8939_v57 = vadd.f32 1.0, %v7043_v35  ;;  %vm1049_vm13 = vweird.f32 %v8890_v34 }
 0x1f1   :  { %v886_v50 = vpop.f32.mrf.mxu1  ;;  %v8967_v39 = vpop.eup %7046 }
 0x1f2   :  { %v887_v17 = vadd.f32 %v886_v50, %v8854_v59  ;;  %v1008_v50 = vand.u32 2147483647, %v8747_v47  ;;  %v1010_v59 = vand.u32 2147483648, %v8747_v47  ;;  %v1349_v3 = vmul.f32 %v8967_v39, %v8877_v31 }
 0x1f4   :  { %v1217_v9 = vpop.f32.mrf.mxu2  ;;  %v6110_v2 = vmul.f32 -1.442695, %v887_v17  ;;  %v1307_v17 = vadd.f32 %v8776_v33, %v1306_v8  ;;  %vm8921_vm10 = vcmp.eq.f32.partialorder %v1008_v50, 8.507059e+37  ;;  %v1003_v8 = vadd.f32 %v8790_v36, %v1002_v19 }
 0x1f5   :  { %v1030_v50 = vmul.f32 %v8906_v55, %v8807_v24  ;;  %v1011_v35 = vor.u32 1.1754944e-38, %v1010_v59  ;;  %v1218_v59 = vadd.f32 %v1217_v9, %v8327_v4  ;;  %v8984_v51 = vpop.eup %7048  ;;  %v1330_v9 = vor.u32 1.1754944e-38, %v1329_v56 }
 0x1f6   :  { %7050 = vpow2.f32 %v6110_v2  ;;  %v1311_v27 = vsel %vm8946_vm14, %v8776_v33, %v1307_v17  ;;  %v1017_v2 = vmul.f32 %v8852_v48, %v1016_v49  ;;  %v8971_v33 = vmul.f32 %v8934_v42, %v8843_v28  ;;  %vm9073_vm14 = vmor %vm1034_vm6, %vm1035_vm7 }
 0x1f7   :  { %7052 = vpow2.f32 %v6109_v0  ;;  %v1321_v0 = vmul.f32 %v8834_v38, %v1320_v11  ;;  %v1040_v49 = vand.u32 2147483648, %v8807_v24  ;;  %v1007_v47 = vsel %vm8961_vm1, %v8790_v36, %v1003_v8 }
 0x1f8   :  { %7054 = vpow2.f32 %v6142_v16  ;;  %v1031_v17 = vsub.f32 1.0, %v1030_v50  ;;  %v8991_v36 = vsel %vm8911_vm12, %v8869_v44, %v1311_v27  ;;  %v6143_v44 = vmul.f32 -1.442695, %v1218_v59  ;;  %vm9042_vm12 = vmor %vm1323_vm15, %vm1324_vm2 }
 0x1f9   :  { %v888_v41 = vpop.f32.mrf.mxu1  ;;  %7056 = vrcp.f32 %v8939_v57  ;;  %v9002_v14 = vor.u32 1.1754944e-38, %v1040_v49  ;;  %v9006_v56 = vsel %vm8921_vm10, %v1011_v35, %v1007_v47  ;;  %v1322_v27 = vadd.f32 %v8834_v38, %v1321_v0 }
 0x1fa   :  { %v889_v46 = vadd.f32 %v888_v41, %v8925_v32  ;;  %v1359_v32 = vand.u32 2147483648, %v8877_v31  ;;  %v1045_v49 = vmul.f32 %v8984_v51, %v8890_v34  ;;  %v1357_v35 = vand.u32 2147483647, %v8877_v31 }
 0x1fb   :  { %vm1353_vm10 = vweird.f32 %v8877_v31  ;;  %vm1354_vm15 = vweird.f32 %v8967_v39  ;;  %vm1368_vm2 = vweird.f32 %v8939_v57  ;;  %vm1050_vm5 = vweird.f32 %v8984_v51 }
 0x1fc   :  { %v1220_v19 = vpop.f32.mrf.mxu2  ;;  %v6111_v11 = vmul.f32 -1.442695, %v889_v46  ;;  %v7051_v8 = vpop.eup %7050  ;;  %v1018_v46 = vadd.f32 %v8852_v48, %v1017_v2  ;;  %v1032_v2 = vmul.f32 %v8906_v55, %v1031_v17  ;;  %v9011_v63 = vor.u32 1.1754944e-38, %v1359_v32  ;;  %vm9127_vm6 = vmor %vm1353_vm10, %vm1354_vm15 }
 0x1fd   :  { %v1221_v16 = vadd.f32 %v1220_v19, %v8350_v37  ;;  %v1038_v19 = vand.u32 2147483647, %v8807_v24  ;;  %v7053_v37 = vpop.eup %7052  ;;  %v9015_v13 = vadd.f32 1.0, %v7051_v8  ;;  %v1350_v32 = vsub.f32 1.0, %v1349_v3 }
 0x1fe   :  { %v7055_v4 = vpop.eup %7054  ;;  %7058 = vpow2.f32 %v6111_v11  ;;  %v9028_v47 = vadd.f32 1.0, %v7053_v37  ;;  %v1022_v11 = vsel %vm9021_vm9, %v8852_v48, %v1018_v46  ;;  %v9046_v37 = vpop.permute.xlu1 %241  ;;  %v1326_v48 = vsel %vm9042_vm12, %v8834_v38, %v1322_v27 }
 0x1ff   :  { %v6144_v21 = vmul.f32 -1.442695, %v1221_v16  ;;  %v9026_v0 = vpop.eup %7056  ;;  %vm9034_vm11 = vcmp.eq.f32.partialorder %v1038_v19, 8.507059e+37  ;;  %15405 = vst [vmem:[#allocation33_spill] sm:$0xff] %v9046_v37  ;;  %v9048_v8 = vadd.f32 1.0, %v7055_v4  ;;  %7060 = vpow2.f32 %v6143_v44 }
 0x200   :  { %v1055_v3 = vand.u32 2147483648, %v8890_v34  ;;  %v1033_v46 = vadd.f32 %v8906_v55, %v1032_v2  ;;  %v1046_v19 = vsub.f32 1.0, %v1045_v49  ;;  %v1364_v4 = vmul.f32 %v9026_v0, %v8939_v57 }
 0x201   :  { %v891_v50 = vpop.f32.mrf.mxu1  ;;  %7062 = vpow2.f32 %v6144_v21  ;;  %v1027_v44 = vsel %vm8980_vm3, %v8950_v5, %v1022_v11  ;;  %v1351_v27 = vmul.f32 %v8967_v39, %v1350_v32  ;;  %v1053_v5 = vand.u32 2147483647, %v8890_v34 }
 0x202   :  { %v892_v60 = vadd.f32 %v891_v50, %v8836_v58  ;;  %7064 = vrcp.f32 %v9015_v13  ;;  %v9080_v2 = vsel %vm8998_vm8, %v1330_v9, %v1326_v48  ;;  %v9083_v49 = vor.u32 1.1754944e-38, %v1055_v3 }
 0x203   :  { %7066 = vrcp.f32 %v9028_v47  ;;  %v1037_v32 = vsel %vm9073_vm14, %v8906_v55, %v1033_v46  ;;  %vm9088_vm1 = vcmp.eq.f32.partialorder %v1357_v35, 8.507059e+37  ;;  %v1047_v11 = vmul.f32 %v8984_v51, %v1046_v19 }
 0x204   :  { %v1222_v59 = vpop.f32.mrf.mxu2  ;;  %v7059_v38 = vpop.eup %7058  ;;  %7068 = vrcp.f32 %v9048_v8  ;;  %v6112_v12 = vmul.f32 -1.442695, %v892_v60  ;;  %v1365_v15 = vsub.f32 1.0, %v1364_v4  ;;  %v9095_v48 = vmul.f32 0.0, %v1027_v44 }
 0x205   :  { %v1223_v17 = vadd.f32 %v1222_v59, %v8355_v40  ;;  %v1374_v59 = vand.u32 2147483648, %v8939_v57  ;;  %v9093_v53 = vadd.f32 1.0, %v7059_v38  ;;  %v1352_v55 = vadd.f32 %v8967_v39, %v1351_v27 }
 0x206   :  { %v1070_v46 = vand.u32 2147483648, %v9028_v47  ;;  %v1042_v19 = vsel %vm9034_vm11, %v9002_v14, %v1037_v32  ;;  %vm9108_vm3 = vcmp.eq.f32.partialorder %v1053_v5, 8.507059e+37  ;;  %v1372_v44 = vand.u32 2147483647, %v8939_v57  ;;  %vm9164_vm11 = vmor %vm1049_vm13, %vm1050_vm5 }
 0x207   :  { %v6145_v50 = vmul.f32 -1.442695, %v1223_v17  ;;  %v7061_v17 = vpop.eup %7060  ;;  %v9097_v29 = vor.u32 1.1754944e-38, %v1374_v59  ;;  %v1389_v27 = vand.u32 2147483648, %v9048_v8  ;;  %v1366_v16 = vmul.f32 %v9026_v0, %v1365_v15 }
 0x208   :  { %v7063_v3 = vpop.eup %7062  ;;  %v9116_v59 = vadd.f32 1.0, %v7061_v17  ;;  %v1048_v5 = vadd.f32 %v8984_v51, %v1047_v11  ;;  %v9140_v31 = vmul.f32 0.0, %v1042_v19  ;;  %v1356_v58 = vsel %vm9127_vm6, %v8967_v39, %v1352_v55 }
 0x209   :  { %v893_v21 = vpop.f32.mrf.mxu1  ;;  %7070 = vpow2.f32 %v6145_v50  ;;  %v9101_v35 = vpop.eup %7064  ;;  %v9133_v41 = vadd.f32 1.0, %v7063_v3  ;;  %vm1369_vm8 = vweird.f32 %v9026_v0  ;;  %v9148_v3 = vor.u32 1.1754944e-38, %v1070_v46 }
 0x20a   :  { %v894_v60 = vadd.f32 %v893_v21, %v9046_v37  ;;  %v9113_v38 = vpop.eup %7066  ;;  %7072 = vpow2.f32 %v6112_v12  ;;  %v9121_v21 = vpop.permute.xlu1 %256  ;;  %v1075_v32 = vmul.f32 %v9101_v35, %v9015_v13  ;;  %vm9151_vm9 = vcmp.eq.f32.partialorder %v1372_v44, 8.507059e+37  ;;  %vm9188_vm12 = vmor %vm1368_vm2, %vm1369_vm8 }
 0x20b   :  { %v9119_v50 = vpop.eup %7068  ;;  %15412 = vst [vmem:[#allocation34_spill] sm:$0xff] %v9121_v21  ;;  %7074 = vrcp.f32 %v9093_v53  ;;  %v9136_v12 = vpop.permute.xlu0 %246  ;;  %v1060_v15 = vmul.f32 %v9113_v38, %v9028_v47  ;;  %v9157_v6 = vor.u32 1.1754944e-38, %v1389_v27  ;;  %v1361_v46 = vsel %vm9088_vm1, %v9011_v63, %v1356_v58 }
 0x20c   :  { %v1225_v9 = vpop.f32.mrf.mxu2  ;;  %15415 = vst [vmem:[#allocation35_spill] sm:$0xff] %v9136_v12  ;;  %v6113_v17 = vmul.f32 -1.442695, %v894_v60  ;;  %v1379_v19 = vmul.f32 %v9119_v50, %v9048_v8  ;;  %7076 = vrcp.f32 %v9116_v59  ;;  %v1052_v44 = vsel %vm9164_vm11, %v8984_v51, %v1048_v5 }
 0x20d   :  { %7078 = vrcp.f32 %v9133_v41  ;;  %v1367_v27 = vadd.f32 %v9026_v0, %v1366_v16  ;;  %v1076_v14 = vsub.f32 1.0, %v1075_v32  ;;  %v1061_v1 = vsub.f32 1.0, %v1060_v15 }
 0x20e   :  { %7080 = vpow2.f32 %v6113_v17  ;;  %v1380_v51 = vsub.f32 1.0, %v1379_v19  ;;  %v1083_v24 = vand.u32 2147483647, %v9015_v13  ;;  %v1057_v16 = vsel %vm9108_vm3, %v9083_v49, %v1052_v44 }
 0x20f   :  { %v7071_v60 = vpop.eup %7070  ;;  %vm1064_vm7 = vweird.f32 %v9028_v47  ;;  %vm1079_vm10 = vweird.f32 %v9015_v13  ;;  %v9202_v57 = vmul.f32 %v1361_v46, %v8524_v26  ;;  %v1371_v32 = vsel %vm9188_vm12, %v9026_v0, %v1367_v27 }
 0x210   :  { %v7073_v34 = vpop.eup %7072  ;;  %v9181_v7 = vadd.f32 1.0, %v7071_v60  ;;  %v1077_v15 = vmul.f32 %v9101_v35, %v1076_v14  ;;  %v1062_v39 = vmul.f32 %v9113_v38, %v1061_v1  ;;  %v9221_v44 = vmul.f32 %v9119_v50, %v1380_v51 }
 0x211   :  { %v896_v37 = vpop.f32.mrf.mxu1  ;;  %v9179_v30 = vpop.eup %7074  ;;  %v9199_v5 = vadd.f32 1.0, %v7073_v34  ;;  %vm1080_vm13 = vweird.f32 %v9101_v35  ;;  %vm9224_vm14 = vcmp.eq.f32.partialorder %v1083_v24, 8.507059e+37  ;;  %v1376_v1 = vsel %vm9151_vm9, %v9097_v29, %v1371_v32 }
 0x212   :  { %v897_v11 = vadd.f32 %v896_v37, %v9136_v12  ;;  %v1085_v12 = vand.u32 2147483648, %v9015_v13  ;;  %v1226_v37 = vadd.f32 %v1225_v9, %v8340_v23  ;;  %v1404_v9 = vand.u32 2147483648, %v9116_v59  ;;  %v9207_v17 = vpop.eup %7076  ;;  %v9218_v46 = vpop.permute.xlu1 %251  ;;  %vm9256_vm1 = vmor %vm1079_vm10, %vm1080_vm13 }
 0x213   :  { %v1090_v49 = vmul.f32 %v9179_v30, %v9093_v53  ;;  %v9212_v19 = vpop.eup %7078  ;;  %15422 = vst [vmem:[#allocation36_spill] sm:$0xff] %v9218_v46  ;;  %v1394_v34 = vmul.f32 %v9207_v17, %v9116_v59  ;;  %v1100_v14 = vand.u32 2147483648, %v9093_v53  ;;  %v1078_v51 = vadd.f32 %v9101_v35, %v1077_v15 }
 0x214   :  { %v1227_v55 = vpop.f32.mrf.mxu2  ;;  %7082 = vtanh.f32 %v897_v11  ;;  %v1086_v11 = vor.u32 1.1754944e-38, %v1085_v12  ;;  %v6146_v4 = vmul.f32 -1.442695, %v1226_v37  ;;  %v7081_v0 = vpop.eup %7080  ;;  %v9228_v37 = vor.u32 1.1754944e-38, %v1404_v9 }
 0x215   :  { %v1228_v63 = vadd.f32 %v1227_v55, %v8378_v61  ;;  %7084 = vrcp.f32 %v9181_v7  ;;  %v9216_v55 = vmul.f32 0.0, %v1057_v16  ;;  %v1091_v24 = vsub.f32 1.0, %v1090_v49 }
 0x216   :  { %7086 = vrcp.f32 %v9199_v5  ;;  %v1409_v9 = vmul.f32 %v9212_v19, %v9133_v41  ;;  %v9241_v40 = vadd.f32 1.0, %v7081_v0  ;;  %v9244_v29 = vadd.f32 %v9113_v38, %v1062_v39 }
 0x217   :  { %v6147_v26 = vmul.f32 -1.442695, %v1228_v63  ;;  %7088 = vpow2.f32 %v6146_v4  ;;  %vm1065_vm15 = vweird.f32 %v9113_v38  ;;  %v1098_v16 = vand.u32 2147483647, %v9093_v53 }
 0x218   :  { %v1419_v32 = vand.u32 2147483648, %v9133_v41  ;;  %v1395_v4 = vsub.f32 1.0, %v1394_v34  ;;  %vm1094_vm2 = vweird.f32 %v9093_v53  ;;  %v9261_v39 = vor.u32 1.1754944e-38, %v1100_v14  ;;  %vm9275_vm3 = vmor %vm1064_vm7, %vm1065_vm15 }
 0x219   :  { %v898_v60 = vpop.f32.mrf.mxu1  ;;  %7090 = vpow2.f32 %v6147_v26  ;;  %v9264_v26 = vmul.f32 %v1376_v1, %v8544_v45  ;;  %v1092_v0 = vmul.f32 %v9179_v30, %v1091_v24  ;;  %v1417_v1 = vand.u32 2147483647, %v9133_v41 }
 0x21a   :  { %v7083_v27 = vpop.eup %7082  ;;  %v899_v63 = vadd.f32 %v898_v60, %v9218_v46  ;;  %v1067_v14 = vsel %vm9275_vm3, %v9113_v38, %v9244_v29  ;;  %vm9294_vm6 = vcmp.eq.f32.partialorder %v1098_v16, 8.507059e+37  ;;  %vm1413_vm8 = vweird.f32 %v9133_v41 }
 0x21b   :  { %v1142_v60 = vmul.f32 %v7083_v27, %v8840_v10  ;;  %v9250_v15 = vpop.eup %7084  ;;  %v1082_v10 = vsel %vm9256_vm1, %v9101_v35, %v1078_v51  ;;  %v1410_v27 = vsub.f32 1.0, %v1409_v9  ;;  %v9299_v49 = vor.u32 1.1754944e-38, %v1419_v32 }
 0x21c   :  { %v1230_v58 = vpop.f32.mrf.mxu2  ;;  %7092 = vtanh.f32 %v899_v63  ;;  %v9279_v45 = vpop.eup %7086  ;;  %v9308_v29 = vsel %vm9224_vm14, %v1086_v11, %v1082_v10  ;;  %v9311_v16 = vmul.f32 %v9207_v17, %v1395_v4  ;;  %vm1095_vm9 = vweird.f32 %v9179_v30 }
 0x21d   :  { %v1231_v13 = vadd.f32 %v1230_v58, %v8419_v54  ;;  %7094 = vrcp.f32 %v9241_v40  ;;  %v15429_v58 = vand.u32 2147483647, %v9028_v47  ;;  %v7089_v24 = vpop.eup %7088  ;;  %v9304_v38 = vadd.f32 %v1142_v60, %v9095_v48  ;;  %vm9339_vm13 = vmor %vm1094_vm2, %vm1095_vm9 }
 0x21e   :  { %v1115_v32 = vand.u32 2147483648, %v9199_v5  ;;  %v1411_v48 = vmul.f32 %v9212_v19, %v1410_v27  ;;  %v1434_v60 = vand.u32 2147483648, %v9181_v7  ;;  %vm1384_vm11 = vweird.f32 %v9119_v50 }
 0x21f   :  { %vm9290_vm5 = vcmp.eq.f32.partialorder %v15429_v58, 8.507059e+37  ;;  %15434 = vst [vmem:[#allocation37_spill] sm:$0xff] %v9304_v38  ;;  %7096 = vtanh.f32 %v1231_v13  ;;  %v7091_v47 = vpop.eup %7090  ;;  %v1105_v11 = vmul.f32 %v9279_v45, %v9199_v5  ;;  %vm1414_vm12 = vweird.f32 %v9212_v19 }
 0x220   :  { %vm9325_vm7 = vcmp.eq.f32.partialorder %v1417_v1, 8.507059e+37  ;;  %v9329_v13 = vadd.f32 1.0, %v7089_v24  ;;  %vm1383_vm10 = vweird.f32 %v9048_v8  ;;  %v9343_v1 = vor.u32 1.1754944e-38, %v1115_v32  ;;  %vm9378_vm1 = vmor %vm1413_vm8, %vm1414_vm12 }
 0x221   :  { %v901_v63 = vpop.f32.mrf.mxu1  ;;  %v1412_v53 = vadd.f32 %v9212_v19, %v1411_v48  ;;  %vm1428_vm14 = vweird.f32 %v9181_v7  ;;  %v1432_v32 = vand.u32 2147483647, %v9181_v7  ;;  %v1106_v46 = vsub.f32 1.0, %v1105_v11  ;;  %vm9419_vm9 = vmor %vm1383_vm10, %vm1384_vm11 }
 0x222   :  { %v902_v35 = vadd.f32 %v901_v63, %v9121_v21  ;;  %v1424_v63 = vmul.f32 %v9250_v15, %v9181_v7  ;;  %v7093_v58 = vpop.eup %7092  ;;  %v1093_v21 = vadd.f32 %v9179_v30, %v1092_v0  ;;  %vm1399_vm15 = vweird.f32 %v9207_v17 }
 0x223   :  { %v1143_v4 = vmul.f32 %v7093_v58, %v8858_v22  ;;  %v9350_v58 = vpop.permute.xlu2 %261  ;;  %v1130_v11 = vand.u32 2147483648, %v9241_v40  ;;  %vm1110_vm2 = vweird.f32 %v9279_v45  ;;  %vm1398_vm3 = vweird.f32 %v9116_v59 }
 0x224   :  { %v1232_v34 = vpop.f32.mrf.mxu2  ;;  %7098 = vtanh.f32 %v902_v35  ;;  %v1425_v27 = vsub.f32 1.0, %v1424_v63  ;;  %v9332_v35 = vpop.eup %7094  ;;  %15440 = vst [vmem:[#allocation39_spill] sm:$0xff] %v9350_v58  ;;  %v1097_v12 = vsel %vm9339_vm13, %v9179_v30, %v1093_v21  ;;  %v1072_v21 = vsel %vm9290_vm5, %v9148_v3, %v1067_v14 }
 0x225   :  { %v1233_v10 = vadd.f32 %v1232_v34, %v8480_v62  ;;  %7100 = vtanh.f32 %v9304_v38  ;;  %v9345_v34 = vadd.f32 1.0, %v7091_v47  ;;  %v9348_v24 = vadd.f32 %v1143_v4, %v9140_v31  ;;  %v7097_v63 = vpop.eup %7096 }
 0x226   :  { %v9358_v38 = vor.u32 1.1754944e-38, %v1434_v60  ;;  %v1476_v31 = vmul.f32 %v7097_v63, %v8894_v25  ;;  %v1426_v22 = vmul.f32 %v9250_v15, %v1425_v27  ;;  %v1120_v30 = vmul.f32 %v9332_v35, %v9241_v40 }
 0x227   :  { %15439 = vst [vmem:[#allocation38_spill] sm:$0xff] %v9348_v24  ;;  %7102 = vtanh.f32 %v1233_v10  ;;  %v1102_v25 = vsel %vm9294_vm6, %v9261_v39, %v1097_v12  ;;  %v1128_v60 = vand.u32 2147483647, %v9241_v40  ;;  %v1416_v39 = vsel %vm9378_vm1, %v9212_v19, %v1412_v53  ;;  %vm9479_vm1 = vmor %vm1398_vm3, %vm1399_vm15 }
 0x228   :  { %7104 = vtanh.f32 %v9348_v24  ;;  %v9390_v41 = vadd.f32 %v1476_v31, %v9202_v57  ;;  %v1107_v12 = vmul.f32 %v9279_v45, %v1106_v46  ;;  %v1141_v63 = vmul.f32 0.0, %v1072_v21 }
 0x229   :  { %v903_v47 = vpop.f32.mrf.mxu1  ;;  %7106 = vrcp.f32 %v9329_v13  ;;  %vm1109_vm5 = vweird.f32 %v9199_v5  ;;  %v1427_v19 = vadd.f32 %v9250_v15, %v1426_v22  ;;  %vm1429_vm6 = vweird.f32 %v9250_v15 }
 0x22a   :  { %v904_v4 = vadd.f32 %v903_v47, %v9350_v58  ;;  %v7099_v10 = vpop.eup %7098  ;;  %7108 = vrcp.f32 %v9345_v34  ;;  %v1382_v47 = vadd.f32 %v9119_v50, %v9221_v44  ;;  %v1121_v57 = vsub.f32 1.0, %v1120_v30  ;;  %vm9438_vm11 = vmor %vm1428_vm14, %vm1429_vm6 }
 0x22b   :  { %v7101_v14 = vpop.eup %7100  ;;  %v1144_v27 = vmul.f32 %v7099_v10, %v8931_v18  ;;  %v1421_v46 = vsel %vm9325_vm7, %v9299_v49, %v1416_v39  ;;  %vm9405_vm8 = vcmp.eq.f32.partialorder %v1432_v32, 8.507059e+37  ;;  %v1387_v44 = vand.u32 2147483647, %v9048_v8 }
 0x22c   :  { %v1235_v3 = vpop.f32.mrf.mxu2  ;;  %7110 = vtanh.f32 %v904_v4  ;;  %v15445_v4 = vsub.f32 1.0, %v8971_v33  ;;  %vm1124_vm12 = vweird.f32 %v9241_v40  ;;  %v1154_v49 = vmul.f32 %v7101_v14, %v9308_v29 }
 0x22d   :  { %v1236_v51 = vadd.f32 %v1235_v3, %v8410_v43  ;;  %v7103_v9 = vpop.eup %7102  ;;  %v9432_v30 = vadd.f32 %v9279_v45, %v1107_v12  ;;  %vm1125_vm7 = vweird.f32 %v9332_v35  ;;  %v9444_v29 = vadd.f32 %v1144_v27, %v9216_v55 }
 0x22e   :  { %v1477_v53 = vmul.f32 %v7103_v9, %v8991_v36  ;;  %v7105_v31 = vpop.eup %7104  ;;  %v1336_v10 = vmul.f32 %v8934_v42, %v15445_v4  ;;  %v1122_v7 = vmul.f32 %v9332_v35, %v1121_v57  ;;  %vm1388_vm10 = vcmp.eq.f32.partialorder %v1387_v44, 8.507059e+37 }
 0x22f   :  { %7112 = vtanh.f32 %v1236_v51  ;;  %v9413_v22 = vpop.eup %7106  ;;  %v1155_v0 = vmul.f32 %v7105_v31, %v1102_v25  ;;  %15451 = vst [vmem:[#allocation41_spill] sm:$0xff] %v9444_v29  ;;  %v1431_v25 = vsel %vm9438_vm11, %v9250_v15, %v1427_v19  ;;  %v15452_v39 = vand.u32 2147483647, %v9199_v5 }
 0x230   :  { %7114 = vtanh.f32 %v9390_v41  ;;  %v9427_v33 = vadd.f32 %v1477_v53, %v9264_v26  ;;  %v9429_v32 = vpop.eup %7108  ;;  %v1386_v26 = vsel %vm9419_vm9, %v9119_v50, %v1382_v47  ;;  %v1439_v3 = vmul.f32 %v9413_v22, %v9329_v13  ;;  %vm9490_vm9 = vmor %vm1109_vm5, %vm1110_vm2 }
 0x231   :  { %v6709_v48 = vpack.c.bf16 %v1155_v0, %v1154_v49  ;;  %v1397_v50 = vadd.f32 %v9207_v17, %v9311_v16  ;;  %vm9461_vm13 = vcmp.eq.f32.partialorder %v15452_v39, 8.507059e+37  ;;  %v1454_v15 = vmul.f32 %v9429_v32, %v9345_v34  ;;  %vm9514_vm2 = vmor %vm1124_vm12, %vm1125_vm7 }
 0x232   :  { %15448 = vst [vmem:[#allocation40_spill] sm:$0xff] %v9427_v33  ;;  %v7111_v21 = vpop.eup %7110  ;;  %7116 = vtanh.f32 %v9427_v33  ;;  %v1391_v9 = vsel %vm1388_vm10, %v9157_v6, %v1386_v26  ;;  %vm1339_vm14 = vweird.f32 %v8934_v42  ;;  %v1402_v47 = vand.u32 2147483647, %v9116_v59  ;;  %v15514_v33 = vld [vmem:[#allocation33_spill] sm:$0xff] }
 0x233   :  { %v1145_v55 = vmul.f32 %v7111_v21, %v9006_v56  ;;  %6900 = vst [vmem:[#allocation3 + $0x10] sm:$0xff] %v6709_v48   ;;  %v1337_v56 = vadd.f32 %v8934_v42, %v1336_v10  ;;  %7118 = vtanh.f32 %v9444_v29  ;;  %v1123_v57 = vadd.f32 %v9332_v35, %v1122_v7 }
 0x234   :  { %v1237_v14 = vpop.f32.mrf.mxu2  ;;  %vm1338_vm6 = vweird.f32 %v8843_v28  ;;  %v1342_v31 = vand.u32 2147483647, %v8843_v28  ;;  %v1401_v44 = vsel %vm9479_vm1, %v9207_v17, %v1397_v50  ;;  %v1436_v10 = vsel %vm9405_vm8, %v9358_v38, %v1431_v25 }
 0x235   :  { %v1238_v12 = vadd.f32 %v1237_v14, %v8580_v52  ;;  %v7113_v27 = vpop.eup %7112  ;;  %v9471_v16 = vadd.f32 %v1145_v55, %v1141_v63  ;;  %v1344_v63 = vand.u32 2147483648, %v8843_v28  ;;  %v1440_v5 = vsub.f32 1.0, %v1439_v3  ;;  %vm9506_vm15 = vmor %vm1338_vm6, %vm1339_vm14  ;;  %v15465_v55 = vld [vmem:[#allocation21_spill] sm:$0xff] }
 0x236   :  { %v7115_v19 = vpop.eup %7114  ;;  %v1478_v59 = vmul.f32 %v7113_v27, %v9080_v2  ;;  %v1455_v36 = vsub.f32 1.0, %v1454_v15  ;;  %v1474_v49 = vmul.f32 %v1391_v9, %v8627_v20  ;;  %v1341_v20 = vsel %vm9506_vm15, %v8934_v42, %v1337_v56  ;;  %v15470_v56 = vld [vmem:[#allocation24_spill] sm:$0xff] }
 0x237   :  { %15455 = vst [vmem:[#allocation42_spill] sm:$0xff] %v9471_v16  ;;  %7120 = vtanh.f32 %v1238_v12  ;;  %v1488_v2 = vmul.f32 %v7115_v19, %v1421_v46  ;;  %vm1403_vm3 = vcmp.eq.f32.partialorder %v1402_v47, 8.507059e+37  ;;  %v1112_v38 = vsel %vm9490_vm9, %v9279_v45, %v9432_v30 }
 0x238   :  { %7122 = vtanh.f32 %v9471_v16  ;;  %v7117_v4 = vpop.eup %7116  ;;  %v1127_v18 = vsel %vm9514_vm2, %v9332_v35, %v1123_v57  ;;  %v1345_v8 = vor.u32 1.1754944e-38, %v1344_v63  ;;  %v1406_v26 = vsel %vm1403_vm3, %v9228_v37, %v1401_v44  ;;  %v6184_v37 = vld [vmem:[%s15073_s0 + $0x10] sm:$0xff]   ;;  %v6254_v57 = vld [vmem:[%s15073_s0 + $0x18] sm:$0xff]  }
 0x239   :  { %v1489_v17 = vmul.f32 %v7117_v4, %v1436_v10  ;;  %v7119_v21 = vpop.eup %7118  ;;  %v1131_v46 = vor.u32 1.1754944e-38, %v1130_v11  ;;  %v9531_v7 = vadd.f32 %v1478_v59, %v1474_v49  ;;  %vm1343_vm5 = vcmp.eq.f32.partialorder %v1342_v31, 8.507059e+37  ;;  %1844 = vst [vmem:[#allocation2] sm:$0xff] %v6184_v37   ;;  %v7974_v37 = vld [vmem:[%s15079_s3 + $0x38] sm:$0xff] }
 0x23a   :  { %vm1129_vm8 = vcmp.eq.f32.partialorder %v1128_v60, 8.507059e+37  ;;  %v1441_v45 = vmul.f32 %v9413_v22, %v1440_v5  ;;  %v1456_v30 = vmul.f32 %v9429_v32, %v1455_v36  ;;  %v1346_v35 = vsel %vm1343_vm5, %v1345_v8, %v1341_v20  ;;  %v7962_v20 = vld [vmem:[%s15079_s3 + $0x8] sm:$0xff]  ;;  %v7965_v8 = vld [vmem:[%s15074_s1 + $0x10] sm:$0xff] }
 0x23b   :  { %v6699_v25 = vpack.c.bf16 %v1489_v17, %v1488_v2  ;;  %15464 = vst [vmem:[#allocation43_spill] sm:$0xff] %v9531_v7  ;;  %v1117_v11 = vsel %vm9461_vm13, %v9343_v1, %v1112_v38  ;;  %v1132_v3 = vsel %vm1129_vm8, %v1131_v46, %v1127_v18  ;;  %v1475_v14 = vmul.f32 %v1406_v26, %v15465_v55  ;;  %v7960_v2 = vld [vmem:[%s15079_s3] sm:$0xff]  ;;  %v7963_v38 = vld [vmem:[%s15074_s1 + $0x8] sm:$0xff]  ;;  %v7964_v18 = vld [vmem:[%s15079_s3 + $0x10] sm:$0xff] }
 0x23c   :  { %v1156_v60 = vmul.f32 %v7119_v21, %v1117_v11  ;;  %vm1444_vm12 = vweird.f32 %v9413_v22  ;;  %7124 = vtanh.f32 %v9531_v7  ;;  %v1442_v15 = vadd.f32 %v9413_v22, %v1441_v45  ;;  %v7961_v17 = vld [vmem:[%s15074_s1] sm:$0xff]  ;;  %v7966_v26 = vld [vmem:[%s15079_s3 + $0x18] sm:$0xff]  ;;  %v7971_v45 = vld [vmem:[%s15074_s1 + $0x28] sm:$0xff] }
 0x23d   :  { %v7121_v42 = vpop.eup %7120  ;;  %6700 = vst [vmem:[#allocation3] sm:$0xff] %v6699_v25   ;;  %v1457_v51 = vadd.f32 %v9429_v32, %v1456_v30  ;;  %vm1459_vm11 = vweird.f32 %v9429_v32  ;;  %vm1443_vm7 = vweird.f32 %v9329_v13  ;;  %v1449_v9 = vand.u32 2147483648, %v9329_v13  ;;  %v7967_v21 = vld [vmem:[%s15074_s1 + $0x18] sm:$0xff]  ;;  %v7968_v46 = vld [vmem:[%s15079_s3 + $0x20] sm:$0xff]  ;;  %v7972_v30 = vld [vmem:[%s15079_s3 + $0x30] sm:$0xff] }
 0x23e   :  { %v7123_v48 = vpop.eup %7122  ;;  %v1479_v40 = vmul.f32 %v7121_v42, %v1346_v35  ;;  %6902 = vst [vmem:[#allocation2 + $0x8] sm:$0xff] %v6699_v25   ;;  %v1464_v12 = vand.u32 2147483648, %v9345_v34  ;;  %vm9555_vm10 = vmor %vm1443_vm7, %vm1444_vm12  ;;  %v1447_v27 = vand.u32 2147483647, %v9329_v13  ;;  %vm1458_vm13 = vweird.f32 %v9345_v34  ;;  %v7969_v25 = vld [vmem:[%s15074_s1 + $0x20] sm:$0xff]  ;;  %v7970_v42 = vld [vmem:[%s15079_s3 + $0x28] sm:$0xff] }
 0x23f   :  { %v1157_v50 = vmul.f32 %v7123_v48, %v1132_v3  ;;  %v1462_v47 = vand.u32 2147483647, %v9345_v34  ;;  %vm1460_vm14 = vmor %vm1458_vm13, %vm1459_vm11  ;;  %v1446_v19 = vsel %vm9555_vm10, %v9413_v22, %v1442_v15  ;;  %v1450_v53 = vor.u32 1.1754944e-38, %v1449_v9  ;;  %v7973_v35 = vld [vmem:[%s15074_s1 + $0x30] sm:$0xff]  ;;  %v7975_v48 = vld [vmem:[%s15074_s1 + $0x38] sm:$0xff] }
 0x240   :  { %v9546_v39 = vadd.f32 %v1479_v40, %v1475_v14  ;;  %v1461_v6 = vsel %vm1460_vm14, %v9429_v32, %v1457_v51  ;;  %v1465_v59 = vor.u32 1.1754944e-38, %v1464_v12  ;;  %vm1448_vm1 = vcmp.eq.f32.partialorder %v1447_v27, 8.507059e+37  ;;  %v6634_v13 = vld [vmem:[#allocation2] sm:$0xff]  ;;  %v6632_v32 = vld [vmem:[#allocation3 + $0x10] sm:$0xff] }
 0x241   :  { %v6714_v1 = vpack.c.bf16 %v1157_v50, %v1156_v60  ;;  %vm1463_vm6 = vcmp.eq.f32.partialorder %v1462_v47, 8.507059e+37  ;;  %v1451_v34 = vsel %vm1448_vm1, %v1450_v53, %v1446_v19  ;;  %2527 = vst [vmem:[#allocation2] sm:$0xff] %v6254_v57   ;;  %v15469_v51 = vld [vmem:[#allocation7_spill] sm:$0xff]  ;;  %v15471_v19 = vld [vmem:[#allocation10_spill] sm:$0xff]  ;;  %v15472_v57 = vld [vmem:[#allocation25_spill] sm:$0xff] }
 0x242   :  { %15466 = vst [vmem:[#allocation21_spill] sm:$0xff] %v9546_v39  ;;  %7126 = vtanh.f32 %v9546_v39  ;;  %v7125_v63 = vpop.eup %7124  ;;  %v1466_v44 = vsel %vm1463_vm6, %v1465_v59, %v1461_v6  ;;  %v15473_v53 = vld [vmem:[#allocation5_spill] sm:$0xff] }
 0x243   :  { %6901 = vst [vmem:[#allocation3 + $0x18] sm:$0xff] %v6714_v1   ;;  %v1490_v4 = vmul.f32 %v7125_v63, %v1451_v34 }
 0x244   :  { %v6630_v0 = vld [vmem:[#allocation3] sm:$0xff] }
 0x245   :  { %v6635_v28 = vld [vmem:[#allocation2 + $0x8] sm:$0xff] }
 0x248   :  { %v7127_v31 = vpop.eup %7126 }
 0x249   :  { %v1491_v10 = vmul.f32 %v7127_v31, %v1466_v44  ;;  %v15474_v31 = vld [vmem:[#allocation26_spill] sm:$0xff] }
 0x24a   :  { %v6633_v5 = vld [vmem:[#allocation3 + $0x18] sm:$0xff] }
 0x24b   :  { %v6704_v22 = vpack.c.bf16 %v1491_v10, %v1490_v4  ;;  %1544 = vmatpush.bf16.msra.mxu3 %v6633_v5  ;;  %v15475_v4 = vld [vmem:[#allocation8_spill] sm:$0xff] }
 0x24d   :  { %6899 = vst [vmem:[#allocation3 + $0x8] sm:$0xff] %v6704_v22  }
 0x24e   :  { %6903 = vst [vmem:[#allocation2 + $0x10] sm:$0xff] %v6704_v22   ;;  %v15476_v22 = vld [vmem:[#allocation22_spill] sm:$0xff] }
 0x24f   :  { %1545 = vmatpush.bf16.msra.mxu3 %v6632_v32 }
 0x254   :  { %v6631_v36 = vld [vmem:[#allocation3 + $0x8] sm:$0xff] }
 0x255   :  { %v6636_v49 = vld [vmem:[#allocation2 + $0x10] sm:$0xff]  ;;  %1546 = vmatpush.bf16.msra.mxu3 %v6631_v36 }
 0x256   :  { %1879 = vmatpush.bf16.msrb.mxu0 %v6636_v49 }
 0x259   :  { %1547 = vmatpush.bf16.msra.mxu3 %v6630_v0 }
 0x25a   :  { %1880 = vmatpush.bf16.msrb.mxu0 %v6635_v28 }
 0x25c   :  { %6164 = vmatmul.msk.bf16.vlgmr.msra.gmra.mxu3 %vm15178_vm4, %v7960_v2  ;;  %v15477_v2 = vld [vmem:[#allocation11_spill] sm:$0xff] }
 0x25e   :  { %1881 = vmatpush.bf16.msrb.mxu0 %v6634_v13 }
 0x261   :  { %6198 = vmatmul.msk.bf16.vlgmr.msrb.gmra.mxu0 %vm422_vm0, %v7961_v17 }
 0x26c   :  { %6165 = vmatmul.msk.bf16.gmra.mxu3 %vm15178_vm4, %v7962_v20 }
 0x271   :  { %6199 = vmatmul.msk.bf16.gmra.mxu0 %vm422_vm0, %v7963_v38  ;;  %v15478_v38 = vld [vmem:[#allocation28_spill] sm:$0xff] }
 0x27c   :  { %6166 = vmatmul.msk.bf16.gmra.mxu3 %vm15178_vm4, %v7964_v18 }
 0x281   :  { %6200 = vmatmul.msk.bf16.gmra.mxu0 %vm422_vm0, %v7965_v8 }
 0x28c   :  { %6167 = vmatmul.msk.bf16.gmra.mxu3 %vm15178_vm4, %v7966_v26 }
 0x291   :  { %6201 = vmatmul.msk.bf16.gmra.mxu0 %vm422_vm0, %v7967_v21  ;;  %v15479_v21 = vld [vmem:[#allocation12_spill] sm:$0xff] }
 0x29c   :  { %6168 = vmatmul.msk.bf16.gmra.mxu3 %vm15178_vm4, %v7968_v46 }
 0x2a1   :  { %6202 = vmatmul.msk.bf16.gmra.mxu0 %vm422_vm0, %v7969_v25 }
 0x2ac   :  { %6169 = vmatmul.msk.bf16.gmra.mxu3 %vm15178_vm4, %v7970_v42  ;;  %v15480_v42 = vld [vmem:[#allocation29_spill] sm:$0xff] }
 0x2b1   :  { %6203 = vmatmul.msk.bf16.gmra.mxu0 %vm422_vm0, %v7971_v45 }
 0x2bc   :  { %6170 = vmatmul.msk.bf16.gmra.mxu3 %vm15178_vm4, %v7972_v30 }
 0x2c1   :  { %6204 = vmatmul.msk.bf16.gmra.mxu0 %vm422_vm0, %v7973_v35 }
 0x2cc   :  { %6171 = vmatmul.msk.bf16.gmra.mxu3 %vm15178_vm4, %v7974_v37 }
 0x2d1   :  { %6205 = vmatmul.msk.bf16.gmra.mxu0 %vm422_vm0, %v7975_v48 }
 0x2de   :  { %v1883_v11 = vpop.f32.mrf.mxu0 }
 0x2df   :  { %v1549_v3 = vpop.f32.mrf.mxu3  ;;  %v1884_v1 = vadd.f32 %v1883_v11, %v15469_v51 }
 0x2e0   :  { %v1550_v27 = vadd.f32 %v1549_v3, %v15470_v56 }
 0x2e1   :  { %v6206_v47 = vmul.f32 -1.442695, %v1884_v1 }
 0x2e2   :  { %v6172_v13 = vmul.f32 -1.442695, %v1550_v27 }
 0x2e3   :  { %7128 = vpow2.f32 %v6206_v47 }
 0x2e4   :  { %7130 = vpow2.f32 %v6172_v13 }
 0x2e6   :  { %v1885_v55 = vpop.f32.mrf.mxu0 }
 0x2e7   :  { %v1551_v14 = vpop.f32.mrf.mxu3  ;;  %v1886_v6 = vadd.f32 %v1885_v55, %v15471_v19 }
 0x2e8   :  { %v1552_v63 = vadd.f32 %v1551_v14, %v15472_v57 }
 0x2e9   :  { %v6207_v44 = vmul.f32 -1.442695, %v1886_v6  ;;  %v7129_v26 = vpop.eup %7128  ;;  %v15483_v6 = vld [vmem:[#allocation6_spill] sm:$0xff] }
 0x2ea   :  { %v6173_v5 = vmul.f32 -1.442695, %v1552_v63  ;;  %v7131_v35 = vpop.eup %7130  ;;  %v9645_v37 = vadd.f32 1.0, %v7129_v26  ;;  %v15488_v26 = vld [vmem:[#allocation9_spill] sm:$0xff] }
 0x2eb   :  { %7132 = vpow2.f32 %v6207_v44 }
 0x2ec   :  { %7134 = vpow2.f32 %v6173_v5  ;;  %vm1976_vm9 = vweird.f32 %v9645_v37 }
 0x2ee   :  { %v1888_v40 = vpop.f32.mrf.mxu0 }
 0x2ef   :  { %v1554_v60 = vpop.f32.mrf.mxu3  ;;  %v1889_v59 = vadd.f32 %v1888_v40, %v15473_v53 }
 0x2f0   :  { %v1555_v34 = vadd.f32 %v1554_v60, %v15474_v31 }
 0x2f1   :  { %v6208_v49 = vmul.f32 -1.442695, %v1889_v59  ;;  %v7133_v11 = vpop.eup %7132 }
 0x2f2   :  { %v6174_v28 = vmul.f32 -1.442695, %v1555_v34  ;;  %v7135_v14 = vpop.eup %7134  ;;  %v9650_v1 = vadd.f32 1.0, %v7133_v11 }
 0x2f3   :  { %7136 = vpow2.f32 %v6208_v49 }
 0x2f4   :  { %7138 = vpow2.f32 %v6174_v28  ;;  %vm1991_vm11 = vweird.f32 %v9650_v1 }
 0x2f6   :  { %v1890_v50 = vpop.f32.mrf.mxu0 }
 0x2f7   :  { %v1556_v15 = vpop.f32.mrf.mxu3  ;;  %v1891_v10 = vadd.f32 %v1890_v50, %v15475_v4  ;;  %v9647_v50 = vadd.f32 1.0, %v7131_v35 }
 0x2f8   :  { %v1557_v32 = vadd.f32 %v1556_v15, %v15476_v22 }
 0x2f9   :  { %v6209_v20 = vmul.f32 -1.442695, %v1891_v10  ;;  %v7137_v60 = vpop.eup %7136  ;;  %v1646_v52 = vand.u32 2147483647, %v9647_v50  ;;  %vm1642_vm5 = vweird.f32 %v9647_v50 }
 0x2fa   :  { %v6175_v8 = vmul.f32 -1.442695, %v1557_v32  ;;  %v7139_v15 = vpop.eup %7138  ;;  %v9654_v47 = vadd.f32 1.0, %v7137_v60  ;;  %v15487_v32 = vld [vmem:[#allocation23_spill] sm:$0xff] }
 0x2fb   :  { %7140 = vpow2.f32 %v6209_v20  ;;  %v9658_v59 = vadd.f32 1.0, %v7139_v15  ;;  %vm9887_vm12 = vcmp.eq.f32.partialorder %v1646_v52, 8.507059e+37 }
 0x2fc   :  { %7142 = vpow2.f32 %v6175_v8  ;;  %15482 = vst [vmem:[#allocation45_spill] sm:$0xff] %v9654_v47 }
 0x2fd   :  { %15484 = vst [vmem:[#allocation46_spill] sm:$0xff] %v9658_v59 }
 0x2fe   :  { %v1893_v9 = vpop.f32.mrf.mxu0 }
 0x2ff   :  { %v1559_v12 = vpop.f32.mrf.mxu3  ;;  %v1894_v17 = vadd.f32 %v1893_v9, %v15477_v2  ;;  %v15503_v2 = vld [vmem:[#allocation32_spill] sm:$0xff] }
 0x300   :  { %v1560_v18 = vadd.f32 %v1559_v12, %v15478_v38  ;;  %v9652_v12 = vadd.f32 1.0, %v7135_v14 }
 0x301   :  { %v6210_v25 = vmul.f32 -1.442695, %v1894_v17  ;;  %v7141_v9 = vpop.eup %7140 }
 0x302   :  { %v6176_v30 = vmul.f32 -1.442695, %v1560_v18  ;;  %15481 = vst [vmem:[#allocation44_spill] sm:$0xff] %v9652_v12  ;;  %v7143_v27 = vpop.eup %7142  ;;  %v9661_v34 = vadd.f32 1.0, %v7141_v9 }
 0x303   :  { %7144 = vpow2.f32 %v6210_v25  ;;  %v9664_v5 = vadd.f32 1.0, %v7143_v27  ;;  %v15492_v27 = vld [vmem:[#allocation14_spill] sm:$0xff] }
 0x304   :  { %7146 = vpow2.f32 %v6176_v30  ;;  %15485 = vst [vmem:[#allocation47_spill] sm:$0xff] %v9661_v34  ;;  %v15489_v30 = vld [vmem:[#allocation27_spill] sm:$0xff] }
 0x305   :  { %7148 = vrcp.f32 %v9645_v37  ;;  %15486 = vst [vmem:[#allocation48_spill] sm:$0xff] %v9664_v5 }
 0x306   :  { %v1895_v36 = vpop.f32.mrf.mxu0 }
 0x307   :  { %v1561_v0 = vpop.f32.mrf.mxu3  ;;  %v1896_v46 = vadd.f32 %v1895_v36, %v15479_v21 }
 0x308   :  { %v1562_v45 = vadd.f32 %v1561_v0, %v15480_v42 }
 0x309   :  { %v6211_v3 = vmul.f32 -1.442695, %v1896_v46  ;;  %v7145_v13 = vpop.eup %7144 }
 0x30a   :  { %v6177_v40 = vmul.f32 -1.442695, %v1562_v45  ;;  %v7147_v10 = vpop.eup %7146  ;;  %v9671_v20 = vadd.f32 1.0, %v7145_v13 }
 0x30b   :  { %7150 = vpow2.f32 %v6211_v3  ;;  %v9667_v0 = vpop.eup %7148  ;;  %v9674_v8 = vadd.f32 1.0, %v7147_v10  ;;  %v15494_v10 = vld [vmem:[#allocation31_spill] sm:$0xff] }
 0x30c   :  { %7152 = vpow2.f32 %v6177_v40  ;;  %v2042_v31 = vand.u32 2147483648, %v9671_v20  ;;  %vm1977_vm15 = vweird.f32 %v9667_v0  ;;  %vm2036_vm13 = vweird.f32 %v9671_v20 }
 0x30d   :  { %7154 = vrcp.f32 %v9647_v50  ;;  %v1708_v53 = vand.u32 2147483648, %v9674_v8  ;;  %vm9874_vm8 = vmor %vm1976_vm9, %vm1977_vm15 }
 0x30e   :  { %v1898_v48 = vpop.f32.mrf.mxu0  ;;  %7156 = vrcp.f32 %v9650_v1  ;;  %v9767_v39 = vor.u32 1.1754944e-38, %v2042_v31 }
 0x30f   :  { %v1564_v55 = vpop.f32.mrf.mxu3  ;;  %v1899_v63 = vadd.f32 %v1898_v48, %v15483_v6  ;;  %7158 = vrcp.f32 %v9652_v12 }
 0x310   :  { %v1565_v36 = vadd.f32 %v1564_v55, %v15487_v32  ;;  %7160 = vrcp.f32 %v9654_v47  ;;  %v15500_v32 = vld [vmem:[#allocation15_spill] sm:$0xff] }
 0x311   :  { %v6212_v28 = vmul.f32 -1.442695, %v1899_v63  ;;  %v7151_v17 = vpop.eup %7150  ;;  %7162 = vrcp.f32 %v9658_v59 }
 0x312   :  { %v7153_v18 = vpop.eup %7152  ;;  %7164 = vrcp.f32 %v9661_v34  ;;  %v6178_v45 = vmul.f32 -1.442695, %v1565_v36  ;;  %v9683_v11 = vadd.f32 1.0, %v7151_v17 }
 0x313   :  { %v9677_v25 = vpop.eup %7154  ;;  %7166 = vrcp.f32 %v9664_v5  ;;  %v9688_v55 = vadd.f32 1.0, %v7153_v18 }
 0x314   :  { %v9681_v48 = vpop.eup %7156  ;;  %7168 = vpow2.f32 %v6212_v28  ;;  %v9704_v28 = vmul.f32 %v9667_v0, %v9645_v37  ;;  %v2057_v51 = vand.u32 2147483648, %v9683_v11  ;;  %vm1643_vm3 = vweird.f32 %v9677_v25 }
 0x315   :  { %v9685_v3 = vpop.eup %7158  ;;  %7170 = vrcp.f32 %v9671_v20  ;;  %vm1992_vm10 = vweird.f32 %v9681_v48  ;;  %vm9930_vm6 = vmor %vm1642_vm5, %vm1643_vm3  ;;  %vm1702_vm5 = vweird.f32 %v9674_v8 }
 0x316   :  { %v1900_v44 = vpop.f32.mrf.mxu0  ;;  %v9690_v14 = vpop.eup %7160  ;;  %7172 = vrcp.f32 %v9674_v8  ;;  %vm9965_vm3 = vmor %vm1991_vm11, %vm1992_vm10 }
 0x317   :  { %v1566_v49 = vpop.f32.mrf.mxu3  ;;  %v1901_v46 = vadd.f32 %v1900_v44, %v15488_v26  ;;  %15490 = vst [vmem:[#allocation49_spill] sm:$0xff] %v9690_v14  ;;  %v9693_v15 = vpop.eup %7162  ;;  %7174 = vpow2.f32 %v6178_v45  ;;  %v9713_v45 = vmul.f32 %v9681_v48, %v9650_v1 }
 0x318   :  { %v1567_v35 = vadd.f32 %v1566_v49, %v15489_v30  ;;  %15491 = vst [vmem:[#allocation50_spill] sm:$0xff] %v9693_v15  ;;  %v9696_v44 = vpop.eup %7164  ;;  %7176 = vrcp.f32 %v9683_v11  ;;  %v9736_v42 = vmul.f32 %v9693_v15, %v9658_v59 }
 0x319   :  { %v6213_v40 = vmul.f32 -1.442695, %v1901_v46  ;;  %15493 = vst [vmem:[#allocation51_spill] sm:$0xff] %v9696_v44  ;;  %v9700_v49 = vpop.eup %7166  ;;  %7178 = vrcp.f32 %v9688_v55  ;;  %v9709_v46 = vmul.f32 %v9677_v25, %v9647_v50 }
 0x31a   :  { %v6179_v9 = vmul.f32 -1.442695, %v1567_v35  ;;  %15495 = vst [vmem:[#allocation52_spill] sm:$0xff] %v9700_v49  ;;  %v7169_v18 = vpop.eup %7168  ;;  %v9751_v22 = vmul.f32 %v9700_v49, %v9664_v5  ;;  %v9779_v49 = vor.u32 1.1754944e-38, %v2057_v51  ;;  %v1982_v51 = vand.u32 2147483648, %v9645_v37 }
 0x31b   :  { %7180 = vpow2.f32 %v6213_v40  ;;  %15498 = vst [vmem:[#allocation55_spill] sm:$0xff] %v9736_v42 }
 0x31c   :  { %7182 = vpow2.f32 %v6179_v9  ;;  %v9740_v9 = vmul.f32 %v9696_v44, %v9661_v34  ;;  %15501 = vst [vmem:[#allocation57_spill] sm:$0xff] %v9751_v22 }
 0x31d   :  { %15504 = vst [vmem:[#allocation59_spill] sm:$0xff] %v9779_v49 }
 0x31e   :  { %v1903_v60 = vpop.f32.mrf.mxu0  ;;  %15499 = vst [vmem:[#allocation56_spill] sm:$0xff] %v9740_v9  ;;  %v9814_v9 = vor.u32 1.1754944e-38, %v1982_v51 }
 0x31f   :  { %v1904_v63 = vadd.f32 %v1903_v60, %v15492_v27  ;;  %v1569_v13 = vpop.f32.mrf.mxu3  ;;  %v9715_v60 = vpop.eup %7170  ;;  %v9728_v27 = vadd.f32 1.0, %v7169_v18 }
 0x320   :  { %v1570_v36 = vadd.f32 %v1569_v13, %v15494_v10  ;;  %v9719_v13 = vmul.f32 %v9685_v3, %v9652_v12  ;;  %v9725_v10 = vpop.eup %7172  ;;  %vm2037_vm7 = vweird.f32 %v9715_v60 }
 0x321   :  { %v6214_v17 = vmul.f32 -1.442695, %v1904_v63  ;;  %v9723_v63 = vmul.f32 %v9690_v14, %v9654_v47  ;;  %v7175_v30 = vpop.eup %7174  ;;  %15497 = vst [vmem:[#allocation54_spill] sm:$0xff] %v9728_v27  ;;  %vm1703_vm15 = vweird.f32 %v9725_v10  ;;  %vm9983_vm11 = vmor %vm2036_vm13, %vm2037_vm7 }
 0x322   :  { %v6180_v35 = vmul.f32 -1.442695, %v1570_v36  ;;  %v9730_v40 = vpop.eup %7176  ;;  %v2032_v36 = vmul.f32 %v9715_v60, %v9671_v20  ;;  %v9754_v4 = vadd.f32 1.0, %v7175_v30 }
 0x323   :  { %15496 = vst [vmem:[#allocation53_spill] sm:$0xff] %v9723_v63  ;;  %7184 = vpow2.f32 %v6214_v17  ;;  %v9742_v6 = vpop.eup %7178 }
 0x324   :  { %7186 = vpow2.f32 %v6180_v35  ;;  %v7181_v21 = vpop.eup %7180  ;;  %15502 = vst [vmem:[#allocation58_spill] sm:$0xff] %v9754_v4  ;;  %v1698_v35 = vmul.f32 %v9725_v10, %v9674_v8  ;;  %v2033_v29 = vsub.f32 1.0, %v2032_v36  ;;  %v1713_v31 = vmul.f32 %v9742_v6, %v9688_v55 }
 0x325   :  { %v7183_v18 = vpop.eup %7182  ;;  %7188 = vrcp.f32 %v9728_v27 }
 0x326   :  { %v1905_v17 = vpop.f32.mrf.mxu0  ;;  %v9772_v56 = vadd.f32 1.0, %v7183_v18  ;;  %v1699_v5 = vsub.f32 1.0, %v1698_v35  ;;  %v9788_v18 = vmul.f32 %v9715_v60, %v2033_v29  ;;  %v2072_v35 = vand.u32 2147483648, %v9728_v27 }
 0x327   :  { %v1906_v26 = vadd.f32 %v1905_v17, %v15500_v32  ;;  %v1571_v38 = vpop.f32.mrf.mxu3  ;;  %v1738_v29 = vand.u32 2147483648, %v9754_v4 }
 0x328   :  { %v1572_v57 = vadd.f32 %v1571_v38, %v15503_v2  ;;  %v1723_v38 = vand.u32 2147483648, %v9688_v55  ;;  %v9765_v2 = vadd.f32 1.0, %v7181_v21  ;;  %v9798_v22 = vmul.f32 %v9725_v10, %v1699_v5 }
 0x329   :  { %v6215_v17 = vmul.f32 -1.442695, %v1906_v26  ;;  %v7185_v32 = vpop.eup %7184  ;;  %v2047_v26 = vmul.f32 %v9730_v40, %v9683_v11  ;;  %v15506_v5 = vsub.f32 1.0, %v9704_v28 }
 0x32a   :  { %v6181_v30 = vmul.f32 -1.442695, %v1572_v57  ;;  %v7187_v16 = vpop.eup %7186  ;;  %v9775_v57 = vor.u32 1.1754944e-38, %v1708_v53  ;;  %v9777_v36 = vadd.f32 1.0, %v7185_v32  ;;  %v9790_v19 = vor.u32 1.1754944e-38, %v1723_v38 }
 0x32b   :  { %7190 = vpow2.f32 %v6215_v17  ;;  %v9783_v21 = vadd.f32 1.0, %v7187_v16  ;;  %v9785_v58 = vpop.eup %7188  ;;  %v2048_v32 = vsub.f32 1.0, %v2047_v26  ;;  %v1980_v38 = vand.u32 2147483647, %v9645_v37 }
 0x32c   :  { %7192 = vrcp.f32 %v9754_v4  ;;  %15505 = vst [vmem:[#allocation60_spill] sm:$0xff] %v9790_v19  ;;  %v1714_v26 = vsub.f32 1.0, %v1713_v31  ;;  %v2062_v7 = vmul.f32 %v9785_v58, %v9728_v27  ;;  %v1974_v44 = vmul.f32 %v9667_v0, %v15506_v5 }
 0x32d   :  { %7194 = vpow2.f32 %v6181_v30  ;;  %v9818_v24 = vmul.f32 %v9730_v40, %v2048_v32  ;;  %v9820_v31 = vor.u32 1.1754944e-38, %v2072_v35  ;;  %v9828_v5 = vor.u32 1.1754944e-38, %v1738_v29 }
 0x32e   :  { %v1908_v17 = vpop.f32.mrf.mxu0  ;;  %7196 = vrcp.f32 %v9765_v2  ;;  %v2087_v51 = vand.u32 2147483648, %v9765_v2  ;;  %vm9833_vm2 = vcmp.eq.f32.partialorder %v1980_v38, 8.507059e+37  ;;  %v2063_v42 = vsub.f32 1.0, %v2062_v7  ;;  %v15512_v7 = vld [vmem:[#allocation30_spill] sm:$0xff] }
 0x32f   :  { %v1574_v53 = vpop.f32.mrf.mxu3  ;;  %7198 = vrcp.f32 %v9772_v56  ;;  %v1909_v16 = vadd.f32 %v1908_v17, %v8340_v23  ;;  %15507 = vst [vmem:[#allocation61_spill] sm:$0xff] %v9820_v31  ;;  %v9840_v31 = vmul.f32 %v9742_v6, %v1714_v26  ;;  %v1975_v38 = vadd.f32 %v9667_v0, %v1974_v44 }
 0x330   :  { %7200 = vrcp.f32 %v9777_v36  ;;  %15508 = vst [vmem:[#allocation62_spill] sm:$0xff] %v9828_v5  ;;  %v1753_v5 = vand.u32 2147483648, %v9772_v56  ;;  %v1995_v19 = vand.u32 2147483647, %v9650_v1  ;;  %v9857_v63 = vor.u32 1.1754944e-38, %v2087_v51 }
 0x331   :  { %v7191_v30 = vpop.eup %7190  ;;  %7202 = vrcp.f32 %v9783_v21  ;;  %v6216_v17 = vmul.f32 -1.442695, %v1909_v16  ;;  %v1648_v16 = vand.u32 2147483648, %v9647_v50  ;;  %15511 = vst [vmem:[#allocation63_spill] sm:$0xff] %v9840_v31  ;;  %v15515_v44 = vsub.f32 1.0, %v9709_v46 }
 0x332   :  { %v9804_v34 = vpop.eup %7192  ;;  %v9809_v23 = vadd.f32 1.0, %v7191_v30  ;;  %15513 = vst [vmem:[#allocation64_spill] sm:$0xff] %v9857_v63  ;;  %v9864_v49 = vmul.f32 %v9785_v58, %v2063_v42  ;;  %v9880_v42 = vor.u32 1.1754944e-38, %v1753_v5  ;;  %vm9916_vm14 = vcmp.eq.f32.partialorder %v1995_v19, 8.507059e+37 }
 0x333   :  { %v7195_v59 = vpop.eup %7194  ;;  %v1728_v28 = vmul.f32 %v9804_v34, %v9754_v4  ;;  %7204 = vpow2.f32 %v6216_v17  ;;  %v1575_v17 = vadd.f32 %v1574_v53, %v15512_v7  ;;  %v9855_v43 = vor.u32 1.1754944e-38, %v1648_v16 }
 0x334   :  { %v9824_v30 = vpop.eup %7196  ;;  %v9831_v15 = vadd.f32 1.0, %v7195_v59  ;;  %7206 = vrcp.f32 %v9809_v23  ;;  %v1640_v31 = vmul.f32 %v9677_v25, %v15515_v44  ;;  %15518 = vst [vmem:[#allocation65_spill] sm:$0xff] %v9880_v42  ;;  %vm2096_vm1 = vweird.f32 %v9777_v36 }
 0x335   :  { %v9837_v35 = vpop.eup %7198  ;;  %v1729_v14 = vsub.f32 1.0, %v1728_v28  ;;  %v2077_v27 = vmul.f32 %v9824_v30, %v9765_v2  ;;  %v6182_v5 = vmul.f32 -1.442695, %v1575_v17  ;;  %vm1762_vm9 = vweird.f32 %v9783_v21 }
 0x336   :  { %v1910_v47 = vpop.f32.mrf.mxu0  ;;  %v9843_v29 = vpop.eup %7200  ;;  %7208 = vrcp.f32 %v9831_v15  ;;  %v1743_v46 = vmul.f32 %v9837_v35, %v9772_v56 }
 0x337   :  { %v1576_v59 = vpop.f32.mrf.mxu3  ;;  %v9850_v26 = vpop.eup %7202  ;;  %v1911_v4 = vadd.f32 %v1910_v47, %v8378_v61  ;;  %v2092_v47 = vmul.f32 %v9843_v29, %v9777_v36  ;;  %v9898_v16 = vmul.f32 %v9804_v34, %v1729_v14  ;;  %v2078_v17 = vsub.f32 1.0, %v2077_v27 }
 0x338   :  { %v1577_v12 = vadd.f32 %v1576_v59, %v15514_v33  ;;  %v1758_v28 = vmul.f32 %v9850_v26, %v9783_v21  ;;  %v2102_v59 = vand.u32 2147483648, %v9777_v36  ;;  %v1744_v14 = vsub.f32 1.0, %v1743_v46 }
 0x339   :  { %v6217_v53 = vmul.f32 -1.442695, %v1911_v4  ;;  %v1979_v4 = vsel %vm9874_vm8, %v9667_v0, %v1975_v38  ;;  %v7205_v37 = vpop.eup %7204  ;;  %v1641_v0 = vadd.f32 %v9677_v25, %v1640_v31  ;;  %v15521_v38 = vsub.f32 1.0, %v9713_v45 }
 0x33a   :  { %v9895_v44 = vpop.eup %7206  ;;  %v6183_v52 = vmul.f32 -1.442695, %v1577_v12  ;;  %v9910_v42 = vsel %vm9833_vm2, %v9814_v9, %v1979_v4  ;;  %v1997_v12 = vand.u32 2147483648, %v9650_v1  ;;  %v2100_v31 = vand.u32 2147483647, %v9777_v36 }
 0x33b   :  { %7210 = vpow2.f32 %v6217_v53  ;;  %v1989_v33 = vmul.f32 %v9681_v48, %v15521_v38  ;;  %v2093_v53 = vsub.f32 1.0, %v2092_v47  ;;  %v1759_v45 = vsub.f32 1.0, %v1758_v28 }
 0x33c   :  { %v9904_v7 = vpop.eup %7208  ;;  %v9914_v63 = vadd.f32 1.0, %v7205_v37  ;;  %v9921_v27 = vor.u32 1.1754944e-38, %v2102_v59  ;;  %v2107_v9 = vmul.f32 %v9895_v44, %v9809_v23  ;;  %7212 = vpow2.f32 %v6182_v5 }
 0x33d   :  { %v1773_v19 = vmul.f32 %v9904_v7, %v9831_v15  ;;  %7214 = vpow2.f32 %v6183_v52  ;;  %v1645_v46 = vsel %vm9930_vm6, %v9677_v25, %v1641_v0  ;;  %v1990_v28 = vadd.f32 %v9681_v48, %v1989_v33 }
 0x33e   :  { %v1913_v61 = vpop.f32.mrf.mxu0  ;;  %v2094_v50 = vmul.f32 %v9843_v29, %v2093_v53  ;;  %v1768_v37 = vand.u32 2147483648, %v9783_v21  ;;  %v9948_v59 = vmul.f32 %v9837_v35, %v1744_v14  ;;  %v1760_v5 = vmul.f32 %v9850_v26, %v1759_v45 }
 0x33f   :  { %v1914_v32 = vadd.f32 %v1913_v61, %v8419_v54  ;;  %v9941_v61 = vmul.f32 %v9824_v30, %v2078_v17  ;;  %v1766_v25 = vand.u32 2147483647, %v9783_v21  ;;  %7216 = vrcp.f32 %v9914_v63 }
 0x340   :  { %vm2052_vm2 = vweird.f32 %v9730_v40  ;;  %v2108_v33 = vsub.f32 1.0, %v2107_v9  ;;  %v2035_v52 = vadd.f32 %v9715_v60, %v9788_v18  ;;  %v9959_v0 = vsel %vm9887_vm12, %v9855_v43, %v1645_v46  ;;  %v1579_v18 = vpop.f32.mrf.mxu3 }
 0x341   :  { %v7211_v4 = vpop.eup %7210  ;;  %7218 = vtanh.f32 %v1914_v32  ;;  %v1774_v53 = vsub.f32 1.0, %v1773_v19  ;;  %v1994_v51 = vsel %vm9965_vm3, %v9681_v48, %v1990_v28  ;;  %v1998_v43 = vor.u32 1.1754944e-38, %v1997_v12 }
 0x342   :  { %v9970_v14 = vadd.f32 1.0, %v7211_v4  ;;  %v7213_v45 = vpop.eup %7212  ;;  %vm2051_vm8 = vweird.f32 %v9683_v11  ;;  %v2095_v1 = vadd.f32 %v9843_v29, %v2094_v50  ;;  %vm2097_vm12 = vweird.f32 %v9843_v29  ;;  %v15534_v50 = vld [vmem:[#allocation35_spill] sm:$0xff] }
 0x343   :  { %v1769_v9 = vor.u32 1.1754944e-38, %v1768_v37  ;;  %v2040_v32 = vand.u32 2147483647, %v9671_v20  ;;  %v7215_v47 = vpop.eup %7214  ;;  %vm9987_vm10 = vcmp.eq.f32.partialorder %v2100_v31, 8.507059e+37  ;;  %v1761_v12 = vadd.f32 %v9850_v26, %v1760_v5  ;;  %vm10015_vm7 = vmor %vm2096_vm1, %vm2097_vm12 }
 0x344   :  { %vm1763_vm6 = vweird.f32 %v9850_v26  ;;  %vm2111_vm3 = vweird.f32 %v9809_v23  ;;  %v2115_v46 = vand.u32 2147483647, %v9809_v23  ;;  %v2117_v28 = vand.u32 2147483648, %v9809_v23 }
 0x345   :  { %vm9996_vm4 = vcmp.eq.f32.partialorder %v1766_v25, 8.507059e+37  ;;  %v2109_v4 = vmul.f32 %v9895_v44, %v2108_v33  ;;  %v2039_v31 = vsel %vm9983_vm11, %v9715_v60, %v2035_v52  ;;  %v1580_v37 = vadd.f32 %v1579_v18, %v15534_v50  ;;  %v10009_v17 = vpop.eup %7216  ;;  %vm10031_vm13 = vmor %vm1762_vm9, %vm1763_vm6 }
 0x346   :  { %v10007_v5 = vsel %vm9916_vm14, %v1998_v43, %v1994_v51  ;;  %v1775_v33 = vmul.f32 %v9904_v7, %v1774_v53  ;;  %v1781_v60 = vand.u32 2147483647, %v9831_v15  ;;  %v10021_v52 = vadd.f32 1.0, %v7213_v45  ;;  %v1915_v43 = vpop.f32.mrf.mxu0  ;;  %vm10061_vm11 = vmor %vm1702_vm5, %vm1703_vm15 }
 0x347   :  { %7220 = vrcp.f32 %v9970_v14  ;;  %v7219_v38 = vpop.eup %7218  ;;  %v2099_v18 = vsel %vm10015_vm7, %v9843_v29, %v2095_v1  ;;  %v1783_v53 = vand.u32 2147483648, %v9831_v15  ;;  %v10036_v51 = vadd.f32 1.0, %v7215_v47  ;;  %vm10077_vm15 = vmor %vm2051_vm8, %vm2052_vm2 }
 0x348   :  { %vm2041_vm14 = vcmp.eq.f32.partialorder %v2040_v32, 8.507059e+37  ;;  %v1765_v45 = vsel %vm10031_vm13, %v9850_v26, %v1761_v12  ;;  %vm2112_vm1 = vweird.f32 %v9895_v44  ;;  %vm10042_vm12 = vcmp.eq.f32.partialorder %v2115_v46, 8.507059e+37 }
 0x349   :  { %vm1778_vm9 = vweird.f32 %v9904_v7  ;;  %v2044_v21 = vsel %vm2041_vm14, %v9767_v39, %v2039_v31  ;;  %v2110_v1 = vadd.f32 %v9895_v44, %v2109_v4  ;;  %v2159_v47 = vmul.f32 %v7219_v38, %v9910_v42  ;;  %vm10096_vm2 = vmor %vm2111_vm3, %vm2112_vm1  ;;  %v15555_v39 = vld [vmem:[#allocation37_spill] sm:$0xff] }
 0x34a   :  { %v1701_v32 = vadd.f32 %v9725_v10, %v9798_v22  ;;  %7222 = vtanh.f32 %v1580_v37  ;;  %v1776_v26 = vadd.f32 %v9904_v7, %v1775_v33  ;;  %v2122_v19 = vmul.f32 %v10009_v17, %v9914_v63 }
 0x34b   :  { %7224 = vrcp.f32 %v10021_v52  ;;  %v1916_v12 = vadd.f32 %v1915_v43, %v8480_v62  ;;  %vm1718_vm6 = vweird.f32 %v9742_v6  ;;  %v2155_v22 = vmul.f32 %v2044_v21, %v9390_v41  ;;  %v15552_v21 = vld [vmem:[#allocation54_spill] sm:$0xff]  ;;  %v15557_v41 = vld [vmem:[#allocation44_spill] sm:$0xff] }
 0x34c   :  { %7226 = vrcp.f32 %v10036_v51  ;;  %v1706_v42 = vand.u32 2147483647, %v9674_v8  ;;  %v2050_v46 = vadd.f32 %v9730_v40, %v9818_v24  ;;  %v2118_v37 = vor.u32 1.1754944e-38, %v2117_v28 }
 0x34d   :  { %v10071_v4 = vpop.eup %7220  ;;  %vm1777_vm5 = vweird.f32 %v9831_v15  ;;  %vm10082_vm7 = vcmp.eq.f32.partialorder %v1781_v60, 8.507059e+37  ;;  %v1784_v8 = vor.u32 1.1754944e-38, %v1783_v53  ;;  %vm1717_vm13 = vweird.f32 %v9688_v55 }
 0x34e   :  { %v10090_v24 = vsel %vm9987_vm10, %v9921_v27, %v2099_v18  ;;  %v10100_v15 = vadd.f32 %v2159_v47, %v2155_v22  ;;  %v1705_v25 = vsel %vm10061_vm11, %v9725_v10, %v1701_v32  ;;  %v2055_v33 = vand.u32 2147483647, %v9683_v11  ;;  %vm10115_vm8 = vmor %vm1777_vm5, %vm1778_vm9  ;;  %v15553_v47 = vld [vmem:[#allocation59_spill] sm:$0xff]  ;;  %v1918_v28 = vpop.f32.mrf.mxu0 }
 0x34f   :  { %v10108_v27 = vsel %vm9996_vm4, %v1769_v9, %v1765_v45  ;;  %v2114_v23 = vsel %vm10096_vm2, %v9895_v44, %v2110_v1  ;;  %v2123_v60 = vsub.f32 1.0, %v2122_v19  ;;  %7228 = vtanh.f32 %v1916_v12  ;;  %v1581_v9 = vpop.f32.mrf.mxu3  ;;  %vm10177_vm9 = vmor %vm1717_vm13, %vm1718_vm6 }
 0x350   :  { %v7223_v38 = vpop.eup %7222  ;;  %vm2067_vm10 = vweird.f32 %v9785_v58  ;;  %v1780_v11 = vsel %vm10115_vm8, %v9904_v7, %v1776_v26  ;;  %v2137_v10 = vmul.f32 %v10071_v4, %v9970_v14  ;;  %vm1707_vm4 = vcmp.eq.f32.partialorder %v1706_v42, 8.507059e+37  ;;  %v15554_v26 = vld [vmem:[#allocation36_spill] sm:$0xff] }
 0x351   :  { %v2054_v44 = vsel %vm10077_vm15, %v9730_v40, %v2050_v46  ;;  %v10128_v20 = vpop.eup %7224  ;;  %v2130_v18 = vand.u32 2147483647, %v9914_v63  ;;  %v2132_v36 = vand.u32 2147483648, %v9914_v63  ;;  %v1710_v53 = vsel %vm1707_vm4, %v9775_v57, %v1705_v25 }
 0x352   :  { %v15551_v43 = vsub.f32 1.0, %v9719_v13  ;;  %v10136_v45 = vpop.eup %7226  ;;  %vm2066_vm3 = vweird.f32 %v15552_v21  ;;  %v10141_v40 = vsel %vm10042_vm12, %v2118_v37, %v2114_v23  ;;  %7230 = vtanh.f32 %v10100_v15 }
 0x353   :  { %v1825_v1 = vmul.f32 %v7223_v38, %v9959_v0  ;;  %vm2056_vm14 = vcmp.eq.f32.partialorder %v2055_v33, 8.507059e+37  ;;  %v10147_v57 = vsel %vm10082_vm7, %v1784_v8, %v1780_v11  ;;  %v10150_v13 = vmul.f32 %v10009_v17, %v2123_v60  ;;  %v15556_v0 = vld [vmem:[#allocation63_spill] sm:$0xff]  ;;  %v15559_v33 = vld [vmem:[#allocation40_spill] sm:$0xff]  ;;  %vm10216_vm13 = vmor %vm2066_vm3, %vm2067_vm10 }
 0x354   :  { %v1655_v7 = vmul.f32 %v9685_v3, %v15551_v43  ;;  %v2059_v32 = vsel %vm2056_vm14, %v15553_v47, %v2054_v44  ;;  %v1582_v19 = vadd.f32 %v1581_v9, %v15554_v26  ;;  %v10156_v29 = vmul.f32 %v10128_v20, %v10021_v52  ;;  %v15564_v9 = vld [vmem:[#allocation49_spill] sm:$0xff] }
 0x355   :  { %v2138_v12 = vsub.f32 1.0, %v2137_v10  ;;  %v1821_v22 = vmul.f32 %v1710_v53, %v15555_v39  ;;  %v1716_v42 = vadd.f32 %v9742_v6, %v15556_v0  ;;  %v7229_v46 = vpop.eup %7228  ;;  %v10163_v31 = vmul.f32 %v10136_v45, %v10036_v51  ;;  %v15562_v10 = vld [vmem:[#allocation53_spill] sm:$0xff]  ;;  %v15568_v39 = vld [vmem:[#allocation58_spill] sm:$0xff] }
 0x356   :  { %v1656_v37 = vadd.f32 %v9685_v3, %v1655_v7  ;;  %vm1658_vm1 = vweird.f32 %v9685_v3  ;;  %v1663_v8 = vand.u32 2147483648, %v15557_v41  ;;  %v2156_v23 = vmul.f32 %v2059_v32, %v15559_v33  ;;  %v15567_v47 = vld [vmem:[#allocation17_spill] sm:$0xff] }
 0x357   :  { %v10168_v25 = vadd.f32 %v1825_v1, %v1821_v22  ;;  %v2160_v48 = vmul.f32 %v7229_v46, %v10007_v5  ;;  %vm1657_vm12 = vweird.f32 %v15557_v41  ;;  %v1661_v38 = vand.u32 2147483647, %v15557_v41 }
 0x358   :  { %v1721_v11 = vand.u32 2147483647, %v9688_v55  ;;  %7232 = vtanh.f32 %v1582_v19  ;;  %v15563_v44 = vsub.f32 1.0, %v15562_v10  ;;  %v7231_v5 = vpop.eup %7230  ;;  %vm1733_vm11 = vweird.f32 %v9804_v34  ;;  %vm10194_vm6 = vmor %vm1657_vm12, %vm1658_vm1  ;;  %v15578_v10 = vld [vmem:[#allocation50_spill] sm:$0xff] }
 0x359   :  { %15558 = vst [vmem:[#allocation54_spill] sm:$0xff] %v10168_v25  ;;  %v10188_v43 = vmul.f32 %v10071_v4, %v2138_v12  ;;  %v10190_v7 = vadd.f32 %v2160_v48, %v2156_v23  ;;  %v1720_v55 = vsel %vm10177_vm9, %v9742_v6, %v1716_v42  ;;  %v1919_v32 = vadd.f32 %v1918_v28, %v15567_v47  ;;  %v1584_v42 = vpop.f32.mrf.mxu3  ;;  %v15575_v48 = vld [vmem:[#allocation34_spill] sm:$0xff] }
 0x35a   :  { %v2004_v53 = vmul.f32 %v15564_v9, %v15563_v44  ;;  %v1660_v19 = vsel %vm10194_vm6, %v9685_v3, %v1656_v37  ;;  %v1664_v12 = vor.u32 1.1754944e-38, %v1663_v8  ;;  %vm1722_vm15 = vcmp.eq.f32.partialorder %v1721_v11, 8.507059e+37  ;;  %v15571_v37 = vld [vmem:[#allocation60_spill] sm:$0xff]  ;;  %v15572_v8 = vld [vmem:[#allocation45_spill] sm:$0xff] }
 0x35b   :  { %vm2007_vm5 = vweird.f32 %v15564_v9  ;;  %vm1732_vm7 = vweird.f32 %v15568_v39  ;;  %7234 = vtanh.f32 %v10190_v7  ;;  %v2065_v0 = vadd.f32 %v9785_v58, %v9864_v49 }
 0x35c   :  { %v2005_v22 = vadd.f32 %v15564_v9, %v2004_v53  ;;  %v2070_v6 = vand.u32 2147483647, %v15552_v21  ;;  %v2171_v46 = vmul.f32 %v7231_v5, %v10090_v24  ;;  %7236 = vtanh.f32 %v10168_v25 }
 0x35d   :  { %vm1662_vm2 = vcmp.eq.f32.partialorder %v1661_v38, 8.507059e+37  ;;  %v1725_v41 = vsel %vm1722_vm15, %v15571_v37, %v1720_v55  ;;  %vm2082_vm8 = vweird.f32 %v9824_v30  ;;  %vm2006_vm4 = vweird.f32 %v15572_v8  ;;  %v15576_v38 = vld [vmem:[#allocation55_spill] sm:$0xff]  ;;  %v15580_v55 = vld [vmem:[#allocation61_spill] sm:$0xff] }
 0x35e   :  { %v1665_v49 = vsel %vm1662_vm2, %v1664_v12, %v1660_v19  ;;  %v2069_v21 = vsel %vm10216_vm13, %v9785_v58, %v2065_v0  ;;  %7238 = vtanh.f32 %v1919_v32  ;;  %v7233_v28 = vpop.eup %7232  ;;  %vm10230_vm10 = vmor %vm2006_vm4, %vm2007_vm5  ;;  %v2010_v33 = vand.u32 2147483647, %v15572_v8  ;;  %v15579_v58 = vld [vmem:[#allocation38_spill] sm:$0xff] }
 0x35f   :  { %v2012_v23 = vand.u32 2147483648, %v15572_v8  ;;  %v1585_v60 = vadd.f32 %v1584_v42, %v15575_v48  ;;  %v15577_v11 = vsub.f32 1.0, %v15576_v38  ;;  %vm2081_vm3 = vweird.f32 %v9765_v2  ;;  %v15581_v12 = vld [vmem:[#allocation46_spill] sm:$0xff]  ;;  %v1920_v42 = vpop.f32.mrf.mxu0  ;;  %vm10273_vm5 = vmor %vm1732_vm7, %vm1733_vm11  ;;  %v15671_v48 = vld [vmem:[#allocation16_spill] sm:$0xff] }
 0x360   :  { %v1822_v53 = vmul.f32 %v1725_v41, %v15579_v58  ;;  %v1826_v5 = vmul.f32 %v7233_v28, %v1665_v49  ;;  %v2009_v1 = vsel %vm10230_vm10, %v15564_v9, %v2005_v22  ;;  %vm2071_vm14 = vcmp.eq.f32.partialorder %v2070_v6, 8.507059e+37  ;;  %v15591_v58 = vld [vmem:[#allocation43_spill] sm:$0xff]  ;;  %vm10300_vm4 = vmor %vm2081_vm3, %vm2082_vm8 }
 0x361   :  { %v1670_v44 = vmul.f32 %v15578_v10, %v15577_v11  ;;  %v2074_v32 = vsel %vm2071_vm14, %v15580_v55, %v2069_v21  ;;  %vm1673_vm1 = vweird.f32 %v15578_v10  ;;  %v1676_v0 = vand.u32 2147483647, %v15581_v12  ;;  %v7235_v3 = vpop.eup %7234 }
 0x362   :  { %v10249_v37 = vadd.f32 %v1826_v5, %v1822_v53  ;;  %v1678_v41 = vand.u32 2147483648, %v15581_v12  ;;  %v1731_v49 = vadd.f32 %v9804_v34, %v9898_v16  ;;  %7240 = vtanh.f32 %v1585_v60  ;;  %v7237_v9 = vpop.eup %7236  ;;  %v15585_v16 = vld [vmem:[#allocation20_spill] sm:$0xff] }
 0x363   :  { %v1671_v19 = vadd.f32 %v15578_v10, %v1670_v44  ;;  %vm1748_vm12 = vweird.f32 %v9837_v35  ;;  %v2172_v22 = vmul.f32 %v7235_v3, %v10141_v40  ;;  %v2013_v6 = vor.u32 1.1754944e-38, %v2012_v23  ;;  %v15586_v60 = vld [vmem:[#allocation56_spill] sm:$0xff]  ;;  %v15588_v40 = vld [vmem:[#allocation51_spill] sm:$0xff] }
 0x364   :  { %15582 = vst [vmem:[#allocation59_spill] sm:$0xff] %v10249_v37  ;;  %vm1672_vm9 = vweird.f32 %v15581_v12  ;;  %v1736_v8 = vand.u32 2147483647, %v15568_v39  ;;  %v7239_v21 = vpop.eup %7238  ;;  %7242 = vtanh.f32 %v10249_v37  ;;  %vm2011_vm6 = vcmp.eq.f32.partialorder %v2010_v33, 8.507059e+37 }
 0x365   :  { %vm10261_vm15 = vmor %vm1672_vm9, %vm1673_vm1  ;;  %v1921_v24 = vadd.f32 %v1920_v42, %v15585_v16  ;;  %v15587_v38 = vsub.f32 1.0, %v15586_v60  ;;  %vm1747_vm13 = vweird.f32 %v9772_v56  ;;  %v6729_v33 = vpack.c.bf16 %v2172_v22, %v2171_v46  ;;  %v15597_v22 = vld [vmem:[#allocation62_spill] sm:$0xff] }
 0x366   :  { %v2014_v44 = vsel %vm2011_vm6, %v2013_v6, %v2009_v1  ;;  %v2157_v53 = vmul.f32 %v2074_v32, %v15591_v58  ;;  %v1675_v5 = vsel %vm10261_vm15, %v15578_v10, %v1671_v19  ;;  %vm10282_vm2 = vcmp.eq.f32.partialorder %v1676_v0, 8.507059e+37  ;;  %v1586_v10 = vpop.f32.mrf.mxu3  ;;  %v15594_v19 = vld [vmem:[#allocation47_spill] sm:$0xff]  ;;  %v15605_v58 = vld [vmem:[#allocation64_spill] sm:$0xff] }
 0x367   :  { %v2019_v23 = vmul.f32 %v15588_v40, %v15587_v38  ;;  %v2161_v55 = vmul.f32 %v7239_v21, %v2014_v44  ;;  %v1679_v39 = vor.u32 1.1754944e-38, %v1678_v41  ;;  %v1735_v42 = vsel %vm10273_vm5, %v9804_v34, %v1731_v49  ;;  %6730 = vst [vmem:[#allocation3] sm:$0xff] %v6729_v33   ;;  %v15604_v38 = vld [vmem:[#allocation52_spill] sm:$0xff] }
 0x368   :  { %vm1737_vm11 = vcmp.eq.f32.partialorder %v1736_v8, 8.507059e+37  ;;  %vm2022_vm7 = vweird.f32 %v15588_v40  ;;  %v2080_v1 = vadd.f32 %v9824_v30, %v9941_v61  ;;  %v7241_v32 = vpop.eup %7240  ;;  %6907 = vst [vmem:[#allocation2 + $0x8] sm:$0xff] %v6729_v33   ;;  %v2025_v0 = vand.u32 2147483647, %v15594_v19 }
 0x369   :  { %v2020_v46 = vadd.f32 %v15588_v40, %v2019_v23  ;;  %v2027_v3 = vand.u32 2147483648, %v15594_v19  ;;  %v2085_v41 = vand.u32 2147483647, %v9765_v2  ;;  %7244 = vtanh.f32 %v1921_v24  ;;  %v15602_v24 = vld [vmem:[#allocation57_spill] sm:$0xff] }
 0x36a   :  { %vm2127_vm10 = vweird.f32 %v10009_v17  ;;  %v1837_v61 = vmul.f32 %v7237_v9, %v10108_v27  ;;  %v1680_v49 = vsel %vm10282_vm2, %v1679_v39, %v1675_v5  ;;  %v1740_v6 = vsel %vm1737_vm11, %v15597_v22, %v1735_v42  ;;  %v7243_v8 = vpop.eup %7242  ;;  %v15601_v9 = vld [vmem:[#allocation39_spill] sm:$0xff]  ;;  %v15606_v5 = vld [vmem:[#allocation48_spill] sm:$0xff]  ;;  %vm10341_vm2 = vmor %vm1747_vm13, %vm1748_vm12 }
 0x36b   :  { %vm2021_vm14 = vweird.f32 %v15594_v19  ;;  %v10310_v21 = vadd.f32 %v2161_v55, %v2157_v53  ;;  %v2084_v27 = vsel %vm10300_vm4, %v9824_v30, %v2080_v1  ;;  %v1587_v28 = vadd.f32 %v1586_v10, %v15601_v9  ;;  %v15609_v10 = vld [vmem:[#allocation21_spill] sm:$0xff] }
 0x36c   :  { %vm10314_vm8 = vmor %vm2021_vm14, %vm2022_vm7  ;;  %v15603_v60 = vsub.f32 1.0, %v15602_v24  ;;  %vm2126_vm3 = vweird.f32 %v9914_v63  ;;  %v1838_v11 = vmul.f32 %v7243_v8, %v10147_v57  ;;  %v1827_v33 = vmul.f32 %v7241_v32, %v1680_v49  ;;  %v15616_v8 = vld [vmem:[#allocation65_spill] sm:$0xff] }
 0x36d   :  { %15598 = vst [vmem:[#allocation37_spill] sm:$0xff] %v10310_v21  ;;  %v2024_v44 = vsel %vm10314_vm8, %v15588_v40, %v2020_v46  ;;  %vm2086_vm1 = vcmp.eq.f32.partialorder %v2085_v41, 8.507059e+37  ;;  %vm2141_vm9 = vweird.f32 %v9970_v14  ;;  %vm2026_vm6 = vcmp.eq.f32.partialorder %v2025_v0, 8.507059e+37  ;;  %vm10394_vm14 = vmor %vm2126_vm3, %vm2127_vm10 }
 0x36e   :  { %v1685_v23 = vmul.f32 %v15604_v38, %v15603_v60  ;;  %v2028_v30 = vor.u32 1.1754944e-38, %v2027_v3  ;;  %v2089_v53 = vsel %vm2086_vm1, %v15605_v58, %v2084_v27  ;;  %vm1687_vm15 = vweird.f32 %v15606_v5 }
 0x36f   :  { %v6739_v55 = vpack.c.bf16 %v1838_v11, %v1837_v61  ;;  %vm1688_vm5 = vweird.f32 %v15604_v38  ;;  %v1746_v57 = vadd.f32 %v9837_v35, %v9948_v59  ;;  %v7245_v39 = vpop.eup %7244  ;;  %v1693_v46 = vand.u32 2147483648, %v15606_v5  ;;  %v15612_v61 = vld [vmem:[#allocation41_spill] sm:$0xff] }
 0x370   :  { %v1686_v12 = vadd.f32 %v15604_v38, %v1685_v23  ;;  %v2029_v42 = vsel %vm2026_vm6, %v2028_v30, %v2024_v44  ;;  %v1751_v1 = vand.u32 2147483647, %v9772_v56  ;;  %7246 = vtanh.f32 %v1587_v28  ;;  %vm10367_vm13 = vmor %vm1687_vm15, %vm1688_vm5  ;;  %v15622_v30 = vld [vmem:[#allocation42_spill] sm:$0xff]  ;;  %v7986_v44 = vld [vmem:[%s15074_s1 + $0x28] sm:$0xff] }
 0x371   :  { %6905 = vst [vmem:[#allocation3 + $0x10] sm:$0xff] %v6739_v55   ;;  %v2158_v32 = vmul.f32 %v2089_v53, %v15609_v10  ;;  %v2162_v19 = vmul.f32 %v7245_v39, %v2029_v42  ;;  %v1691_v59 = vand.u32 2147483647, %v15606_v5  ;;  %v1750_v0 = vsel %vm10341_vm2, %v9837_v35, %v1746_v57 }
 0x372   :  { %v2125_v3 = vadd.f32 %v10009_v17, %v10150_v13  ;;  %vm10356_vm12 = vcmp.eq.f32.partialorder %v2130_v18, 8.507059e+37  ;;  %v1789_v56 = vsub.f32 1.0, %v10156_v29  ;;  %v1804_v34 = vsub.f32 1.0, %v10163_v31  ;;  %v10377_v29 = vld [vmem:[#allocation2] sm:$0xff] }
 0x373   :  { %v1823_v49 = vmul.f32 %v1740_v6, %v15612_v61  ;;  %7248 = vtanh.f32 %v10310_v21  ;;  %v10372_v18 = vadd.f32 %v2162_v19, %v2158_v32  ;;  %v1690_v13 = vsel %vm10367_vm13, %v15604_v38, %v1686_v12  ;;  %v6324_v31 = vld [vmem:[%s15073_s0 + $0x20] sm:$0xff]  }
 0x374   :  { %vm1752_vm11 = vcmp.eq.f32.partialorder %v1751_v1, 8.507059e+37  ;;  %v2140_v22 = vadd.f32 %v10071_v4, %v10188_v43  ;;  %vm2142_vm7 = vweird.f32 %v10071_v4  ;;  %v1694_v6 = vor.u32 1.1754944e-38, %v1693_v46  ;;  %3210 = vst [vmem:[#allocation2] sm:$0xff] %v6324_v31   ;;  %v7980_v43 = vld [vmem:[%s15074_s1 + $0x10] sm:$0xff]  ;;  %v15635_v1 = vld [vmem:[#allocation10_spill] sm:$0xff] }
 0x375   :  { %15615 = vst [vmem:[#allocation63_spill] sm:$0xff] %v10372_v18  ;;  %v1755_v2 = vsel %vm1752_vm11, %v15616_v8, %v1750_v0  ;;  %v2147_v27 = vand.u32 2147483648, %v9970_v14  ;;  %v10387_v28 = vadd.f32 %v1827_v33, %v1823_v49  ;;  %7250 = vtanh.f32 %v10372_v18  ;;  %vm10408_vm10 = vmor %vm2141_vm9, %vm2142_vm7  ;;  %v7976_v8 = vld [vmem:[%s15074_s1] sm:$0xff] }
 0x376   :  { %vm1692_vm4 = vcmp.eq.f32.partialorder %v1691_v59, 8.507059e+37  ;;  %v7247_v24 = vpop.eup %7246  ;;  %v1790_v60 = vmul.f32 %v10128_v20, %v1789_v56  ;;  %v2145_v38 = vand.u32 2147483647, %v9970_v14  ;;  %v1805_v23 = vmul.f32 %v10136_v45, %v1804_v34 }
 0x377   :  { %15617 = vst [vmem:[#allocation44_spill] sm:$0xff] %v10387_v28  ;;  %v1695_v11 = vsel %vm1692_vm4, %v1694_v6, %v1690_v13  ;;  %v2133_v33 = vor.u32 1.1754944e-38, %v2132_v36  ;;  %vm1792_vm8 = vweird.f32 %v10021_v52  ;;  %v1824_v58 = vmul.f32 %v1755_v2, %v15622_v30  ;;  %v6637_v2 = vld [vmem:[#allocation3] sm:$0xff]  ;;  %v7987_v30 = vld [vmem:[%s15079_s3 + $0x28] sm:$0xff] }
 0x378   :  { %v1828_v53 = vmul.f32 %v7247_v24, %v1695_v11  ;;  %v2129_v5 = vsel %vm10394_vm14, %v10009_v17, %v2125_v3  ;;  %v1796_v63 = vand.u32 2147483647, %v10021_v52  ;;  %v1798_v36 = vand.u32 2147483648, %v10021_v52  ;;  %v7979_v24 = vld [vmem:[%s15079_s3 + $0x8] sm:$0xff]  ;;  %v7984_v11 = vld [vmem:[%s15074_s1 + $0x20] sm:$0xff] }
 0x379   :  { %v2144_v55 = vsel %vm10408_vm10, %v10071_v4, %v2140_v22  ;;  %v7249_v14 = vpop.eup %7248  ;;  %vm1793_vm3 = vweird.f32 %v10128_v20  ;;  %v2148_v12 = vor.u32 1.1754944e-38, %v2147_v27  ;;  %7252 = vtanh.f32 %v10387_v28  ;;  %v7977_v27 = vld [vmem:[%s15079_s3] sm:$0xff] }
 0x37a   :  { %v10423_v57 = vadd.f32 %v1828_v53, %v1824_v58  ;;  %v1791_v39 = vadd.f32 %v10128_v20, %v1790_v60  ;;  %vm2146_vm1 = vcmp.eq.f32.partialorder %v2145_v38, 8.507059e+37  ;;  %v1806_v17 = vadd.f32 %v10136_v45, %v1805_v23  ;;  %vm10434_vm6 = vmor %vm1792_vm8, %vm1793_vm3  ;;  %v7981_v60 = vld [vmem:[%s15079_s3 + $0x10] sm:$0xff]  ;;  %v7982_v38 = vld [vmem:[%s15074_s1 + $0x18] sm:$0xff] }
 0x37b   :  { %vm1808_vm9 = vweird.f32 %v10136_v45  ;;  %v7251_v40 = vpop.eup %7250  ;;  %v2134_v42 = vsel %vm10356_vm12, %v2133_v33, %v2129_v5  ;;  %v2149_v4 = vsel %vm2146_vm1, %v2148_v12, %v2144_v55  ;;  %v1813_v46 = vand.u32 2147483648, %v10036_v51  ;;  %v7983_v23 = vld [vmem:[%s15079_s3 + $0x18] sm:$0xff]  ;;  %v7985_v33 = vld [vmem:[%s15079_s3 + $0x20] sm:$0xff]  ;;  %v7988_v58 = vld [vmem:[%s15074_s1 + $0x30] sm:$0xff] }
 0x37c   :  { %15623 = vst [vmem:[#allocation40_spill] sm:$0xff] %v10423_v57  ;;  %7254 = vtanh.f32 %v10423_v57  ;;  %vm1807_vm15 = vweird.f32 %v10036_v51  ;;  %v1811_v10 = vand.u32 2147483647, %v10036_v51  ;;  %v2173_v32 = vmul.f32 %v7249_v14, %v2134_v42  ;;  %v7989_v53 = vld [vmem:[%s15079_s3 + $0x30] sm:$0xff]  ;;  %v7990_v5 = vld [vmem:[%s15074_s1 + $0x38] sm:$0xff] }
 0x37d   :  { %v2174_v19 = vmul.f32 %v7251_v40, %v2149_v4  ;;  %vm1809_vm5 = vmor %vm1807_vm15, %vm1808_vm9  ;;  %v1795_v59 = vsel %vm10434_vm6, %v10128_v20, %v1791_v39  ;;  %v1799_v52 = vor.u32 1.1754944e-38, %v1798_v36  ;;  %v1814_v56 = vor.u32 1.1754944e-38, %v1813_v46  ;;  %v6642_v20 = vld [vmem:[#allocation2 + $0x8] sm:$0xff] }
 0x37e   :  { %v1810_v0 = vsel %vm1809_vm5, %v10136_v45, %v1806_v17  ;;  %vm1797_vm2 = vcmp.eq.f32.partialorder %v1796_v63, 8.507059e+37  ;;  %vm1812_vm12 = vcmp.eq.f32.partialorder %v1811_v10, 8.507059e+37  ;;  %v6639_v45 = vld [vmem:[#allocation3 + $0x10] sm:$0xff]  ;;  %vm15626_vm13 = vcmask 523264   ;;  %v7991_v63 = vld [vmem:[%s15079_s3 + $0x38] sm:$0xff] }
 0x37f   :  { %v6734_v3 = vpack.c.bf16 %v2174_v19, %v2173_v32  ;;  %v7253_v41 = vpop.eup %7252  ;;  %v1800_v61 = vsel %vm1797_vm2, %v1799_v52, %v1795_v59  ;;  %v1815_v49 = vsel %vm1812_vm12, %v1814_v56, %v1810_v0  ;;  %vm15627_vm11 = vmmov %vm15626_vm13  ;;  %v15634_v4 = vld [vmem:[#allocation7_spill] sm:$0xff]  ;;  %v15637_v52 = vld [vmem:[#allocation5_spill] sm:$0xff] }
 0x380   :  { %v1839_v51 = vmul.f32 %v7253_v41, %v1800_v61  ;;  %vm15628_vm7 = vmmov %vm15627_vm11 }
 0x381   :  { %6904 = vst [vmem:[#allocation3 + $0x8] sm:$0xff] %v6734_v3   ;;  %vm15629_vm4 = vmmov %vm15628_vm7 }
 0x382   :  { %v7255_v34 = vpop.eup %7254  ;;  %6908 = vst [vmem:[#allocation2 + $0x10] sm:$0xff] %v6734_v3   ;;  %vm15630_vm14 = vmmov %vm15629_vm4  ;;  %v15636_v3 = vld [vmem:[#allocation24_spill] sm:$0xff] }
 0x383   :  { %v1840_v35 = vmul.f32 %v7255_v34, %v1815_v49  ;;  %vm15631_vm8 = vmmov %vm15629_vm4  ;;  %v15638_v34 = vld [vmem:[#allocation25_spill] sm:$0xff] }
 0x384   :  { %vm15632_vm10 = vmmov %vm15629_vm4 }
 0x385   :  { %v6744_v13 = vpack.c.bf16 %v1840_v35, %v1839_v51  ;;  %vm15633_vm3 = vmmov %vm15629_vm4  ;;  %v15639_v51 = vld [vmem:[#allocation11_spill] sm:$0xff] }
 0x387   :  { %6906 = vst [vmem:[#allocation3 + $0x18] sm:$0xff] %v6744_v13  }
 0x388   :  { %v6638_v6 = vld [vmem:[#allocation3 + $0x8] sm:$0xff] }
 0x389   :  { %v6643_v31 = vld [vmem:[#allocation2 + $0x10] sm:$0xff] }
 0x38a   :  { %2562 = vmatpush.bf16.msrb.mxu1 %v6643_v31 }
 0x38e   :  { %v6640_v22 = vld [vmem:[#allocation3 + $0x18] sm:$0xff]  ;;  %2563 = vmatpush.bf16.msrb.mxu1 %v6642_v20 }
 0x38f   :  { %2227 = vmatpush.bf16.msrb.mxu2 %v6640_v22 }
 0x392   :  { %2564 = vmatpush.bf16.msrb.mxu1 %v10377_v29  ;;  %v7978_v29 = vld [vmem:[%s15074_s1 + $0x8] sm:$0xff] }
 0x393   :  { %2228 = vmatpush.bf16.msrb.mxu2 %v6639_v45 }
 0x395   :  { %6268 = vmatmul.msk.bf16.vlgmr.msrb.gmra.mxu1 %vm422_vm0, %v7976_v8  ;;  %v15640_v8 = vld [vmem:[#allocation8_spill] sm:$0xff] }
 0x397   :  { %2229 = vmatpush.bf16.msrb.mxu2 %v6638_v6 }
 0x39b   :  { %2230 = vmatpush.bf16.msrb.mxu2 %v6637_v2 }
 0x39e   :  { %6234 = vmatmul.msk.bf16.vlgmr.msrb.gmra.mxu2 %vm15626_vm13, %v7977_v27 }
 0x3a5   :  { %6269 = vmatmul.msk.bf16.gmra.mxu1 %vm422_vm0, %v7978_v29  ;;  %v15641_v29 = vld [vmem:[#allocation26_spill] sm:$0xff] }
 0x3ae   :  { %6235 = vmatmul.msk.bf16.gmra.mxu2 %vm15627_vm11, %v7979_v24 }
 0x3b5   :  { %6270 = vmatmul.msk.bf16.gmra.mxu1 %vm422_vm0, %v7980_v43 }
 0x3be   :  { %6236 = vmatmul.msk.bf16.gmra.mxu2 %vm15628_vm7, %v7981_v60  ;;  %v15642_v60 = vld [vmem:[#allocation22_spill] sm:$0xff] }
 0x3c5   :  { %6271 = vmatmul.msk.bf16.gmra.mxu1 %vm422_vm0, %v7982_v38 }
 0x3ce   :  { %6237 = vmatmul.msk.bf16.gmra.mxu2 %vm15629_vm4, %v7983_v23 }
 0x3d5   :  { %6272 = vmatmul.msk.bf16.gmra.mxu1 %vm422_vm0, %v7984_v11  ;;  %v15643_v11 = vld [vmem:[#allocation12_spill] sm:$0xff] }
 0x3de   :  { %6238 = vmatmul.msk.bf16.gmra.mxu2 %vm15630_vm14, %v7985_v33 }
 0x3e5   :  { %6273 = vmatmul.msk.bf16.gmra.mxu1 %vm422_vm0, %v7986_v44 }
 0x3ee   :  { %6239 = vmatmul.msk.bf16.gmra.mxu2 %vm15631_vm8, %v7987_v30  ;;  %v15644_v30 = vld [vmem:[#allocation28_spill] sm:$0xff] }
 0x3f5   :  { %6274 = vmatmul.msk.bf16.gmra.mxu1 %vm422_vm0, %v7988_v58 }
 0x3fe   :  { %6240 = vmatmul.msk.bf16.gmra.mxu2 %vm15632_vm10, %v7989_v53 }
 0x405   :  { %6275 = vmatmul.msk.bf16.gmra.mxu1 %vm422_vm0, %v7990_v5 }
 0x40e   :  { %6241 = vmatmul.msk.bf16.gmra.mxu2 %vm15633_vm3, %v7991_v63 }
 0x412   :  { %v2566_v36 = vpop.f32.mrf.mxu1 }
 0x413   :  { %v2567_v46 = vadd.f32 %v2566_v36, %v15634_v4 }
 0x415   :  { %v6276_v32 = vmul.f32 -1.442695, %v2567_v46 }
 0x417   :  { %7256 = vpow2.f32 %v6276_v32 }
 0x41a   :  { %v2568_v55 = vpop.f32.mrf.mxu1 }
 0x41b   :  { %v2569_v10 = vadd.f32 %v2568_v55, %v15635_v1  ;;  %v15645_v55 = vld [vmem:[#allocation6_spill] sm:$0xff] }
 0x41d   :  { %v6277_v59 = vmul.f32 -1.442695, %v2569_v10  ;;  %v7257_v22 = vpop.eup %7256 }
 0x41e   :  { %v10517_v43 = vadd.f32 1.0, %v7257_v22 }
 0x41f   :  { %7258 = vpow2.f32 %v6277_v59 }
 0x420   :  { %vm2659_vm1 = vweird.f32 %v10517_v43 }
 0x421   :  { %v2232_v14 = vpop.f32.mrf.mxu2 }
 0x422   :  { %v2571_v12 = vpop.f32.mrf.mxu1  ;;  %v2233_v41 = vadd.f32 %v2232_v14, %v15636_v3 }
 0x423   :  { %v2572_v56 = vadd.f32 %v2571_v12, %v15637_v52 }
 0x424   :  { %v6242_v49 = vmul.f32 -1.442695, %v2233_v41  ;;  %v15648_v41 = vld [vmem:[#allocation9_spill] sm:$0xff] }
 0x425   :  { %v6278_v31 = vmul.f32 -1.442695, %v2572_v56  ;;  %v7259_v6 = vpop.eup %7258 }
 0x426   :  { %7260 = vpow2.f32 %v6242_v49  ;;  %v10520_v23 = vadd.f32 1.0, %v7259_v6 }
 0x427   :  { %7262 = vpow2.f32 %v6278_v31 }
 0x429   :  { %v2234_v39 = vpop.f32.mrf.mxu2 }
 0x42a   :  { %v2573_v17 = vpop.f32.mrf.mxu1  ;;  %v2235_v61 = vadd.f32 %v2234_v39, %v15638_v34  ;;  %v15665_v34 = vld [vmem:[#allocation13_spill] sm:$0xff] }
 0x42b   :  { %v2574_v2 = vadd.f32 %v2573_v17, %v15640_v8 }
 0x42c   :  { %v6243_v45 = vmul.f32 -1.442695, %v2235_v61  ;;  %v7261_v63 = vpop.eup %7260 }
 0x42d   :  { %v6279_v44 = vmul.f32 -1.442695, %v2574_v2  ;;  %v7263_v17 = vpop.eup %7262  ;;  %v10527_v46 = vadd.f32 1.0, %v7261_v63  ;;  %v15653_v63 = vld [vmem:[#allocation23_spill] sm:$0xff] }
 0x42e   :  { %7264 = vpow2.f32 %v6243_v45 }
 0x431   :  { %v2237_v40 = vpop.f32.mrf.mxu2 }
 0x432   :  { %v2576_v42 = vpop.f32.mrf.mxu1  ;;  %v2238_v24 = vadd.f32 %v2237_v40, %v15641_v29 }
 0x433   :  { %v2577_v35 = vadd.f32 %v2576_v42, %v15639_v51 }
 0x434   :  { %v6244_v53 = vmul.f32 -1.442695, %v2238_v24  ;;  %v7265_v42 = vpop.eup %7264 }
 0x435   :  { %v6280_v27 = vmul.f32 -1.442695, %v2577_v35  ;;  %v10535_v49 = vadd.f32 1.0, %v7265_v42 }
 0x437   :  { %7266 = vpow2.f32 %v6280_v27  ;;  %15649 = vst [vmem:[#allocation49_spill] sm:$0xff] %v10535_v49  ;;  %v15650_v27 = vld [vmem:[#allocation14_spill] sm:$0xff] }
 0x438   :  { %7268 = vrcp.f32 %v10517_v43 }
 0x439   :  { %v2239_v19 = vpop.f32.mrf.mxu2  ;;  %7270 = vrcp.f32 %v10520_v23 }
 0x43a   :  { %v2578_v0 = vpop.f32.mrf.mxu1  ;;  %v2240_v38 = vadd.f32 %v2239_v19, %v15642_v60  ;;  %7272 = vpow2.f32 %v6279_v44  ;;  %v15646_v19 = vld [vmem:[#allocation29_spill] sm:$0xff] }
 0x43b   :  { %v2579_v33 = vadd.f32 %v2578_v0, %v15643_v11  ;;  %7274 = vpow2.f32 %v6244_v53  ;;  %v10530_v0 = vadd.f32 1.0, %v7263_v17 }
 0x43c   :  { %v6245_v36 = vmul.f32 -1.442695, %v2240_v38 }
 0x43d   :  { %v6281_v39 = vmul.f32 -1.442695, %v2579_v33  ;;  %v7267_v10 = vpop.eup %7266  ;;  %15647 = vst [vmem:[#allocation53_spill] sm:$0xff] %v10530_v0 }
 0x43e   :  { %7276 = vpow2.f32 %v6245_v36  ;;  %v10533_v61 = vpop.eup %7268 }
 0x43f   :  { %7278 = vpow2.f32 %v6281_v39  ;;  %v10537_v35 = vpop.eup %7270  ;;  %vm2660_vm9 = vweird.f32 %v10533_v61 }
 0x440   :  { %vm10770_vm11 = vmor %vm2659_vm1, %vm2660_vm9  ;;  %vm2675_vm10 = vweird.f32 %v10537_v35  ;;  %vm2674_vm1 = vweird.f32 %v10520_v23 }
 0x441   :  { %v2242_v13 = vpop.f32.mrf.mxu2 }
 0x442   :  { %v2581_v20 = vpop.f32.mrf.mxu1  ;;  %v2243_v58 = vadd.f32 %v2242_v13, %v15644_v30  ;;  %v10540_v13 = vadd.f32 1.0, %v7267_v10 }
 0x443   :  { %v2582_v14 = vadd.f32 %v2581_v20, %v15645_v55  ;;  %v7273_v20 = vpop.eup %7272 }
 0x444   :  { %v6246_v40 = vmul.f32 -1.442695, %v2243_v58  ;;  %v7275_v6 = vpop.eup %7274  ;;  %v10545_v44 = vadd.f32 1.0, %v7273_v20  ;;  %vm2719_vm2 = vweird.f32 %v10540_v13 }
 0x445   :  { %v6282_v32 = vmul.f32 -1.442695, %v2582_v14  ;;  %v7277_v38 = vpop.eup %7276 }
 0x446   :  { %7280 = vpow2.f32 %v6246_v40  ;;  %v7279_v33 = vpop.eup %7278  ;;  %15651 = vst [vmem:[#allocation17_spill] sm:$0xff] %v10545_v44 }
 0x447   :  { %7282 = vrcp.f32 %v10527_v46  ;;  %v10555_v17 = vadd.f32 1.0, %v7279_v33 }
 0x448   :  { %7284 = vpow2.f32 %v6282_v32 }
 0x449   :  { %v2244_v5 = vpop.f32.mrf.mxu2  ;;  %7286 = vrcp.f32 %v10530_v0  ;;  %vm2734_vm8 = vweird.f32 %v10555_v17 }
 0x44a   :  { %v2583_v12 = vpop.f32.mrf.mxu1  ;;  %v2245_v59 = vadd.f32 %v2244_v5, %v15646_v19  ;;  %7288 = vrcp.f32 %v10535_v49  ;;  %v10548_v5 = vadd.f32 1.0, %v7275_v6  ;;  %v15657_v6 = vld [vmem:[#allocation15_spill] sm:$0xff] }
 0x44b   :  { %v2584_v56 = vadd.f32 %v2583_v12, %v15648_v41  ;;  %7290 = vrcp.f32 %v10540_v13  ;;  %v10553_v12 = vadd.f32 1.0, %v7277_v38  ;;  %v10574_v38 = vmul.f32 %v10533_v61, %v10517_v43  ;;  %v15663_v19 = vld [vmem:[#allocation31_spill] sm:$0xff] }
 0x44c   :  { %v6247_v22 = vmul.f32 -1.442695, %v2245_v59  ;;  %v7281_v53 = vpop.eup %7280  ;;  %15652 = vst [vmem:[#allocation58_spill] sm:$0xff] %v10548_v5 }
 0x44d   :  { %v6283_v2 = vmul.f32 -1.442695, %v2584_v56  ;;  %v10551_v14 = vpop.eup %7282  ;;  %15654 = vst [vmem:[#allocation60_spill] sm:$0xff] %v10553_v12  ;;  %v10560_v42 = vadd.f32 1.0, %v7281_v53  ;;  %v15656_v56 = vld [vmem:[#allocation27_spill] sm:$0xff]  ;;  %v15679_v25 = vsub.f32 1.0, %v10574_v38 }
 0x44e   :  { %7292 = vpow2.f32 %v6247_v22  ;;  %v7285_v39 = vpop.eup %7284 }
 0x44f   :  { %7294 = vpow2.f32 %v6283_v2  ;;  %v10557_v40 = vpop.eup %7286 }
 0x450   :  { %v10562_v32 = vpop.eup %7288 }
 0x451   :  { %v2247_v31 = vpop.f32.mrf.mxu2  ;;  %15655 = vst [vmem:[#allocation45_spill] sm:$0xff] %v10562_v32  ;;  %v10566_v22 = vpop.eup %7290 }
 0x452   :  { %v2586_v45 = vpop.f32.mrf.mxu1  ;;  %v2248_v36 = vadd.f32 %v2247_v31, %v15653_v63  ;;  %vm2720_vm6 = vweird.f32 %v10566_v22 }
 0x453   :  { %v2587_v24 = vadd.f32 %v2586_v45, %v15650_v27  ;;  %v10569_v45 = vadd.f32 1.0, %v7285_v39  ;;  %v10584_v39 = vmul.f32 %v10551_v14, %v10527_v46  ;;  %vm10827_vm9 = vmor %vm2719_vm2, %vm2720_vm6 }
 0x454   :  { %v6248_v59 = vmul.f32 -1.442695, %v2248_v36 }
 0x455   :  { %v6284_v58 = vmul.f32 -1.442695, %v2587_v24  ;;  %v7293_v24 = vpop.eup %7292 }
 0x456   :  { %v7295_v33 = vpop.eup %7294  ;;  %v10594_v27 = vadd.f32 1.0, %v7293_v24 }
 0x457   :  { %7296 = vpow2.f32 %v6284_v58  ;;  %v10579_v58 = vmul.f32 %v10537_v35, %v10520_v23 }
 0x458   :  { %7298 = vrcp.f32 %v10545_v44 }
 0x459   :  { %v2249_v10 = vpop.f32.mrf.mxu2  ;;  %7300 = vrcp.f32 %v10548_v5 }
 0x45a   :  { %v2250_v31 = vadd.f32 %v2249_v10, %v15656_v56  ;;  %v2588_v20 = vpop.f32.mrf.mxu1  ;;  %7302 = vrcp.f32 %v10553_v12 }
 0x45b   :  { %v2589_v2 = vadd.f32 %v2588_v20, %v15657_v6  ;;  %7304 = vrcp.f32 %v10555_v17 }
 0x45c   :  { %7306 = vrcp.f32 %v10560_v42  ;;  %v6249_v10 = vmul.f32 -1.442695, %v2250_v31  ;;  %v2715_v31 = vmul.f32 %v10566_v22, %v10540_v13 }
 0x45d   :  { %v6285_v53 = vmul.f32 -1.442695, %v2589_v2  ;;  %v7297_v36 = vpop.eup %7296  ;;  %7308 = vpow2.f32 %v6248_v59  ;;  %v10601_v59 = vmul.f32 %v10557_v40, %v10530_v0 }
 0x45e   :  { %v10586_v20 = vpop.eup %7298  ;;  %7310 = vrcp.f32 %v10569_v45  ;;  %v10589_v56 = vadd.f32 1.0, %v7297_v36  ;;  %v10605_v36 = vadd.f32 1.0, %v7295_v33  ;;  %v2725_v33 = vand.u32 2147483648, %v10540_v13 }
 0x45f   :  { %15658 = vst [vmem:[#allocation55_spill] sm:$0xff] %v10586_v20  ;;  %v10591_v6 = vpop.eup %7300  ;;  %7312 = vpow2.f32 %v6285_v53  ;;  %v10612_v53 = vmul.f32 %v10562_v32, %v10535_v49  ;;  %v10619_v29 = vmul.f32 %v10586_v20, %v10545_v44  ;;  %v2716_v3 = vsub.f32 1.0, %v2715_v31 }
 0x460   :  { %15659 = vst [vmem:[#allocation50_spill] sm:$0xff] %v10591_v6  ;;  %v10596_v2 = vpop.eup %7302  ;;  %7314 = vpow2.f32 %v6249_v10  ;;  %v10626_v51 = vmul.f32 %v10591_v6, %v10548_v5  ;;  %v10642_v57 = vor.u32 1.1754944e-38, %v2725_v33  ;;  %v2391_v33 = vand.u32 2147483648, %v10560_v42 }
 0x461   :  { %15660 = vst [vmem:[#allocation38_spill] sm:$0xff] %v10596_v2  ;;  %v2252_v41 = vpop.f32.mrf.mxu2  ;;  %v10607_v30 = vpop.eup %7304  ;;  %7316 = vrcp.f32 %v10589_v56  ;;  %v2770_v37 = vand.u32 2147483648, %v10605_v36  ;;  %vm2779_vm5 = vweird.f32 %v10589_v56 }
 0x462   :  { %15661 = vst [vmem:[#allocation61_spill] sm:$0xff] %v10605_v36  ;;  %v2253_v63 = vadd.f32 %v2252_v41, %v15663_v19  ;;  %v2591_v55 = vpop.f32.mrf.mxu1  ;;  %v10615_v60 = vpop.eup %7306  ;;  %v2740_v41 = vand.u32 2147483648, %v10555_v17  ;;  %7318 = vrcp.f32 %v10594_v27  ;;  %v2730_v4 = vmul.f32 %v10607_v30, %v10555_v17 }
 0x463   :  { %15662 = vst [vmem:[#allocation46_spill] sm:$0xff] %v10612_v53  ;;  %v2592_v24 = vadd.f32 %v2591_v55, %v15665_v34  ;;  %v7309_v11 = vpop.eup %7308  ;;  %7320 = vrcp.f32 %v10605_v36  ;;  %v10637_v34 = vmul.f32 %v10596_v2, %v10553_v12  ;;  %v2381_v31 = vmul.f32 %v10615_v60, %v10560_v42  ;;  %v15669_v55 = vld [vmem:[#allocation32_spill] sm:$0xff] }
 0x464   :  { %15664 = vst [vmem:[#allocation56_spill] sm:$0xff] %v10619_v29  ;;  %v6250_v10 = vmul.f32 -1.442695, %v2253_v63  ;;  %v10630_v19 = vpop.eup %7310  ;;  %v10646_v8 = vadd.f32 1.0, %v7309_v11  ;;  %v10649_v28 = vor.u32 1.1754944e-38, %v2740_v41  ;;  %v2755_v11 = vand.u32 2147483648, %v10569_v45 }
 0x465   :  { %15666 = vst [vmem:[#allocation51_spill] sm:$0xff] %v10626_v51  ;;  %v6286_v52 = vmul.f32 -1.442695, %v2592_v24  ;;  %v7313_v1 = vpop.eup %7312  ;;  %v2745_v63 = vmul.f32 %v10630_v19, %v10569_v45  ;;  %v2382_v51 = vsub.f32 1.0, %v2381_v31  ;;  %vm2735_vm7 = vweird.f32 %v10607_v30 }
 0x466   :  { %15667 = vst [vmem:[#allocation43_spill] sm:$0xff] %v10637_v34  ;;  %7322 = vpow2.f32 %v6250_v10  ;;  %v7315_v24 = vpop.eup %7314  ;;  %v10651_v12 = vadd.f32 1.0, %v7313_v1  ;;  %v10656_v10 = vmul.f32 %v10566_v22, %v2716_v3  ;;  %v2731_v1 = vsub.f32 1.0, %v2730_v4 }
 0x467   :  { %15668 = vst [vmem:[#allocation47_spill] sm:$0xff] %v10646_v8  ;;  %7324 = vpow2.f32 %v6286_v52  ;;  %v10653_v2 = vpop.eup %7316  ;;  %v2406_v52 = vand.u32 2147483648, %v10594_v27  ;;  %v10674_v41 = vadd.f32 1.0, %v7315_v24  ;;  %v10679_v34 = vor.u32 1.1754944e-38, %v2755_v11 }
 0x468   :  { %v10662_v18 = vpop.eup %7318  ;;  %7326 = vrcp.f32 %v10646_v8  ;;  %v2775_v29 = vmul.f32 %v10653_v2, %v10589_v56  ;;  %v10688_v21 = vmul.f32 %v10607_v30, %v2731_v1  ;;  %v2421_v11 = vand.u32 2147483648, %v10646_v8 }
 0x469   :  { %v2254_v9 = vpop.f32.mrf.mxu2  ;;  %v10667_v3 = vpop.eup %7320  ;;  %15672 = vst [vmem:[#allocation57_spill] sm:$0xff] %v10674_v41  ;;  %7328 = vrcp.f32 %v10651_v12  ;;  %vm2780_vm13 = vweird.f32 %v10653_v2  ;;  %vm2794_vm14 = vweird.f32 %v10651_v12 }
 0x46a   :  { %v2255_v5 = vadd.f32 %v2254_v9, %v15669_v55  ;;  %v2593_v6 = vpop.f32.mrf.mxu1  ;;  %15670 = vst [vmem:[#allocation62_spill] sm:$0xff] %v10667_v3  ;;  %v10677_v9 = vor.u32 1.1754944e-38, %v2391_v33  ;;  %v2746_v55 = vsub.f32 1.0, %v2745_v63  ;;  %v10693_v63 = vor.u32 1.1754944e-38, %v2406_v52  ;;  %vm10780_vm4 = vmor %vm2779_vm5, %vm2780_vm13 }
 0x46b   :  { %v2594_v44 = vadd.f32 %v2593_v6, %v15671_v48  ;;  %15674 = vst [vmem:[#allocation64_spill] sm:$0xff] %v10679_v34  ;;  %v2396_v6 = vmul.f32 %v10662_v18, %v10594_v27  ;;  %v2760_v48 = vmul.f32 %v10667_v3, %v10605_v36  ;;  %v10696_v33 = vor.u32 1.1754944e-38, %v2770_v37 }
 0x46c   :  { %v7323_v20 = vpop.eup %7322  ;;  %v6251_v4 = vmul.f32 -1.442695, %v2255_v5  ;;  %15673 = vst [vmem:[#allocation52_spill] sm:$0xff] %v10677_v9  ;;  %v10691_v5 = vmul.f32 %v10615_v60, %v2382_v51  ;;  %v2776_v49 = vsub.f32 1.0, %v2775_v29  ;;  %v2663_v37 = vand.u32 2147483647, %v10517_v43 }
 0x46d   :  { %v10681_v31 = vadd.f32 1.0, %v7323_v20  ;;  %v7325_v16 = vpop.eup %7324  ;;  %v6287_v24 = vmul.f32 -1.442695, %v2594_v44  ;;  %15675 = vst [vmem:[#allocation48_spill] sm:$0xff] %v10693_v63  ;;  %v2665_v20 = vand.u32 2147483648, %v10517_v43  ;;  %v10703_v44 = vmul.f32 %v10630_v19, %v2746_v55 }
 0x46e   :  { %7330 = vpow2.f32 %v6251_v4  ;;  %15676 = vst [vmem:[#allocation21_spill] sm:$0xff] %v10696_v33  ;;  %v10700_v26 = vpop.eup %7326  ;;  %v10706_v51 = vadd.f32 1.0, %v7325_v16  ;;  %v2397_v4 = vsub.f32 1.0, %v2396_v6  ;;  %v2761_v29 = vsub.f32 1.0, %v2760_v48  ;;  %v15678_v33 = vld [vmem:[#allocation30_spill] sm:$0xff] }
 0x46f   :  { %7332 = vrcp.f32 %v10674_v41  ;;  %15677 = vst [vmem:[#allocation41_spill] sm:$0xff] %v10700_v26  ;;  %v10710_v52 = vpop.eup %7328  ;;  %v2783_v34 = vand.u32 2147483647, %v10589_v56  ;;  %v2785_v55 = vand.u32 2147483648, %v10589_v56  ;;  %v2657_v16 = vmul.f32 %v10533_v61, %v15679_v25 }
 0x470   :  { %7334 = vrcp.f32 %v10681_v31  ;;  %v2666_v36 = vor.u32 1.1754944e-38, %v2665_v20  ;;  %v2411_v53 = vmul.f32 %v10700_v26, %v10646_v8  ;;  %v10720_v9 = vor.u32 1.1754944e-38, %v2421_v11 }
 0x471   :  { %v2257_v1 = vpop.f32.mrf.mxu2  ;;  %7336 = vpow2.f32 %v6287_v24  ;;  %v2777_v48 = vmul.f32 %v10653_v2, %v2776_v49  ;;  %v2790_v24 = vmul.f32 %v10710_v52, %v10651_v12  ;;  %vm10730_vm15 = vcmp.eq.f32.partialorder %v2663_v37, 8.507059e+37 }
 0x472   :  { %v2258_v63 = vadd.f32 %v2257_v1, %v15678_v33  ;;  %15680 = vst [vmem:[#allocation65_spill] sm:$0xff] %v10720_v9  ;;  %v2596_v6 = vpop.f32.mrf.mxu1  ;;  %7338 = vrcp.f32 %v10706_v51  ;;  %v10737_v49 = vmul.f32 %v10662_v18, %v2397_v4  ;;  %v10740_v1 = vmul.f32 %v10667_v3, %v2761_v29 }
 0x473   :  { %v2436_v33 = vand.u32 2147483648, %v10674_v41  ;;  %vm10747_vm12 = vcmp.eq.f32.partialorder %v2783_v34, 8.507059e+37  ;;  %v2658_v37 = vadd.f32 %v10533_v61, %v2657_v16  ;;  %v2778_v8 = vadd.f32 %v10653_v2, %v2777_v48 }
 0x474   :  { %v7331_v32 = vpop.eup %7330  ;;  %v6252_v38 = vmul.f32 -1.442695, %v2258_v63  ;;  %15684 = vst [vmem:[#allocation66_spill] sm:$0xff] %v10737_v49  ;;  %v2786_v63 = vor.u32 1.1754944e-38, %v2785_v55  ;;  %v2597_v49 = vadd.f32 %v2596_v6, %v8419_v54  ;;  %v2791_v3 = vsub.f32 1.0, %v2790_v24 }
 0x475   :  { %v10728_v25 = vadd.f32 1.0, %v7331_v32  ;;  %v10734_v11 = vpop.eup %7332  ;;  %15685 = vst [vmem:[#allocation67_spill] sm:$0xff] %v10740_v1  ;;  %v2412_v1 = vsub.f32 1.0, %v2411_v53  ;;  %v10761_v55 = vor.u32 1.1754944e-38, %v2436_v33  ;;  %v2800_v16 = vand.u32 2147483648, %v10651_v12 }
 0x476   :  { %15683 = vst [vmem:[#allocation42_spill] sm:$0xff] %v10734_v11  ;;  %v10744_v9 = vpop.eup %7334  ;;  %v2426_v34 = vmul.f32 %v10734_v11, %v10674_v41  ;;  %v2798_v43 = vand.u32 2147483647, %v10651_v12  ;;  %v2782_v56 = vsel %vm10780_vm4, %v10653_v2, %v2778_v8  ;;  %v2451_v54 = vand.u32 2147483648, %v10681_v31 }
 0x477   :  { %7340 = vrcp.f32 %v10728_v25  ;;  %v7337_v29 = vpop.eup %7336  ;;  %15688 = vst [vmem:[#allocation68_spill] sm:$0xff] %v10761_v55  ;;  %v2441_v53 = vmul.f32 %v10744_v9, %v10681_v31  ;;  %v10793_v4 = vmul.f32 %v10700_v26, %v2412_v1  ;;  %v2718_v1 = vadd.f32 %v10566_v22, %v10656_v10 }
 0x478   :  { %v10759_v0 = vadd.f32 1.0, %v7337_v29  ;;  %7342 = vpow2.f32 %v6252_v38  ;;  %v10775_v24 = vpop.eup %7338  ;;  %v2662_v38 = vsel %vm10770_vm11, %v10533_v61, %v2658_v37  ;;  %v15693_v29 = vsub.f32 1.0, %v10579_v58 }
 0x479   :  { %15694 = vst [vmem:[#allocation69_spill] sm:$0xff] %v10793_v4  ;;  %7344 = vtanh.f32 %v2597_v49  ;;  %v2259_v55 = vpop.f32.mrf.mxu2  ;;  %v2427_v61 = vsub.f32 1.0, %v2426_v34  ;;  %v2792_v58 = vmul.f32 %v10710_v52, %v2791_v3  ;;  %v2801_v37 = vor.u32 1.1754944e-38, %v2800_v16 }
 0x47a   :  { %v2672_v6 = vmul.f32 %v10537_v35, %v15693_v29  ;;  %7346 = vrcp.f32 %v10759_v0  ;;  %v2442_v8 = vsub.f32 1.0, %v2441_v53  ;;  %v2805_v2 = vmul.f32 %v10775_v24, %v10706_v51  ;;  %v2598_v48 = vpop.f32.mrf.mxu1 }
 0x47b   :  { %v2667_v49 = vsel %vm10730_vm15, %v2666_v36, %v2662_v38  ;;  %vm10811_vm3 = vcmp.eq.f32.partialorder %v2798_v43, 8.507059e+37  ;;  %v2815_v3 = vand.u32 2147483648, %v10706_v51  ;;  %v2723_v16 = vand.u32 2147483647, %v10540_v13 }
 0x47c   :  { %v10820_v53 = vadd.f32 %v10537_v35, %v2672_v6  ;;  %v10833_v20 = vsel %vm10747_vm12, %v2786_v63, %v2782_v56  ;;  %vm2795_vm15 = vweird.f32 %v10710_v52  ;;  %v2449_v43 = vand.u32 2147483647, %v10681_v31 }
 0x47d   :  { %v10799_v41 = vpop.eup %7340  ;;  %15699 = vst [vmem:[#allocation70_spill] sm:$0xff] %v10833_v20  ;;  %v10837_v6 = vor.u32 1.1754944e-38, %v2451_v54  ;;  %v10840_v38 = vmul.f32 %v10734_v11, %v2427_v61  ;;  %v2793_v29 = vadd.f32 %v10710_v52, %v2792_v58  ;;  %vm2445_vm6 = vweird.f32 %v10681_v31  ;;  %v15701_v11 = vld [vmem:[#allocation33_spill] sm:$0xff]  ;;  %vm10867_vm12 = vmor %vm2794_vm14, %vm2795_vm15 }
 0x47e   :  { %v7343_v33 = vpop.eup %7342  ;;  %v2456_v10 = vmul.f32 %v10799_v41, %v10728_v25  ;;  %v2722_v13 = vsel %vm10827_vm9, %v10566_v22, %v2718_v1  ;;  %v2599_v32 = vadd.f32 %v2598_v48, %v8480_v62  ;;  %v2443_v56 = vmul.f32 %v10744_v9, %v2442_v8  ;;  %vm10890_vm9 = vmor %vm2734_vm8, %vm2735_vm7 }
 0x47f   :  { %15700 = vst [vmem:[#allocation71_spill] sm:$0xff] %v10840_v38  ;;  %v7345_v63 = vpop.eup %7344  ;;  %v2806_v4 = vsub.f32 1.0, %v2805_v2  ;;  %v2813_v54 = vand.u32 2147483647, %v10706_v51  ;;  %v10850_v26 = vadd.f32 1.0, %v7343_v33  ;;  %v10854_v38 = vor.u32 1.1754944e-38, %v2815_v3  ;;  %vm10917_vm8 = vmor %vm2674_vm1, %vm2675_vm10 }
 0x480   :  { %v10852_v61 = vpop.eup %7346  ;;  %v2457_v58 = vsub.f32 1.0, %v2456_v10  ;;  %vm2724_vm5 = vcmp.eq.f32.partialorder %v2723_v16, 8.507059e+37  ;;  %v2260_v20 = vadd.f32 %v2259_v55, %v15701_v11  ;;  %v15702_v22 = vand.u32 2147483647, %v10520_v23 }
 0x481   :  { %vm2446_vm13 = vweird.f32 %v10744_v9  ;;  %vm2809_vm11 = vweird.f32 %v10706_v51  ;;  %v2466_v55 = vand.u32 2147483648, %v10728_v25  ;;  %v2727_v2 = vsel %vm2724_vm5, %v10642_v57, %v2722_v13 }
 0x482   :  { %vm10859_vm2 = vcmp.eq.f32.partialorder %v15702_v22, 8.507059e+37  ;;  %v2733_v48 = vadd.f32 %v10607_v30, %v10688_v21  ;;  %vm2386_vm4 = vweird.f32 %v10615_v60  ;;  %v2797_v12 = vsel %vm10867_vm12, %v10710_v52, %v2793_v29  ;;  %vm10933_vm10 = vmor %vm2445_vm6, %vm2446_vm13  ;;  %v2601_v33 = vpop.f32.mrf.mxu1 }
 0x483   :  { %vm10881_vm14 = vcmp.eq.f32.partialorder %v2449_v43, 8.507059e+37  ;;  %v2842_v3 = vmul.f32 %v7345_v63, %v2667_v49  ;;  %v2738_v10 = vand.u32 2147483647, %v10555_v17  ;;  %7348 = vtanh.f32 %v2599_v32  ;;  %v2262_v49 = vpop.f32.mrf.mxu2 }
 0x484   :  { %v2444_v57 = vadd.f32 %v10744_v9, %v2443_v56  ;;  %v2807_v52 = vmul.f32 %v10775_v24, %v2806_v4  ;;  %v2820_v16 = vmul.f32 %v10852_v61, %v10759_v0  ;;  %7350 = vrcp.f32 %v10850_v26 }
 0x485   :  { %vm2385_vm15 = vweird.f32 %v10560_v42  ;;  %v2458_v36 = vmul.f32 %v10799_v41, %v2457_v58  ;;  %v2838_v17 = vmul.f32 %v2727_v2, %v10100_v15  ;;  %v6253_v43 = vmul.f32 -1.442695, %v2260_v20 }
 0x486   :  { %v2737_v29 = vsel %vm10890_vm9, %v10607_v30, %v2733_v48  ;;  %v10907_v4 = vsel %vm10811_vm3, %v2801_v37, %v2797_v12  ;;  %vm2460_vm7 = vweird.f32 %v10728_v25  ;;  %v2464_v13 = vand.u32 2147483647, %v10728_v25 }
 0x487   :  { %v10911_v32 = vor.u32 1.1754944e-38, %v2466_v55  ;;  %vm2810_vm5 = vweird.f32 %v10775_v24  ;;  %v10922_v30 = vadd.f32 %v2842_v3, %v2838_v17  ;;  %v2677_v37 = vsel %vm10917_vm8, %v10537_v35, %v10820_v53 }
 0x488   :  { %vm2739_vm3 = vcmp.eq.f32.partialorder %v2738_v10, 8.507059e+37  ;;  %vm2750_vm12 = vweird.f32 %v10630_v19  ;;  %v10938_v20 = vadd.f32 %v10775_v24, %v2807_v52  ;;  %v2821_v63 = vsub.f32 1.0, %v2820_v16  ;;  %vm10964_vm13 = vmor %vm2809_vm11, %vm2810_vm5 }
 0x489   :  { %v15715_v56 = vand.u32 2147483648, %v10520_v23  ;;  %v2742_v35 = vsel %vm2739_vm3, %v10649_v28, %v2737_v29  ;;  %v7349_v53 = vpop.eup %7348  ;;  %v2448_v22 = vsel %vm10933_vm10, %v10744_v9, %v2444_v57  ;;  %v10947_v31 = vadd.f32 %v10799_v41, %v2458_v36 }
 0x48a   :  { %vm2461_vm1 = vweird.f32 %v10799_v41  ;;  %7352 = vpow2.f32 %v6253_v43  ;;  %v10950_v8 = vpop.eup %7350  ;;  %vm2749_vm6 = vweird.f32 %v10569_v45  ;;  %v2828_v23 = vand.u32 2147483647, %v10759_v0 }
 0x48b   :  { %v2681_v58 = vor.u32 1.1754944e-38, %v15715_v56  ;;  %v2263_v55 = vadd.f32 %v2262_v49, %v15534_v50  ;;  %v15716_v2 = vsub.f32 1.0, %v10584_v39  ;;  %7354 = vtanh.f32 %v10922_v30  ;;  %v2264_v29 = vpop.f32.mrf.mxu2  ;;  %vm11050_vm3 = vmor %vm2749_vm6, %vm2750_vm12 }
 0x48c   :  { %v2839_v12 = vmul.f32 %v2742_v35, %v10190_v7  ;;  %v2384_v3 = vadd.f32 %v10615_v60, %v10691_v5  ;;  %v10975_v39 = vsel %vm10881_vm14, %v10837_v6, %v2448_v22  ;;  %v2812_v10 = vsel %vm10964_vm13, %v10775_v24, %v10938_v20  ;;  %vm11006_vm14 = vmor %vm2385_vm15, %vm2386_vm4 }
 0x48d   :  { %v2682_v28 = vsel %vm10859_vm2, %v2681_v58, %v2677_v37  ;;  %v2323_v9 = vmul.f32 %v10551_v14, %v15716_v2  ;;  %vm10985_vm2 = vmor %vm2460_vm7, %vm2461_vm1  ;;  %v2822_v5 = vmul.f32 %v10852_v61, %v2821_v63  ;;  %v2830_v21 = vand.u32 2147483648, %v10759_v0 }
 0x48e   :  { %v2843_v1 = vmul.f32 %v7349_v53, %v2682_v28  ;;  %v2463_v6 = vsel %vm10985_vm2, %v10799_v41, %v10947_v31  ;;  %v10997_v57 = vmul.f32 %v10950_v8, %v10850_v26  ;;  %vm2326_vm11 = vweird.f32 %v10551_v14  ;;  %v15726_v53 = vld [vmem:[#allocation53_spill] sm:$0xff] }
 0x48f   :  { %vm2401_vm9 = vweird.f32 %v10662_v18  ;;  %v2324_v49 = vadd.f32 %v10551_v14, %v2323_v9  ;;  %v2389_v36 = vand.u32 2147483647, %v10560_v42  ;;  %7356 = vtanh.f32 %v2263_v55 }
 0x490   :  { %v10999_v52 = vadd.f32 %v2843_v1, %v2839_v12  ;;  %v15723_v17 = vsub.f32 1.0, %v10601_v59  ;;  %v7353_v15 = vpop.eup %7352  ;;  %v2331_v37 = vand.u32 2147483648, %v10527_v46  ;;  %v2388_v34 = vsel %vm11006_vm14, %v10615_v60, %v2384_v3  ;;  %v15730_v12 = vld [vmem:[#allocation62_spill] sm:$0xff] }
 0x491   :  { %v2602_v63 = vadd.f32 %v2601_v33, %v15567_v47  ;;  %vm2400_vm4 = vweird.f32 %v10594_v27  ;;  %v11024_v42 = vadd.f32 %v10852_v61, %v2822_v5  ;;  %vm2325_vm15 = vweird.f32 %v10527_v46  ;;  %v7355_v58 = vpop.eup %7354  ;;  %v15731_v5 = vld [vmem:[#allocation70_spill] sm:$0xff] }
 0x492   :  { %v2687_v43 = vmul.f32 %v10557_v40, %v15723_v17  ;;  %7358 = vtanh.f32 %v10999_v52  ;;  %v2329_v59 = vand.u32 2147483647, %v10527_v46  ;;  %v2748_v56 = vadd.f32 %v10630_v19, %v10703_v44  ;;  %vm11032_vm7 = vmor %vm2325_vm15, %vm2326_vm11  ;;  %v15727_v44 = vld [vmem:[#allocation52_spill] sm:$0xff] }
 0x493   :  { %vm2390_vm8 = vcmp.eq.f32.partialorder %v2389_v36, 8.507059e+37  ;;  %vm2690_vm5 = vweird.f32 %v10557_v40  ;;  %v2693_v22 = vand.u32 2147483647, %v15726_v53  ;;  %v11039_v28 = vadd.f32 1.0, %v7353_v15  ;;  %v15734_v36 = vld [vmem:[#allocation46_spill] sm:$0xff] }
 0x494   :  { %v2688_v60 = vadd.f32 %v10557_v40, %v2687_v43  ;;  %v2328_v46 = vsel %vm11032_vm7, %v10551_v14, %v2324_v49  ;;  %v2393_v55 = vsel %vm2390_vm8, %v15727_v44, %v2388_v34  ;;  %v2695_v2 = vand.u32 2147483648, %v15726_v53  ;;  %v15736_v43 = vld [vmem:[#allocation45_spill] sm:$0xff]  ;;  %v15741_v44 = vld [vmem:[#allocation64_spill] sm:$0xff]  ;;  %vm11092_vm8 = vmor %vm2400_vm4, %vm2401_vm9 }
 0x495   :  { %vm2765_vm10 = vweird.f32 %v15730_v12  ;;  %v2332_v1 = vor.u32 1.1754944e-38, %v2331_v37  ;;  %vm2689_vm1 = vweird.f32 %v15726_v53  ;;  %v2753_v3 = vand.u32 2147483647, %v10569_v45  ;;  %v7357_v14 = vpop.eup %7356  ;;  %v15737_v37 = vld [vmem:[#allocation61_spill] sm:$0xff] }
 0x496   :  { %7360 = vtanh.f32 %v2602_v63  ;;  %v2854_v33 = vmul.f32 %v7355_v58, %v15731_v5  ;;  %vm2330_vm11 = vcmp.eq.f32.partialorder %v2329_v59, 8.507059e+37  ;;  %vm11060_vm14 = vmor %vm2689_vm1, %vm2690_vm5  ;;  %v2752_v49 = vsel %vm11050_vm3, %v10630_v19, %v2748_v56  ;;  %v15738_v63 = vld [vmem:[#allocation54_spill] sm:$0xff]  ;;  %v15742_v5 = vld [vmem:[#allocation36_spill] sm:$0xff] }
 0x497   :  { %v15735_v17 = vsub.f32 1.0, %v15734_v36  ;;  %vm2764_vm12 = vweird.f32 %v15737_v37  ;;  %v2333_v34 = vsel %vm2330_vm11, %v2332_v1, %v2328_v46  ;;  %v2504_v59 = vmul.f32 %v2393_v55, %v15738_v63  ;;  %v15743_v1 = vld [vmem:[#allocation49_spill] sm:$0xff] }
 0x498   :  { %v7359_v45 = vpop.eup %7358  ;;  %v2692_v58 = vsel %vm11060_vm14, %v10557_v40, %v2688_v60  ;;  %vm11075_vm6 = vcmp.eq.f32.partialorder %v2693_v22, 8.507059e+37  ;;  %v2508_v56 = vmul.f32 %v7357_v14, %v2333_v34  ;;  %v2696_v53 = vor.u32 1.1754944e-38, %v2695_v2  ;;  %v15744_v22 = vld [vmem:[#allocation66_spill] sm:$0xff]  ;;  %v2267_v14 = vpop.f32.mrf.mxu2 }
 0x499   :  { %v2338_v15 = vmul.f32 %v15736_v43, %v15735_v17  ;;  %v2855_v19 = vmul.f32 %v7359_v45, %v10907_v4  ;;  %vm2754_vm15 = vcmp.eq.f32.partialorder %v2753_v3, 8.507059e+37  ;;  %v2265_v36 = vadd.f32 %v2264_v29, %v15742_v5  ;;  %v2603_v4 = vpop.f32.mrf.mxu1 }
 0x49a   :  { %v2757_v9 = vsel %vm2754_vm15, %v15741_v44, %v2752_v49  ;;  %vm2341_vm7 = vweird.f32 %v15736_v43  ;;  %v2344_v40 = vand.u32 2147483647, %v15743_v1  ;;  %v2346_v60 = vand.u32 2147483648, %v15743_v1  ;;  %v15747_v49 = vld [vmem:[#allocation41_spill] sm:$0xff] }
 0x49b   :  { %v2339_v46 = vadd.f32 %v15736_v43, %v2338_v15  ;;  %v6759_v55 = vpack.c.bf16 %v2855_v19, %v2854_v33  ;;  %v2399_v16 = vadd.f32 %v10662_v18, %v15744_v22  ;;  %7362 = vrcp.f32 %v11039_v28  ;;  %v15749_v15 = vld [vmem:[#allocation37_spill] sm:$0xff]  ;;  %v15753_v19 = vld [vmem:[#allocation56_spill] sm:$0xff] }
 0x49c   :  { %v7361_v2 = vpop.eup %7360  ;;  %v2697_v3 = vsel %vm11075_vm6, %v2696_v53, %v2692_v58  ;;  %vm2340_vm5 = vweird.f32 %v15743_v1  ;;  %v2404_v33 = vand.u32 2147483647, %v10594_v27  ;;  %vm2416_vm3 = vweird.f32 %v15747_v49  ;;  %v15755_v53 = vld [vmem:[#allocation55_spill] sm:$0xff]  ;;  %vm11132_vm6 = vmor %vm2764_vm12, %vm2765_vm10 }
 0x49d   :  { %6760 = vst [vmem:[#allocation3] sm:$0xff] %v6759_v55   ;;  %v11102_v17 = vadd.f32 %v2508_v56, %v2504_v59  ;;  %v2840_v45 = vmul.f32 %v2757_v9, %v15749_v15  ;;  %v2844_v34 = vmul.f32 %v7361_v2, %v2697_v3  ;;  %vm11107_vm9 = vmor %vm2340_vm5, %vm2341_vm7  ;;  %v2403_v58 = vsel %vm11092_vm8, %v10662_v18, %v2399_v16  ;;  %v15752_v59 = vld [vmem:[#allocation20_spill] sm:$0xff]  ;;  %v15756_v9 = vld [vmem:[#allocation47_spill] sm:$0xff] }
 0x49e   :  { %6912 = vst [vmem:[#allocation2 + $0x8] sm:$0xff] %v6759_v55   ;;  %v2343_v27 = vsel %vm11107_vm9, %v15736_v43, %v2339_v46  ;;  %7364 = vtanh.f32 %v2265_v36  ;;  %v2604_v35 = vadd.f32 %v2603_v4, %v15752_v59  ;;  %v15754_v56 = vsub.f32 1.0, %v15753_v19  ;;  %v15757_v18 = vld [vmem:[#allocation48_spill] sm:$0xff]  ;;  %v15758_v16 = vld [vmem:[#allocation17_spill] sm:$0xff]  ;;  %v15759_v36 = vld [vmem:[#allocation67_spill] sm:$0xff] }
 0x49f   :  { %15748 = vst [vmem:[#allocation53_spill] sm:$0xff] %v11102_v17  ;;  %vm2415_vm4 = vweird.f32 %v15756_v9  ;;  %vm2345_vm1 = vcmp.eq.f32.partialorder %v2344_v40, 8.507059e+37  ;;  %v2347_v1 = vor.u32 1.1754944e-38, %v2346_v60  ;;  %vm2405_vm11 = vcmp.eq.f32.partialorder %v2404_v33, 8.507059e+37  ;;  %v15762_v40 = vld [vmem:[#allocation42_spill] sm:$0xff]  ;;  %v15778_v33 = vld [vmem:[#allocation69_spill] sm:$0xff] }
 0x4a0   :  { %v2702_v44 = vmul.f32 %v15755_v53, %v15754_v56  ;;  %vm2705_vm14 = vweird.f32 %v15755_v53  ;;  %v2408_v55 = vsel %vm2405_vm11, %v15757_v18, %v2403_v58  ;;  %v2710_v43 = vand.u32 2147483648, %v15758_v16  ;;  %v15767_v58 = vld [vmem:[#allocation57_spill] sm:$0xff]  ;;  %v15769_v56 = vld [vmem:[#allocation51_spill] sm:$0xff] }
 0x4a1   :  { %v2763_v46 = vadd.f32 %v15730_v12, %v15759_v36  ;;  %vm2431_vm15 = vweird.f32 %v15762_v40  ;;  %v11137_v60 = vadd.f32 %v2844_v34, %v2840_v45  ;;  %v2348_v2 = vsel %vm2345_vm1, %v2347_v1, %v2343_v27  ;;  %v11141_v3 = vpop.eup %7362  ;;  %v15766_v34 = vld [vmem:[#allocation34_spill] sm:$0xff] }
 0x4a2   :  { %v2703_v22 = vadd.f32 %v15755_v53, %v2702_v44  ;;  %vm2704_vm7 = vweird.f32 %v15758_v16  ;;  %v2768_v29 = vand.u32 2147483647, %v15737_v37  ;;  %vm2825_vm8 = vweird.f32 %v10852_v61  ;;  %v15768_v37 = vld [vmem:[#allocation59_spill] sm:$0xff]  ;;  %v15771_v1 = vld [vmem:[#allocation50_spill] sm:$0xff] }
 0x4a3   :  { %15763 = vst [vmem:[#allocation52_spill] sm:$0xff] %v11137_v60  ;;  %vm11144_vm5 = vmor %vm2704_vm7, %vm2705_vm14  ;;  %v2708_v15 = vand.u32 2147483647, %v15758_v16  ;;  %v2767_v45 = vsel %vm11132_vm6, %v15730_v12, %v2763_v46  ;;  %7366 = vtanh.f32 %v2604_v35  ;;  %v2268_v63 = vadd.f32 %v2267_v14, %v15766_v34  ;;  %v15772_v35 = vld [vmem:[#allocation21_spill] sm:$0xff]  ;;  %v15773_v14 = vld [vmem:[#allocation58_spill] sm:$0xff] }
 0x4a4   :  { %vm2430_vm10 = vweird.f32 %v15767_v58  ;;  %v2505_v27 = vmul.f32 %v2408_v55, %v15768_v37  ;;  %v2707_v19 = vsel %vm11144_vm5, %v15755_v53, %v2703_v22  ;;  %vm2769_vm12 = vcmp.eq.f32.partialorder %v2768_v29, 8.507059e+37  ;;  %v7365_v16 = vpop.eup %7364  ;;  %vm11191_vm5 = vmor %vm2415_vm4, %vm2416_vm3  ;;  %v15851_v34 = vld [vmem:[#allocation32_spill] sm:$0xff] }
 0x4a5   :  { %v15770_v44 = vsub.f32 1.0, %v15769_v56  ;;  %vm2824_vm9 = vweird.f32 %v10759_v0  ;;  %v2711_v12 = vor.u32 1.1754944e-38, %v2710_v43  ;;  %v2772_v36 = vsel %vm2769_vm12, %v15772_v35, %v2767_v45  ;;  %v2269_v43 = vpop.f32.mrf.mxu2  ;;  %v15784_v35 = vld [vmem:[#allocation43_spill] sm:$0xff] }
 0x4a6   :  { %vm2355_vm1 = vweird.f32 %v15773_v14  ;;  %vm2356_vm11 = vweird.f32 %v15771_v1  ;;  %vm11167_vm14 = vcmp.eq.f32.partialorder %v2464_v13, 8.507059e+37  ;;  %v2509_v53 = vmul.f32 %v7365_v16, %v2348_v2  ;;  %v15783_v16 = vld [vmem:[#allocation39_spill] sm:$0xff] }
 0x4a7   :  { %v2353_v18 = vmul.f32 %v15771_v1, %v15770_v44  ;;  %v2359_v46 = vand.u32 2147483647, %v15773_v14  ;;  %v2361_v4 = vand.u32 2147483648, %v15773_v14  ;;  %vm2709_vm6 = vcmp.eq.f32.partialorder %v2708_v15, 8.507059e+37  ;;  %vm11174_vm7 = vmor %vm2355_vm1, %vm2356_vm11  ;;  %v15782_v44 = vld [vmem:[#allocation63_spill] sm:$0xff] }
 0x4a8   :  { %v2414_v25 = vadd.f32 %v15747_v49, %v15778_v33  ;;  %v2419_v13 = vand.u32 2147483647, %v15756_v9  ;;  %7368 = vtanh.f32 %v2268_v63  ;;  %v11182_v2 = vadd.f32 %v2509_v53, %v2505_v27  ;;  %vm11228_vm11 = vmor %vm2430_vm10, %vm2431_vm15 }
 0x4a9   :  { %v2354_v22 = vadd.f32 %v15771_v1, %v2353_v18  ;;  %7370 = vtanh.f32 %v11102_v17  ;;  %v2712_v45 = vsel %vm2709_vm6, %v2711_v12, %v2707_v19  ;;  %v7367_v15 = vpop.eup %7366  ;;  %v2841_v63 = vmul.f32 %v2772_v36, %v15782_v44  ;;  %v15786_v12 = vld [vmem:[#allocation38_spill] sm:$0xff]  ;;  %vm11239_vm6 = vmor %vm2824_vm9, %vm2825_vm8 }
 0x4aa   :  { %15779 = vst [vmem:[#allocation62_spill] sm:$0xff] %v11182_v2  ;;  %v2362_v18 = vor.u32 1.1754944e-38, %v2361_v4  ;;  %v2270_v27 = vadd.f32 %v2269_v43, %v15783_v16  ;;  %v15785_v19 = vsub.f32 1.0, %v15784_v35  ;;  %7372 = vtanh.f32 %v11182_v2  ;;  %v11213_v4 = vld [vmem:[#allocation2] sm:$0xff] }
 0x4ab   :  { %v2358_v37 = vsel %vm11174_vm7, %v15771_v1, %v2354_v22  ;;  %v2845_v1 = vmul.f32 %v7367_v15, %v2712_v45  ;;  %vm2360_vm12 = vcmp.eq.f32.partialorder %v2359_v46, 8.507059e+37  ;;  %v2418_v9 = vsel %vm11191_vm5, %v15747_v49, %v2414_v25  ;;  %v6394_v46 = vld [vmem:[%s15073_s0 + $0x28] sm:$0xff]   ;;  %v15793_v25 = vld [vmem:[#allocation65_spill] sm:$0xff]  ;;  %v15794_v45 = vld [vmem:[#allocation60_spill] sm:$0xff] }
 0x4ac   :  { %v2368_v14 = vmul.f32 %v15786_v12, %v15785_v19  ;;  %vm11206_vm3 = vcmp.eq.f32.partialorder %v2813_v54, 8.507059e+37  ;;  %v2486_v36 = vmul.f32 %v11141_v3, %v11039_v28  ;;  %7374 = vtanh.f32 %v11137_v60  ;;  %v15790_v54 = vld [vmem:[#allocation71_spill] sm:$0xff]  ;;  %3893 = vst [vmem:[#allocation2] sm:$0xff] %v6394_v46  }
 0x4ad   :  { %v2363_v22 = vsel %vm2360_vm12, %v2362_v18, %v2358_v37  ;;  %vm2420_vm4 = vcmp.eq.f32.partialorder %v2419_v13, 8.507059e+37  ;;  %v11218_v49 = vadd.f32 %v2845_v1, %v2841_v63  ;;  %vm2371_vm1 = vweird.f32 %v15786_v12 }
 0x4ae   :  { %v2369_v51 = vadd.f32 %v15786_v12, %v2368_v14  ;;  %v2429_v43 = vadd.f32 %v15762_v40, %v15790_v54  ;;  %v7369_v29 = vpop.eup %7368  ;;  %v2423_v13 = vsel %vm2420_vm4, %v15793_v25, %v2418_v9  ;;  %v2376_v37 = vand.u32 2147483648, %v15794_v45 }
 0x4af   :  { %15789 = vst [vmem:[#allocation70_spill] sm:$0xff] %v11218_v49  ;;  %v2434_v15 = vand.u32 2147483647, %v15767_v58  ;;  %7376 = vtanh.f32 %v2270_v27  ;;  %v7371_v56 = vpop.eup %7370  ;;  %v2510_v63 = vmul.f32 %v7369_v29, %v2363_v22  ;;  %vm2370_vm15 = vweird.f32 %v15794_v45 }
 0x4b0   :  { %7378 = vtanh.f32 %v11218_v49  ;;  %v2374_v18 = vand.u32 2147483647, %v15794_v45  ;;  %v2468_v58 = vsel %vm11167_vm14, %v10911_v32, %v2463_v6  ;;  %v2472_v27 = vsub.f32 1.0, %v10997_v57  ;;  %vm11257_vm8 = vmor %vm2370_vm15, %vm2371_vm1  ;;  %v7373_v14 = vpop.eup %7372  ;;  %v15799_v32 = vld [vmem:[#allocation44_spill] sm:$0xff] }
 0x4b1   :  { %v2487_v35 = vsub.f32 1.0, %v2486_v36  ;;  %v2433_v7 = vsel %vm11228_vm11, %v15762_v40, %v2429_v43  ;;  %v2827_v41 = vsel %vm11239_vm6, %v10852_v61, %v11024_v42  ;;  %v2506_v31 = vmul.f32 %v2423_v13, %v15799_v32  ;;  %v15800_v36 = vld [vmem:[#allocation68_spill] sm:$0xff] }
 0x4b2   :  { %v2373_v6 = vsel %vm11257_vm8, %v15786_v12, %v2369_v51  ;;  %vm2435_vm2 = vcmp.eq.f32.partialorder %v2434_v15, 8.507059e+37  ;;  %v7375_v57 = vpop.eup %7374  ;;  %v2520_v55 = vmul.f32 %v7371_v56, %v10975_v39  ;;  %v2521_v1 = vmul.f32 %v7373_v14, %v2468_v58  ;;  %v6649_v14 = vld [vmem:[#allocation2 + $0x8] sm:$0xff] }
 0x4b3   :  { %v2377_v9 = vor.u32 1.1754944e-38, %v2376_v37  ;;  %v2438_v40 = vsel %vm2435_vm2, %v15800_v36, %v2433_v7  ;;  %vm2829_vm10 = vcmp.eq.f32.partialorder %v2828_v23, 8.507059e+37  ;;  %v2831_v61 = vor.u32 1.1754944e-38, %v2830_v21  ;;  %v15802_v21 = vld [vmem:[#allocation40_spill] sm:$0xff]  ;;  %v7999_v36 = vld [vmem:[%s15079_s3 + $0x18] sm:$0xff] }
 0x4b4   :  { %v11278_v42 = vadd.f32 %v2510_v63, %v2506_v31  ;;  %vm2375_vm9 = vcmp.eq.f32.partialorder %v2374_v18, 8.507059e+37  ;;  %v2473_v12 = vmul.f32 %v10950_v8, %v2472_v27  ;;  %v2488_v46 = vmul.f32 %v11141_v3, %v2487_v35  ;;  %v6644_v31 = vld [vmem:[#allocation3] sm:$0xff] }
 0x4b5   :  { %v7377_v22 = vpop.eup %7376  ;;  %v6769_v51 = vpack.c.bf16 %v2521_v1, %v2520_v55  ;;  %v2378_v39 = vsel %vm2375_vm9, %v2377_v9, %v2373_v6  ;;  %v2817_v0 = vsel %vm11206_vm3, %v10854_v38, %v2812_v10  ;;  %v2832_v23 = vsel %vm2829_vm10, %v2831_v61, %v2827_v41  ;;  %v7993_v6 = vld [vmem:[%s15079_s3] sm:$0xff]  ;;  %v7996_v55 = vld [vmem:[%s15074_s1 + $0x10] sm:$0xff]  ;;  %v7998_v9 = vld [vmem:[%s15074_s1 + $0x18] sm:$0xff] }
 0x4b6   :  { %15801 = vst [vmem:[#allocation46_spill] sm:$0xff] %v11278_v42  ;;  %v7379_v54 = vpop.eup %7378  ;;  %v2507_v43 = vmul.f32 %v2438_v40, %v15802_v21  ;;  %v2511_v29 = vmul.f32 %v7377_v22, %v2378_v39  ;;  %v2856_v33 = vmul.f32 %v7375_v57, %v2817_v0  ;;  %vm2476_vm14 = vweird.f32 %v10950_v8  ;;  %v7995_v57 = vld [vmem:[%s15079_s3 + $0x8] sm:$0xff]  ;;  %v7997_v1 = vld [vmem:[%s15079_s3 + $0x10] sm:$0xff]  ;;  %v8000_v40 = vld [vmem:[%s15074_s1 + $0x20] sm:$0xff] }
 0x4b7   :  { %6910 = vst [vmem:[#allocation3 + $0x10] sm:$0xff] %v6769_v51   ;;  %v2857_v25 = vmul.f32 %v7379_v54, %v2832_v23  ;;  %7380 = vtanh.f32 %v11278_v42  ;;  %v2474_v48 = vadd.f32 %v10950_v8, %v2473_v12  ;;  %v2489_v24 = vadd.f32 %v11141_v3, %v2488_v46  ;;  %v8001_v61 = vld [vmem:[%s15079_s3 + $0x20] sm:$0xff]  ;;  %v8002_v22 = vld [vmem:[%s15074_s1 + $0x28] sm:$0xff]  ;;  %v8004_v46 = vld [vmem:[%s15074_s1 + $0x30] sm:$0xff] }
 0x4b8   :  { %v11293_v13 = vadd.f32 %v2511_v29, %v2507_v43  ;;  %vm2491_vm13 = vweird.f32 %v11141_v3  ;;  %vm2475_vm7 = vweird.f32 %v10850_v26  ;;  %v2481_v20 = vand.u32 2147483648, %v10850_v26  ;;  %v8003_v12 = vld [vmem:[%s15079_s3 + $0x28] sm:$0xff]  ;;  %v8005_v51 = vld [vmem:[%s15079_s3 + $0x30] sm:$0xff]  ;;  %v8006_v39 = vld [vmem:[%s15074_s1 + $0x38] sm:$0xff] }
 0x4b9   :  { %v6764_v38 = vpack.c.bf16 %v2857_v25, %v2856_v33  ;;  %v2496_v10 = vand.u32 2147483648, %v11039_v28  ;;  %vm11302_vm5 = vmor %vm2475_vm7, %vm2476_vm14  ;;  %v2479_v45 = vand.u32 2147483647, %v10850_v26  ;;  %vm2490_vm12 = vweird.f32 %v11039_v28  ;;  %v8007_v0 = vld [vmem:[%s15079_s3 + $0x38] sm:$0xff] }
 0x4ba   :  { %15803 = vst [vmem:[#allocation45_spill] sm:$0xff] %v11293_v13  ;;  %7382 = vtanh.f32 %v11293_v13  ;;  %v2494_v37 = vand.u32 2147483647, %v11039_v28  ;;  %vm2492_vm3 = vmor %vm2490_vm12, %vm2491_vm13  ;;  %v2478_v15 = vsel %vm11302_vm5, %v10950_v8, %v2474_v48  ;;  %v2482_v63 = vor.u32 1.1754944e-38, %v2481_v20  ;;  %v7992_v8 = vld [vmem:[%s15074_s1] sm:$0xff] }
 0x4bb   :  { %6909 = vst [vmem:[#allocation3 + $0x8] sm:$0xff] %v6764_v38   ;;  %v2493_v56 = vsel %vm2492_vm3, %v11141_v3, %v2489_v24  ;;  %v2497_v18 = vor.u32 1.1754944e-38, %v2496_v10  ;;  %vm2480_vm4 = vcmp.eq.f32.partialorder %v2479_v45, 8.507059e+37  ;;  %vm15806_vm11 = vcmask 523264   ;;  %v15814_v24 = vld [vmem:[#allocation7_spill] sm:$0xff]  ;;  %v15815_v20 = vld [vmem:[#allocation10_spill] sm:$0xff] }
 0x4bc   :  { %6913 = vst [vmem:[#allocation2 + $0x10] sm:$0xff] %v6764_v38   ;;  %vm2495_vm1 = vcmp.eq.f32.partialorder %v2494_v37, 8.507059e+37  ;;  %v2483_v26 = vsel %vm2480_vm4, %v2482_v63, %v2478_v15  ;;  %vm15807_vm6 = vmmov %vm15806_vm11  ;;  %v15817_v63 = vld [vmem:[#allocation24_spill] sm:$0xff] }
 0x4bd   :  { %v7381_v44 = vpop.eup %7380  ;;  %v2498_v27 = vsel %vm2495_vm1, %v2497_v18, %v2493_v56  ;;  %vm15808_vm15 = vmmov %vm15807_vm6  ;;  %v15816_v56 = vld [vmem:[#allocation5_spill] sm:$0xff] }
 0x4be   :  { %v2522_v35 = vmul.f32 %v7381_v44, %v2483_v26  ;;  %v6646_v3 = vld [vmem:[#allocation3 + $0x10] sm:$0xff]  ;;  %vm15809_vm8 = vmmov %vm15807_vm6 }
 0x4bf   :  { %vm15810_vm2 = vmmov %vm15807_vm6 }
 0x4c0   :  { %v7383_v58 = vpop.eup %7382  ;;  %vm15811_vm10 = vmmov %vm15810_vm2 }
 0x4c1   :  { %v2523_v19 = vmul.f32 %v7383_v58, %v2498_v27  ;;  %vm15812_vm9 = vmmov %vm15810_vm2  ;;  %v15818_v58 = vld [vmem:[#allocation8_spill] sm:$0xff]  ;;  %v15819_v27 = vld [vmem:[#allocation11_spill] sm:$0xff] }
 0x4c2   :  { %v6645_v32 = vld [vmem:[#allocation3 + $0x8] sm:$0xff]  ;;  %vm15813_vm14 = vmmov %vm15810_vm2 }
 0x4c3   :  { %v6774_v28 = vpack.c.bf16 %v2523_v19, %v2522_v35  ;;  %v6650_v7 = vld [vmem:[#allocation2 + $0x10] sm:$0xff] }
 0x4c4   :  { %3245 = vmatpush.bf16.msra.mxu0 %v6650_v7 }
 0x4c5   :  { %6911 = vst [vmem:[#allocation3 + $0x18] sm:$0xff] %v6774_v28  }
 0x4c8   :  { %3246 = vmatpush.bf16.msra.mxu0 %v6649_v14 }
 0x4cc   :  { %v6647_v41 = vld [vmem:[#allocation3 + $0x18] sm:$0xff]  ;;  %3247 = vmatpush.bf16.msra.mxu0 %v11213_v4  ;;  %v7994_v4 = vld [vmem:[%s15074_s1 + $0x8] sm:$0xff] }
 0x4cd   :  { %2910 = vmatpush.bf16.msrb.mxu3 %v6647_v41 }
 0x4cf   :  { %6338 = vmatmul.msk.bf16.vlgmr.msra.gmra.mxu0 %vm422_vm0, %v7992_v8 }
 0x4d1   :  { %2911 = vmatpush.bf16.msrb.mxu3 %v6646_v3 }
 0x4d5   :  { %2912 = vmatpush.bf16.msrb.mxu3 %v6645_v32 }
 0x4d9   :  { %2913 = vmatpush.bf16.msrb.mxu3 %v6644_v31  ;;  %v15820_v31 = vld [vmem:[#allocation12_spill] sm:$0xff] }
 0x4dc   :  { %6304 = vmatmul.msk.bf16.vlgmr.msrb.gmra.mxu3 %vm15806_vm11, %v7993_v6 }
 0x4df   :  { %6339 = vmatmul.msk.bf16.gmra.mxu0 %vm422_vm0, %v7994_v4  ;;  %v15821_v4 = vld [vmem:[#allocation25_spill] sm:$0xff] }
 0x4ec   :  { %6305 = vmatmul.msk.bf16.gmra.mxu3 %vm15807_vm6, %v7995_v57 }
 0x4ef   :  { %6340 = vmatmul.msk.bf16.gmra.mxu0 %vm422_vm0, %v7996_v55 }
 0x4fc   :  { %6306 = vmatmul.msk.bf16.gmra.mxu3 %vm15808_vm15, %v7997_v1  ;;  %v15822_v1 = vld [vmem:[#allocation26_spill] sm:$0xff] }
 0x4ff   :  { %6341 = vmatmul.msk.bf16.gmra.mxu0 %vm422_vm0, %v7998_v9 }
 0x50c   :  { %6307 = vmatmul.msk.bf16.gmra.mxu3 %vm15809_vm8, %v7999_v36 }
 0x50f   :  { %6342 = vmatmul.msk.bf16.gmra.mxu0 %vm422_vm0, %v8000_v40  ;;  %v15823_v40 = vld [vmem:[#allocation22_spill] sm:$0xff] }
 0x51c   :  { %6308 = vmatmul.msk.bf16.gmra.mxu3 %vm15810_vm2, %v8001_v61 }
 0x51f   :  { %6343 = vmatmul.msk.bf16.gmra.mxu0 %vm422_vm0, %v8002_v22 }
 0x52c   :  { %6309 = vmatmul.msk.bf16.gmra.mxu3 %vm15811_vm10, %v8003_v12  ;;  %v15824_v12 = vld [vmem:[#allocation6_spill] sm:$0xff] }
 0x52f   :  { %6344 = vmatmul.msk.bf16.gmra.mxu0 %vm422_vm0, %v8004_v46 }
 0x53c   :  { %6310 = vmatmul.msk.bf16.gmra.mxu3 %vm15812_vm9, %v8005_v51 }
 0x53f   :  { %6345 = vmatmul.msk.bf16.gmra.mxu0 %vm422_vm0, %v8006_v39 }
 0x54c   :  { %v3249_v54 = vpop.f32.mrf.mxu0  ;;  %6311 = vmatmul.msk.bf16.gmra.mxu3 %vm15813_vm14, %v8007_v0 }
 0x54d   :  { %v3250_v38 = vadd.f32 %v3249_v54, %v15814_v24  ;;  %v15846_v24 = vld [vmem:[#allocation31_spill] sm:$0xff] }
 0x54f   :  { %v6346_v45 = vmul.f32 -1.442695, %v3250_v38  ;;  %v15825_v38 = vld [vmem:[#allocation28_spill] sm:$0xff] }
 0x551   :  { %7384 = vpow2.f32 %v6346_v45  ;;  %v15827_v45 = vld [vmem:[#allocation9_spill] sm:$0xff] }
 0x554   :  { %v3251_v23 = vpop.f32.mrf.mxu0 }
 0x555   :  { %v3252_v10 = vadd.f32 %v3251_v23, %v15815_v20 }
 0x557   :  { %v6347_v37 = vmul.f32 -1.442695, %v3252_v10  ;;  %v7385_v41 = vpop.eup %7384 }
 0x558   :  { %v11386_v55 = vadd.f32 1.0, %v7385_v41 }
 0x559   :  { %7386 = vpow2.f32 %v6347_v37 }
 0x55a   :  { %vm3342_vm13 = vweird.f32 %v11386_v55 }
 0x55c   :  { %v3254_v21 = vpop.f32.mrf.mxu0 }
 0x55d   :  { %v3255_v44 = vadd.f32 %v3254_v21, %v15816_v56 }
 0x55f   :  { %v2915_v43 = vpop.f32.mrf.mxu3  ;;  %v6348_v19 = vmul.f32 -1.442695, %v3255_v44  ;;  %v7387_v32 = vpop.eup %7386  ;;  %v15829_v44 = vld [vmem:[#allocation29_spill] sm:$0xff] }
 0x560   :  { %v2916_v18 = vadd.f32 %v2915_v43, %v15817_v63  ;;  %v11389_v36 = vadd.f32 1.0, %v7387_v32 }
 0x561   :  { %7388 = vpow2.f32 %v6348_v19 }
 0x562   :  { %v6312_v7 = vmul.f32 -1.442695, %v2916_v18  ;;  %vm3357_vm11 = vweird.f32 %v11389_v36 }
 0x564   :  { %v3256_v29 = vpop.f32.mrf.mxu0  ;;  %7390 = vpow2.f32 %v6312_v7 }
 0x565   :  { %v3257_v26 = vadd.f32 %v3256_v29, %v15818_v58 }
 0x567   :  { %v2917_v33 = vpop.f32.mrf.mxu3  ;;  %v6349_v14 = vmul.f32 -1.442695, %v3257_v26  ;;  %v7389_v54 = vpop.eup %7388 }
 0x568   :  { %v2918_v57 = vadd.f32 %v2917_v33, %v15821_v4 }
 0x569   :  { %7392 = vpow2.f32 %v6349_v14 }
 0x56a   :  { %v6313_v39 = vmul.f32 -1.442695, %v2918_v57  ;;  %v7391_v23 = vpop.eup %7390 }
 0x56c   :  { %v3259_v25 = vpop.f32.mrf.mxu0 }
 0x56d   :  { %v3260_v35 = vadd.f32 %v3259_v25, %v15819_v27 }
 0x56f   :  { %v2920_v48 = vpop.f32.mrf.mxu3  ;;  %v6350_v8 = vmul.f32 -1.442695, %v3260_v35  ;;  %v7393_v29 = vpop.eup %7392 }
 0x570   :  { %v2921_v9 = vadd.f32 %v2920_v48, %v15822_v1  ;;  %v11395_v48 = vadd.f32 1.0, %v7389_v54 }
 0x571   :  { %7394 = vpow2.f32 %v6350_v8  ;;  %v15830_v8 = vld [vmem:[#allocation14_spill] sm:$0xff] }
 0x572   :  { %7396 = vrcp.f32 %v11386_v55  ;;  %v6314_v0 = vmul.f32 -1.442695, %v2921_v9 }
 0x573   :  { %7398 = vrcp.f32 %v11389_v36 }
 0x574   :  { %v3261_v53 = vpop.f32.mrf.mxu0 }
 0x575   :  { %v3262_v6 = vadd.f32 %v3261_v53, %v15820_v31  ;;  %v11398_v53 = vadd.f32 1.0, %v7391_v23  ;;  %v15833_v23 = vld [vmem:[#allocation23_spill] sm:$0xff] }
 0x577   :  { %v2922_v15 = vpop.f32.mrf.mxu3  ;;  %v6351_v22 = vmul.f32 -1.442695, %v3262_v6  ;;  %v7395_v25 = vpop.eup %7394  ;;  %15826 = vst [vmem:[#allocation61_spill] sm:$0xff] %v11398_v53 }
 0x578   :  { %v2923_v61 = vadd.f32 %v2922_v15, %v15823_v40  ;;  %v11401_v15 = vadd.f32 1.0, %v7393_v29  ;;  %v11404_v26 = vpop.eup %7396  ;;  %v11406_v35 = vadd.f32 1.0, %v7395_v25 }
 0x579   :  { %7400 = vpow2.f32 %v6351_v22  ;;  %vm3343_vm12 = vweird.f32 %v11404_v26 }
 0x57a   :  { %v6315_v21 = vmul.f32 -1.442695, %v2923_v61  ;;  %7402 = vpow2.f32 %v6313_v39  ;;  %15828 = vst [vmem:[#allocation54_spill] sm:$0xff] %v11401_v15  ;;  %v3408_v4 = vand.u32 2147483648, %v11406_v35  ;;  %vm3402_vm3 = vweird.f32 %v11406_v35  ;;  %vm11597_vm1 = vmor %vm3342_vm13, %vm3343_vm12 }
 0x57b   :  { %7404 = vpow2.f32 %v6314_v0 }
 0x57c   :  { %v3264_v28 = vpop.f32.mrf.mxu0  ;;  %7406 = vpow2.f32 %v6315_v21  ;;  %v11503_v42 = vor.u32 1.1754944e-38, %v3408_v4 }
 0x57d   :  { %v3265_v46 = vadd.f32 %v3264_v28, %v15824_v12  ;;  %v11408_v28 = vpop.eup %7398 }
 0x57e   :  { %vm3358_vm15 = vweird.f32 %v11408_v28 }
 0x57f   :  { %v2925_v3 = vpop.f32.mrf.mxu3  ;;  %v6352_v33 = vmul.f32 -1.442695, %v3265_v46  ;;  %v7401_v14 = vpop.eup %7400  ;;  %vm11694_vm12 = vmor %vm3357_vm11, %vm3358_vm15 }
 0x580   :  { %v2926_v10 = vadd.f32 %v2925_v3, %v15825_v38  ;;  %v7403_v32 = vpop.eup %7402  ;;  %v11415_v46 = vadd.f32 1.0, %v7401_v14 }
 0x581   :  { %7408 = vpow2.f32 %v6352_v33  ;;  %v7405_v9 = vpop.eup %7404  ;;  %v11417_v39 = vadd.f32 1.0, %v7403_v32 }
 0x582   :  { %7410 = vrcp.f32 %v11395_v48  ;;  %v6316_v7 = vmul.f32 -1.442695, %v2926_v10  ;;  %v7407_v22 = vpop.eup %7406  ;;  %v11421_v0 = vadd.f32 1.0, %v7405_v9  ;;  %v11445_v9 = vmul.f32 %v11408_v28, %v11389_v36 }
 0x583   :  { %7412 = vrcp.f32 %v11398_v53  ;;  %15831 = vst [vmem:[#allocation64_spill] sm:$0xff] %v11417_v39  ;;  %v11426_v29 = vadd.f32 1.0, %v7407_v22  ;;  %vm3417_vm2 = vweird.f32 %v11415_v46 }
 0x584   :  { %v3266_v51 = vpop.f32.mrf.mxu0  ;;  %7414 = vrcp.f32 %v11401_v15  ;;  %15832 = vst [vmem:[#allocation49_spill] sm:$0xff] %v11421_v0 }
 0x585   :  { %v3267_v37 = vadd.f32 %v3266_v51, %v15827_v45  ;;  %7416 = vrcp.f32 %v11406_v35  ;;  %15834 = vst [vmem:[#allocation66_spill] sm:$0xff] %v11426_v29 }
 0x586   :  { %7418 = vpow2.f32 %v6316_v7 }
 0x587   :  { %v2927_v43 = vpop.f32.mrf.mxu3  ;;  %v6353_v41 = vmul.f32 -1.442695, %v3267_v37  ;;  %v7409_v51 = vpop.eup %7408 }
 0x588   :  { %v2928_v18 = vadd.f32 %v2927_v43, %v15829_v44  ;;  %v11419_v54 = vpop.eup %7410  ;;  %v11431_v10 = vadd.f32 1.0, %v7409_v51 }
 0x589   :  { %7420 = vpow2.f32 %v6353_v41  ;;  %v11424_v43 = vpop.eup %7412  ;;  %v11450_v22 = vmul.f32 %v11419_v54, %v11395_v48 }
 0x58a   :  { %v6317_v6 = vmul.f32 -1.442695, %v2928_v18  ;;  %v11428_v25 = vpop.eup %7414  ;;  %v15836_v18 = vld [vmem:[#allocation15_spill] sm:$0xff]  ;;  %vm3432_vm15 = vweird.f32 %v11431_v10 }
 0x58b   :  { %15835 = vst [vmem:[#allocation41_spill] sm:$0xff] %v11428_v25  ;;  %v11433_v37 = vpop.eup %7416 }
 0x58c   :  { %v3269_v19 = vpop.f32.mrf.mxu0  ;;  %7422 = vpow2.f32 %v6317_v6  ;;  %v7419_v7 = vpop.eup %7418  ;;  %vm3403_vm5 = vweird.f32 %v11433_v37 }
 0x58d   :  { %v3270_v3 = vadd.f32 %v3269_v19, %v15830_v8  ;;  %v11452_v51 = vadd.f32 1.0, %v7419_v7  ;;  %v3398_v7 = vmul.f32 %v11433_v37, %v11406_v35  ;;  %vm11652_vm9 = vmor %vm3402_vm3, %vm3403_vm5 }
 0x58f   :  { %v2930_v57 = vpop.f32.mrf.mxu3  ;;  %v6354_v61 = vmul.f32 -1.442695, %v3270_v3  ;;  %v7421_v3 = vpop.eup %7420  ;;  %v3399_v63 = vsub.f32 1.0, %v3398_v7  ;;  %v3438_v7 = vand.u32 2147483648, %v11431_v10  ;;  %v3074_v16 = vand.u32 2147483648, %v11452_v51 }
 0x590   :  { %v2931_v21 = vadd.f32 %v2930_v57, %v15833_v23  ;;  %v11441_v57 = vmul.f32 %v11404_v26, %v11386_v55 }
 0x591   :  { %7424 = vpow2.f32 %v6354_v61  ;;  %v11518_v4 = vmul.f32 %v11433_v37, %v3399_v63  ;;  %v11534_v17 = vor.u32 1.1754944e-38, %v3438_v7 }
 0x592   :  { %7426 = vrcp.f32 %v11415_v46  ;;  %v6318_v14 = vmul.f32 -1.442695, %v2931_v21  ;;  %v7423_v6 = vpop.eup %7422 }
 0x593   :  { %7428 = vrcp.f32 %v11417_v39  ;;  %v11470_v44 = vadd.f32 1.0, %v7423_v6 }
 0x594   :  { %v3271_v33 = vpop.f32.mrf.mxu0  ;;  %7430 = vrcp.f32 %v11421_v0 }
 0x595   :  { %v3272_v19 = vadd.f32 %v3271_v33, %v15836_v18  ;;  %7432 = vrcp.f32 %v11426_v29  ;;  %v11458_v33 = vmul.f32 %v11424_v43, %v11398_v53  ;;  %v11466_v18 = vmul.f32 %v11428_v25, %v11401_v15  ;;  %15839 = vst [vmem:[#allocation55_spill] sm:$0xff] %v11470_v44 }
 0x596   :  { %7434 = vrcp.f32 %v11431_v10 }
 0x597   :  { %v2932_v41 = vpop.f32.mrf.mxu3  ;;  %v6355_v32 = vmul.f32 -1.442695, %v3272_v19  ;;  %v7425_v61 = vpop.eup %7424  ;;  %v11460_v19 = vadd.f32 1.0, %v7421_v3  ;;  %15838 = vst [vmem:[#allocation56_spill] sm:$0xff] %v11466_v18  ;;  %v3339_v3 = vsub.f32 1.0, %v11441_v57 }
 0x598   :  { %v11454_v21 = vpop.eup %7426  ;;  %v11477_v45 = vadd.f32 1.0, %v7425_v61  ;;  %v15844_v61 = vld [vmem:[#allocation13_spill] sm:$0xff] }
 0x599   :  { %7436 = vpow2.f32 %v6355_v32  ;;  %v11462_v23 = vpop.eup %7428  ;;  %v15840_v32 = vld [vmem:[#allocation27_spill] sm:$0xff]  ;;  %v3413_v6 = vmul.f32 %v11454_v21, %v11415_v46 }
 0x59a   :  { %7438 = vpow2.f32 %v6318_v14  ;;  %15837 = vst [vmem:[#allocation37_spill] sm:$0xff] %v11462_v23  ;;  %v2933_v38 = vadd.f32 %v2932_v41, %v15840_v32  ;;  %v11473_v40 = vpop.eup %7430  ;;  %v11491_v57 = vmul.f32 %v11462_v23, %v11417_v39  ;;  %vm3462_vm4 = vweird.f32 %v11477_v45 }
 0x59b   :  { %15841 = vst [vmem:[#allocation47_spill] sm:$0xff] %v11473_v40  ;;  %v11479_v12 = vpop.eup %7432  ;;  %7440 = vrcp.f32 %v11452_v51  ;;  %v11499_v32 = vmul.f32 %v11473_v40, %v11421_v0  ;;  %v3089_v40 = vand.u32 2147483648, %v11470_v44 }
 0x59c   :  { %v3274_v8 = vpop.f32.mrf.mxu0  ;;  %15842 = vst [vmem:[#allocation48_spill] sm:$0xff] %v11479_v12  ;;  %v11486_v41 = vpop.eup %7434  ;;  %7442 = vrcp.f32 %v11460_v19  ;;  %v6319_v58 = vmul.f32 -1.442695, %v2933_v38  ;;  %v11507_v27 = vmul.f32 %v11479_v12, %v11426_v29 }
 0x59d   :  { %15843 = vst [vmem:[#allocation17_spill] sm:$0xff] %v11491_v57  ;;  %v3275_v14 = vadd.f32 %v3274_v8, %v15844_v61  ;;  %7444 = vrcp.f32 %v11470_v44  ;;  %v3414_v8 = vsub.f32 1.0, %v3413_v6 }
 0x59e   :  { %15845 = vst [vmem:[#allocation67_spill] sm:$0xff] %v11499_v32  ;;  %7446 = vrcp.f32 %v11477_v45 }
 0x59f   :  { %v2935_v1 = vpop.f32.mrf.mxu3  ;;  %v7437_v31 = vpop.eup %7436  ;;  %v6356_v20 = vmul.f32 -1.442695, %v3275_v14  ;;  %15847 = vst [vmem:[#allocation42_spill] sm:$0xff] %v11507_v27  ;;  %7448 = vpow2.f32 %v6319_v58  ;;  %v11531_v63 = vmul.f32 %v11454_v21, %v3414_v8 }
 0x5a0   :  { %v7439_v56 = vpop.eup %7438  ;;  %v2936_v13 = vadd.f32 %v2935_v1, %v15846_v24  ;;  %v11513_v0 = vadd.f32 1.0, %v7437_v31  ;;  %v3428_v1 = vmul.f32 %v11486_v41, %v11431_v10  ;;  %v15849_v31 = vld [vmem:[#allocation16_spill] sm:$0xff] }
 0x5a1   :  { %v11515_v14 = vpop.eup %7440  ;;  %v11522_v6 = vadd.f32 1.0, %v7439_v56  ;;  %7450 = vpow2.f32 %v6356_v20  ;;  %v3346_v56 = vand.u32 2147483647, %v11386_v55  ;;  %v11541_v20 = vor.u32 1.1754944e-38, %v3074_v16 }
 0x5a2   :  { %v11524_v29 = vpop.eup %7442  ;;  %v6320_v61 = vmul.f32 -1.442695, %v2936_v13  ;;  %v3064_v38 = vmul.f32 %v11515_v14, %v11452_v51  ;;  %7452 = vrcp.f32 %v11513_v0  ;;  %v3429_v8 = vsub.f32 1.0, %v3428_v1 }
 0x5a3   :  { %15848 = vst [vmem:[#allocation57_spill] sm:$0xff] %v11522_v6  ;;  %v11528_v2 = vpop.eup %7444  ;;  %7454 = vrcp.f32 %v11522_v6  ;;  %v3443_v27 = vmul.f32 %v11524_v29, %v11460_v19  ;;  %v3340_v16 = vmul.f32 %v11404_v26, %v3339_v3  ;;  %vm11557_vm7 = vcmp.eq.f32.partialorder %v3346_v56, 8.507059e+37 }
 0x5a4   :  { %v3276_v24 = vpop.f32.mrf.mxu0  ;;  %v11537_v58 = vpop.eup %7446  ;;  %15850 = vst [vmem:[#allocation59_spill] sm:$0xff] %v11541_v20  ;;  %7456 = vpow2.f32 %v6320_v61  ;;  %v3079_v49 = vmul.f32 %v11528_v2, %v11470_v44  ;;  %v3065_v23 = vsub.f32 1.0, %v3064_v38  ;;  %v3363_v3 = vand.u32 2147483648, %v11389_v36 }
 0x5a5   :  { %v3277_v12 = vadd.f32 %v3276_v24, %v15849_v31  ;;  %v3348_v24 = vand.u32 2147483648, %v11386_v55  ;;  %v7449_v32 = vpop.eup %7448  ;;  %v3458_v1 = vmul.f32 %v11537_v58, %v11477_v45  ;;  %v11564_v57 = vmul.f32 %v11486_v41, %v3429_v8 }
 0x5a6   :  { %v3444_v56 = vsub.f32 1.0, %v3443_v27  ;;  %v3080_v8 = vsub.f32 1.0, %v3079_v49  ;;  %v11579_v15 = vadd.f32 1.0, %v7449_v32  ;;  %v11582_v44 = vmul.f32 %v11515_v14, %v3065_v23 }
 0x5a7   :  { %v2937_v13 = vpop.f32.mrf.mxu3  ;;  %v6357_v7 = vmul.f32 -1.442695, %v3277_v12  ;;  %v7451_v12 = vpop.eup %7450  ;;  %v3349_v61 = vor.u32 1.1754944e-38, %v3348_v24  ;;  %v3341_v24 = vadd.f32 %v11404_v26, %v3340_v16  ;;  %v3104_v27 = vand.u32 2147483648, %v11522_v6 }
 0x5a8   :  { %v2938_v31 = vadd.f32 %v2937_v13, %v15851_v34  ;;  %v11566_v20 = vadd.f32 1.0, %v7451_v12  ;;  %v11569_v38 = vpop.eup %7452  ;;  %v3361_v13 = vand.u32 2147483647, %v11389_v36  ;;  %v3459_v12 = vsub.f32 1.0, %v3458_v1  ;;  %15855 = vst [vmem:[#allocation50_spill] sm:$0xff] %v11582_v44 }
 0x5a9   :  { %7458 = vpow2.f32 %v6357_v7  ;;  %v11571_v7 = vor.u32 1.1754944e-38, %v3089_v40  ;;  %v11575_v5 = vpop.eup %7454  ;;  %v15856_v40 = vld [vmem:[#allocation18_spill] sm:$0xff]  ;;  %v3466_v49 = vand.u32 2147483647, %v11477_v45  ;;  %v3473_v1 = vmul.f32 %v11569_v38, %v11513_v0 }
 0x5aa   :  { %v6321_v39 = vmul.f32 -1.442695, %v2938_v31  ;;  %v7457_v59 = vpop.eup %7456  ;;  %v3345_v18 = vsel %vm11597_vm1, %v11404_v26, %v3341_v24  ;;  %v11613_v60 = vmul.f32 %v11528_v2, %v3080_v8  ;;  %v3460_v44 = vmul.f32 %v11537_v58, %v3459_v12 }
 0x5ab   :  { %15854 = vst [vmem:[#allocation51_spill] sm:$0xff] %v11571_v7  ;;  %v11586_v7 = vor.u32 1.1754944e-38, %v3363_v3  ;;  %v11602_v3 = vmul.f32 %v11524_v29, %v3444_v56  ;;  %v11617_v56 = vor.u32 1.1754944e-38, %v3104_v27  ;;  %vm11624_vm6 = vcmp.eq.f32.partialorder %v3466_v49, 8.507059e+37 }
 0x5ac   :  { %7460 = vpow2.f32 %v6321_v39  ;;  %v3279_v31 = vpop.f32.mrf.mxu0  ;;  %v3468_v39 = vand.u32 2147483648, %v11477_v45  ;;  %v3474_v8 = vsub.f32 1.0, %v3473_v1  ;;  %v3350_v12 = vsel %vm11557_vm7, %v3349_v61, %v3345_v18 }
 0x5ad   :  { %v3280_v16 = vadd.f32 %v3279_v31, %v15856_v40  ;;  %7462 = vrcp.f32 %v11566_v20  ;;  %v3094_v31 = vmul.f32 %v11575_v5, %v11522_v6  ;;  %15859 = vst [vmem:[#allocation21_spill] sm:$0xff] %v11617_v56  ;;  %v11619_v6 = vadd.f32 1.0, %v7457_v59 }
 0x5ae   :  { %v3469_v53 = vor.u32 1.1754944e-38, %v3468_v39  ;;  %7464 = vrcp.f32 %v11579_v15  ;;  %v3401_v39 = vadd.f32 %v11433_v37, %v11518_v4  ;;  %v3483_v27 = vand.u32 2147483648, %v11513_v0 }
 0x5af   :  { %v7459_v25 = vpop.eup %7458  ;;  %v2940_v32 = vpop.f32.mrf.mxu3  ;;  %7466 = vtanh.f32 %v3280_v16  ;;  %v3095_v59 = vsub.f32 1.0, %v3094_v31  ;;  %vm11637_vm8 = vcmp.eq.f32.partialorder %v3361_v13, 8.507059e+37  ;;  %v3461_v34 = vadd.f32 %v11537_v58, %v3460_v44 }
 0x5b0   :  { %v11606_v40 = vadd.f32 1.0, %v7459_v25  ;;  %v15860_v25 = vsub.f32 1.0, %v11445_v9  ;;  %vm3463_vm10 = vweird.f32 %v11537_v58  ;;  %v3119_v18 = vand.u32 2147483648, %v11579_v15 }
 0x5b1   :  { %v3406_v4 = vand.u32 2147483647, %v11406_v35  ;;  %v3481_v61 = vand.u32 2147483647, %v11513_v0  ;;  %v3475_v31 = vmul.f32 %v11569_v38, %v3474_v8  ;;  %vm3477_vm14 = vweird.f32 %v11513_v0  ;;  %vm11672_vm13 = vmor %vm3462_vm4, %vm3463_vm10 }
 0x5b2   :  { %v7461_v55 = vpop.eup %7460  ;;  %v3355_v26 = vmul.f32 %v11408_v28, %v15860_v25  ;;  %7468 = vrcp.f32 %v11606_v40  ;;  %v3405_v35 = vsel %vm11652_vm9, %v11433_v37, %v3401_v39  ;;  %v11677_v8 = vmul.f32 %v11575_v5, %v3095_v59 }
 0x5b3   :  { %v11634_v16 = vadd.f32 1.0, %v7461_v55  ;;  %v11641_v49 = vpop.eup %7462  ;;  %7470 = vrcp.f32 %v11619_v6  ;;  %v3484_v1 = vor.u32 1.1754944e-38, %v3483_v27  ;;  %v3465_v39 = vsel %vm11672_vm13, %v11537_v58, %v3461_v34 }
 0x5b4   :  { %v3356_v44 = vadd.f32 %v11408_v28, %v3355_v26  ;;  %v11660_v23 = vpop.eup %7464  ;;  %v3281_v55 = vpop.f32.mrf.mxu0  ;;  %15869 = vst [vmem:[#allocation58_spill] sm:$0xff] %v11677_v8  ;;  %v3488_v13 = vmul.f32 %v11641_v49, %v11566_v20  ;;  %vm3478_vm7 = vweird.f32 %v11569_v38  ;;  %v11688_v45 = vor.u32 1.1754944e-38, %v3119_v18  ;;  %v15875_v26 = vld [vmem:[#allocation30_spill] sm:$0xff] }
 0x5b5   :  { %v7467_v56 = vpop.eup %7466  ;;  %7472 = vrcp.f32 %v11634_v16  ;;  %vm3407_vm5 = vcmp.eq.f32.partialorder %v3406_v4, 8.507059e+37  ;;  %vm11698_vm3 = vcmp.eq.f32.partialorder %v3481_v61, 8.507059e+37  ;;  %v3109_v58 = vmul.f32 %v11660_v23, %v11579_v15  ;;  %vm11726_vm1 = vmor %vm3477_vm14, %vm3478_vm7 }
 0x5b6   :  { %15870 = vst [vmem:[#allocation69_spill] sm:$0xff] %v11688_v45  ;;  %v3410_v34 = vsel %vm3407_vm5, %v11503_v42, %v3405_v35  ;;  %v3282_v18 = vadd.f32 %v3281_v55, %v8480_v62  ;;  %v3360_v36 = vsel %vm11694_vm12, %v11408_v28, %v3356_v44  ;;  %v3476_v4 = vadd.f32 %v11569_v38, %v3475_v31 }
 0x5b7   :  { %v2942_v27 = vpop.f32.mrf.mxu3  ;;  %v2941_v45 = vadd.f32 %v2940_v32, %v15875_v26  ;;  %v3416_v61 = vadd.f32 %v11454_v21, %v11531_v63  ;;  %vm3418_vm4 = vweird.f32 %v11454_v21  ;;  %v11718_v42 = vsel %vm11624_vm6, %v3469_v53, %v3465_v39 }
 0x5b8   :  { %v11682_v37 = vpop.eup %7468  ;;  %v3489_v35 = vsub.f32 1.0, %v3488_v13  ;;  %v3525_v28 = vmul.f32 %v7467_v56, %v3350_v12  ;;  %v3496_v63 = vand.u32 2147483647, %v11566_v20  ;;  %v3365_v53 = vsel %vm11637_vm8, %v11586_v7, %v3360_v36  ;;  %vm11744_vm11 = vmor %vm3417_vm2, %vm3418_vm4 }
 0x5b9   :  { %v11714_v8 = vpop.eup %7470  ;;  %v3503_v55 = vmul.f32 %v11682_v37, %v11606_v40  ;;  %v3421_v24 = vand.u32 2147483647, %v11415_v46  ;;  %v2943_v44 = vadd.f32 %v2942_v27, %v15701_v11  ;;  %v3110_v56 = vsub.f32 1.0, %v3109_v58 }
 0x5ba   :  { %v3498_v12 = vand.u32 2147483648, %v11566_v20  ;;  %v3521_v0 = vmul.f32 %v3410_v34, %v10922_v30  ;;  %7474 = vtanh.f32 %v3282_v18  ;;  %vm3433_vm6 = vweird.f32 %v11486_v41 }
 0x5bb   :  { %v11736_v31 = vpop.eup %7472  ;;  %v3480_v7 = vsel %vm11726_vm1, %v11569_v38, %v3476_v4  ;;  %v3124_v9 = vmul.f32 %v11714_v8, %v11619_v6  ;;  %v6322_v39 = vmul.f32 -1.442695, %v2941_v45  ;;  %v3420_v30 = vsel %vm11744_vm11, %v11454_v21, %v3416_v61 }
 0x5bc   :  { %v3490_v59 = vmul.f32 %v11641_v49, %v3489_v35  ;;  %v3504_v27 = vsub.f32 1.0, %v3503_v55  ;;  %v11758_v58 = vadd.f32 %v3525_v28, %v3521_v0  ;;  %v15880_v34 = vand.u32 2147483648, %v11415_v46  ;;  %v3284_v28 = vpop.f32.mrf.mxu0 }
 0x5bd   :  { %vm3492_vm8 = vweird.f32 %v11566_v20  ;;  %v3139_v38 = vmul.f32 %v11736_v31, %v11634_v16  ;;  %vm3422_vm2 = vcmp.eq.f32.partialorder %v3421_v24, 8.507059e+37  ;;  %v6323_v45 = vmul.f32 -1.442695, %v2943_v44 }
 0x5be   :  { %v3424_v18 = vor.u32 1.1754944e-38, %v15880_v34  ;;  %v3499_v36 = vor.u32 1.1754944e-38, %v3498_v12  ;;  %v3132_v21 = vand.u32 2147483647, %v11619_v6  ;;  %v3134_v4 = vand.u32 2147483648, %v11619_v6 }
 0x5bf   :  { %v11770_v35 = vsel %vm11698_vm3, %v3484_v1, %v3480_v7  ;;  %v11773_v46 = vmul.f32 %v11660_v23, %v3110_v56  ;;  %vm3493_vm10 = vweird.f32 %v11641_v49  ;;  %vm11776_vm9 = vcmp.eq.f32.partialorder %v3496_v63, 8.507059e+37  ;;  %v2945_v32 = vpop.f32.mrf.mxu3  ;;  %vm11823_vm3 = vmor %vm3432_vm15, %vm3433_vm6 }
 0x5c0   :  { %v3425_v61 = vsel %vm3422_vm2, %v3424_v18, %v3420_v30  ;;  %7476 = vpow2.f32 %v6322_v39  ;;  %v7475_v24 = vpop.eup %7474  ;;  %v3491_v44 = vadd.f32 %v11641_v49, %v3490_v59  ;;  %v3125_v12 = vsub.f32 1.0, %v3124_v9  ;;  %vm11796_vm13 = vmor %vm3492_vm8, %vm3493_vm10 }
 0x5c1   :  { %v3505_v25 = vmul.f32 %v11682_v37, %v3504_v27  ;;  %7478 = vtanh.f32 %v11758_v58  ;;  %vm3372_vm14 = vweird.f32 %v11395_v48  ;;  %v3140_v1 = vsub.f32 1.0, %v3139_v38 }
 0x5c2   :  { %v3522_v56 = vmul.f32 %v3425_v61, %v10999_v52  ;;  %v3526_v63 = vmul.f32 %v7475_v24, %v3365_v53  ;;  %7480 = vpow2.f32 %v6323_v45  ;;  %v11785_v0 = vor.u32 1.1754944e-38, %v3134_v4  ;;  %v15903_v24 = vld [vmem:[#allocation55_spill] sm:$0xff] }
 0x5c3   :  { %v3513_v13 = vand.u32 2147483648, %v11606_v40  ;;  %v3285_v7 = vadd.f32 %v3284_v28, %v15567_v47  ;;  %v15883_v39 = vsub.f32 1.0, %v11450_v22  ;;  %vm3507_vm7 = vweird.f32 %v11606_v40 }
 0x5c4   :  { %v3149_v52 = vand.u32 2147483648, %v11634_v16  ;;  %v11802_v53 = vadd.f32 %v3526_v63, %v3522_v56  ;;  %v3431_v59 = vadd.f32 %v11486_v41, %v11564_v57  ;;  %vm3069_vm5 = vweird.f32 %v11515_v14 }
 0x5c5   :  { %v3370_v9 = vmul.f32 %v11419_v54, %v15883_v39  ;;  %v3495_v22 = vsel %vm11796_vm13, %v11641_v49, %v3491_v44  ;;  %v3126_v20 = vmul.f32 %v11714_v8, %v3125_v12  ;;  %vm3508_vm12 = vweird.f32 %v11682_v37 }
 0x5c6   :  { %v3511_v27 = vand.u32 2147483647, %v11606_v40  ;;  %v7477_v34 = vpop.eup %7476  ;;  %v11814_v18 = vadd.f32 %v11682_v37, %v3505_v25  ;;  %v3141_v38 = vmul.f32 %v11736_v31, %v3140_v1  ;;  %7482 = vtanh.f32 %v11802_v53  ;;  %vm11853_vm6 = vmor %vm3507_vm7, %vm3508_vm12  ;;  %v15919_v40 = vld [vmem:[#allocation59_spill] sm:$0xff] }
 0x5c7   :  { %v3436_v57 = vand.u32 2147483647, %v11431_v10  ;;  %v7479_v45 = vpop.eup %7478  ;;  %vm3068_vm4 = vweird.f32 %v11452_v51  ;;  %v11828_v4 = vor.u32 1.1754944e-38, %v3513_v13  ;;  %v3371_v61 = vadd.f32 %v11419_v54, %v3370_v9  ;;  %v2947_v30 = vpop.f32.mrf.mxu3 }
 0x5c8   :  { %vm3373_vm1 = vweird.f32 %v11419_v54  ;;  %7484 = vtanh.f32 %v3285_v7  ;;  %v7481_v28 = vpop.eup %7480  ;;  %v11833_v44 = vor.u32 1.1754944e-38, %v3149_v52  ;;  %v3435_v10 = vsel %vm11823_vm3, %v11486_v41, %v3431_v59  ;;  %v15902_v7 = vld [vmem:[#allocation41_spill] sm:$0xff]  ;;  %vm11921_vm3 = vmor %vm3068_vm4, %vm3069_vm5 }
 0x5c9   :  { %v15888_v12 = vsub.f32 1.0, %v11458_v33  ;;  %vm3447_vm11 = vweird.f32 %v11460_v19  ;;  %v11844_v1 = vsel %vm11776_vm9, %v3499_v36, %v3495_v22  ;;  %v11847_v56 = vadd.f32 %v11714_v8, %v3126_v20  ;;  %vm11876_vm8 = vmor %vm3372_vm14, %vm3373_vm1 }
 0x5ca   :  { %v11857_v33 = vadd.f32 1.0, %v7477_v34  ;;  %v15891_v41 = vand.u32 2147483647, %v11395_v48  ;;  %v3510_v36 = vsel %vm11853_vm6, %v11682_v37, %v11814_v18  ;;  %v11870_v55 = vadd.f32 %v11736_v31, %v3141_v38  ;;  %v15946_v37 = vld [vmem:[#allocation58_spill] sm:$0xff] }
 0x5cb   :  { %v3006_v25 = vmul.f32 %v11424_v43, %v15888_v12  ;;  %v15896_v39 = vand.u32 2147483648, %v11395_v48  ;;  %vm3437_vm2 = vcmp.eq.f32.partialorder %v3436_v57, 8.507059e+37  ;;  %v3537_v52 = vmul.f32 %v7479_v45, %v11718_v42  ;;  %v15897_v48 = vld [vmem:[#allocation61_spill] sm:$0xff]  ;;  %v3286_v12 = vpop.f32.mrf.mxu0 }
 0x5cc   :  { %vm11861_vm15 = vcmp.eq.f32.partialorder %v15891_v41, 8.507059e+37  ;;  %v11883_v59 = vadd.f32 1.0, %v7481_v28  ;;  %v3375_v22 = vsel %vm11876_vm8, %v11419_v54, %v3371_v61  ;;  %v3440_v20 = vsel %vm3437_vm2, %v11534_v17, %v3435_v10  ;;  %v7483_v34 = vpop.eup %7482  ;;  %v15898_v17 = vld [vmem:[#allocation50_spill] sm:$0xff]  ;;  %v15899_v61 = vld [vmem:[#allocation52_spill] sm:$0xff] }
 0x5cd   :  { %v3379_v9 = vor.u32 1.1754944e-38, %v15896_v39  ;;  %v2946_v38 = vadd.f32 %v2945_v32, %v15534_v50  ;;  %v3007_v49 = vadd.f32 %v11424_v43, %v3006_v25  ;;  %vm3009_vm10 = vweird.f32 %v11424_v43  ;;  %v15900_v10 = vld [vmem:[#allocation56_spill] sm:$0xff] }
 0x5ce   :  { %v3012_v57 = vand.u32 2147483647, %v15897_v48  ;;  %v7485_v41 = vpop.eup %7484  ;;  %vm3084_vm9 = vweird.f32 %v11528_v2  ;;  %7486 = vrcp.f32 %v11857_v33  ;;  %v3538_v42 = vmul.f32 %v7483_v34, %v11770_v35 }
 0x5cf   :  { %v3014_v54 = vand.u32 2147483648, %v15897_v48  ;;  %v3067_v45 = vadd.f32 %v11515_v14, %v15898_v17  ;;  %v3380_v32 = vsel %vm11861_vm15, %v3379_v9, %v3375_v22  ;;  %v3523_v28 = vmul.f32 %v3440_v20, %v15899_v61  ;;  %v15906_v22 = vld [vmem:[#allocation20_spill] sm:$0xff] }
 0x5d0   :  { %vm3008_vm14 = vweird.f32 %v15897_v48  ;;  %v15901_v25 = vsub.f32 1.0, %v15900_v10  ;;  %vm3083_vm13 = vweird.f32 %v15903_v24  ;;  %vm3129_vm7 = vweird.f32 %v11714_v8 }
 0x5d1   :  { %v6789_v35 = vpack.c.bf16 %v3538_v42, %v3537_v52  ;;  %7488 = vrcp.f32 %v11883_v59  ;;  %vm11911_vm12 = vmor %vm3008_vm14, %vm3009_vm10  ;;  %v3072_v9 = vand.u32 2147483647, %v11452_v51  ;;  %v3287_v20 = vadd.f32 %v3286_v12, %v15906_v22 }
 0x5d2   :  { %v3385_v39 = vmul.f32 %v15902_v7, %v15901_v25  ;;  %v3527_v52 = vmul.f32 %v7485_v41, %v3380_v32  ;;  %v3011_v48 = vsel %vm11911_vm12, %v11424_v43, %v3007_v49  ;;  %vm11928_vm1 = vcmp.eq.f32.partialorder %v3012_v57, 8.507059e+37  ;;  %v15918_v25 = vld [vmem:[#allocation36_spill] sm:$0xff] }
 0x5d3   :  { %7490 = vtanh.f32 %v2946_v38  ;;  %vm3128_vm15 = vweird.f32 %v11619_v6  ;;  %vm3144_vm8 = vweird.f32 %v11736_v31  ;;  %6790 = vst [vmem:[#allocation3] sm:$0xff] %v6789_v35   ;;  %v3015_v51 = vor.u32 1.1754944e-38, %v3014_v54  ;;  %v15911_v38 = vld [vmem:[#allocation54_spill] sm:$0xff] }
 0x5d4   :  { %v3071_v12 = vsel %vm11921_vm3, %v11515_v14, %v3067_v45  ;;  %v3446_v41 = vadd.f32 %v11524_v29, %v11602_v3  ;;  %vm3448_vm5 = vweird.f32 %v11524_v29  ;;  %6917 = vst [vmem:[#allocation2 + $0x8] sm:$0xff] %v6789_v35   ;;  %v3386_v43 = vadd.f32 %v15902_v7, %v3385_v39  ;;  %v11950_v54 = vpop.eup %7486  ;;  %v2950_v35 = vpop.f32.mrf.mxu3 }
 0x5d5   :  { %vm3388_vm4 = vweird.f32 %v15902_v7  ;;  %v3391_v49 = vand.u32 2147483647, %v15911_v38  ;;  %vm11945_vm2 = vmor %vm3447_vm11, %vm3448_vm5  ;;  %v3451_v14 = vand.u32 2147483647, %v11460_v19  ;;  %vm3143_vm10 = vweird.f32 %v11634_v16 }
 0x5d6   :  { %vm3073_vm14 = vcmp.eq.f32.partialorder %v3072_v9, 8.507059e+37  ;;  %v3393_v3 = vand.u32 2147483648, %v15911_v38  ;;  %v3450_v17 = vsel %vm11945_vm2, %v11524_v29, %v3446_v41  ;;  %7492 = vtanh.f32 %v3287_v20  ;;  %v15922_v9 = vld [vmem:[#allocation17_spill] sm:$0xff]  ;;  %v15927_v41 = vld [vmem:[#allocation64_spill] sm:$0xff] }
 0x5d7   :  { %vm11959_vm11 = vcmp.eq.f32.partialorder %v3511_v27, 8.507059e+37  ;;  %v11963_v32 = vadd.f32 %v3527_v52, %v3523_v28  ;;  %vm3387_vm12 = vweird.f32 %v15911_v38  ;;  %v15917_v61 = vand.u32 2147483648, %v11460_v19  ;;  %v11969_v13 = vpop.eup %7488  ;;  %v15924_v20 = vld [vmem:[#allocation37_spill] sm:$0xff] }
 0x5d8   :  { %v2948_v39 = vadd.f32 %v2947_v30, %v15918_v25  ;;  %v3016_v29 = vsel %vm11928_vm1, %v3015_v51, %v3011_v48  ;;  %v3076_v27 = vsel %vm3073_vm14, %v15919_v40, %v3071_v12  ;;  %vm11976_vm3 = vmor %vm3387_vm12, %vm3388_vm4  ;;  %vm3452_vm5 = vcmp.eq.f32.partialorder %v3451_v14, 8.507059e+37  ;;  %v15939_v48 = vld [vmem:[#allocation53_spill] sm:$0xff] }
 0x5d9   :  { %15916 = vst [vmem:[#allocation63_spill] sm:$0xff] %v11963_v32  ;;  %v3454_v10 = vor.u32 1.1754944e-38, %v15917_v61  ;;  %v15923_v19 = vsub.f32 1.0, %v15922_v9  ;;  %v7491_v30 = vpop.eup %7490  ;;  %vm3099_vm2 = vweird.f32 %v11575_v5  ;;  %v3390_v52 = vsel %vm11976_vm3, %v15902_v7, %v3386_v43  ;;  %vm11999_vm12 = vmor %vm3083_vm13, %vm3084_vm9  ;;  %v15930_v43 = vld [vmem:[#allocation57_spill] sm:$0xff]  ;;  %v15936_v9 = vld [vmem:[#allocation67_spill] sm:$0xff] }
 0x5da   :  { %vm11987_vm1 = vcmp.eq.f32.partialorder %v3391_v49, 8.507059e+37  ;;  %vm3024_vm4 = vweird.f32 %v15924_v20  ;;  %v3394_v51 = vor.u32 1.1754944e-38, %v3393_v3  ;;  %vm3023_vm14 = vweird.f32 %v15927_v41  ;;  %v15944_v7 = vld [vmem:[#allocation34_spill] sm:$0xff]  ;;  %v15948_v28 = vld [vmem:[#allocation49_spill] sm:$0xff] }
 0x5db   :  { %v3021_v34 = vmul.f32 %v15924_v20, %v15923_v19  ;;  %v3455_v42 = vsel %vm3452_vm5, %v3454_v10, %v3450_v17  ;;  %v3029_v38 = vand.u32 2147483648, %v15927_v41  ;;  %vm3098_vm3 = vweird.f32 %v15930_v43  ;;  %v15931_v10 = vld [vmem:[#allocation70_spill] sm:$0xff]  ;;  %vm12014_vm9 = vmor %vm3023_vm14, %vm3024_vm4 }
 0x5dc   :  { %v3027_v49 = vand.u32 2147483647, %v15927_v41  ;;  %v3082_v57 = vadd.f32 %v11528_v2, %v11613_v60  ;;  %v3087_v14 = vand.u32 2147483647, %v15903_v24  ;;  %7494 = vtanh.f32 %v2948_v39  ;;  %v7493_v3 = vpop.eup %7492  ;;  %vm12023_vm5 = vmor %vm3128_vm15, %vm3129_vm7  ;;  %v12041_v41 = vld [vmem:[#allocation2] sm:$0xff]  ;;  %v2952_v45 = vpop.f32.mrf.mxu3 }
 0x5dd   :  { %v3022_v12 = vadd.f32 %v15924_v20, %v3021_v34  ;;  %7496 = vtanh.f32 %v11963_v32  ;;  %v3191_v17 = vmul.f32 %v7491_v30, %v3016_v29  ;;  %v3395_v61 = vsel %vm11987_vm1, %v3394_v51, %v3390_v52  ;;  %v15938_v34 = vld [vmem:[#allocation47_spill] sm:$0xff]  ;;  %vm12051_vm1 = vmor %vm3143_vm10, %vm3144_vm8  ;;  %v16022_v32 = vld [vmem:[#allocation18_spill] sm:$0xff] }
 0x5de   :  { %v3524_v40 = vmul.f32 %v3455_v42, %v15931_v10  ;;  %vm3114_vm13 = vweird.f32 %v11660_v23  ;;  %v3528_v24 = vmul.f32 %v7493_v3, %v3395_v61  ;;  %v3086_v29 = vsel %vm11999_vm12, %v11528_v2, %v3082_v57  ;;  %vm12097_vm10 = vmor %vm3098_vm3, %vm3099_vm2 }
 0x5df   :  { %v3026_v39 = vsel %vm12014_vm9, %v15924_v20, %v3022_v12  ;;  %v15937_v19 = vsub.f32 1.0, %v15936_v9  ;;  %v3131_v52 = vsel %vm12023_vm5, %v11714_v8, %v11847_v56  ;;  %v3187_v42 = vmul.f32 %v3076_v27, %v15939_v48  ;;  %v6464_v20 = vld [vmem:[%s15073_s0 + $0x30] sm:$0xff]   ;;  %v15943_v27 = vld [vmem:[#allocation51_spill] sm:$0xff] }
 0x5e0   :  { %v3030_v51 = vor.u32 1.1754944e-38, %v3029_v38  ;;  %vm3088_vm7 = vcmp.eq.f32.partialorder %v3087_v14, 8.507059e+37  ;;  %vm3113_vm15 = vweird.f32 %v11579_v15  ;;  %v12055_v12 = vadd.f32 %v3528_v24, %v3524_v40  ;;  %4576 = vst [vmem:[#allocation2] sm:$0xff] %v6464_v20   ;;  %v15957_v48 = vld [vmem:[#allocation39_spill] sm:$0xff] }
 0x5e1   :  { %v3036_v30 = vmul.f32 %v15938_v34, %v15937_v19  ;;  %vm3028_vm4 = vcmp.eq.f32.partialorder %v3027_v49, 8.507059e+37  ;;  %v3091_v38 = vsel %vm3088_vm7, %v15943_v27, %v3086_v29  ;;  %v2951_v57 = vadd.f32 %v2950_v35, %v15944_v7  ;;  %v15951_v29 = vld [vmem:[#allocation42_spill] sm:$0xff]  ;;  %v15953_v19 = vld [vmem:[#allocation48_spill] sm:$0xff]  ;;  %vm12131_vm9 = vmor %vm3113_vm15, %vm3114_vm13 }
 0x5e2   :  { %15942 = vst [vmem:[#allocation43_spill] sm:$0xff] %v12055_v12  ;;  %v3515_v14 = vsel %vm11959_vm11, %v11828_v4, %v3510_v36  ;;  %v3146_v3 = vsel %vm12051_vm1, %v11736_v31, %v11870_v55  ;;  %v12071_v49 = vadd.f32 %v3191_v17, %v3187_v42  ;;  %v3031_v61 = vsel %vm3028_vm4, %v3030_v51, %v3026_v39  ;;  %v7495_v10 = vpop.eup %7494  ;;  %v15947_v36 = vld [vmem:[#allocation62_spill] sm:$0xff] }
 0x5e3   :  { %7498 = vtanh.f32 %v12055_v12  ;;  %v3037_v63 = vadd.f32 %v15938_v34, %v3036_v30  ;;  %vm3039_vm8 = vweird.f32 %v15938_v34  ;;  %v3097_v18 = vadd.f32 %v11575_v5, %v15946_v37  ;;  %v7497_v4 = vpop.eup %7496  ;;  %v15963_v37 = vld [vmem:[#allocation66_spill] sm:$0xff] }
 0x5e4   :  { %15945 = vst [vmem:[#allocation38_spill] sm:$0xff] %v12071_v49  ;;  %v3188_v35 = vmul.f32 %v3091_v38, %v15947_v36  ;;  %v3192_v40 = vmul.f32 %v7495_v10, %v3031_v61  ;;  %v3042_v31 = vand.u32 2147483647, %v15948_v28  ;;  %v3044_v55 = vand.u32 2147483648, %v15948_v28 }
 0x5e5   :  { %vm12083_vm6 = vcmp.eq.f32.partialorder %v3132_v21, 8.507059e+37  ;;  %v3154_v24 = vmul.f32 %v11950_v54, %v11857_v33  ;;  %v3102_v39 = vand.u32 2147483647, %v15930_v43  ;;  %7500 = vtanh.f32 %v2951_v57 }
 0x5e6   :  { %v15952_v9 = vsub.f32 1.0, %v15951_v29  ;;  %7502 = vtanh.f32 %v12071_v49  ;;  %v12102_v21 = vadd.f32 %v3192_v40, %v3188_v35  ;;  %vm3038_vm11 = vweird.f32 %v15948_v28  ;;  %v15967_v29 = vld [vmem:[#allocation46_spill] sm:$0xff] }
 0x5e7   :  { %v2953_v42 = vadd.f32 %v2952_v45, %v15957_v48  ;;  %v3169_v51 = vmul.f32 %v11969_v13, %v11883_v59  ;;  %v3539_v20 = vmul.f32 %v7497_v4, %v11844_v1  ;;  %vm12111_vm14 = vmor %vm3038_vm11, %vm3039_vm8  ;;  %v3101_v2 = vsel %vm12097_vm10, %v11575_v5, %v3097_v18 }
 0x5e8   :  { %v3051_v30 = vmul.f32 %v15953_v19, %v15952_v9  ;;  %15956 = vst [vmem:[#allocation71_spill] sm:$0xff] %v12102_v21  ;;  %v3112_v27 = vadd.f32 %v11660_v23, %v11773_v46  ;;  %7504 = vtanh.f32 %v12102_v21  ;;  %v3041_v38 = vsel %vm12111_vm14, %v15938_v34, %v3037_v63  ;;  %v15962_v34 = vld [vmem:[#allocation21_spill] sm:$0xff]  ;;  %v16013_v21 = vld [vmem:[#allocation16_spill] sm:$0xff] }
 0x5e9   :  { %vm3043_vm2 = vcmp.eq.f32.partialorder %v3042_v31, 8.507059e+37  ;;  %v3045_v1 = vor.u32 1.1754944e-38, %v3044_v55  ;;  %v7499_v57 = vpop.eup %7498  ;;  %vm3103_vm12 = vcmp.eq.f32.partialorder %v3102_v39, 8.507059e+37  ;;  %vm3054_vm3 = vweird.f32 %v15953_v19  ;;  %v6651_v55 = vld [vmem:[#allocation3] sm:$0xff] }
 0x5ea   :  { %v3052_v61 = vadd.f32 %v15953_v19, %v3051_v30  ;;  %v3117_v10 = vand.u32 2147483647, %v11579_v15  ;;  %v3540_v46 = vmul.f32 %v7499_v57, %v3515_v14  ;;  %v3106_v63 = vsel %vm3103_vm12, %v15962_v34, %v3101_v2 }
 0x5eb   :  { %v3059_v18 = vand.u32 2147483648, %v15963_v37  ;;  %7506 = vtanh.f32 %v2953_v42  ;;  %v7501_v45 = vpop.eup %7500  ;;  %v3046_v4 = vsel %vm3043_vm2, %v3045_v1, %v3041_v38  ;;  %vm3053_vm7 = vweird.f32 %v15963_v37  ;;  %v15968_v42 = vld [vmem:[#allocation69_spill] sm:$0xff] }
 0x5ec   :  { %v3057_v36 = vand.u32 2147483647, %v15963_v37  ;;  %v3116_v15 = vsel %vm12131_vm9, %v11660_v23, %v3112_v27  ;;  %v7503_v35 = vpop.eup %7502  ;;  %v3155_v40 = vsub.f32 1.0, %v3154_v24  ;;  %v3170_v28 = vsub.f32 1.0, %v3169_v51  ;;  %vm12144_vm13 = vmor %vm3053_vm7, %vm3054_vm3 }
 0x5ed   :  { %v6794_v31 = vpack.c.bf16 %v3540_v46, %v3539_v20  ;;  %v3193_v14 = vmul.f32 %v7501_v45, %v3046_v4  ;;  %v15966_v39 = vand.u32 2147483647, %v11634_v16  ;;  %v3189_v9 = vmul.f32 %v3106_v63, %v15967_v29  ;;  %v6656_v4 = vld [vmem:[#allocation2 + $0x8] sm:$0xff] }
 0x5ee   :  { %v3056_v23 = vsel %vm12144_vm13, %v15953_v19, %v3052_v61  ;;  %vm3118_vm1 = vcmp.eq.f32.partialorder %v3117_v10, 8.507059e+37  ;;  %v7505_v24 = vpop.eup %7504  ;;  %v3136_v30 = vsel %vm12083_vm6, %v11785_v0, %v3131_v52  ;;  %v3060_v6 = vor.u32 1.1754944e-38, %v3059_v18  ;;  %v15970_v0 = vld [vmem:[#allocation45_spill] sm:$0xff]  ;;  %v8012_v29 = vld [vmem:[%s15079_s3 + $0x8] sm:$0xff] }
 0x5ef   :  { %vm3148_vm15 = vcmp.eq.f32.partialorder %v15966_v39, 8.507059e+37  ;;  %6914 = vst [vmem:[#allocation3 + $0x8] sm:$0xff] %v6794_v31   ;;  %v3121_v51 = vsel %vm3118_vm1, %v15968_v42, %v3116_v15  ;;  %v3203_v20 = vmul.f32 %v7503_v35, %v3136_v30  ;;  %v12164_v43 = vadd.f32 %v3193_v14, %v3189_v9  ;;  %v8009_v14 = vld [vmem:[%s15074_s1 + $0x8] sm:$0xff]  ;;  %v8011_v39 = vld [vmem:[%s15074_s1 + $0x10] sm:$0xff]  ;;  %v8013_v9 = vld [vmem:[%s15074_s1 + $0x18] sm:$0xff] }
 0x5f0   :  { %v3151_v16 = vsel %vm3148_vm15, %v11833_v44, %v3146_v3  ;;  %6918 = vst [vmem:[#allocation2 + $0x10] sm:$0xff] %v6794_v31   ;;  %vm3058_vm4 = vcmp.eq.f32.partialorder %v3057_v36, 8.507059e+37  ;;  %v3156_v2 = vmul.f32 %v11950_v54, %v3155_v40  ;;  %v3171_v8 = vmul.f32 %v11969_v13, %v3170_v28  ;;  %v8016_v30 = vld [vmem:[%s15079_s3 + $0x18] sm:$0xff]  ;;  %v8019_v42 = vld [vmem:[%s15074_s1 + $0x30] sm:$0xff] }
 0x5f1   :  { %v3204_v19 = vmul.f32 %v7505_v24, %v3151_v16  ;;  %15969 = vst [vmem:[#allocation65_spill] sm:$0xff] %v12164_v43  ;;  %v7507_v60 = vpop.eup %7506  ;;  %v3061_v56 = vsel %vm3058_vm4, %v3060_v6, %v3056_v23  ;;  %v3190_v52 = vmul.f32 %v3121_v51, %v15970_v0  ;;  %vm3159_vm5 = vweird.f32 %v11950_v54  ;;  %v8014_v23 = vld [vmem:[%s15079_s3 + $0x10] sm:$0xff]  ;;  %v8015_v24 = vld [vmem:[%s15074_s1 + $0x20] sm:$0xff]  ;;  %v8017_v16 = vld [vmem:[%s15074_s1 + $0x28] sm:$0xff] }
 0x5f2   :  { %v3194_v44 = vmul.f32 %v7507_v60, %v3061_v56  ;;  %7508 = vtanh.f32 %v12164_v43  ;;  %v3157_v27 = vadd.f32 %v11950_v54, %v3156_v2  ;;  %v3172_v38 = vadd.f32 %v11969_v13, %v3171_v8  ;;  %v8018_v6 = vld [vmem:[%s15079_s3 + $0x20] sm:$0xff]  ;;  %v8020_v51 = vld [vmem:[%s15079_s3 + $0x28] sm:$0xff]  ;;  %v8023_v8 = vld [vmem:[%s15079_s3 + $0x38] sm:$0xff] }
 0x5f3   :  { %v6799_v17 = vpack.c.bf16 %v3204_v19, %v3203_v20  ;;  %vm3174_vm8 = vweird.f32 %v11969_v13  ;;  %vm3158_vm6 = vweird.f32 %v11857_v33  ;;  %v3164_v1 = vand.u32 2147483648, %v11857_v33  ;;  %v8021_v20 = vld [vmem:[%s15074_s1 + $0x38] sm:$0xff]  ;;  %v8022_v19 = vld [vmem:[%s15079_s3 + $0x30] sm:$0xff] }
 0x5f4   :  { %v12171_v3 = vadd.f32 %v3194_v44, %v3190_v52  ;;  %v3179_v57 = vand.u32 2147483648, %v11883_v59  ;;  %vm12180_vm10 = vmor %vm3158_vm6, %vm3159_vm5  ;;  %v3162_v10 = vand.u32 2147483647, %v11857_v33  ;;  %vm3173_vm11 = vweird.f32 %v11883_v59 }
 0x5f5   :  { %6915 = vst [vmem:[#allocation3 + $0x10] sm:$0xff] %v6799_v17   ;;  %v3177_v5 = vand.u32 2147483647, %v11883_v59  ;;  %vm3175_vm14 = vmor %vm3173_vm11, %vm3174_vm8  ;;  %v3161_v34 = vsel %vm12180_vm10, %v11950_v54, %v3157_v27  ;;  %v3165_v18 = vor.u32 1.1754944e-38, %v3164_v1  ;;  %v8008_v54 = vld [vmem:[%s15074_s1] sm:$0xff]  ;;  %vm15974_vm3 = vcmask 523264  }
 0x5f6   :  { %15971 = vst [vmem:[#allocation60_spill] sm:$0xff] %v12171_v3  ;;  %7510 = vtanh.f32 %v12171_v3  ;;  %v3176_v63 = vsel %vm3175_vm14, %v11969_v13, %v3172_v38  ;;  %v3180_v45 = vor.u32 1.1754944e-38, %v3179_v57  ;;  %vm3163_vm2 = vcmp.eq.f32.partialorder %v3162_v10, 8.507059e+37  ;;  %v6652_v31 = vld [vmem:[#allocation3 + $0x8] sm:$0xff]  ;;  %vm15975_vm9 = vmmov %vm15974_vm3  ;;  %v15982_v27 = vld [vmem:[#allocation7_spill] sm:$0xff] }
 0x5f7   :  { %v6657_v46 = vld [vmem:[#allocation2 + $0x10] sm:$0xff]  ;;  %vm3178_vm12 = vcmp.eq.f32.partialorder %v3177_v5, 8.507059e+37  ;;  %v3166_v36 = vsel %vm3163_vm2, %v3165_v18, %v3161_v34  ;;  %vm15976_vm7 = vmmov %vm15974_vm3  ;;  %v15983_v57 = vld [vmem:[#allocation10_spill] sm:$0xff] }
 0x5f8   :  { %3928 = vmatpush.bf16.msra.mxu1 %v6657_v46  ;;  %v7509_v37 = vpop.eup %7508  ;;  %v3181_v15 = vsel %vm3178_vm12, %v3180_v45, %v3176_v63  ;;  %vm15977_vm13 = vmmov %vm15974_vm3  ;;  %v15984_v34 = vld [vmem:[#allocation5_spill] sm:$0xff]  ;;  %v15986_v45 = vld [vmem:[#allocation24_spill] sm:$0xff] }
 0x5f9   :  { %v3205_v35 = vmul.f32 %v7509_v37, %v3166_v36  ;;  %vm15978_vm15 = vmmov %vm15974_vm3  ;;  %v15985_v37 = vld [vmem:[#allocation8_spill] sm:$0xff] }
 0x5fa   :  { %vm15979_vm1 = vmmov %vm15974_vm3 }
 0x5fb   :  { %vm15980_vm4 = vmmov %vm15979_vm1 }
 0x5fc   :  { %v7511_v33 = vpop.eup %7510  ;;  %3929 = vmatpush.bf16.msra.mxu1 %v6656_v4  ;;  %v6653_v28 = vld [vmem:[#allocation3 + $0x10] sm:$0xff]  ;;  %vm15981_vm5 = vmmov %vm15979_vm1 }
 0x5fd   :  { %v3206_v59 = vmul.f32 %v7511_v33, %v3181_v15  ;;  %v15987_v33 = vld [vmem:[#allocation11_spill] sm:$0xff] }
 0x5ff   :  { %v6804_v40 = vpack.c.bf16 %v3206_v59, %v3205_v35 }
 0x600   :  { %3930 = vmatpush.bf16.msra.mxu1 %v12041_v41  ;;  %v8010_v41 = vld [vmem:[%s15079_s3] sm:$0xff] }
 0x601   :  { %6916 = vst [vmem:[#allocation3 + $0x18] sm:$0xff] %v6804_v40  }
 0x603   :  { %6408 = vmatmul.msk.bf16.vlgmr.msra.gmra.mxu1 %vm422_vm0, %v8008_v54 }
 0x608   :  { %v6654_v13 = vld [vmem:[#allocation3 + $0x18] sm:$0xff] }
 0x609   :  { %3593 = vmatpush.bf16.msra.mxu2 %v6654_v13 }
 0x60d   :  { %3594 = vmatpush.bf16.msra.mxu2 %v6653_v28  ;;  %v15988_v28 = vld [vmem:[#allocation12_spill] sm:$0xff] }
 0x611   :  { %3595 = vmatpush.bf16.msra.mxu2 %v6652_v31 }
 0x613   :  { %6409 = vmatmul.msk.bf16.gmra.mxu1 %vm422_vm0, %v8009_v14 }
 0x615   :  { %3596 = vmatpush.bf16.msra.mxu2 %v6651_v55 }
 0x618   :  { %6374 = vmatmul.msk.bf16.vlgmr.msra.gmra.mxu2 %vm15974_vm3, %v8010_v41  ;;  %v15989_v41 = vld [vmem:[#allocation25_spill] sm:$0xff] }
 0x623   :  { %6410 = vmatmul.msk.bf16.gmra.mxu1 %vm422_vm0, %v8011_v39 }
 0x628   :  { %6375 = vmatmul.msk.bf16.gmra.mxu2 %vm15975_vm9, %v8012_v29 }
 0x633   :  { %6411 = vmatmul.msk.bf16.gmra.mxu1 %vm422_vm0, %v8013_v9  ;;  %v15990_v9 = vld [vmem:[#allocation26_spill] sm:$0xff] }
 0x638   :  { %6376 = vmatmul.msk.bf16.gmra.mxu2 %vm15976_vm7, %v8014_v23 }
 0x643   :  { %6412 = vmatmul.msk.bf16.gmra.mxu1 %vm422_vm0, %v8015_v24 }
 0x648   :  { %6377 = vmatmul.msk.bf16.gmra.mxu2 %vm15977_vm13, %v8016_v30 }
 0x653   :  { %6413 = vmatmul.msk.bf16.gmra.mxu1 %vm422_vm0, %v8017_v16  ;;  %v15991_v16 = vld [vmem:[#allocation6_spill] sm:$0xff] }
 0x658   :  { %6378 = vmatmul.msk.bf16.gmra.mxu2 %vm15978_vm15, %v8018_v6 }
 0x663   :  { %6414 = vmatmul.msk.bf16.gmra.mxu1 %vm422_vm0, %v8019_v42 }
 0x668   :  { %6379 = vmatmul.msk.bf16.gmra.mxu2 %vm15979_vm1, %v8020_v51 }
 0x673   :  { %6415 = vmatmul.msk.bf16.gmra.mxu1 %vm422_vm0, %v8021_v20 }
 0x678   :  { %6380 = vmatmul.msk.bf16.gmra.mxu2 %vm15980_vm4, %v8022_v19 }
 0x680   :  { %v3932_v60 = vpop.f32.mrf.mxu1 }
 0x681   :  { %v3933_v38 = vadd.f32 %v3932_v60, %v15982_v27 }
 0x683   :  { %v6416_v5 = vmul.f32 -1.442695, %v3933_v38 }
 0x685   :  { %7512 = vpow2.f32 %v6416_v5 }
 0x688   :  { %v3934_v2 = vpop.f32.mrf.mxu1  ;;  %6381 = vmatmul.msk.bf16.gmra.mxu2 %vm15981_vm5, %v8023_v8 }
 0x689   :  { %v3935_v61 = vadd.f32 %v3934_v2, %v15983_v57 }
 0x68b   :  { %v6417_v46 = vmul.f32 -1.442695, %v3935_v61  ;;  %v7513_v14 = vpop.eup %7512 }
 0x68c   :  { %v12265_v30 = vadd.f32 1.0, %v7513_v14 }
 0x68d   :  { %7514 = vpow2.f32 %v6417_v46 }
 0x68e   :  { %v4031_v57 = vand.u32 2147483648, %v12265_v30  ;;  %vm4025_vm8 = vweird.f32 %v12265_v30 }
 0x690   :  { %v3937_v56 = vpop.f32.mrf.mxu1 }
 0x691   :  { %v3938_v63 = vadd.f32 %v3937_v56, %v15984_v34 }
 0x693   :  { %v6418_v35 = vmul.f32 -1.442695, %v3938_v63  ;;  %v7515_v55 = vpop.eup %7514  ;;  %v15995_v63 = vld [vmem:[#allocation14_spill] sm:$0xff] }
 0x694   :  { %v12268_v42 = vadd.f32 1.0, %v7515_v55 }
 0x695   :  { %7516 = vpow2.f32 %v6418_v35 }
 0x696   :  { %vm4040_vm14 = vweird.f32 %v12268_v42 }
 0x698   :  { %v3939_v17 = vpop.f32.mrf.mxu1 }
 0x699   :  { %v3940_v18 = vadd.f32 %v3939_v17, %v15985_v37 }
 0x69b   :  { %v3598_v0 = vpop.f32.mrf.mxu2  ;;  %v6419_v59 = vmul.f32 -1.442695, %v3940_v18  ;;  %v7517_v51 = vpop.eup %7516 }
 0x69c   :  { %v3599_v4 = vadd.f32 %v3598_v0, %v15986_v45  ;;  %v12272_v0 = vadd.f32 1.0, %v7517_v51 }
 0x69d   :  { %7518 = vpow2.f32 %v6419_v59 }
 0x69e   :  { %v6382_v40 = vmul.f32 -1.442695, %v3599_v4 }
 0x6a0   :  { %v3942_v52 = vpop.f32.mrf.mxu1  ;;  %7520 = vpow2.f32 %v6382_v40 }
 0x6a1   :  { %v3943_v36 = vadd.f32 %v3942_v52, %v15987_v33  ;;  %v15992_v52 = vld [vmem:[#allocation9_spill] sm:$0xff] }
 0x6a3   :  { %v3600_v44 = vpop.f32.mrf.mxu2  ;;  %v6420_v13 = vmul.f32 -1.442695, %v3943_v36  ;;  %v7519_v60 = vpop.eup %7518 }
 0x6a4   :  { %v3601_v39 = vadd.f32 %v3600_v44, %v15989_v41  ;;  %v12275_v38 = vadd.f32 1.0, %v7519_v60  ;;  %v16007_v41 = vld [vmem:[#allocation23_spill] sm:$0xff] }
 0x6a5   :  { %7522 = vpow2.f32 %v6420_v13 }
 0x6a6   :  { %v6383_v20 = vmul.f32 -1.442695, %v3601_v39  ;;  %v7521_v8 = vpop.eup %7520 }
 0x6a8   :  { %v3944_v1 = vpop.f32.mrf.mxu1 }
 0x6a9   :  { %v3945_v31 = vadd.f32 %v3944_v1, %v15988_v28  ;;  %v15993_v1 = vld [vmem:[#allocation22_spill] sm:$0xff] }
 0x6ab   :  { %v3603_v10 = vpop.f32.mrf.mxu2  ;;  %v6421_v29 = vmul.f32 -1.442695, %v3945_v31  ;;  %v7523_v17 = vpop.eup %7522 }
 0x6ac   :  { %v3604_v23 = vadd.f32 %v3603_v10, %v15990_v9  ;;  %v12278_v10 = vadd.f32 1.0, %v7521_v8  ;;  %v12280_v46 = vadd.f32 1.0, %v7523_v17  ;;  %v16001_v17 = vld [vmem:[#allocation15_spill] sm:$0xff]  ;;  %v16005_v9 = vld [vmem:[#allocation13_spill] sm:$0xff] }
 0x6ad   :  { %7524 = vpow2.f32 %v6421_v29 }
 0x6ae   :  { %v6384_v2 = vmul.f32 -1.442695, %v3604_v23  ;;  %7526 = vrcp.f32 %v12265_v30  ;;  %15994 = vst [vmem:[#allocation44_spill] sm:$0xff] %v12278_v10  ;;  %vm4085_vm12 = vweird.f32 %v12280_v46 }
 0x6af   :  { %7528 = vrcp.f32 %v12268_v42 }
 0x6b0   :  { %v3947_v15 = vpop.f32.mrf.mxu1  ;;  %7530 = vpow2.f32 %v6383_v20 }
 0x6b1   :  { %v3948_v6 = vadd.f32 %v3947_v15, %v15991_v16  ;;  %7532 = vpow2.f32 %v6384_v2  ;;  %v15996_v15 = vld [vmem:[#allocation28_spill] sm:$0xff] }
 0x6b3   :  { %v3605_v54 = vpop.f32.mrf.mxu2  ;;  %v6422_v56 = vmul.f32 -1.442695, %v3948_v6  ;;  %v7525_v4 = vpop.eup %7524 }
 0x6b4   :  { %v3606_v61 = vadd.f32 %v3605_v54, %v15993_v1  ;;  %v12285_v59 = vpop.eup %7526  ;;  %v12292_v55 = vadd.f32 1.0, %v7525_v4 }
 0x6b5   :  { %7534 = vpow2.f32 %v6422_v56  ;;  %v12288_v13 = vpop.eup %7528  ;;  %vm4026_vm10 = vweird.f32 %v12285_v59 }
 0x6b6   :  { %7536 = vrcp.f32 %v12272_v0  ;;  %v6385_v40 = vmul.f32 -1.442695, %v3606_v61  ;;  %v7531_v14 = vpop.eup %7530  ;;  %vm12440_vm2 = vmor %vm4025_vm8, %vm4026_vm10  ;;  %vm4041_vm9 = vweird.f32 %v12288_v13  ;;  %vm4100_vm7 = vweird.f32 %v12292_v55 }
 0x6b7   :  { %7538 = vrcp.f32 %v12275_v38  ;;  %v7533_v39 = vpop.eup %7532  ;;  %v12297_v20 = vadd.f32 1.0, %v7531_v14  ;;  %vm12504_vm15 = vmor %vm4040_vm14, %vm4041_vm9 }
 0x6b8   :  { %v3949_v24 = vpop.f32.mrf.mxu1  ;;  %7540 = vrcp.f32 %v12278_v10  ;;  %v12302_v2 = vadd.f32 1.0, %v7533_v39 }
 0x6b9   :  { %v3950_v44 = vadd.f32 %v3949_v24, %v15992_v52  ;;  %7542 = vrcp.f32 %v12280_v46  ;;  %v15997_v24 = vld [vmem:[#allocation29_spill] sm:$0xff]  ;;  %15998 = vst [vmem:[#allocation68_spill] sm:$0xff] %v12297_v20 }
 0x6ba   :  { %15999 = vst [vmem:[#allocation40_spill] sm:$0xff] %v12302_v2 }
 0x6bb   :  { %v3608_v19 = vpop.f32.mrf.mxu2  ;;  %v6423_v36 = vmul.f32 -1.442695, %v3950_v44  ;;  %v7535_v23 = vpop.eup %7534 }
 0x6bc   :  { %v3609_v35 = vadd.f32 %v3608_v19, %v15996_v15  ;;  %v12295_v51 = vpop.eup %7536  ;;  %v12306_v56 = vadd.f32 1.0, %v7535_v23 }
 0x6bd   :  { %7544 = vpow2.f32 %v6423_v36  ;;  %v12299_v60 = vpop.eup %7538  ;;  %v12324_v39 = vmul.f32 %v12295_v51, %v12272_v0 }
 0x6be   :  { %v6386_v29 = vmul.f32 -1.442695, %v3609_v35  ;;  %7546 = vpow2.f32 %v6385_v40  ;;  %v12304_v8 = vpop.eup %7540  ;;  %v4021_v40 = vmul.f32 %v12285_v59, %v12265_v30 }
 0x6bf   :  { %16000 = vst [vmem:[#allocation61_spill] sm:$0xff] %v12304_v8  ;;  %v12309_v61 = vpop.eup %7542 }
 0x6c0   :  { %v3952_v5 = vpop.f32.mrf.mxu1  ;;  %v4022_v15 = vsub.f32 1.0, %v4021_v40  ;;  %vm4086_vm11 = vweird.f32 %v12309_v61 }
 0x6c1   :  { %v3953_v18 = vadd.f32 %v3952_v5, %v15995_v63  ;;  %v12344_v63 = vmul.f32 %v12304_v8, %v12278_v10  ;;  %vm12522_vm4 = vmor %vm4085_vm12, %vm4086_vm11 }
 0x6c2   :  { %v4023_v49 = vmul.f32 %v12285_v59, %v4022_v15 }
 0x6c3   :  { %v3610_v54 = vpop.f32.mrf.mxu2  ;;  %v6424_v31 = vmul.f32 -1.442695, %v3953_v18  ;;  %v7545_v4 = vpop.eup %7544  ;;  %16004 = vst [vmem:[#allocation56_spill] sm:$0xff] %v12344_v63 }
 0x6c4   :  { %v3611_v6 = vadd.f32 %v3610_v54, %v15997_v24  ;;  %v7547_v35 = vpop.eup %7546 }
 0x6c5   :  { %7548 = vpow2.f32 %v6424_v31  ;;  %v12317_v31 = vmul.f32 %v12288_v13, %v12268_v42 }
 0x6c6   :  { %7550 = vrcp.f32 %v12292_v55  ;;  %v6387_v5 = vmul.f32 -1.442695, %v3611_v6  ;;  %v12330_v6 = vmul.f32 %v12299_v60, %v12275_v38 }
 0x6c7   :  { %7552 = vpow2.f32 %v6386_v29  ;;  %v12326_v29 = vadd.f32 1.0, %v7545_v4 }
 0x6c8   :  { %v3954_v19 = vpop.f32.mrf.mxu1  ;;  %7554 = vrcp.f32 %v12297_v20 }
 0x6c9   :  { %v3955_v44 = vadd.f32 %v3954_v19, %v16001_v17  ;;  %7556 = vrcp.f32 %v12302_v2  ;;  %v4091_v19 = vand.u32 2147483648, %v12280_v46  ;;  %v4081_v17 = vmul.f32 %v12309_v61, %v12280_v46 }
 0x6ca   :  { %7558 = vrcp.f32 %v12306_v56 }
 0x6cb   :  { %v3613_v18 = vpop.f32.mrf.mxu2  ;;  %v6425_v36 = vmul.f32 -1.442695, %v3955_v44  ;;  %v7549_v54 = vpop.eup %7548  ;;  %7560 = vpow2.f32 %v6387_v5  ;;  %v12333_v44 = vadd.f32 1.0, %v7547_v35  ;;  %v12359_v37 = vor.u32 1.1754944e-38, %v4091_v19  ;;  %v16009_v19 = vld [vmem:[#allocation27_spill] sm:$0xff] }
 0x6cc   :  { %v12320_v14 = vpop.eup %7550  ;;  %v12337_v1 = vadd.f32 1.0, %v7549_v54  ;;  %v3614_v16 = vadd.f32 %v3613_v18, %v16007_v41  ;;  %v4082_v33 = vsub.f32 1.0, %v4081_v17 }
 0x6cd   :  { %v7553_v23 = vpop.eup %7552  ;;  %16002 = vst [vmem:[#allocation50_spill] sm:$0xff] %v12333_v44  ;;  %7562 = vpow2.f32 %v6425_v36  ;;  %v4096_v35 = vmul.f32 %v12320_v14, %v12292_v55 }
 0x6ce   :  { %v12339_v4 = vpop.eup %7554  ;;  %7564 = vrcp.f32 %v12326_v29  ;;  %v12353_v54 = vadd.f32 1.0, %v7553_v23  ;;  %v4121_v23 = vand.u32 2147483648, %v12306_v56  ;;  %v6388_v17 = vmul.f32 -1.442695, %v3614_v16 }
 0x6cf   :  { %16003 = vst [vmem:[#allocation52_spill] sm:$0xff] %v12339_v4  ;;  %v12349_v52 = vpop.eup %7556  ;;  %7566 = vrcp.f32 %v12333_v44  ;;  %v12364_v40 = vmul.f32 %v12339_v4, %v12297_v20  ;;  %v4097_v34 = vsub.f32 1.0, %v4096_v35  ;;  %v12385_v41 = vmul.f32 %v12309_v61, %v4082_v33 }
 0x6d0   :  { %v3957_v24 = vpop.f32.mrf.mxu1  ;;  %16006 = vst [vmem:[#allocation41_spill] sm:$0xff] %v12349_v52  ;;  %v12356_v28 = vpop.eup %7558  ;;  %7568 = vrcp.f32 %v12337_v1  ;;  %v12388_v16 = vor.u32 1.1754944e-38, %v4121_v23  ;;  %v4149_v12 = vand.u32 2147483647, %v12337_v1  ;;  %vm4145_vm3 = vweird.f32 %v12337_v1 }
 0x6d1   :  { %v3958_v36 = vadd.f32 %v3957_v24, %v16005_v9  ;;  %v7561_v9 = vpop.eup %7560  ;;  %16008 = vst [vmem:[#allocation55_spill] sm:$0xff] %v12364_v40  ;;  %v4111_v3 = vmul.f32 %v12356_v28, %v12306_v56  ;;  %v12400_v33 = vmul.f32 %v12320_v14, %v4097_v34 }
 0x6d2   :  { %v12379_v43 = vadd.f32 1.0, %v7561_v9  ;;  %vm12509_vm1 = vcmp.eq.f32.partialorder %v4149_v12, 8.507059e+37 }
 0x6d3   :  { %v3615_v5 = vpop.f32.mrf.mxu2  ;;  %v6426_v24 = vmul.f32 -1.442695, %v3958_v36  ;;  %v7563_v18 = vpop.eup %7562  ;;  %v12372_v36 = vmul.f32 %v12349_v52, %v12302_v2  ;;  %v4112_v20 = vsub.f32 1.0, %v4111_v3 }
 0x6d4   :  { %v3616_v45 = vadd.f32 %v3615_v5, %v16009_v19  ;;  %16011 = vst [vmem:[#allocation54_spill] sm:$0xff] %v12379_v43  ;;  %v12382_v5 = vpop.eup %7564  ;;  %v12390_v48 = vadd.f32 1.0, %v7563_v18  ;;  %v4032_v18 = vor.u32 1.1754944e-38, %v4031_v57  ;;  %v16017_v57 = vld [vmem:[#allocation31_spill] sm:$0xff] }
 0x6d5   :  { %7570 = vpow2.f32 %v6426_v24  ;;  %16010 = vst [vmem:[#allocation20_spill] sm:$0xff] %v12372_v36  ;;  %v4029_v24 = vand.u32 2147483647, %v12265_v30  ;;  %v12392_v27 = vpop.eup %7566  ;;  %v12433_v19 = vmul.f32 %v12356_v28, %v4112_v20 }
 0x6d6   :  { %7572 = vrcp.f32 %v12353_v54  ;;  %16012 = vst [vmem:[#allocation59_spill] sm:$0xff] %v12392_v27  ;;  %v6389_v2 = vmul.f32 -1.442695, %v3616_v45  ;;  %v12397_v52 = vpop.eup %7568  ;;  %v4126_v45 = vmul.f32 %v12382_v5, %v12326_v29  ;;  %v12414_v34 = vmul.f32 %v12392_v27, %v12333_v44 }
 0x6d7   :  { %7574 = vpow2.f32 %v6388_v17  ;;  %vm12406_vm6 = vcmp.eq.f32.partialorder %v4029_v24, 8.507059e+37  ;;  %v3757_v17 = vand.u32 2147483648, %v12353_v54  ;;  %v4024_v24 = vadd.f32 %v12285_v59, %v4023_v49 }
 0x6d8   :  { %v3959_v35 = vpop.f32.mrf.mxu1  ;;  %7576 = vrcp.f32 %v12379_v43  ;;  %16016 = vst [vmem:[#allocation17_spill] sm:$0xff] %v12414_v34  ;;  %v4141_v36 = vmul.f32 %v12397_v52, %v12337_v1  ;;  %vm4146_vm13 = vweird.f32 %v12397_v52  ;;  %vm4160_vm8 = vweird.f32 %v12390_v48 }
 0x6d9   :  { %v3960_v9 = vadd.f32 %v3959_v35, %v16013_v21  ;;  %7578 = vrcp.f32 %v12390_v48  ;;  %v12448_v40 = vor.u32 1.1754944e-38, %v3757_v17  ;;  %v4028_v20 = vsel %vm12440_vm2, %v12285_v59, %v4024_v24  ;;  %vm12556_vm10 = vmor %vm4145_vm3, %vm4146_vm13 }
 0x6da   :  { %7580 = vpow2.f32 %v6389_v2  ;;  %v4151_v2 = vand.u32 2147483648, %v12337_v1  ;;  %v4142_v10 = vsub.f32 1.0, %v4141_v36  ;;  %vm4116_vm3 = vweird.f32 %v12356_v28 }
 0x6db   :  { %v3618_v23 = vpop.f32.mrf.mxu2  ;;  %v7571_v7 = vpop.eup %7570  ;;  %v6427_v15 = vmul.f32 -1.442695, %v3960_v9  ;;  %v4046_v9 = vand.u32 2147483648, %v12268_v42  ;;  %16020 = vst [vmem:[#allocation37_spill] sm:$0xff] %v12448_v40  ;;  %vm4056_vm13 = vweird.f32 %v12295_v51 }
 0x6dc   :  { %v12410_v21 = vpop.eup %7572  ;;  %v3619_v3 = vadd.f32 %v3618_v23, %v16017_v57  ;;  %v12425_v44 = vadd.f32 1.0, %v7571_v7  ;;  %v4127_v23 = vsub.f32 1.0, %v4126_v45 }
 0x6dd   :  { %7582 = vpow2.f32 %v6427_v15  ;;  %v3747_v57 = vmul.f32 %v12410_v21, %v12353_v54  ;;  %v7575_v49 = vpop.eup %7574  ;;  %v4044_v15 = vand.u32 2147483647, %v12268_v42  ;;  %v12456_v25 = vor.u32 1.1754944e-38, %v4046_v9 }
 0x6de   :  { %v6390_v7 = vmul.f32 -1.442695, %v3619_v3  ;;  %v12445_v4 = vpop.eup %7576  ;;  %v16021_v3 = vsub.f32 1.0, %v12317_v31  ;;  %7584 = vrcp.f32 %v12425_v44  ;;  %v12464_v45 = vmul.f32 %v12382_v5, %v4127_v23 }
 0x6df   :  { %v12458_v34 = vpop.eup %7578  ;;  %v3748_v59 = vsub.f32 1.0, %v3747_v57  ;;  %v12466_v31 = vor.u32 1.1754944e-38, %v4151_v2  ;;  %v12468_v24 = vadd.f32 1.0, %v7575_v49  ;;  %v3762_v23 = vmul.f32 %v12445_v4, %v12379_v43 }
 0x6e0   :  { %v3962_v27 = vpop.f32.mrf.mxu1  ;;  %v4038_v30 = vmul.f32 %v12288_v13, %v16021_v3  ;;  %v7581_v8 = vpop.eup %7580  ;;  %7586 = vpow2.f32 %v6390_v7  ;;  %v4033_v3 = vsel %vm12406_vm6, %v4032_v18, %v4028_v20  ;;  %v4156_v57 = vmul.f32 %v12458_v34, %v12390_v48 }
 0x6e1   :  { %v3963_v17 = vadd.f32 %v3962_v27, %v16022_v32  ;;  %16023 = vst [vmem:[#allocation64_spill] sm:$0xff] %v12468_v24  ;;  %v16024_v27 = vld [vmem:[#allocation32_spill] sm:$0xff]  ;;  %v4143_v49 = vmul.f32 %v12397_v52, %v4142_v10  ;;  %v12485_v7 = vadd.f32 1.0, %v7581_v8  ;;  %v12489_v18 = vmul.f32 %v12410_v21, %v3748_v59 }
 0x6e2   :  { %v12480_v2 = vadd.f32 %v12288_v13, %v4038_v30  ;;  %v4084_v20 = vadd.f32 %v12309_v61, %v12385_v41  ;;  %v4166_v10 = vand.u32 2147483648, %v12390_v48  ;;  %v3763_v36 = vsub.f32 1.0, %v3762_v23 }
 0x6e3   :  { %v3620_v40 = vpop.f32.mrf.mxu2  ;;  %v7583_v9 = vpop.eup %7582  ;;  %7588 = vtanh.f32 %v3963_v17  ;;  %16025 = vst [vmem:[#allocation57_spill] sm:$0xff] %v12489_v18  ;;  %v4089_v18 = vand.u32 2147483647, %v12280_v46  ;;  %v4144_v12 = vadd.f32 %v12397_v52, %v4143_v49  ;;  %v4164_v23 = vand.u32 2147483647, %v12390_v48 }
 0x6e4   :  { %v3621_v32 = vadd.f32 %v3620_v40, %v16024_v27  ;;  %v4061_v40 = vand.u32 2147483648, %v12272_v0  ;;  %7590 = vrcp.f32 %v12468_v24  ;;  %v12492_v35 = vadd.f32 1.0, %v7583_v9  ;;  %v12496_v30 = vpop.eup %7584 }
 0x6e5   :  { %v4157_v27 = vsub.f32 1.0, %v4156_v57  ;;  %7592 = vrcp.f32 %v12485_v7  ;;  %vm12529_vm5 = vcmp.eq.f32.partialorder %v4044_v15, 8.507059e+37  ;;  %v4171_v46 = vmul.f32 %v12496_v30, %v12425_v44 }
 0x6e6   :  { %v6391_v8 = vmul.f32 -1.442695, %v3621_v32  ;;  %v4043_v32 = vsel %vm12504_vm15, %v12288_v13, %v12480_v2  ;;  %v7587_v42 = vpop.eup %7586  ;;  %v12535_v2 = vor.u32 1.1754944e-38, %v4061_v40  ;;  %7594 = vrcp.f32 %v12492_v35 }
 0x6e7   :  { %v4088_v49 = vsel %vm12522_vm4, %v12309_v61, %v4084_v20  ;;  %v12545_v43 = vor.u32 1.1754944e-38, %v4166_v10  ;;  %v4099_v40 = vadd.f32 %v12320_v14, %v12400_v33  ;;  %vm4101_vm6 = vweird.f32 %v12320_v14 }
 0x6e8   :  { %v3964_v17 = vpop.f32.mrf.mxu1  ;;  %7596 = vpow2.f32 %v6391_v8  ;;  %v12561_v61 = vmul.f32 %v12445_v4, %v3763_v36  ;;  %v4158_v20 = vmul.f32 %v12458_v34, %v4157_v27  ;;  %v12564_v10 = vadd.f32 1.0, %v7587_v42  ;;  %vm12575_vm2 = vmor %vm4100_vm7, %vm4101_vm6 }
 0x6e9   :  { %v3965_v15 = vadd.f32 %v3964_v17, %v8480_v62  ;;  %v7589_v59 = vpop.eup %7588  ;;  %vm4090_vm11 = vcmp.eq.f32.partialorder %v4089_v18, 8.507059e+37  ;;  %v4148_v33 = vsel %vm12556_vm10, %v12397_v52, %v4144_v12  ;;  %v3787_v8 = vand.u32 2147483648, %v12468_v24 }
 0x6ea   :  { %v12550_v63 = vpop.eup %7590  ;;  %v4093_v1 = vsel %vm4090_vm11, %v12359_v37, %v4088_v49  ;;  %v4104_v17 = vand.u32 2147483647, %v12292_v55  ;;  %vm4161_vm14 = vweird.f32 %v12458_v34  ;;  %v4172_v62 = vsub.f32 1.0, %v4171_v46 }
 0x6eb   :  { %v12533_v13 = vpop.f32.mrf.mxu2  ;;  %v4208_v36 = vmul.f32 %v7589_v59, %v4033_v3  ;;  %7598 = vtanh.f32 %v3965_v15  ;;  %v12579_v18 = vpop.eup %7592  ;;  %vm12581_vm12 = vcmp.eq.f32.partialorder %v4164_v23, 8.507059e+37  ;;  %v3777_v37 = vmul.f32 %v12550_v63, %v12468_v24 }
 0x6ec   :  { %v4179_v42 = vand.u32 2147483647, %v12425_v44  ;;  %v4181_v3 = vand.u32 2147483648, %v12425_v44  ;;  %v4103_v12 = vsel %vm12575_vm2, %v12320_v14, %v4099_v40  ;;  %v12592_v46 = vpop.eup %7594  ;;  %v4159_v49 = vadd.f32 %v12458_v34, %v4158_v20 }
 0x6ed   :  { %7600 = vrcp.f32 %v12564_v10  ;;  %v4204_v23 = vmul.f32 %v4093_v1, %v11758_v58  ;;  %v16040_v15 = vand.u32 2147483648, %v12292_v55  ;;  %v12603_v24 = vsel %vm12509_vm1, %v12466_v31, %v4148_v33  ;;  %vm12620_vm1 = vmor %vm4160_vm8, %vm4161_vm14 }
 0x6ee   :  { %v7597_v9 = vpop.eup %7596  ;;  %v12605_v14 = vor.u32 1.1754944e-38, %v3787_v8  ;;  %vm4175_vm9 = vweird.f32 %v12425_v44  ;;  %vm4105_vm7 = vcmp.eq.f32.partialorder %v4104_v17, 8.507059e+37  ;;  %v4173_v58 = vmul.f32 %v12496_v30, %v4172_v62 }
 0x6ef   :  { %v4107_v59 = vor.u32 1.1754944e-38, %v16040_v15  ;;  %v12609_v1 = vadd.f32 %v4208_v36, %v4204_v23  ;;  %v4048_v55 = vsel %vm12529_vm5, %v12456_v25, %v4043_v32  ;;  %vm4115_vm15 = vweird.f32 %v12306_v56 }
 0x6f0   :  { %v3967_v40 = vpop.f32.mrf.mxu1  ;;  %v3778_v62 = vsub.f32 1.0, %v3777_v37  ;;  %v4182_v41 = vor.u32 1.1754944e-38, %v4181_v3  ;;  %v3802_v33 = vand.u32 2147483648, %v12485_v7  ;;  %v4186_v25 = vmul.f32 %v12592_v46, %v12492_v35  ;;  %vm12699_vm14 = vmor %vm4115_vm15, %vm4116_vm3 }
 0x6f1   :  { %v4108_v27 = vsel %vm4105_vm7, %v4107_v59, %v4103_v12  ;;  %v7599_v32 = vpop.eup %7598  ;;  %v4163_v57 = vsel %vm12620_vm1, %v12458_v34, %v4159_v49  ;;  %vm4176_vm4 = vweird.f32 %v12496_v30  ;;  %vm12631_vm5 = vcmp.eq.f32.partialorder %v4179_v42, 8.507059e+37 }
 0x6f2   :  { %v3792_v8 = vmul.f32 %v12579_v18, %v12485_v7  ;;  %v12637_v17 = vadd.f32 1.0, %v7597_v9  ;;  %vm4055_vm8 = vweird.f32 %v12272_v0  ;;  %v4196_v36 = vand.u32 2147483648, %v12492_v35  ;;  %vm12674_vm11 = vmor %vm4175_vm9, %vm4176_vm4 }
 0x6f3   :  { %v3625_v20 = vpop.f32.mrf.mxu2  ;;  %v4205_v37 = vmul.f32 %v4108_v27, %v11802_v53  ;;  %v4209_v3 = vmul.f32 %v7599_v32, %v4048_v55  ;;  %v3624_v34 = vadd.f32 %v12533_v13, %v15875_v26  ;;  %v12644_v12 = vpop.eup %7600  ;;  %v4174_v42 = vadd.f32 %v12496_v30, %v4173_v58  ;;  %vm12722_vm3 = vmor %vm4055_vm8, %vm4056_vm13 }
 0x6f4   :  { %7602 = vtanh.f32 %v12609_v1  ;;  %v3968_v49 = vadd.f32 %v3967_v40, %v15567_v47  ;;  %v16045_v23 = vsub.f32 1.0, %v12324_v39  ;;  %v12653_v59 = vmul.f32 %v12550_v63, %v3778_v62 }
 0x6f5   :  { %v4187_v53 = vsub.f32 1.0, %v4186_v25  ;;  %v4194_v9 = vand.u32 2147483647, %v12492_v35  ;;  %v12656_v55 = vadd.f32 %v4209_v3, %v4205_v37  ;;  %vm4130_vm6 = vweird.f32 %v12326_v29 }
 0x6f6   :  { %v4053_v15 = vmul.f32 %v12295_v51, %v16045_v23  ;;  %v4168_v13 = vsel %vm12581_vm12, %v12545_v43, %v4163_v57  ;;  %v3793_v58 = vsub.f32 1.0, %v3792_v8  ;;  %v3817_v40 = vand.u32 2147483648, %v12564_v10 }
 0x6f7   :  { %7604 = vrcp.f32 %v12637_v17  ;;  %v16046_v39 = vand.u32 2147483647, %v12272_v0  ;;  %v12680_v43 = vmul.f32 %v12644_v12, %v12564_v10  ;;  %v6392_v52 = vmul.f32 -1.442695, %v3624_v34 }
 0x6f8   :  { %7606 = vtanh.f32 %v12656_v55  ;;  %v4114_v62 = vadd.f32 %v12356_v28, %v12433_v19  ;;  %v4178_v32 = vsel %vm12674_vm11, %v12496_v30, %v4174_v42  ;;  %v12688_v44 = vor.u32 1.1754944e-38, %v4196_v36  ;;  %v3969_v23 = vpop.f32.mrf.mxu1 }
 0x6f9   :  { %vm12666_vm10 = vcmp.eq.f32.partialorder %v16046_v39, 8.507059e+37  ;;  %v4054_v57 = vadd.f32 %v12295_v51, %v4053_v15  ;;  %7608 = vtanh.f32 %v3968_v49  ;;  %v4188_v8 = vmul.f32 %v12592_v46, %v4187_v53  ;;  %v16065_v53 = vld [vmem:[#allocation61_spill] sm:$0xff] }
 0x6fa   :  { %v3815_v37 = vand.u32 2147483647, %v12564_v10  ;;  %v4119_v3 = vand.u32 2147483647, %v12306_v56  ;;  %v3626_v34 = vadd.f32 %v3625_v20, %v15701_v11  ;;  %v7603_v19 = vpop.eup %7602  ;;  %v12704_v36 = vmul.f32 %v12579_v18, %v3793_v58 }
 0x6fb   :  { %v3628_v25 = vpop.f32.mrf.mxu2  ;;  %vm4191_vm2 = vweird.f32 %v12592_v46  ;;  %v12707_v42 = vor.u32 1.1754944e-38, %v3817_v40  ;;  %v16053_v49 = vsub.f32 1.0, %v12330_v6  ;;  %v12714_v15 = vsel %vm12631_vm5, %v4182_v41, %v4178_v32 }
 0x6fc   :  { %vm4190_vm12 = vweird.f32 %v12492_v35  ;;  %v3808_v56 = vsub.f32 1.0, %v12680_v43  ;;  %7610 = vpow2.f32 %v6392_v52  ;;  %v4118_v6 = vsel %vm12699_vm14, %v12356_v28, %v4114_v62 }
 0x6fd   :  { %v4068_v20 = vmul.f32 %v12299_v60, %v16053_v49  ;;  %v12729_v48 = vpop.eup %7604  ;;  %v4058_v41 = vsel %vm12722_vm3, %v12295_v51, %v4054_v57  ;;  %v3970_v58 = vadd.f32 %v3969_v23, %v15906_v22  ;;  %v4129_v40 = vadd.f32 %v12382_v5, %v12464_v45  ;;  %v16063_v49 = vld [vmem:[#allocation56_spill] sm:$0xff]  ;;  %vm12790_vm11 = vmor %vm4190_vm12, %vm4191_vm2 }
 0x6fe   :  { %vm4131_vm9 = vweird.f32 %v12382_v5  ;;  %v7607_v0 = vpop.eup %7606  ;;  %v4189_v39 = vadd.f32 %v12592_v46, %v4188_v8  ;;  %v4220_v31 = vmul.f32 %v7603_v19, %v12603_v24  ;;  %vm4120_vm7 = vcmp.eq.f32.partialorder %v4119_v3, 8.507059e+37 }
 0x6ff   :  { %v6393_v28 = vmul.f32 -1.442695, %v3626_v34  ;;  %v7609_v43 = vpop.eup %7608  ;;  %v4221_v52 = vmul.f32 %v7607_v0, %v4168_v13  ;;  %v4069_v62 = vadd.f32 %v12299_v60, %v4068_v20  ;;  %vm4071_vm13 = vweird.f32 %v12299_v60  ;;  %vm12758_vm5 = vmor %vm4130_vm6, %vm4131_vm9 }
 0x700   :  { %v4134_v51 = vand.u32 2147483647, %v12326_v29  ;;  %vm3752_vm15 = vweird.f32 %v12410_v21  ;;  %vm12744_vm1 = vcmp.eq.f32.partialorder %v4194_v9, 8.507059e+37  ;;  %v4063_v24 = vsel %vm12666_vm10, %v12535_v2, %v4058_v41 }
 0x701   :  { %v4123_v32 = vsel %vm4120_vm7, %v12388_v16, %v4118_v6  ;;  %vm4070_vm4 = vweird.f32 %v12275_v38  ;;  %v4076_v13 = vand.u32 2147483648, %v12275_v38  ;;  %v6819_v9 = vpack.c.bf16 %v4221_v52, %v4220_v31 }
 0x702   :  { %v4074_v8 = vand.u32 2147483647, %v12275_v38  ;;  %v4133_v2 = vsel %vm12758_vm5, %v12382_v5, %v4129_v40  ;;  %7612 = vtanh.f32 %v3970_v58  ;;  %v7611_v27 = vpop.eup %7610  ;;  %vm3751_vm8 = vweird.f32 %v12353_v54  ;;  %vm12771_vm6 = vmor %vm4070_vm4, %vm4071_vm13  ;;  %v16066_v58 = vld [vmem:[#allocation63_spill] sm:$0xff] }
 0x703   :  { %v3630_v16 = vpop.f32.mrf.mxu2  ;;  %v3822_v3 = vmul.f32 %v12729_v48, %v12637_v17  ;;  %v4210_v34 = vmul.f32 %v7609_v43, %v4063_v24  ;;  %7614 = vpow2.f32 %v6393_v28  ;;  %v16062_v38 = vand.u32 2147483648, %v12326_v29  ;;  %6820 = vst [vmem:[#allocation3] sm:$0xff] %v6819_v9   ;;  %v16069_v43 = vld [vmem:[#allocation54_spill] sm:$0xff] }
 0x704   :  { %v4073_v5 = vsel %vm12771_vm6, %v12299_v60, %v4069_v62  ;;  %vm4135_vm10 = vcmp.eq.f32.partialorder %v4134_v51, 8.507059e+37  ;;  %v3629_v30 = vadd.f32 %v3628_v25, %v15534_v50  ;;  %v16064_v20 = vsub.f32 1.0, %v16063_v49  ;;  %6922 = vst [vmem:[#allocation2 + $0x8] sm:$0xff] %v6819_v9   ;;  %v16092_v49 = vld [vmem:[#allocation41_spill] sm:$0xff] }
 0x705   :  { %v4137_v19 = vor.u32 1.1754944e-38, %v16062_v38  ;;  %v3830_v41 = vand.u32 2147483647, %v12637_v17  ;;  %v4206_v40 = vmul.f32 %v4123_v32, %v16066_v58  ;;  %v4077_v0 = vor.u32 1.1754944e-38, %v4076_v13  ;;  %v16070_v32 = vld [vmem:[#allocation43_spill] sm:$0xff]  ;;  %v16075_v38 = vld [vmem:[#allocation52_spill] sm:$0xff] }
 0x706   :  { %v3689_v6 = vmul.f32 %v16065_v53, %v16064_v20  ;;  %v3809_v25 = vmul.f32 %v12644_v12, %v3808_v56  ;;  %v3832_v31 = vand.u32 2147483648, %v12637_v17  ;;  %v12796_v28 = vadd.f32 1.0, %v7611_v27 }
 0x707   :  { %v4138_v29 = vsel %vm4135_vm10, %v4137_v19, %v4133_v2  ;;  %vm4075_vm14 = vcmp.eq.f32.partialorder %v4074_v8, 8.507059e+37  ;;  %vm3766_vm3 = vweird.f32 %v16069_v43  ;;  %v4193_v52 = vsel %vm12790_vm11, %v12592_v46, %v4189_v39  ;;  %v16071_v8 = vld [vmem:[#allocation44_spill] sm:$0xff]  ;;  %v16072_v39 = vld [vmem:[#allocation57_spill] sm:$0xff] }
 0x708   :  { %v3823_v62 = vsub.f32 1.0, %v3822_v3  ;;  %v12802_v51 = vadd.f32 %v4210_v34, %v4206_v40  ;;  %v4078_v35 = vsel %vm4075_vm14, %v4077_v0, %v4073_v5  ;;  %v7613_v24 = vpop.eup %7612  ;;  %v4207_v13 = vmul.f32 %v4138_v29, %v16070_v32  ;;  %v16073_v34 = vld [vmem:[#allocation55_spill] sm:$0xff]  ;;  %v16080_v40 = vld [vmem:[#allocation36_spill] sm:$0xff] }
 0x709   :  { %v3690_v56 = vadd.f32 %v16065_v53, %v3689_v6  ;;  %vm3692_vm2 = vweird.f32 %v16065_v53  ;;  %7616 = vtanh.f32 %v3629_v30  ;;  %v7615_v57 = vpop.eup %7614  ;;  %vm3812_vm12 = vweird.f32 %v12644_v12 }
 0x70a   :  { %v4211_v9 = vmul.f32 %v7613_v24, %v4078_v35  ;;  %v3695_v2 = vand.u32 2147483647, %v16071_v8  ;;  %v3697_v46 = vand.u32 2147483648, %v16071_v8  ;;  %v3750_v27 = vadd.f32 %v12410_v21, %v16072_v39  ;;  %v16088_v39 = vld [vmem:[#allocation34_spill] sm:$0xff] }
 0x70b   :  { %v4198_v3 = vsel %vm12744_vm1, %v12688_v44, %v4193_v52  ;;  %7618 = vrcp.f32 %v12796_v28  ;;  %vm3691_vm9 = vweird.f32 %v16071_v8  ;;  %v16074_v23 = vsub.f32 1.0, %v16073_v34  ;;  %vm12838_vm1 = vmor %vm3751_vm8, %vm3752_vm15  ;;  %v3633_v29 = vpop.f32.mrf.mxu2  ;;  %v16090_v44 = vld [vmem:[#allocation20_spill] sm:$0xff] }
 0x70c   :  { %v12821_v5 = vadd.f32 %v12644_v12, %v3809_v25  ;;  %vm3811_vm7 = vweird.f32 %v12564_v10  ;;  %7620 = vtanh.f32 %v12802_v51  ;;  %v12825_v30 = vadd.f32 %v4211_v9, %v4207_v13  ;;  %vm12829_vm13 = vmor %vm3691_vm9, %vm3692_vm2  ;;  %v16083_v13 = vld [vmem:[#allocation37_spill] sm:$0xff] }
 0x70d   :  { %v3704_v19 = vmul.f32 %v16075_v38, %v16074_v23  ;;  %v3755_v45 = vand.u32 2147483647, %v12353_v54  ;;  %v3824_v20 = vmul.f32 %v12729_v48, %v3823_v62  ;;  %v12843_v6 = vadd.f32 1.0, %v7615_v57  ;;  %v16082_v62 = vld [vmem:[#allocation68_spill] sm:$0xff] }
 0x70e   :  { %v3694_v58 = vsel %vm12829_vm13, %v16065_v53, %v3690_v56  ;;  %v3631_v0 = vadd.f32 %v3630_v16, %v16080_v40  ;;  %vm3782_vm4 = vweird.f32 %v12550_v63  ;;  %7622 = vtanh.f32 %v12825_v30  ;;  %v16081_v53 = vld [vmem:[#allocation64_spill] sm:$0xff] }
 0x70f   :  { %vm3696_vm5 = vcmp.eq.f32.partialorder %v3695_v2, 8.507059e+37  ;;  %v3698_v54 = vor.u32 1.1754944e-38, %v3697_v46  ;;  %v3754_v60 = vsel %vm12838_vm1, %v12410_v21, %v3750_v27  ;;  %v7617_v25 = vpop.eup %7616  ;;  %vm3826_vm15 = vweird.f32 %v12637_v17  ;;  %v16100_v2 = vld [vmem:[#allocation40_spill] sm:$0xff] }
 0x710   :  { %v3705_v52 = vadd.f32 %v16075_v38, %v3704_v19  ;;  %vm3707_vm8 = vweird.f32 %v16075_v38  ;;  %v3765_v16 = vadd.f32 %v12445_v4, %v12561_v61  ;;  %vm3767_vm6 = vweird.f32 %v12445_v4  ;;  %v16099_v61 = vld [vmem:[#allocation71_spill] sm:$0xff] }
 0x711   :  { %vm3781_vm10 = vweird.f32 %v16081_v53  ;;  %vm3756_vm11 = vcmp.eq.f32.partialorder %v3755_v45, 8.507059e+37  ;;  %vm3706_vm14 = vweird.f32 %v16082_v62  ;;  %v3712_v35 = vand.u32 2147483648, %v16082_v62  ;;  %v12864_v24 = vpop.eup %7618  ;;  %vm12870_vm2 = vmor %vm3766_vm3, %vm3767_vm6 }
 0x712   :  { %v3770_v21 = vand.u32 2147483647, %v16069_v43  ;;  %v3699_v32 = vsel %vm3696_vm5, %v3698_v54, %v3694_v58  ;;  %v3759_v56 = vsel %vm3756_vm11, %v16083_v13, %v3754_v60  ;;  %v3710_v57 = vand.u32 2147483647, %v16082_v62  ;;  %v7621_v9 = vpop.eup %7620  ;;  %vm12877_vm13 = vmor %vm3706_vm14, %vm3707_vm8 }
 0x713   :  { %7624 = vtanh.f32 %v3631_v0  ;;  %vm3827_vm9 = vweird.f32 %v12729_v48  ;;  %v3874_v8 = vmul.f32 %v7617_v25, %v3699_v32  ;;  %v3769_v46 = vsel %vm12870_vm2, %v12445_v4, %v3765_v16  ;;  %v16093_v4 = vld [vmem:[#allocation38_spill] sm:$0xff]  ;;  %vm12903_vm5 = vmor %vm3811_vm7, %vm3812_vm12  ;;  %v6534_v16 = vld [vmem:[%s15073_s0 + $0x38] sm:$0xff]  }
 0x714   :  { %v3634_v27 = vadd.f32 %v3633_v29, %v16088_v39  ;;  %7626 = vrcp.f32 %v12843_v6  ;;  %v3709_v34 = vsel %vm12877_vm13, %v16075_v38, %v3705_v52  ;;  %v16089_v23 = vand.u32 2147483648, %v16069_v43  ;;  %v7623_v0 = vpop.eup %7622  ;;  %v12908_v52 = vld [vmem:[#allocation2] sm:$0xff]  ;;  %vm12927_vm7 = vmor %vm3826_vm15, %vm3827_vm9 }
 0x715   :  { %v16091_v45 = vsub.f32 1.0, %v16090_v44  ;;  %v12895_v54 = vadd.f32 %v12729_v48, %v3824_v20  ;;  %v3870_v60 = vmul.f32 %v3759_v56, %v16093_v4  ;;  %v3713_v29 = vor.u32 1.1754944e-38, %v3712_v35  ;;  %5259 = vst [vmem:[#allocation2] sm:$0xff] %v6534_v16   ;;  %v3635_v56 = vpop.f32.mrf.mxu2  ;;  %vm12940_vm6 = vmor %vm3781_vm10, %vm3782_vm4 }
 0x716   :  { %v3773_v19 = vor.u32 1.1754944e-38, %v16089_v23  ;;  %vm3771_vm3 = vcmp.eq.f32.partialorder %v3770_v21, 8.507059e+37  ;;  %vm3796_vm1 = vweird.f32 %v12485_v7  ;;  %v4222_v38 = vmul.f32 %v7621_v9, %v12714_v15 }
 0x717   :  { %v3719_v58 = vmul.f32 %v16092_v49, %v16091_v45  ;;  %v4223_v25 = vmul.f32 %v7623_v0, %v4198_v3  ;;  %vm3711_vm8 = vcmp.eq.f32.partialorder %v3710_v57, 8.507059e+37  ;;  %v3814_v62 = vsel %vm12903_vm5, %v12644_v12, %v12821_v5  ;;  %v16105_v45 = vld [vmem:[#allocation17_spill] sm:$0xff]  ;;  %v16107_v0 = vld [vmem:[#allocation59_spill] sm:$0xff]  ;;  %v16119_v5 = vld [vmem:[#allocation60_spill] sm:$0xff] }
 0x718   :  { %v3774_v20 = vsel %vm3771_vm3, %v3773_v19, %v3769_v46  ;;  %v12917_v35 = vadd.f32 %v3874_v8, %v3870_v60  ;;  %v3714_v21 = vsel %vm3711_vm8, %v3713_v29, %v3709_v34  ;;  %7628 = vtanh.f32 %v3634_v27 }
 0x719   :  { %v7625_v15 = vpop.eup %7624  ;;  %v6824_v3 = vpack.c.bf16 %v4223_v25, %v4222_v38  ;;  %v3720_v32 = vadd.f32 %v16092_v49, %v3719_v58  ;;  %vm3722_vm12 = vweird.f32 %v16092_v49  ;;  %v3780_v13 = vadd.f32 %v12550_v63, %v12653_v59 }
 0x71a   :  { %16096 = vst [vmem:[#allocation70_spill] sm:$0xff] %v12917_v35  ;;  %v3871_v9 = vmul.f32 %v3774_v20, %v16099_v61  ;;  %v3875_v8 = vmul.f32 %v7625_v15, %v3714_v21  ;;  %v3725_v46 = vand.u32 2147483647, %v16100_v2  ;;  %v3727_v27 = vand.u32 2147483648, %v16100_v2  ;;  %v12934_v34 = vpop.eup %7626  ;;  %v16112_v15 = vld [vmem:[#allocation50_spill] sm:$0xff] }
 0x71b   :  { %vm12946_vm15 = vcmp.eq.f32.partialorder %v3815_v37, 8.507059e+37  ;;  %v3829_v19 = vsel %vm12927_vm7, %v12729_v48, %v12895_v54  ;;  %6919 = vst [vmem:[#allocation3 + $0x8] sm:$0xff] %v6824_v3   ;;  %vm3721_vm11 = vweird.f32 %v16100_v2  ;;  %v3785_v44 = vand.u32 2147483647, %v16081_v53  ;;  %v16111_v54 = vld [vmem:[#allocation39_spill] sm:$0xff] }
 0x71c   :  { %v16106_v58 = vsub.f32 1.0, %v16105_v45  ;;  %v3837_v10 = vmul.f32 %v12864_v24, %v12796_v28  ;;  %6923 = vst [vmem:[#allocation2 + $0x10] sm:$0xff] %v6824_v3   ;;  %7630 = vtanh.f32 %v12917_v35  ;;  %v12962_v37 = vadd.f32 %v3875_v8, %v3871_v9  ;;  %vm12966_vm4 = vmor %vm3721_vm11, %vm3722_vm12  ;;  %v8028_v2 = vld [vmem:[%s15079_s3 + $0x8] sm:$0xff] }
 0x71d   :  { %v3636_v53 = vadd.f32 %v3635_v56, %v16111_v54  ;;  %v3724_v60 = vsel %vm12966_vm4, %v16092_v49, %v3720_v32  ;;  %v3784_v29 = vsel %vm12940_vm6, %v12550_v63, %v3780_v13  ;;  %v3795_v38 = vadd.f32 %v12579_v18, %v12704_v36 }
 0x71e   :  { %v3734_v4 = vmul.f32 %v16107_v0, %v16106_v58  ;;  %16108 = vst [vmem:[#allocation67_spill] sm:$0xff] %v12962_v37  ;;  %vm3797_vm10 = vweird.f32 %v12579_v18  ;;  %v7629_v25 = vpop.eup %7628  ;;  %v3852_v20 = vmul.f32 %v12934_v34, %v12843_v6  ;;  %7632 = vtanh.f32 %v12962_v37 }
 0x71f   :  { %vm3726_vm14 = vcmp.eq.f32.partialorder %v3725_v46, 8.507059e+37  ;;  %v3728_v16 = vor.u32 1.1754944e-38, %v3727_v27  ;;  %vm3786_vm2 = vcmp.eq.f32.partialorder %v3785_v44, 8.507059e+37  ;;  %vm3737_vm9 = vweird.f32 %v16107_v0  ;;  %vm12990_vm13 = vmor %vm3796_vm1, %vm3797_vm10  ;;  %v16117_v27 = vld [vmem:[#allocation65_spill] sm:$0xff] }
 0x720   :  { %v3735_v49 = vadd.f32 %v16107_v0, %v3734_v4  ;;  %v3800_v63 = vand.u32 2147483647, %v12485_v7  ;;  %v3789_v36 = vsel %vm3786_vm2, %v12605_v14, %v3784_v29  ;;  %v3742_v3 = vand.u32 2147483648, %v16112_v15 }
 0x721   :  { %v3729_v21 = vsel %vm3726_vm14, %v3728_v16, %v3724_v60  ;;  %7634 = vtanh.f32 %v3636_v53  ;;  %vm3736_vm3 = vweird.f32 %v16112_v15  ;;  %v3740_v56 = vand.u32 2147483647, %v16112_v15 }
 0x722   :  { %v3876_v13 = vmul.f32 %v7629_v25, %v3729_v21  ;;  %v3799_v57 = vsel %vm12990_vm13, %v12579_v18, %v3795_v38  ;;  %v7631_v61 = vpop.eup %7630  ;;  %v3833_v14 = vor.u32 1.1754944e-38, %v3832_v31  ;;  %v3838_v9 = vsub.f32 1.0, %v3837_v10  ;;  %vm13003_vm1 = vmor %vm3736_vm3, %vm3737_vm9 }
 0x723   :  { %v3853_v8 = vsub.f32 1.0, %v3852_v20  ;;  %v3803_v46 = vor.u32 1.1754944e-38, %v3802_v33  ;;  %vm3831_vm8 = vcmp.eq.f32.partialorder %v3830_v41, 8.507059e+37  ;;  %v3872_v18 = vmul.f32 %v3789_v36, %v16117_v27  ;;  %v6664_v59 = vld [vmem:[#allocation2 + $0x10] sm:$0xff] }
 0x724   :  { %v3739_v31 = vsel %vm13003_vm1, %v16107_v0, %v3735_v49  ;;  %vm3801_vm12 = vcmp.eq.f32.partialorder %v3800_v63, 8.507059e+37  ;;  %v7633_v44 = vpop.eup %7632  ;;  %v3819_v7 = vsel %vm12946_vm15, %v12707_v42, %v3814_v62  ;;  %v3834_v33 = vsel %vm3831_vm8, %v3833_v14, %v3829_v19  ;;  %4611 = vmatpush.bf16.msrb.mxu0 %v6664_v59  ;;  %v6663_v42 = vld [vmem:[#allocation2 + $0x8] sm:$0xff]  ;;  %v6658_v14 = vld [vmem:[#allocation3] sm:$0xff]  ;;  %v8030_v27 = vld [vmem:[%s15079_s3 + $0x10] sm:$0xff] }
 0x725   :  { %v3743_v17 = vor.u32 1.1754944e-38, %v3742_v3  ;;  %v3804_v41 = vsel %vm3801_vm12, %v3803_v46, %v3799_v57  ;;  %v3886_v45 = vmul.f32 %v7631_v61, %v3819_v7  ;;  %v3887_v58 = vmul.f32 %v7633_v44, %v3834_v33  ;;  %v6659_v61 = vld [vmem:[#allocation3 + $0x8] sm:$0xff]  ;;  %v8029_v46 = vld [vmem:[%s15074_s1 + $0x18] sm:$0xff]  ;;  %v8033_v59 = vld [vmem:[%s15074_s1 + $0x28] sm:$0xff] }
 0x726   :  { %v13023_v4 = vadd.f32 %v3876_v13, %v3872_v18  ;;  %vm3741_vm7 = vcmp.eq.f32.partialorder %v3740_v56, 8.507059e+37  ;;  %v3839_v10 = vmul.f32 %v12864_v24, %v3838_v9  ;;  %v3854_v43 = vmul.f32 %v12934_v34, %v3853_v8  ;;  %v8026_v9 = vld [vmem:[%s15079_s3] sm:$0xff]  ;;  %v8027_v8 = vld [vmem:[%s15074_s1 + $0x10] sm:$0xff]  ;;  %v8036_v33 = vld [vmem:[%s15079_s3 + $0x28] sm:$0xff] }
 0x727   :  { %v7635_v0 = vpop.eup %7634  ;;  %v3744_v48 = vsel %vm3741_vm7, %v3743_v17, %v3739_v31  ;;  %v6829_v12 = vpack.c.bf16 %v3887_v58, %v3886_v45  ;;  %v3873_v53 = vmul.f32 %v3804_v41, %v16119_v5  ;;  %vm3842_vm5 = vweird.f32 %v12864_v24  ;;  %v8031_v18 = vld [vmem:[%s15074_s1 + $0x20] sm:$0xff]  ;;  %v8032_v31 = vld [vmem:[%s15079_s3 + $0x18] sm:$0xff]  ;;  %v8035_v7 = vld [vmem:[%s15074_s1 + $0x30] sm:$0xff] }
 0x728   :  { %16118 = vst [vmem:[#allocation47_spill] sm:$0xff] %v13023_v4  ;;  %v3877_v23 = vmul.f32 %v7635_v0, %v3744_v48  ;;  %7636 = vtanh.f32 %v13023_v4  ;;  %4612 = vmatpush.bf16.msrb.mxu0 %v6663_v42  ;;  %v3840_v19 = vadd.f32 %v12864_v24, %v3839_v10  ;;  %v3855_v60 = vadd.f32 %v12934_v34, %v3854_v43  ;;  %v8034_v44 = vld [vmem:[%s15079_s3 + $0x20] sm:$0xff]  ;;  %v8037_v17 = vld [vmem:[%s15074_s1 + $0x38] sm:$0xff]  ;;  %v8038_v45 = vld [vmem:[%s15079_s3 + $0x30] sm:$0xff] }
 0x729   :  { %6920 = vst [vmem:[#allocation3 + $0x10] sm:$0xff] %v6829_v12   ;;  %vm3857_vm6 = vweird.f32 %v12934_v34  ;;  %vm3841_vm15 = vweird.f32 %v12796_v28  ;;  %v3847_v29 = vand.u32 2147483648, %v12796_v28  ;;  %v3862_v38 = vand.u32 2147483648, %v12843_v6  ;;  %v8039_v10 = vld [vmem:[%s15079_s3 + $0x38] sm:$0xff]  ;;  %v16132_v42 = vld [vmem:[#allocation10_spill] sm:$0xff] }
 0x72a   :  { %v13030_v62 = vadd.f32 %v3877_v23, %v3873_v53  ;;  %vm13039_vm11 = vmor %vm3841_vm15, %vm3842_vm5  ;;  %v3845_v20 = vand.u32 2147483647, %v12796_v28  ;;  %vm3856_vm4 = vweird.f32 %v12843_v6  ;;  %v3860_v16 = vand.u32 2147483647, %v12843_v6  ;;  %v8024_v28 = vld [vmem:[%s15074_s1] sm:$0xff]  ;;  %v16131_v53 = vld [vmem:[#allocation7_spill] sm:$0xff] }
 0x72b   :  { %vm3858_vm10 = vmor %vm3856_vm4, %vm3857_vm6  ;;  %v3844_v49 = vsel %vm13039_vm11, %v12864_v24, %v3840_v19  ;;  %v3848_v36 = vor.u32 1.1754944e-38, %v3847_v29  ;;  %v3863_v15 = vor.u32 1.1754944e-38, %v3862_v38  ;;  %vm16123_vm9 = vcmask 523264   ;;  %v16133_v38 = vld [vmem:[#allocation5_spill] sm:$0xff] }
 0x72c   :  { %16120 = vst [vmem:[#allocation53_spill] sm:$0xff] %v13030_v62  ;;  %7638 = vtanh.f32 %v13030_v62  ;;  %4613 = vmatpush.bf16.msrb.mxu0 %v12908_v52  ;;  %v3859_v63 = vsel %vm3858_vm10, %v12934_v34, %v3855_v60  ;;  %vm3846_vm14 = vcmp.eq.f32.partialorder %v3845_v20, 8.507059e+37  ;;  %vm3861_vm2 = vcmp.eq.f32.partialorder %v3860_v16, 8.507059e+37  ;;  %v8025_v34 = vld [vmem:[%s15074_s1 + $0x8] sm:$0xff]  ;;  %vm16124_vm13 = vmmov %vm16123_vm9 }
 0x72d   :  { %v3849_v3 = vsel %vm3846_vm14, %v3848_v36, %v3844_v49  ;;  %v3864_v52 = vsel %vm3861_vm2, %v3863_v15, %v3859_v63  ;;  %vm16125_vm3 = vmmov %vm16123_vm9  ;;  %v16134_v16 = vld [vmem:[#allocation11_spill] sm:$0xff]  ;;  %v16135_v36 = vld [vmem:[#allocation8_spill] sm:$0xff] }
 0x72e   :  { %v7637_v21 = vpop.eup %7636  ;;  %vm16126_vm1 = vmmov %vm16125_vm3 }
 0x72f   :  { %6478 = vmatmul.msk.bf16.vlgmr.msrb.gmra.mxu0 %vm422_vm0, %v8024_v28  ;;  %v3888_v32 = vmul.f32 %v7637_v21, %v3849_v3  ;;  %vm16127_vm8 = vmmov %vm16126_vm1  ;;  %v16136_v3 = vld [vmem:[#allocation24_spill] sm:$0xff] }
 0x730   :  { %v6660_v57 = vld [vmem:[#allocation3 + $0x10] sm:$0xff]  ;;  %vm16128_vm12 = vmmov %vm16126_vm1 }
 0x731   :  { %vm16129_vm7 = vmmov %vm16126_vm1 }
 0x732   :  { %v7639_v6 = vpop.eup %7638  ;;  %vm16130_vm5 = vmmov %vm16126_vm1 }
 0x733   :  { %v3889_v13 = vmul.f32 %v7639_v6, %v3864_v52 }
 0x735   :  { %v6834_v56 = vpack.c.bf16 %v3889_v13, %v3888_v32  ;;  %v16137_v32 = vld [vmem:[#allocation12_spill] sm:$0xff] }
 0x737   :  { %6921 = vst [vmem:[#allocation3 + $0x18] sm:$0xff] %v6834_v56  }
 0x73e   :  { %v6661_v24 = vld [vmem:[#allocation3 + $0x18] sm:$0xff] }
 0x73f   :  { %4276 = vmatpush.bf16.msra.mxu3 %v6661_v24  ;;  %6479 = vmatmul.msk.bf16.gmra.mxu0 %vm422_vm0, %v8025_v34 }
 0x743   :  { %4277 = vmatpush.bf16.msra.mxu3 %v6660_v57 }
 0x747   :  { %4278 = vmatpush.bf16.msra.mxu3 %v6659_v61 }
 0x74b   :  { %4279 = vmatpush.bf16.msra.mxu3 %v6658_v14 }
 0x74e   :  { %6444 = vmatmul.msk.bf16.vlgmr.msra.gmra.mxu3 %vm16123_vm9, %v8026_v9  ;;  %v16138_v9 = vld [vmem:[#allocation6_spill] sm:$0xff] }
 0x74f   :  { %6480 = vmatmul.msk.bf16.gmra.mxu0 %vm422_vm0, %v8027_v8 }
 0x75e   :  { %6445 = vmatmul.msk.bf16.gmra.mxu3 %vm16124_vm13, %v8028_v2  ;;  %v16139_v2 = vld [vmem:[#allocation25_spill] sm:$0xff] }
 0x75f   :  { %6481 = vmatmul.msk.bf16.gmra.mxu0 %vm422_vm0, %v8029_v46 }
 0x76e   :  { %6446 = vmatmul.msk.bf16.gmra.mxu3 %vm16125_vm3, %v8030_v27 }
 0x76f   :  { %6482 = vmatmul.msk.bf16.gmra.mxu0 %vm422_vm0, %v8031_v18 }
 0x77e   :  { %6447 = vmatmul.msk.bf16.gmra.mxu3 %vm16126_vm1, %v8032_v31 }
 0x77f   :  { %6483 = vmatmul.msk.bf16.gmra.mxu0 %vm422_vm0, %v8033_v59 }
 0x78e   :  { %6448 = vmatmul.msk.bf16.gmra.mxu3 %vm16127_vm8, %v8034_v44 }
 0x78f   :  { %6484 = vmatmul.msk.bf16.gmra.mxu0 %vm422_vm0, %v8035_v7  ;;  %v16140_v7 = vld [vmem:[#allocation9_spill] sm:$0xff] }
 0x79e   :  { %6449 = vmatmul.msk.bf16.gmra.mxu3 %vm16128_vm12, %v8036_v33 }
 0x79f   :  { %6485 = vmatmul.msk.bf16.gmra.mxu0 %vm422_vm0, %v8037_v17 }
 0x7ac   :  { %v4615_v41 = vpop.f32.mrf.mxu0 }
 0x7ad   :  { %v4616_v23 = vadd.f32 %v4615_v41, %v16131_v53 }
 0x7ae   :  { %6450 = vmatmul.msk.bf16.gmra.mxu3 %vm16129_vm7, %v8038_v45  ;;  %v16141_v45 = vld [vmem:[#allocation26_spill] sm:$0xff] }
 0x7af   :  { %v6486_v29 = vmul.f32 -1.442695, %v4616_v23 }
 0x7b1   :  { %7640 = vpow2.f32 %v6486_v29 }
 0x7b4   :  { %v4617_v58 = vpop.f32.mrf.mxu0 }
 0x7b5   :  { %v4618_v19 = vadd.f32 %v4617_v58, %v16132_v42 }
 0x7b7   :  { %v6487_v20 = vmul.f32 -1.442695, %v4618_v19  ;;  %v7641_v34 = vpop.eup %7640 }
 0x7b8   :  { %v13124_v27 = vadd.f32 1.0, %v7641_v34  ;;  %v16145_v34 = vld [vmem:[#allocation15_spill] sm:$0xff] }
 0x7b9   :  { %7642 = vpow2.f32 %v6487_v20 }
 0x7ba   :  { %vm4708_vm6 = vweird.f32 %v13124_v27 }
 0x7bc   :  { %v4620_v0 = vpop.f32.mrf.mxu0 }
 0x7bd   :  { %v4621_v25 = vadd.f32 %v4620_v0, %v16133_v38 }
 0x7be   :  { %6451 = vmatmul.msk.bf16.gmra.mxu3 %vm16130_vm5, %v8039_v10 }
 0x7bf   :  { %v6488_v21 = vmul.f32 -1.442695, %v4621_v25  ;;  %v7643_v61 = vpop.eup %7642 }
 0x7c0   :  { %v13126_v31 = vadd.f32 1.0, %v7643_v61 }
 0x7c1   :  { %7644 = vpow2.f32 %v6488_v21  ;;  %v16144_v21 = vld [vmem:[#allocation22_spill] sm:$0xff] }
 0x7c2   :  { %v4727_v39 = vand.u32 2147483647, %v13126_v31  ;;  %vm4723_vm2 = vweird.f32 %v13126_v31 }
 0x7c4   :  { %v4622_v43 = vpop.f32.mrf.mxu0  ;;  %vm13321_vm1 = vcmp.eq.f32.partialorder %v4727_v39, 8.507059e+37 }
 0x7c5   :  { %v4623_v15 = vadd.f32 %v4622_v43, %v16135_v36 }
 0x7c7   :  { %v6489_v56 = vmul.f32 -1.442695, %v4623_v15  ;;  %v7645_v18 = vpop.eup %7644 }
 0x7c8   :  { %v13131_v0 = vadd.f32 1.0, %v7645_v18 }
 0x7cc   :  { %v4625_v48 = vpop.f32.mrf.mxu0 }
 0x7cd   :  { %v4626_v49 = vadd.f32 %v4625_v48, %v16134_v16 }
 0x7cf   :  { %v6490_v28 = vmul.f32 -1.442695, %v4626_v49 }
 0x7d1   :  { %v4281_v12 = vpop.f32.mrf.mxu3  ;;  %7646 = vpow2.f32 %v6490_v28 }
 0x7d2   :  { %v4282_v52 = vadd.f32 %v4281_v12, %v16136_v3  ;;  %7648 = vpow2.f32 %v6489_v56  ;;  %v16142_v12 = vld [vmem:[#allocation14_spill] sm:$0xff] }
 0x7d4   :  { %v4627_v5 = vpop.f32.mrf.mxu0  ;;  %v6452_v57 = vmul.f32 -1.442695, %v4282_v52 }
 0x7d5   :  { %v4628_v13 = vadd.f32 %v4627_v5, %v16137_v32 }
 0x7d6   :  { %7650 = vpow2.f32 %v6452_v57 }
 0x7d7   :  { %v6491_v14 = vmul.f32 -1.442695, %v4628_v13  ;;  %v7647_v59 = vpop.eup %7646 }
 0x7d8   :  { %v7649_v43 = vpop.eup %7648  ;;  %v13134_v48 = vadd.f32 1.0, %v7647_v59 }
 0x7d9   :  { %v4283_v60 = vpop.f32.mrf.mxu3  ;;  %7652 = vpow2.f32 %v6491_v14  ;;  %v13138_v25 = vadd.f32 1.0, %v7649_v43 }
 0x7da   :  { %v4284_v46 = vadd.f32 %v4283_v60, %v16139_v2  ;;  %7654 = vrcp.f32 %v13124_v27  ;;  %vm4768_vm14 = vweird.f32 %v13134_v48  ;;  %v4772_v39 = vand.u32 2147483647, %v13134_v48 }
 0x7db   :  { %7656 = vrcp.f32 %v13126_v31 }
 0x7dc   :  { %v4630_v63 = vpop.f32.mrf.mxu0  ;;  %v6453_v41 = vmul.f32 -1.442695, %v4284_v46  ;;  %v7651_v19 = vpop.eup %7650 }
 0x7dd   :  { %v4631_v8 = vadd.f32 %v4630_v63, %v16138_v9  ;;  %v13143_v63 = vadd.f32 1.0, %v7651_v19 }
 0x7df   :  { %v6492_v44 = vmul.f32 -1.442695, %v4631_v8  ;;  %v7653_v29 = vpop.eup %7652  ;;  %16143 = vst [vmem:[#allocation51_spill] sm:$0xff] %v13143_v63 }
 0x7e0   :  { %v13141_v49 = vpop.eup %7654  ;;  %v13148_v52 = vadd.f32 1.0, %v7653_v29 }
 0x7e1   :  { %v4286_v6 = vpop.f32.mrf.mxu3  ;;  %7658 = vpow2.f32 %v6492_v44  ;;  %vm4709_vm15 = vweird.f32 %v13141_v49 }
 0x7e2   :  { %v4287_v58 = vadd.f32 %v4286_v6, %v16141_v45  ;;  %7660 = vpow2.f32 %v6453_v41  ;;  %v13146_v6 = vpop.eup %7656  ;;  %vm13271_vm10 = vmor %vm4708_vm6, %vm4709_vm15  ;;  %vm4783_vm3 = vweird.f32 %v13148_v52  ;;  %vm4773_vm15 = vcmp.eq.f32.partialorder %v4772_v39, 8.507059e+37 }
 0x7e3   :  { %7662 = vrcp.f32 %v13131_v0  ;;  %vm4724_vm13 = vweird.f32 %v13146_v6 }
 0x7e4   :  { %v4632_v24 = vpop.f32.mrf.mxu0  ;;  %v6454_v60 = vmul.f32 -1.442695, %v4287_v58  ;;  %7664 = vrcp.f32 %v13134_v48  ;;  %vm13367_vm6 = vmor %vm4723_vm2, %vm4724_vm13 }
 0x7e5   :  { %v4633_v33 = vadd.f32 %v4632_v24, %v16140_v7 }
 0x7e7   :  { %v6493_v23 = vmul.f32 -1.442695, %v4633_v33  ;;  %v7659_v13 = vpop.eup %7658 }
 0x7e8   :  { %v7661_v24 = vpop.eup %7660  ;;  %v13158_v46 = vadd.f32 1.0, %v7659_v13  ;;  %v13181_v13 = vmul.f32 %v13146_v6, %v13126_v31 }
 0x7e9   :  { %v4288_v17 = vpop.f32.mrf.mxu3  ;;  %7666 = vpow2.f32 %v6493_v23  ;;  %v13152_v61 = vpop.eup %7662  ;;  %v13160_v59 = vadd.f32 1.0, %v7661_v24 }
 0x7ea   :  { %v4289_v15 = vadd.f32 %v4288_v17, %v16144_v21  ;;  %7668 = vpow2.f32 %v6454_v60  ;;  %v13155_v8 = vpop.eup %7664  ;;  %v16149_v60 = vld [vmem:[#allocation28_spill] sm:$0xff]  ;;  %v4789_v21 = vand.u32 2147483648, %v13148_v52 }
 0x7eb   :  { %7670 = vrcp.f32 %v13138_v25  ;;  %16146 = vst [vmem:[#allocation58_spill] sm:$0xff] %v13160_v59  ;;  %v4764_v43 = vmul.f32 %v13155_v8, %v13134_v48  ;;  %vm4769_vm11 = vweird.f32 %v13155_v8 }
 0x7ec   :  { %v4635_v10 = vpop.f32.mrf.mxu0  ;;  %v6455_v14 = vmul.f32 -1.442695, %v4289_v15  ;;  %vm13345_vm7 = vmor %vm4768_vm14, %vm4769_vm11  ;;  %vm4739_vm11 = vweird.f32 %v13152_v61  ;;  %vm4738_vm14 = vweird.f32 %v13131_v0 }
 0x7ed   :  { %v4636_v5 = vadd.f32 %v4635_v10, %v16142_v12  ;;  %v4704_v10 = vmul.f32 %v13141_v49, %v13124_v27 }
 0x7ef   :  { %v6494_v20 = vmul.f32 -1.442695, %v4636_v5  ;;  %v7667_v18 = vpop.eup %7666 }
 0x7f0   :  { %v7669_v44 = vpop.eup %7668  ;;  %v13169_v5 = vadd.f32 1.0, %v7667_v18 }
 0x7f1   :  { %v4291_v28 = vpop.f32.mrf.mxu3  ;;  %7672 = vpow2.f32 %v6494_v20  ;;  %v13162_v17 = vpop.eup %7670  ;;  %v13174_v19 = vadd.f32 1.0, %v7669_v44  ;;  %v4705_v44 = vsub.f32 1.0, %v4704_v10  ;;  %v13219_v10 = vor.u32 1.1754944e-38, %v4789_v21 }
 0x7f2   :  { %7674 = vrcp.f32 %v13143_v63  ;;  %v4292_v29 = vadd.f32 %v4291_v28, %v16149_v60  ;;  %v13189_v24 = vmul.f32 %v13162_v17, %v13138_v25  ;;  %v16150_v28 = vld [vmem:[#allocation13_spill] sm:$0xff]  ;;  %v4765_v60 = vsub.f32 1.0, %v4764_v43 }
 0x7f3   :  { %7676 = vrcp.f32 %v13148_v52  ;;  %16148 = vst [vmem:[#allocation49_spill] sm:$0xff] %v13174_v19  ;;  %v4706_v16 = vmul.f32 %v13141_v49, %v4705_v44 }
 0x7f4   :  { %v4637_v56 = vpop.f32.mrf.mxu0  ;;  %7678 = vpow2.f32 %v6455_v14  ;;  %v13217_v36 = vmul.f32 %v13155_v8, %v4765_v60 }
 0x7f5   :  { %v4638_v57 = vadd.f32 %v4637_v56, %v16145_v34  ;;  %7680 = vrcp.f32 %v13158_v46  ;;  %v13185_v56 = vmul.f32 %v13152_v61, %v13131_v0 }
 0x7f6   :  { %7682 = vrcp.f32 %v13160_v59 }
 0x7f7   :  { %v6495_v33 = vmul.f32 -1.442695, %v4638_v57  ;;  %v7673_v58 = vpop.eup %7672  ;;  %v4774_v57 = vand.u32 2147483648, %v13134_v48 }
 0x7f8   :  { %v13171_v23 = vpop.eup %7674  ;;  %v13192_v14 = vadd.f32 1.0, %v7673_v58  ;;  %v6456_v58 = vmul.f32 -1.442695, %v4292_v29 }
 0x7f9   :  { %v4293_v41 = vpop.f32.mrf.mxu3  ;;  %16147 = vst [vmem:[#allocation62_spill] sm:$0xff] %v13171_v23  ;;  %v13177_v15 = vpop.eup %7676  ;;  %7684 = vpow2.f32 %v6495_v33  ;;  %v13201_v2 = vmul.f32 %v13171_v23, %v13143_v63  ;;  %v13213_v9 = vor.u32 1.1754944e-38, %v4774_v57 }
 0x7fa   :  { %7686 = vrcp.f32 %v13169_v5  ;;  %v7679_v45 = vpop.eup %7678  ;;  %v4779_v33 = vmul.f32 %v13177_v15, %v13148_v52  ;;  %v4834_v37 = vand.u32 2147483648, %v13192_v14  ;;  %vm4784_vm9 = vweird.f32 %v13177_v15 }
 0x7fb   :  { %7688 = vrcp.f32 %v13174_v19  ;;  %v13204_v34 = vpop.eup %7680  ;;  %v13221_v43 = vadd.f32 1.0, %v7679_v45  ;;  %v4712_v45 = vand.u32 2147483647, %v13124_v27  ;;  %vm4828_vm8 = vweird.f32 %v13192_v14 }
 0x7fc   :  { %v4640_v20 = vpop.f32.mrf.mxu0  ;;  %v13210_v7 = vpop.eup %7682  ;;  %7690 = vrcp.f32 %v13192_v14  ;;  %v4794_v57 = vmul.f32 %v13204_v34, %v13158_v46 }
 0x7fd   :  { %v4641_v18 = vadd.f32 %v4640_v20, %v16150_v28  ;;  %v4804_v20 = vand.u32 2147483648, %v13158_v46  ;;  %v16151_v28 = vld [vmem:[#allocation29_spill] sm:$0xff]  ;;  %16152 = vst [vmem:[#allocation42_spill] sm:$0xff] %v13210_v7  ;;  %7692 = vpow2.f32 %v6456_v58  ;;  %v13237_v44 = vmul.f32 %v13210_v7, %v13160_v59 }
 0x7fe   :  { %v4294_v12 = vadd.f32 %v4293_v41, %v16151_v28  ;;  %16153 = vst [vmem:[#allocation48_spill] sm:$0xff] %v13221_v43  ;;  %v4780_v41 = vsub.f32 1.0, %v4779_v33  ;;  %v4714_v58 = vand.u32 2147483648, %v13124_v27  ;;  %v4795_v62 = vsub.f32 1.0, %v4794_v57 }
 0x7ff   :  { %v6496_v32 = vmul.f32 -1.442695, %v4641_v18  ;;  %v7685_v29 = vpop.eup %7684  ;;  %v13229_v42 = vor.u32 1.1754944e-38, %v4804_v20  ;;  %16155 = vst [vmem:[#allocation66_spill] sm:$0xff] %v13237_v44  ;;  %v16156_v20 = vld [vmem:[#allocation16_spill] sm:$0xff]  ;;  %vm13260_vm4 = vcmp.eq.f32.partialorder %v4712_v45, 8.507059e+37 }
 0x800   :  { %v13227_v18 = vpop.eup %7686  ;;  %v6457_v60 = vmul.f32 -1.442695, %v4294_v12  ;;  %v13239_v33 = vadd.f32 1.0, %v7685_v29  ;;  %v4707_v12 = vadd.f32 %v13141_v49, %v4706_v16  ;;  %v4819_v29 = vand.u32 2147483648, %v13169_v5 }
 0x801   :  { %v4296_v38 = vpop.f32.mrf.mxu3  ;;  %v13233_v21 = vpop.eup %7688  ;;  %7694 = vpow2.f32 %v6496_v32  ;;  %v4809_v4 = vmul.f32 %v13227_v18, %v13169_v5  ;;  %v4729_v32 = vand.u32 2147483648, %v13126_v31  ;;  %v13254_v54 = vmul.f32 %v13177_v15, %v4780_v41 }
 0x802   :  { %16154 = vst [vmem:[#allocation21_spill] sm:$0xff] %v13233_v21  ;;  %7696 = vrcp.f32 %v13221_v43  ;;  %v13246_v53 = vpop.eup %7690  ;;  %v13258_v16 = vmul.f32 %v13233_v21, %v13174_v19  ;;  %v13283_v27 = vmul.f32 %v13204_v34, %v4795_v62  ;;  %v13285_v59 = vor.u32 1.1754944e-38, %v4819_v29  ;;  %v16163_v62 = vld [vmem:[#allocation18_spill] sm:$0xff] }
 0x803   :  { %7698 = vpow2.f32 %v6457_v60  ;;  %v7693_v57 = vpop.eup %7692  ;;  %v4715_v60 = vor.u32 1.1754944e-38, %v4714_v58  ;;  %v4824_v45 = vmul.f32 %v13246_v53, %v13192_v14  ;;  %v4810_v35 = vsub.f32 1.0, %v4809_v4 }
 0x804   :  { %v4642_v3 = vpop.f32.mrf.mxu0  ;;  %16157 = vst [vmem:[#allocation46_spill] sm:$0xff] %v13258_v16  ;;  %7700 = vrcp.f32 %v13239_v33  ;;  %v13288_v7 = vor.u32 1.1754944e-38, %v4729_v32  ;;  %v13295_v41 = vadd.f32 1.0, %v7693_v57  ;;  %v13298_v29 = vor.u32 1.1754944e-38, %v4834_v37 }
 0x805   :  { %v4643_v28 = vadd.f32 %v4642_v3, %v16156_v20  ;;  %v4711_v20 = vsel %vm13271_vm10, %v13141_v49, %v4707_v12  ;;  %v4832_v12 = vand.u32 2147483647, %v13192_v14  ;;  %v16164_v32 = vsub.f32 1.0, %v13181_v13 }
 0x806   :  { %v13302_v44 = vsel %vm13260_vm4, %v4715_v60, %v4711_v20  ;;  %v4825_v49 = vsub.f32 1.0, %v4824_v45  ;;  %v13315_v20 = vmul.f32 %v13227_v18, %v4810_v35  ;;  %v4767_v35 = vadd.f32 %v13155_v8, %v13217_v36  ;;  %vm13387_vm4 = vmor %vm4783_vm3, %vm4784_vm9 }
 0x807   :  { %v6497_v19 = vmul.f32 -1.442695, %v4643_v28  ;;  %v7695_v21 = vpop.eup %7694  ;;  %v4721_v63 = vmul.f32 %v13146_v6, %v16164_v32  ;;  %vm4829_vm12 = vweird.f32 %v13246_v53  ;;  %vm13353_vm5 = vcmp.eq.f32.partialorder %v4832_v12, 8.507059e+37 }
 0x808   :  { %v13290_v28 = vpop.eup %7696  ;;  %v13309_v57 = vadd.f32 1.0, %v7695_v21  ;;  %v4771_v23 = vsel %vm13345_vm7, %v13155_v8, %v4767_v35  ;;  %v4782_v12 = vadd.f32 %v13177_v15, %v13254_v54  ;;  %v4787_v54 = vand.u32 2147483647, %v13148_v52  ;;  %vm13413_vm13 = vmor %vm4828_vm8, %vm4829_vm12 }
 0x809   :  { %v4298_v40 = vpop.f32.mrf.mxu3  ;;  %16162 = vst [vmem:[#allocation69_spill] sm:$0xff] %v13290_v28  ;;  %v7699_v50 = vpop.eup %7698  ;;  %7702 = vpow2.f32 %v6497_v19  ;;  %v13319_v13 = vmul.f32 %v13290_v28, %v13221_v43  ;;  %v4722_v45 = vadd.f32 %v13146_v6, %v4721_v63  ;;  %v16171_v19 = vld [vmem:[#allocation27_spill] sm:$0xff]  ;;  %vm4799_vm10 = vweird.f32 %v13204_v34 }
 0x80a   :  { %v13333_v60 = vadd.f32 1.0, %v7699_v50  ;;  %v16174_v50 = vld [vmem:[#allocation19_spill] sm:$0xff]  ;;  %vm4843_vm2 = vweird.f32 %v13239_v33  ;;  %vm4798_vm9 = vweird.f32 %v13158_v46  ;;  %vm4788_vm3 = vcmp.eq.f32.partialorder %v4787_v54, 8.507059e+37 }
 0x80b   :  { %16166 = vst [vmem:[#allocation45_spill] sm:$0xff] %v13319_v13  ;;  %v4726_v8 = vsel %vm13367_vm6, %v13146_v6, %v4722_v45  ;;  %vm4814_vm12 = vweird.f32 %v13227_v18  ;;  %vm4813_vm7 = vweird.f32 %v13169_v5 }
 0x80c   :  { %v4645_v58 = vpop.f32.mrf.mxu0 }
 0x80d   :  { %v4646_v4 = vadd.f32 %v4645_v58, %v16163_v62  ;;  %v16165_v58 = vld [vmem:[#allocation23_spill] sm:$0xff]  ;;  %v13312_v62 = vpop.eup %7700 }
 0x80e   :  { %v4297_v37 = vadd.f32 %v4296_v38, %v16165_v58  ;;  %v4440_v38 = vand.u32 2147483648, %v13295_v41  ;;  %v4839_v32 = vmul.f32 %v13312_v62, %v13239_v33  ;;  %v4299_v58 = vadd.f32 %v4298_v40, %v16171_v19 }
 0x80f   :  { %7704 = vtanh.f32 %v4646_v4  ;;  %v4826_v4 = vmul.f32 %v13246_v53, %v4825_v49  ;;  %v4849_v49 = vand.u32 2147483648, %v13239_v33  ;;  %v7703_v16 = vpop.eup %7702 }
 0x810   :  { %7706 = vrcp.f32 %v13295_v41  ;;  %v6458_v21 = vmul.f32 -1.442695, %v4297_v37  ;;  %v13357_v48 = vor.u32 1.1754944e-38, %v4440_v38  ;;  %v4840_v36 = vsub.f32 1.0, %v4839_v32 }
 0x811   :  { %7708 = vrcp.f32 %v13309_v57  ;;  %v4301_v28 = vpop.f32.mrf.mxu3  ;;  %v4827_v35 = vadd.f32 %v13246_v53, %v4826_v4  ;;  %v13392_v6 = vor.u32 1.1754944e-38, %v4849_v49  ;;  %v6459_v45 = vmul.f32 -1.442695, %v4299_v58 }
 0x812   :  { %7710 = vrcp.f32 %v13333_v60  ;;  %v13399_v4 = vadd.f32 1.0, %v7703_v16  ;;  %v4731_v32 = vsel %vm13321_vm1, %v13288_v7, %v4726_v8  ;;  %v4455_v16 = vand.u32 2147483648, %v13333_v60 }
 0x813   :  { %7712 = vpow2.f32 %v6458_v21  ;;  %v16182_v58 = vsub.f32 1.0, %v13185_v56  ;;  %v4841_v14 = vmul.f32 %v13312_v62, %v4840_v36  ;;  %vm4844_vm1 = vweird.f32 %v13312_v62  ;;  %v16186_v36 = vld [vmem:[#allocation32_spill] sm:$0xff] }
 0x814   :  { %v4647_v43 = vpop.f32.mrf.mxu0 }
 0x815   :  { %v4648_v13 = vadd.f32 %v4647_v43, %v16174_v50  ;;  %v7705_v63 = vpop.eup %7704  ;;  %v16177_v43 = vld [vmem:[#allocation31_spill] sm:$0xff] }
 0x816   :  { %v4302_v38 = vadd.f32 %v4301_v28, %v16177_v43  ;;  %v13379_v31 = vpop.eup %7706  ;;  %v4776_v28 = vsel %vm4773_vm15, %v13213_v9, %v4771_v23  ;;  %v4891_v52 = vmul.f32 %v7705_v63, %v13302_v44  ;;  %v4786_v9 = vsel %vm13387_vm4, %v13177_v15, %v4782_v12  ;;  %vm13485_vm15 = vmor %vm4843_vm2, %vm4844_vm1 }
 0x817   :  { %7714 = vtanh.f32 %v4648_v13  ;;  %v13396_v21 = vpop.eup %7708  ;;  %v4430_v44 = vmul.f32 %v13379_v31, %v13295_v41  ;;  %v4736_v15 = vmul.f32 %v13152_v61, %v16182_v58  ;;  %v4831_v13 = vsel %vm13413_vm13, %v13246_v53, %v4827_v35 }
 0x818   :  { %v6460_v7 = vmul.f32 -1.442695, %v4302_v38  ;;  %v4887_v3 = vmul.f32 %v4776_v28, %v12609_v1  ;;  %v13428_v63 = vpop.eup %7710  ;;  %v4854_v49 = vmul.f32 %v13396_v21, %v13309_v57  ;;  %7716 = vpow2.f32 %v6459_v45 }
 0x819   :  { %v4791_v56 = vsel %vm4788_vm3, %v13219_v10, %v4786_v9  ;;  %v16183_v12 = vand.u32 2147483647, %v13131_v0  ;;  %v4303_v8 = vpop.f32.mrf.mxu3  ;;  %v7713_v1 = vpop.eup %7712  ;;  %7718 = vrcp.f32 %v13399_v4  ;;  %v13449_v39 = vsel %vm13353_vm5, %v13298_v29, %v4831_v13  ;;  %vm13477_vm5 = vmor %vm4738_vm14, %vm4739_vm11 }
 0x81a   :  { %v13442_v38 = vadd.f32 %v4891_v52, %v4887_v3  ;;  %v4304_v54 = vadd.f32 %v4303_v8, %v16186_v36  ;;  %v4431_v28 = vsub.f32 1.0, %v4430_v44  ;;  %7720 = vpow2.f32 %v6460_v7  ;;  %vm13505_vm11 = vmor %vm4798_vm9, %vm4799_vm10 }
 0x81b   :  { %vm13436_vm8 = vcmp.eq.f32.partialorder %v16183_v12, 8.507059e+37  ;;  %v4737_v45 = vadd.f32 %v13152_v61, %v4736_v15  ;;  %v4842_v9 = vadd.f32 %v13312_v62, %v4841_v14  ;;  %v16187_v52 = vand.u32 2147483647, %v13239_v33  ;;  %vm13543_vm9 = vmor %vm4813_vm7, %vm4814_vm12 }
 0x81c   :  { %v4650_v40 = vpop.f32.mrf.mxu0  ;;  %v4888_v58 = vmul.f32 %v4791_v56, %v12656_v55  ;;  %v4855_v29 = vsub.f32 1.0, %v4854_v49  ;;  %v13463_v37 = vmul.f32 %v13428_v63, %v13333_v60  ;;  %v4797_v44 = vadd.f32 %v13204_v34, %v13283_v27 }
 0x81d   :  { %v4651_v35 = vadd.f32 %v4650_v40, %v15567_v47  ;;  %v7715_v10 = vpop.eup %7714  ;;  %vm13456_vm6 = vcmp.eq.f32.partialorder %v16187_v52, 8.507059e+37  ;;  %v6461_v7 = vmul.f32 -1.442695, %v4304_v54  ;;  %v4862_v15 = vand.u32 2147483647, %v13309_v57 }
 0x81e   :  { %v4892_v3 = vmul.f32 %v7715_v10, %v4731_v32  ;;  %v13468_v13 = vadd.f32 1.0, %v7713_v1  ;;  %v7717_v32 = vpop.eup %7716  ;;  %v13490_v49 = vmul.f32 %v13379_v31, %v4431_v28  ;;  %v4741_v56 = vsel %vm13477_vm5, %v13152_v61, %v4737_v45 }
 0x81f   :  { %7722 = vtanh.f32 %v4651_v35  ;;  %v4802_v40 = vand.u32 2147483647, %v13158_v46  ;;  %v16194_v12 = vsub.f32 1.0, %v13189_v24  ;;  %v13499_v1 = vpop.eup %7718  ;;  %v4846_v61 = vsel %vm13485_vm15, %v13312_v62, %v4842_v9 }
 0x820   :  { %7724 = vtanh.f32 %v13442_v38  ;;  %v13471_v14 = vadd.f32 %v4892_v3, %v4888_v58  ;;  %v4864_v35 = vand.u32 2147483648, %v13309_v57  ;;  %v16197_v24 = vand.u32 2147483648, %v13131_v0  ;;  %v7721_v10 = vpop.eup %7720 }
 0x821   :  { %v4751_v8 = vmul.f32 %v13162_v17, %v16194_v12  ;;  %v4856_v28 = vmul.f32 %v13396_v21, %v4855_v29  ;;  %vm4859_vm4 = vweird.f32 %v13396_v21  ;;  %v4446_v46 = vsub.f32 1.0, %v13463_v37  ;;  %v4306_v9 = vpop.f32.mrf.mxu3 }
 0x822   :  { %7726 = vtanh.f32 %v13471_v14  ;;  %v4745_v54 = vor.u32 1.1754944e-38, %v16197_v24  ;;  %v4801_v45 = vsel %vm13505_vm11, %v13204_v34, %v4797_v44  ;;  %v13523_v58 = vadd.f32 1.0, %v7717_v32 }
 0x823   :  { %7728 = vpow2.f32 %v6461_v7  ;;  %v4812_v3 = vadd.f32 %v13227_v18, %v13315_v20  ;;  %vm4858_vm10 = vweird.f32 %v13309_v57  ;;  %v4869_v29 = vmul.f32 %v13499_v1, %v13399_v4 }
 0x824   :  { %v4652_v62 = vpop.f32.mrf.mxu0  ;;  %7730 = vrcp.f32 %v13468_v13  ;;  %v4746_v0 = vsel %vm13436_vm8, %v4745_v54, %v4741_v56  ;;  %vm4803_vm14 = vcmp.eq.f32.partialorder %v4802_v40, 8.507059e+37  ;;  %v4752_v37 = vadd.f32 %v13162_v17, %v4751_v8 }
 0x825   :  { %v7723_v52 = vpop.eup %7722  ;;  %v4653_v34 = vadd.f32 %v4652_v62, %v15906_v22  ;;  %v13534_v7 = vadd.f32 1.0, %v7721_v10  ;;  %v4806_v55 = vsel %vm4803_vm14, %v13229_v42, %v4801_v45  ;;  %vm4754_vm2 = vweird.f32 %v13162_v17 }
 0x826   :  { %v7725_v44 = vpop.eup %7724  ;;  %v4817_v53 = vand.u32 2147483647, %v13169_v5  ;;  %v4851_v32 = vsel %vm13456_vm6, %v13392_v6, %v4846_v61  ;;  %v4893_v27 = vmul.f32 %v7723_v52, %v4746_v0  ;;  %v4759_v56 = vand.u32 2147483648, %v13138_v25  ;;  %vm13593_vm6 = vmor %vm4858_vm10, %vm4859_vm4 }
 0x827   :  { %7732 = vtanh.f32 %v4653_v34  ;;  %vm4753_vm13 = vweird.f32 %v13138_v25  ;;  %v4757_v40 = vand.u32 2147483647, %v13138_v25  ;;  %v4816_v5 = vsel %vm13543_vm9, %v13227_v18, %v4812_v3 }
 0x828   :  { %v7727_v42 = vpop.eup %7726  ;;  %7734 = vrcp.f32 %v13523_v58  ;;  %v4870_v8 = vsub.f32 1.0, %v4869_v29  ;;  %v4903_v23 = vmul.f32 %v7725_v44, %v13449_v39  ;;  %v4889_v33 = vmul.f32 %v4806_v55, %v12802_v51  ;;  %vm13561_vm3 = vmor %vm4753_vm13, %vm4754_vm2 }
 0x829   :  { %v7729_v12 = vpop.eup %7728  ;;  %v4904_v6 = vmul.f32 %v7727_v42, %v4851_v32  ;;  %v4857_v25 = vadd.f32 %v13396_v21, %v4856_v28  ;;  %7736 = vrcp.f32 %v13534_v7  ;;  %v4756_v18 = vsel %vm13561_vm3, %v13162_v17, %v4752_v37  ;;  %v4308_v45 = vpop.f32.mrf.mxu3  ;;  %v16207_v42 = vld [vmem:[#allocation62_spill] sm:$0xff] }
 0x82a   :  { %v13565_v24 = vpop.eup %7730  ;;  %vm4818_vm1 = vcmp.eq.f32.partialorder %v4817_v53, 8.507059e+37  ;;  %v13572_v54 = vadd.f32 %v4893_v27, %v4889_v33  ;;  %v4760_v51 = vor.u32 1.1754944e-38, %v4759_v56  ;;  %vm13577_vm8 = vcmp.eq.f32.partialorder %v4862_v15, 8.507059e+37 }
 0x82b   :  { %v6849_v39 = vpack.c.bf16 %v4904_v6, %v4903_v23  ;;  %v4821_v10 = vsel %vm4818_vm1, %v13285_v59, %v4816_v5  ;;  %v13581_v28 = vadd.f32 1.0, %v7729_v12  ;;  %vm4758_vm12 = vcmp.eq.f32.partialorder %v4757_v40, 8.507059e+37  ;;  %v16218_v5 = vld [vmem:[#allocation66_spill] sm:$0xff] }
 0x82c   :  { %v4307_v52 = vadd.f32 %v4306_v9, %v15875_v26  ;;  %v4865_v0 = vor.u32 1.1754944e-38, %v4864_v35  ;;  %v4871_v3 = vmul.f32 %v13499_v1, %v4870_v8  ;;  %v4761_v29 = vsel %vm4758_vm12, %v4760_v51, %v4756_v18  ;;  %v16212_v18 = vld [vmem:[#allocation35_spill] sm:$0xff]  ;;  %v16293_v26 = vld [vmem:[#allocation28_spill] sm:$0xff] }
 0x82d   :  { %v7733_v17 = vpop.eup %7732  ;;  %6850 = vst [vmem:[#allocation3] sm:$0xff] %v6849_v39   ;;  %v4309_v59 = vadd.f32 %v4308_v45, %v15701_v11  ;;  %vm4435_vm7 = vweird.f32 %v13379_v31  ;;  %v13598_v35 = vmul.f32 %v13428_v63, %v4446_v46  ;;  %v4877_v9 = vand.u32 2147483647, %v13399_v4 }
 0x82e   :  { %v13586_v34 = vpop.eup %7734  ;;  %6927 = vst [vmem:[#allocation2 + $0x8] sm:$0xff] %v6849_v39   ;;  %v4890_v37 = vmul.f32 %v4821_v10, %v12825_v30  ;;  %v4894_v44 = vmul.f32 %v7733_v17, %v4761_v29  ;;  %v4861_v55 = vsel %vm13593_vm6, %v13396_v21, %v4857_v25  ;;  %v4879_v53 = vand.u32 2147483648, %v13399_v4  ;;  %v16213_v17 = vld [vmem:[#allocation51_spill] sm:$0xff] }
 0x82f   :  { %v4470_v57 = vand.u32 2147483648, %v13468_v13  ;;  %7738 = vtanh.f32 %v13572_v54  ;;  %v13608_v20 = vpop.eup %7736  ;;  %vm4434_vm5 = vweird.f32 %v13295_v41  ;;  %v4460_v46 = vmul.f32 %v13565_v24, %v13468_v13 }
 0x830   :  { %7740 = vrcp.f32 %v13581_v28  ;;  %v13614_v30 = vadd.f32 %v4894_v44, %v4890_v37  ;;  %v6462_v32 = vmul.f32 -1.442695, %v4307_v52  ;;  %v4872_v21 = vadd.f32 %v13499_v1, %v4871_v3  ;;  %vm13672_vm3 = vmor %vm4434_vm5, %vm4435_vm7 }
 0x831   :  { %vm4874_vm15 = vweird.f32 %v13499_v1  ;;  %v6463_v27 = vmul.f32 -1.442695, %v4309_v59  ;;  %v16206_v56 = vsub.f32 1.0, %v13201_v2  ;;  %vm4873_vm11 = vweird.f32 %v13399_v4  ;;  %v4311_v33 = vpop.f32.mrf.mxu3 }
 0x832   :  { %vm13622_vm4 = vcmp.eq.f32.partialorder %v4877_v9, 8.507059e+37  ;;  %v4475_v12 = vmul.f32 %v13586_v34, %v13523_v58  ;;  %7742 = vtanh.f32 %v13614_v30  ;;  %v4866_v8 = vsel %vm13577_vm8, %v4865_v0, %v4861_v55  ;;  %vm13635_vm10 = vmor %vm4873_vm11, %vm4874_vm15 }
 0x833   :  { %v4372_v40 = vmul.f32 %v16207_v42, %v16206_v56  ;;  %v4880_v23 = vor.u32 1.1754944e-38, %v4879_v53  ;;  %v13631_v6 = vor.u32 1.1754944e-38, %v4470_v57  ;;  %v4490_v2 = vmul.f32 %v13608_v20, %v13534_v7 }
 0x834   :  { %v4461_v61 = vsub.f32 1.0, %v4460_v46  ;;  %v4485_v25 = vand.u32 2147483648, %v13523_v58  ;;  %7744 = vpow2.f32 %v6462_v32  ;;  %v4312_v39 = vadd.f32 %v4311_v33, %v16212_v18 }
 0x835   :  { %v7739_v51 = vpop.eup %7738  ;;  %v4876_v10 = vsel %vm13635_vm10, %v13499_v1, %v4872_v21  ;;  %7746 = vpow2.f32 %v6463_v27  ;;  %v4373_v45 = vadd.f32 %v16207_v42, %v4372_v40  ;;  %vm4375_vm14 = vweird.f32 %v16207_v42 }
 0x836   :  { %v13646_v62 = vpop.eup %7740  ;;  %vm4449_vm2 = vweird.f32 %v13333_v60  ;;  %v4476_v52 = vsub.f32 1.0, %v4475_v12  ;;  %v4380_v0 = vand.u32 2147483648, %v16213_v17  ;;  %v4433_v3 = vadd.f32 %v13379_v31, %v13490_v49 }
 0x837   :  { %7748 = vtanh.f32 %v4312_v39  ;;  %v4491_v29 = vsub.f32 1.0, %v4490_v2  ;;  %v4500_v59 = vand.u32 2147483648, %v13534_v7  ;;  %vm4374_vm9 = vweird.f32 %v16213_v17 }
 0x838   :  { %v4378_v1 = vand.u32 2147483647, %v16213_v17  ;;  %v7743_v15 = vpop.eup %7742  ;;  %v4881_v9 = vsel %vm13622_vm4, %v4880_v23, %v4876_v10  ;;  %v13658_v37 = vmul.f32 %v13565_v24, %v4461_v61  ;;  %v4498_v44 = vand.u32 2147483647, %v13534_v7  ;;  %vm13663_vm13 = vmor %vm4374_vm9, %vm4375_vm14  ;;  %v16221_v17 = vld [vmem:[#allocation36_spill] sm:$0xff] }
 0x839   :  { %v4438_v55 = vand.u32 2147483647, %v13295_v41  ;;  %v4905_v57 = vmul.f32 %v7739_v51, %v4866_v8  ;;  %v4505_v46 = vmul.f32 %v13646_v62, %v13581_v28  ;;  %v4906_v32 = vmul.f32 %v7743_v15, %v4881_v9  ;;  %v16220_v8 = vld [vmem:[#allocation42_spill] sm:$0xff]  ;;  %v4313_v61 = vpop.f32.mrf.mxu3 }
 0x83a   :  { %v4377_v21 = vsel %vm13663_vm13, %v16207_v42, %v4373_v45  ;;  %v7745_v27 = vpop.eup %7744  ;;  %v13682_v56 = vmul.f32 %v13586_v34, %v4476_v52  ;;  %v4381_v40 = vor.u32 1.1754944e-38, %v4380_v0  ;;  %v4437_v41 = vsel %vm13672_vm3, %v13379_v31, %v4433_v3 }
 0x83b   :  { %v16219_v12 = vsub.f32 1.0, %v16218_v5  ;;  %v7747_v2 = vpop.eup %7746  ;;  %v4492_v33 = vmul.f32 %v13608_v20, %v4491_v29  ;;  %vm4494_vm1 = vweird.f32 %v13534_v7  ;;  %v13692_v4 = vor.u32 1.1754944e-38, %v4500_v59 }
 0x83c   :  { %v6854_v42 = vpack.c.bf16 %v4906_v32, %v4905_v57  ;;  %vm4379_vm8 = vcmp.eq.f32.partialorder %v4378_v1, 8.507059e+37  ;;  %vm4439_vm12 = vcmp.eq.f32.partialorder %v4438_v55, 8.507059e+37  ;;  %v4448_v31 = vadd.f32 %v13428_v63, %v13598_v35  ;;  %v16222_v1 = vld [vmem:[#allocation58_spill] sm:$0xff] }
 0x83d   :  { %v4387_v23 = vmul.f32 %v16220_v8, %v16219_v12  ;;  %v7749_v39 = vpop.eup %7748  ;;  %v4382_v51 = vsel %vm4379_vm8, %v4381_v40, %v4377_v21  ;;  %vm4450_vm7 = vweird.f32 %v13428_v63  ;;  %vm4465_vm6 = vweird.f32 %v13565_v24 }
 0x83e   :  { %v4506_v10 = vsub.f32 1.0, %v4505_v46  ;;  %6924 = vst [vmem:[#allocation3 + $0x8] sm:$0xff] %v6854_v42   ;;  %v13698_v45 = vadd.f32 1.0, %v7745_v27  ;;  %v4442_v52 = vsel %vm4439_vm12, %v13357_v48, %v4437_v41  ;;  %v4314_v0 = vadd.f32 %v4313_v61, %v16221_v17  ;;  %vm13714_vm4 = vmor %vm4449_vm2, %vm4450_vm7  ;;  %v16227_v46 = vld [vmem:[#allocation70_spill] sm:$0xff] }
 0x83f   :  { %6928 = vst [vmem:[#allocation2 + $0x10] sm:$0xff] %v6854_v42   ;;  %v13702_v3 = vadd.f32 1.0, %v7747_v2  ;;  %v4388_v29 = vadd.f32 %v16220_v8, %v4387_v23  ;;  %vm4390_vm5 = vweird.f32 %v16220_v8  ;;  %v4453_v35 = vand.u32 2147483647, %v13333_v60  ;;  %v16231_v23 = vld [vmem:[#allocation46_spill] sm:$0xff] }
 0x840   :  { %vm4464_vm15 = vweird.f32 %v13468_v13  ;;  %vm4495_vm11 = vweird.f32 %v13608_v20  ;;  %v4557_v59 = vmul.f32 %v7749_v39, %v4382_v51  ;;  %v4395_v15 = vand.u32 2147483648, %v16222_v1 }
 0x841   :  { %7750 = vtanh.f32 %v4314_v0  ;;  %v4493_v9 = vadd.f32 %v13608_v20, %v4492_v33  ;;  %vm13719_vm10 = vcmp.eq.f32.partialorder %v4498_v44, 8.507059e+37  ;;  %vm4389_vm14 = vweird.f32 %v16222_v1  ;;  %v4316_v12 = vpop.f32.mrf.mxu3  ;;  %v16233_v33 = vld [vmem:[#allocation21_spill] sm:$0xff]  ;;  %vm13753_vm13 = vmor %vm4494_vm1, %vm4495_vm11 }
 0x842   :  { %v4393_v55 = vand.u32 2147483647, %v16222_v1  ;;  %v4452_v53 = vsel %vm13714_vm4, %v13428_v63, %v4448_v31  ;;  %v4507_v57 = vmul.f32 %v13646_v62, %v4506_v10  ;;  %7752 = vrcp.f32 %v13698_v45  ;;  %vm13733_vm2 = vmor %vm4389_vm14, %vm4390_vm5 }
 0x843   :  { %v4553_v32 = vmul.f32 %v4442_v52, %v16227_v46  ;;  %v4456_v21 = vor.u32 1.1754944e-38, %v4455_v16  ;;  %v4513_v27 = vand.u32 2147483647, %v13581_v28  ;;  %7754 = vrcp.f32 %v13702_v3  ;;  %v16237_v52 = vld [vmem:[#allocation67_spill] sm:$0xff]  ;;  %vm13784_vm11 = vmor %vm4464_vm15, %vm4465_vm6 }
 0x844   :  { %v4392_v63 = vsel %vm13733_vm2, %v16220_v8, %v4388_v29  ;;  %vm4454_vm9 = vcmp.eq.f32.partialorder %v4453_v35, 8.507059e+37  ;;  %v4396_v41 = vor.u32 1.1754944e-38, %v4395_v15  ;;  %v16232_v2 = vsub.f32 1.0, %v16231_v23  ;;  %v16236_v8 = vld [vmem:[#allocation34_spill] sm:$0xff] }
 0x845   :  { %v13744_v40 = vadd.f32 %v4557_v59, %v4553_v32  ;;  %v4457_v5 = vsel %vm4454_vm9, %v4456_v21, %v4452_v53  ;;  %vm4509_vm3 = vweird.f32 %v13581_v28  ;;  %v4515_v16 = vand.u32 2147483648, %v13581_v28  ;;  %v6670_v21 = vld [vmem:[#allocation2 + $0x8] sm:$0xff] }
 0x846   :  { %v4402_v42 = vmul.f32 %v16233_v33, %v16232_v2  ;;  %vm4394_vm8 = vcmp.eq.f32.partialorder %v4393_v55, 8.507059e+37  ;;  %v4317_v61 = vadd.f32 %v4316_v12, %v16236_v8  ;;  %vm4479_vm12 = vweird.f32 %v13523_v58  ;;  %v6671_v10 = vld [vmem:[#allocation2 + $0x10] sm:$0xff] }
 0x847   :  { %16230 = vst [vmem:[#allocation56_spill] sm:$0xff] %v13744_v40  ;;  %v7751_v39 = vpop.eup %7750  ;;  %v4497_v51 = vsel %vm13753_vm13, %v13608_v20, %v4493_v9  ;;  %v4508_v7 = vadd.f32 %v13646_v62, %v4507_v57  ;;  %vm4510_vm1 = vweird.f32 %v13646_v62  ;;  %v4397_v31 = vsel %vm4394_vm8, %v4396_v41, %v4392_v63  ;;  %5294 = vmatpush.bf16.msrb.mxu1 %v6671_v10  ;;  %v16243_v9 = vld [vmem:[#allocation49_spill] sm:$0xff]  ;;  %v16252_v10 = vld [vmem:[#allocation48_spill] sm:$0xff] }
 0x848   :  { %v4554_v0 = vmul.f32 %v4457_v5, %v16237_v52  ;;  %v4558_v29 = vmul.f32 %v7751_v39, %v4397_v31  ;;  %v4463_v35 = vadd.f32 %v13565_v24, %v13658_v37  ;;  %7756 = vtanh.f32 %v4317_v61  ;;  %v13769_v59 = vpop.eup %7752  ;;  %vm13800_vm6 = vmor %vm4509_vm3, %vm4510_vm1  ;;  %v16248_v41 = vld [vmem:[#allocation69_spill] sm:$0xff] }
 0x849   :  { %vm13771_vm7 = vcmp.eq.f32.partialorder %v4513_v27, 8.507059e+37  ;;  %7758 = vtanh.f32 %v13744_v40  ;;  %v4403_v20 = vadd.f32 %v16233_v33, %v4402_v42  ;;  %vm4405_vm5 = vweird.f32 %v16233_v33  ;;  %v13778_v15 = vpop.eup %7754  ;;  %v16246_v27 = vld [vmem:[#allocation45_spill] sm:$0xff]  ;;  %v4318_v23 = vpop.f32.mrf.mxu3  ;;  %v6669_v42 = vld [vmem:[#allocation2] sm:$0xff] }
 0x84a   :  { %v13788_v48 = vadd.f32 %v4558_v29, %v4554_v0  ;;  %v4408_v55 = vand.u32 2147483647, %v16243_v9  ;;  %v4410_v53 = vand.u32 2147483648, %v16243_v9  ;;  %v4468_v57 = vand.u32 2147483647, %v13468_v13 }
 0x84b   :  { %v4502_v46 = vsel %vm13719_vm10, %v13692_v4, %v4497_v51  ;;  %v4516_v44 = vor.u32 1.1754944e-38, %v4515_v16  ;;  %vm4404_vm15 = vweird.f32 %v16243_v9  ;;  %v16247_v63 = vsub.f32 1.0, %v16246_v27  ;;  %5295 = vmatpush.bf16.msrb.mxu1 %v6670_v21  ;;  %v16255_v9 = vld [vmem:[#allocation47_spill] sm:$0xff] }
 0x84c   :  { %16242 = vst [vmem:[#allocation61_spill] sm:$0xff] %v13788_v48  ;;  %v4512_v4 = vsel %vm13800_vm6, %v13646_v62, %v4508_v7  ;;  %v4520_v49 = vmul.f32 %v13769_v59, %v13698_v45  ;;  %7760 = vtanh.f32 %v13788_v48  ;;  %vm13816_vm4 = vmor %vm4404_vm15, %vm4405_vm5  ;;  %v4467_v5 = vsel %vm13784_vm11, %v13565_v24, %v4463_v35  ;;  %v16251_v24 = vld [vmem:[#allocation39_spill] sm:$0xff] }
 0x84d   :  { %v4417_v13 = vmul.f32 %v16248_v41, %v16247_v63  ;;  %v4535_v12 = vmul.f32 %v13778_v15, %v13702_v3  ;;  %v4407_v62 = vsel %vm13816_vm4, %v16233_v33, %v4403_v20  ;;  %v4478_v2 = vadd.f32 %v13586_v34, %v13682_v56  ;;  %v8040_v63 = vld [vmem:[%s15074_s1] sm:$0xff] }
 0x84e   :  { %vm4480_vm10 = vweird.f32 %v13586_v34  ;;  %v7757_v60 = vpop.eup %7756  ;;  %vm4409_vm14 = vcmp.eq.f32.partialorder %v4408_v55, 8.507059e+37  ;;  %v4411_v16 = vor.u32 1.1754944e-38, %v4410_v53  ;;  %vm4469_vm2 = vcmp.eq.f32.partialorder %v4468_v57, 8.507059e+37  ;;  %v8048_v53 = vld [vmem:[%s15074_s1 + $0x28] sm:$0xff] }
 0x84f   :  { %v4319_v61 = vadd.f32 %v4318_v23, %v16251_v24  ;;  %v7759_v39 = vpop.eup %7758  ;;  %v4472_v51 = vsel %vm4469_vm2, %v13631_v6, %v4467_v5  ;;  %v4418_v7 = vadd.f32 %v16248_v41, %v4417_v13  ;;  %vm4420_vm9 = vweird.f32 %v16248_v41  ;;  %vm13843_vm13 = vmor %vm4479_vm12, %vm4480_vm10  ;;  %5296 = vmatpush.bf16.msrb.mxu1 %v6669_v42 }
 0x850   :  { %v4483_v33 = vand.u32 2147483647, %v13523_v58  ;;  %v4517_v56 = vsel %vm13771_vm7, %v4516_v44, %v4512_v4  ;;  %v4412_v31 = vsel %vm4409_vm14, %v4411_v16, %v4407_v62  ;;  %v4425_v52 = vand.u32 2147483648, %v16252_v10 }
 0x851   :  { %7762 = vtanh.f32 %v4319_v61  ;;  %v4559_v6 = vmul.f32 %v7757_v60, %v4412_v31  ;;  %vm4419_vm3 = vweird.f32 %v16252_v10  ;;  %v4423_v29 = vand.u32 2147483647, %v16252_v10 }
 0x852   :  { %v4482_v35 = vsel %vm13843_vm13, %v13586_v34, %v4478_v2  ;;  %v7761_v1 = vpop.eup %7760  ;;  %v4521_v20 = vsub.f32 1.0, %v4520_v49  ;;  %v4536_v37 = vsub.f32 1.0, %v4535_v12  ;;  %v4555_v55 = vmul.f32 %v4472_v51, %v16255_v9  ;;  %vm13855_vm8 = vmor %vm4419_vm3, %vm4420_vm9  ;;  %6548 = vmatmul.msk.bf16.vlgmr.msrb.gmra.mxu1 %vm422_vm0, %v8040_v63  ;;  %v8046_v9 = vld [vmem:[%s15074_s1 + $0x20] sm:$0xff] }
 0x853   :  { %v4486_v57 = vor.u32 1.1754944e-38, %v4485_v25  ;;  %v4569_v32 = vmul.f32 %v7759_v39, %v4502_v46  ;;  %v4570_v44 = vmul.f32 %v7761_v1, %v4517_v56  ;;  %v4422_v34 = vsel %vm13855_vm8, %v16248_v41, %v4418_v7  ;;  %v16259_v41 = vld [vmem:[#allocation53_spill] sm:$0xff]  ;;  %v8043_v1 = vld [vmem:[%s15079_s3] sm:$0xff] }
 0x854   :  { %vm4484_vm12 = vcmp.eq.f32.partialorder %v4483_v33, 8.507059e+37  ;;  %v4426_v21 = vor.u32 1.1754944e-38, %v4425_v52  ;;  %v13868_v4 = vadd.f32 %v4559_v6, %v4555_v55  ;;  %vm4424_vm1 = vcmp.eq.f32.partialorder %v4423_v29, 8.507059e+37  ;;  %v8042_v6 = vld [vmem:[%s15074_s1 + $0x10] sm:$0xff]  ;;  %v6666_v29 = vld [vmem:[#allocation3 + $0x8] sm:$0xff] }
 0x855   :  { %v4487_v27 = vsel %vm4484_vm12, %v4486_v57, %v4482_v35  ;;  %v6859_v13 = vpack.c.bf16 %v4570_v44, %v4569_v32  ;;  %v4522_v25 = vmul.f32 %v13769_v59, %v4521_v20  ;;  %v4537_v46 = vmul.f32 %v13778_v15, %v4536_v37  ;;  %v6665_v35 = vld [vmem:[#allocation3] sm:$0xff]  ;;  %v8045_v37 = vld [vmem:[%s15079_s3 + $0x8] sm:$0xff]  ;;  %v8047_v55 = vld [vmem:[%s15079_s3 + $0x10] sm:$0xff] }
 0x856   :  { %16258 = vst [vmem:[#allocation63_spill] sm:$0xff] %v13868_v4  ;;  %v4427_v49 = vsel %vm4424_vm1, %v4426_v21, %v4422_v34  ;;  %v4556_v28 = vmul.f32 %v4487_v27, %v16259_v41  ;;  %vm4525_vm7 = vweird.f32 %v13769_v59  ;;  %7764 = vtanh.f32 %v13868_v4  ;;  %v8044_v20 = vld [vmem:[%s15074_s1 + $0x18] sm:$0xff]  ;;  %v8050_v32 = vld [vmem:[%s15074_s1 + $0x30] sm:$0xff]  ;;  %v8051_v44 = vld [vmem:[%s15079_s3 + $0x20] sm:$0xff] }
 0x857   :  { %v7763_v58 = vpop.eup %7762  ;;  %6925 = vst [vmem:[#allocation3 + $0x10] sm:$0xff] %v6859_v13   ;;  %v4523_v62 = vadd.f32 %v13769_v59, %v4522_v25  ;;  %v4538_v23 = vadd.f32 %v13778_v15, %v4537_v46  ;;  %vm4540_vm5 = vweird.f32 %v13778_v15  ;;  %vm4524_vm11 = vweird.f32 %v13698_v45  ;;  %v8049_v57 = vld [vmem:[%s15079_s3 + $0x18] sm:$0xff]  ;;  %v8053_v21 = vld [vmem:[%s15079_s3 + $0x28] sm:$0xff]  ;;  %v8054_v13 = vld [vmem:[%s15079_s3 + $0x30] sm:$0xff] }
 0x858   :  { %v4560_v5 = vmul.f32 %v7763_v58, %v4427_v49  ;;  %v4530_v2 = vand.u32 2147483648, %v13698_v45  ;;  %v4545_v42 = vand.u32 2147483648, %v13702_v3  ;;  %vm4526_vm6 = vmor %vm4524_vm11, %vm4525_vm7  ;;  %v4528_v60 = vand.u32 2147483647, %v13698_v45  ;;  %v8052_v34 = vld [vmem:[%s15074_s1 + $0x38] sm:$0xff] }
 0x859   :  { %vm4539_vm15 = vweird.f32 %v13702_v3  ;;  %v4543_v16 = vand.u32 2147483647, %v13702_v3  ;;  %v4527_v61 = vsel %vm4526_vm6, %v13769_v59, %v4523_v62  ;;  %v8041_v3 = vld [vmem:[%s15074_s1 + $0x8] sm:$0xff]  ;;  %vm16261_vm2 = vcmask 523264   ;;  %v8055_v46 = vld [vmem:[%s15079_s3 + $0x38] sm:$0xff]  ;;  %v16270_v62 = vld [vmem:[#allocation10_spill] sm:$0xff] }
 0x85a   :  { %v13875_v12 = vadd.f32 %v4560_v5, %v4556_v28  ;;  %vm4541_vm4 = vmor %vm4539_vm15, %vm4540_vm5  ;;  %v4531_v7 = vor.u32 1.1754944e-38, %v4530_v2  ;;  %v4546_v33 = vor.u32 1.1754944e-38, %v4545_v42  ;;  %vm4529_vm10 = vcmp.eq.f32.partialorder %v4528_v60, 8.507059e+37  ;;  %v16269_v28 = vld [vmem:[#allocation7_spill] sm:$0xff]  ;;  %v16271_v60 = vld [vmem:[#allocation5_spill] sm:$0xff] }
 0x85b   :  { %v4542_v39 = vsel %vm4541_vm4, %v13778_v15, %v4538_v23  ;;  %vm4544_vm14 = vcmp.eq.f32.partialorder %v4543_v16, 8.507059e+37  ;;  %vm16262_vm9 = vmmov %vm16261_vm2 }
 0x85c   :  { %16260 = vst [vmem:[#allocation54_spill] sm:$0xff] %v13875_v12  ;;  %7766 = vtanh.f32 %v13875_v12  ;;  %v7765_v51 = vpop.eup %7764  ;;  %v4532_v31 = vsel %vm4529_vm10, %v4531_v7, %v4527_v61  ;;  %v4547_v10 = vsel %vm4544_vm14, %v4546_v33, %v4542_v39  ;;  %vm16263_vm13 = vmmov %vm16261_vm2  ;;  %v16272_v39 = vld [vmem:[#allocation11_spill] sm:$0xff] }
 0x85d   :  { %v4571_v52 = vmul.f32 %v7765_v51, %v4532_v31  ;;  %vm16264_vm3 = vmmov %vm16261_vm2 }
 0x85e   :  { %v6667_v15 = vld [vmem:[#allocation3 + $0x10] sm:$0xff]  ;;  %vm16265_vm8 = vmmov %vm16261_vm2 }
 0x85f   :  { %vm16266_vm12 = vmmov %vm16261_vm2 }
 0x860   :  { %vm16267_vm1 = vmmov %vm16261_vm2 }
 0x862   :  { %v7767_v56 = vpop.eup %7766  ;;  %6549 = vmatmul.msk.bf16.gmra.mxu1 %vm422_vm0, %v8041_v3 }
 0x863   :  { %v4572_v0 = vmul.f32 %v7767_v56, %v4547_v10  ;;  %v16273_v56 = vld [vmem:[#allocation8_spill] sm:$0xff] }
 0x865   :  { %v6864_v45 = vpack.c.bf16 %v4572_v0, %v4571_v52  ;;  %v16274_v52 = vld [vmem:[#allocation12_spill] sm:$0xff] }
 0x867   :  { %6926 = vst [vmem:[#allocation3 + $0x18] sm:$0xff] %v6864_v45  }
 0x86e   :  { %v6668_v59 = vld [vmem:[#allocation3 + $0x18] sm:$0xff] }
 0x86f   :  { %4959 = vmatpush.bf16.msrb.mxu2 %v6668_v59 }
 0x872   :  { %6550 = vmatmul.msk.bf16.gmra.mxu1 %vm422_vm0, %v8042_v6 }
 0x873   :  { %4960 = vmatpush.bf16.msrb.mxu2 %v6667_v15 }
 0x877   :  { %4961 = vmatpush.bf16.msrb.mxu2 %v6666_v29  ;;  %v16275_v29 = vld [vmem:[#allocation6_spill] sm:$0xff] }
 0x87b   :  { %4962 = vmatpush.bf16.msrb.mxu2 %v6665_v35 }
 0x87e   :  { %6514 = vmatmul.msk.bf16.vlgmr.msrb.gmra.mxu2 %vm16261_vm2, %v8043_v1 }
 0x882   :  { %6551 = vmatmul.msk.bf16.gmra.mxu1 %vm422_vm0, %v8044_v20 }
 0x88e   :  { %6515 = vmatmul.msk.bf16.gmra.mxu2 %vm16262_vm9, %v8045_v37 }
 0x892   :  { %6552 = vmatmul.msk.bf16.gmra.mxu1 %vm422_vm0, %v8046_v9 }
 0x89e   :  { %6516 = vmatmul.msk.bf16.gmra.mxu2 %vm16263_vm13, %v8047_v55 }
 0x8a2   :  { %6553 = vmatmul.msk.bf16.gmra.mxu1 %vm422_vm0, %v8048_v53  ;;  %v16276_v53 = vld [vmem:[#allocation24_spill] sm:$0xff] }
 0x8ae   :  { %6517 = vmatmul.msk.bf16.gmra.mxu2 %vm16264_vm3, %v8049_v57 }
 0x8b2   :  { %6554 = vmatmul.msk.bf16.gmra.mxu1 %vm422_vm0, %v8050_v32 }
 0x8be   :  { %6518 = vmatmul.msk.bf16.gmra.mxu2 %vm16265_vm8, %v8051_v44 }
 0x8c2   :  { %6555 = vmatmul.msk.bf16.gmra.mxu1 %vm422_vm0, %v8052_v34  ;;  %vm16268_vm0 = vmmov %vm16267_vm1 }
 0x8ce   :  { %6519 = vmatmul.msk.bf16.gmra.mxu2 %vm16266_vm12, %v8053_v21  ;;  %v16277_v21 = vld [vmem:[#allocation9_spill] sm:$0xff] }
 0x8cf   :  { %v5298_v27 = vpop.f32.mrf.mxu1 }
 0x8d0   :  { %v5299_v5 = vadd.f32 %v5298_v27, %v16269_v28 }
 0x8d2   :  { %v6556_v61 = vmul.f32 -1.442695, %v5299_v5 }
 0x8d4   :  { %7768 = vpow2.f32 %v6556_v61 }
 0x8d7   :  { %v5300_v63 = vpop.f32.mrf.mxu1 }
 0x8d8   :  { %v5301_v23 = vadd.f32 %v5300_v63, %v16270_v62 }
 0x8da   :  { %v6557_v7 = vmul.f32 -1.442695, %v5301_v23  ;;  %v7769_v6 = vpop.eup %7768 }
 0x8db   :  { %v13956_v37 = vadd.f32 1.0, %v7769_v6 }
 0x8dc   :  { %7770 = vpow2.f32 %v6557_v7 }
 0x8dd   :  { %vm5391_vm5 = vweird.f32 %v13956_v37 }
 0x8de   :  { %6520 = vmatmul.msk.bf16.gmra.mxu2 %vm16267_vm1, %v8054_v13  ;;  %v16278_v13 = vld [vmem:[#allocation14_spill] sm:$0xff] }
 0x8df   :  { %v5303_v58 = vpop.f32.mrf.mxu1 }
 0x8e0   :  { %v5304_v16 = vadd.f32 %v5303_v58, %v16271_v60 }
 0x8e2   :  { %v6558_v33 = vmul.f32 -1.442695, %v5304_v16  ;;  %v7771_v1 = vpop.eup %7770  ;;  %v16279_v16 = vld [vmem:[#allocation15_spill] sm:$0xff] }
 0x8e3   :  { %v13959_v34 = vadd.f32 1.0, %v7771_v1 }
 0x8e4   :  { %7772 = vpow2.f32 %v6558_v33 }
 0x8e5   :  { %vm5406_vm4 = vweird.f32 %v13959_v34  ;;  %v5410_v8 = vand.u32 2147483647, %v13959_v34 }
 0x8e7   :  { %v5305_v25 = vpop.f32.mrf.mxu1  ;;  %vm14148_vm8 = vcmp.eq.f32.partialorder %v5410_v8, 8.507059e+37 }
 0x8e8   :  { %v5306_v31 = vadd.f32 %v5305_v25, %v16273_v56  ;;  %v16280_v56 = vld [vmem:[#allocation25_spill] sm:$0xff] }
 0x8ea   :  { %v6559_v59 = vmul.f32 -1.442695, %v5306_v31  ;;  %v7773_v20 = vpop.eup %7772 }
 0x8eb   :  { %v13962_v63 = vadd.f32 1.0, %v7773_v20 }
 0x8ee   :  { %6521 = vmatmul.msk.bf16.gmra.mxu2 %vm16268_vm0, %v8055_v46 }
 0x8ef   :  { %v5308_v49 = vpop.f32.mrf.mxu1 }
 0x8f0   :  { %v5309_v51 = vadd.f32 %v5308_v49, %v16272_v39 }
 0x8f2   :  { %v6560_v10 = vmul.f32 -1.442695, %v5309_v51 }
 0x8f4   :  { %7774 = vpow2.f32 %v6560_v10 }
 0x8f5   :  { %7776 = vpow2.f32 %v6559_v59 }
 0x8f7   :  { %v5310_v41 = vpop.f32.mrf.mxu1 }
 0x8f8   :  { %v5311_v0 = vadd.f32 %v5310_v41, %v16274_v52 }
 0x8fa   :  { %v6561_v15 = vmul.f32 -1.442695, %v5311_v0  ;;  %v7775_v9 = vpop.eup %7774 }
 0x8fb   :  { %v13966_v25 = vadd.f32 1.0, %v7775_v9  ;;  %v7777_v46 = vpop.eup %7776 }
 0x8fc   :  { %7778 = vpow2.f32 %v6561_v15  ;;  %v13970_v62 = vadd.f32 1.0, %v7777_v46 }
 0x8fd   :  { %7780 = vrcp.f32 %v13956_v37  ;;  %vm5451_vm11 = vweird.f32 %v13966_v25 }
 0x8ff   :  { %v5313_v2 = vpop.f32.mrf.mxu1 }
 0x900   :  { %v5314_v35 = vadd.f32 %v5313_v2, %v16275_v29 }
 0x901   :  { %v4964_v42 = vpop.f32.mrf.mxu2 }
 0x902   :  { %v6562_v55 = vmul.f32 -1.442695, %v5314_v35  ;;  %v4965_v57 = vadd.f32 %v4964_v42, %v16276_v53  ;;  %v7779_v41 = vpop.eup %7778 }
 0x903   :  { %v13973_v23 = vadd.f32 1.0, %v7779_v41  ;;  %v13975_v60 = vpop.eup %7780  ;;  %v16283_v41 = vld [vmem:[#allocation13_spill] sm:$0xff] }
 0x904   :  { %7782 = vpow2.f32 %v6562_v55  ;;  %v6522_v49 = vmul.f32 -1.442695, %v4965_v57  ;;  %v16282_v55 = vld [vmem:[#allocation26_spill] sm:$0xff]  ;;  %vm5392_vm6 = vweird.f32 %v13975_v60 }
 0x905   :  { %7784 = vrcp.f32 %v13959_v34  ;;  %vm14093_vm14 = vmor %vm5391_vm5, %vm5392_vm6  ;;  %vm5466_vm2 = vweird.f32 %v13973_v23 }
 0x906   :  { %7786 = vrcp.f32 %v13962_v63 }
 0x907   :  { %v5315_v45 = vpop.f32.mrf.mxu1  ;;  %7788 = vrcp.f32 %v13966_v25 }
 0x908   :  { %v5316_v27 = vadd.f32 %v5315_v45, %v16277_v21  ;;  %7790 = vpow2.f32 %v6522_v49 }
 0x909   :  { %v4966_v3 = vpop.f32.mrf.mxu2 }
 0x90a   :  { %v6563_v28 = vmul.f32 -1.442695, %v5316_v27  ;;  %v7783_v39 = vpop.eup %7782  ;;  %v4967_v31 = vadd.f32 %v4966_v3, %v16280_v56  ;;  %v5387_v3 = vmul.f32 %v13975_v60, %v13956_v37 }
 0x90b   :  { %v13978_v51 = vpop.eup %7784  ;;  %v13987_v52 = vadd.f32 1.0, %v7783_v39 }
 0x90c   :  { %7792 = vpow2.f32 %v6563_v28  ;;  %v13981_v33 = vpop.eup %7786  ;;  %v6523_v15 = vmul.f32 -1.442695, %v4967_v31  ;;  %v16285_v31 = vld [vmem:[#allocation16_spill] sm:$0xff]  ;;  %vm5407_vm9 = vweird.f32 %v13978_v51 }
 0x90d   :  { %v13985_v10 = vpop.eup %7788  ;;  %vm14160_vm12 = vmor %vm5406_vm4, %vm5407_vm9 }
 0x90e   :  { %v7791_v0 = vpop.eup %7790  ;;  %v5447_v21 = vmul.f32 %v13985_v10, %v13966_v25  ;;  %vm5452_vm7 = vweird.f32 %v13985_v10 }
 0x90f   :  { %v5318_v32 = vpop.f32.mrf.mxu1  ;;  %v13994_v1 = vadd.f32 1.0, %v7791_v0  ;;  %v5487_v0 = vand.u32 2147483648, %v13987_v52  ;;  %vm14138_vm3 = vmor %vm5451_vm11, %vm5452_vm7  ;;  %vm5422_vm7 = vweird.f32 %v13981_v33  ;;  %vm5481_vm11 = vweird.f32 %v13987_v52 }
 0x910   :  { %v5319_v58 = vadd.f32 %v5318_v32, %v16278_v13  ;;  %v14005_v32 = vmul.f32 %v13978_v51, %v13959_v34  ;;  %v14013_v13 = vmul.f32 %v13981_v33, %v13962_v63  ;;  %v5448_v39 = vsub.f32 1.0, %v5447_v21 }
 0x911   :  { %v4969_v44 = vpop.f32.mrf.mxu2  ;;  %16281 = vst [vmem:[#allocation43_spill] sm:$0xff] %v13994_v1 }
 0x912   :  { %v6564_v5 = vmul.f32 -1.442695, %v5319_v58  ;;  %v7793_v45 = vpop.eup %7792  ;;  %v4970_v57 = vadd.f32 %v4969_v44, %v16282_v55  ;;  %v5457_v44 = vand.u32 2147483648, %v13966_v25 }
 0x913   :  { %v14000_v9 = vadd.f32 1.0, %v7793_v45 }
 0x914   :  { %7794 = vpow2.f32 %v6564_v5  ;;  %v5388_v5 = vsub.f32 1.0, %v5387_v3 }
 0x915   :  { %7796 = vrcp.f32 %v13970_v62 }
 0x916   :  { %7798 = vrcp.f32 %v13973_v23 }
 0x917   :  { %v5320_v2 = vpop.f32.mrf.mxu1 }
 0x918   :  { %v5321_v61 = vadd.f32 %v5320_v2, %v16279_v16  ;;  %v6524_v2 = vmul.f32 -1.442695, %v4970_v57  ;;  %v14054_v57 = vor.u32 1.1754944e-38, %v5487_v0 }
 0x919   :  { %v4971_v42 = vpop.f32.mrf.mxu2 }
 0x91a   :  { %v6565_v7 = vmul.f32 -1.442695, %v5321_v61  ;;  %v7795_v59 = vpop.eup %7794  ;;  %v5403_v61 = vsub.f32 1.0, %v14005_v32 }
 0x91b   :  { %v13991_v35 = vpop.eup %7796  ;;  %v14009_v27 = vadd.f32 1.0, %v7795_v59  ;;  %v16284_v59 = vld [vmem:[#allocation22_spill] sm:$0xff] }
 0x91c   :  { %7800 = vpow2.f32 %v6565_v7  ;;  %v13996_v20 = vpop.eup %7798  ;;  %v14017_v58 = vmul.f32 %v13991_v35, %v13970_v62  ;;  %v5472_v7 = vand.u32 2147483648, %v13973_v23 }
 0x91d   :  { %7802 = vrcp.f32 %v13987_v52  ;;  %v5462_v49 = vmul.f32 %v13996_v20, %v13973_v23  ;;  %vm5467_vm10 = vweird.f32 %v13996_v20  ;;  %vm5511_vm13 = vweird.f32 %v14009_v27 }
 0x91e   :  { %7804 = vpow2.f32 %v6523_v15  ;;  %v4972_v15 = vadd.f32 %v4971_v42, %v16284_v59  ;;  %v5449_v42 = vmul.f32 %v13985_v10, %v5448_v39  ;;  %v14047_v59 = vor.u32 1.1754944e-38, %v5472_v7  ;;  %vm14186_vm5 = vmor %vm5466_vm2, %vm5467_vm10 }
 0x91f   :  { %v5323_v6 = vpop.f32.mrf.mxu1  ;;  %7806 = vrcp.f32 %v13994_v1  ;;  %v5463_v32 = vsub.f32 1.0, %v5462_v49  ;;  %v5397_v49 = vand.u32 2147483648, %v13956_v37  ;;  %v5502_v7 = vand.u32 2147483648, %v14000_v9 }
 0x920   :  { %v5324_v28 = vadd.f32 %v5323_v6, %v16283_v41  ;;  %7808 = vrcp.f32 %v14000_v9  ;;  %v14038_v41 = vor.u32 1.1754944e-38, %v5457_v44  ;;  %v5395_v44 = vand.u32 2147483647, %v13956_v37 }
 0x921   :  { %v13989_v29 = vpop.f32.mrf.mxu2  ;;  %7810 = vrcp.f32 %v14009_v27  ;;  %v14061_v39 = vmul.f32 %v13996_v20, %v5463_v32  ;;  %v5398_v32 = vor.u32 1.1754944e-38, %v5397_v49  ;;  %v14086_v48 = vor.u32 1.1754944e-38, %v5502_v7  ;;  %v16292_v7 = vld [vmem:[#allocation18_spill] sm:$0xff] }
 0x922   :  { %v7801_v46 = vpop.eup %7800  ;;  %v6566_v21 = vmul.f32 -1.442695, %v5324_v28  ;;  %7812 = vpow2.f32 %v6524_v2  ;;  %v6525_v2 = vmul.f32 -1.442695, %v4972_v15  ;;  %vm14071_vm15 = vcmp.eq.f32.partialorder %v5395_v44, 8.507059e+37 }
 0x923   :  { %v14025_v16 = vpop.eup %7802  ;;  %v14032_v45 = vadd.f32 1.0, %v7801_v46  ;;  %v5389_v46 = vmul.f32 %v13975_v60, %v5388_v5  ;;  %v5412_v44 = vand.u32 2147483648, %v13959_v34  ;;  %v5465_v34 = vadd.f32 %v13996_v20, %v14061_v39 }
 0x924   :  { %v7805_v55 = vpop.eup %7804  ;;  %v5477_v56 = vmul.f32 %v14025_v16, %v13987_v52  ;;  %vm5482_vm1 = vweird.f32 %v14025_v16  ;;  %vm5421_vm10 = vweird.f32 %v13962_v63 }
 0x925   :  { %v14044_v12 = vpop.eup %7806  ;;  %7814 = vrcp.f32 %v14032_v45  ;;  %v5390_v4 = vadd.f32 %v13975_v60, %v5389_v46  ;;  %vm5526_vm4 = vweird.f32 %v14032_v45 }
 0x926   :  { %16286 = vst [vmem:[#allocation44_spill] sm:$0xff] %v14044_v12  ;;  %v14051_v28 = vpop.eup %7808  ;;  %7816 = vpow2.f32 %v6566_v21  ;;  %v14078_v21 = vmul.f32 %v14044_v12, %v13994_v1 }
 0x927   :  { %v5325_v6 = vpop.f32.mrf.mxu1  ;;  %v14058_v5 = vpop.eup %7810  ;;  %v5492_v15 = vmul.f32 %v14051_v28, %v14000_v9  ;;  %7818 = vpow2.f32 %v6525_v2  ;;  %v5404_v2 = vmul.f32 %v13978_v51, %v5403_v61  ;;  %v5394_v37 = vsel %vm14093_vm14, %v13975_v60, %v5390_v4 }
 0x928   :  { %v5326_v53 = vadd.f32 %v5325_v6, %v16285_v31  ;;  %v14064_v31 = vadd.f32 1.0, %v7805_v55  ;;  %v5478_v6 = vsub.f32 1.0, %v5477_v56  ;;  %v7813_v55 = vpop.eup %7812  ;;  %v5517_v61 = vand.u32 2147483648, %v14009_v27 }
 0x929   :  { %v14035_v3 = vpop.f32.mrf.mxu2  ;;  %v5493_v12 = vsub.f32 1.0, %v5492_v15  ;;  %v14110_v11 = vadd.f32 1.0, %v7813_v55  ;;  %v5399_v60 = vsel %vm14071_vm15, %v5398_v32, %v5394_v37  ;;  %v14122_v15 = vadd.f32 %v13978_v51, %v5404_v2 }
 0x92a   :  { %16287 = vst [vmem:[#allocation57_spill] sm:$0xff] %v14064_v31  ;;  %v6567_v0 = vmul.f32 -1.442695, %v5326_v53  ;;  %v5507_v53 = vmul.f32 %v14058_v5, %v14009_v27  ;;  %7820 = vrcp.f32 %v14064_v31  ;;  %v14102_v17 = vmul.f32 %v14025_v16, %v5478_v6 }
 0x92b   :  { %v14099_v40 = vpop.eup %7814  ;;  %v4975_v31 = vadd.f32 %v13989_v29, %v16293_v26  ;;  %v5515_v29 = vand.u32 2147483647, %v14009_v27  ;;  %v14143_v32 = vmul.f32 %v14051_v28, %v5493_v12  ;;  %v5470_v12 = vand.u32 2147483647, %v13973_v23 }
 0x92c   :  { %7822 = vpow2.f32 %v6567_v0  ;;  %v7817_v18 = vpop.eup %7816  ;;  %v5508_v6 = vsub.f32 1.0, %v5507_v53  ;;  %v5450_v0 = vadd.f32 %v13985_v10, %v5449_v42  ;;  %v5522_v4 = vmul.f32 %v14099_v40, %v14032_v45 }
 0x92d   :  { %v7819_v55 = vpop.eup %7818  ;;  %v14127_v42 = vadd.f32 1.0, %v7817_v18  ;;  %v14145_v18 = vor.u32 1.1754944e-38, %v5517_v61  ;;  %vm5512_vm6 = vweird.f32 %v14058_v5  ;;  %vm14193_vm15 = vcmp.eq.f32.partialorder %v5515_v29, 8.507059e+37 }
 0x92e   :  { %v5509_v37 = vmul.f32 %v14058_v5, %v5508_v6  ;;  %v5523_v26 = vsub.f32 1.0, %v5522_v4  ;;  %v14166_v6 = vadd.f32 1.0, %v7819_v55  ;;  %vm14214_vm14 = vmor %vm5511_vm13, %vm5512_vm6  ;;  %vm5471_vm2 = vcmp.eq.f32.partialorder %v5470_v12, 8.507059e+37 }
 0x92f   :  { %v5328_v56 = vpop.f32.mrf.mxu1  ;;  %vm5497_vm9 = vweird.f32 %v14051_v28  ;;  %vm5527_vm13 = vweird.f32 %v14099_v40 }
 0x930   :  { %v5329_v1 = vadd.f32 %v5328_v56, %v16292_v7  ;;  %v14115_v56 = vor.u32 1.1754944e-38, %v5412_v44  ;;  %v5455_v44 = vand.u32 2147483647, %v13966_v25  ;;  %v14132_v49 = vpop.eup %7820  ;;  %v5454_v25 = vsel %vm14138_vm3, %v13985_v10, %v5450_v0 }
 0x931   :  { %v14082_v46 = vpop.f32.mrf.mxu2  ;;  %v5409_v10 = vsel %vm14160_vm12, %v13978_v51, %v14122_v15  ;;  %v5524_v23 = vmul.f32 %v14099_v40, %v5523_v26  ;;  %vm5496_vm3 = vweird.f32 %v14000_v9 }
 0x932   :  { %7824 = vtanh.f32 %v5329_v1  ;;  %v16294_v1 = vld [vmem:[#allocation29_spill] sm:$0xff]  ;;  %v7823_v7 = vpop.eup %7822  ;;  %vm5456_vm0 = vcmp.eq.f32.partialorder %v5455_v44, 8.507059e+37  ;;  %v16306_v44 = vsub.f32 1.0, %v14013_v13  ;;  %vm14322_vm6 = vmor %vm5496_vm3, %vm5497_vm9 }
 0x933   :  { %v4977_v53 = vadd.f32 %v14035_v3, %v16294_v1  ;;  %7826 = vrcp.f32 %v14110_v11  ;;  %v6526_v3 = vmul.f32 -1.442695, %v4975_v31  ;;  %v5425_v31 = vand.u32 2147483647, %v13962_v63 }
 0x934   :  { %7828 = vrcp.f32 %v14127_v42  ;;  %v14177_v4 = vadd.f32 1.0, %v7823_v7  ;;  %v5459_v55 = vsel %vm5456_vm0, %v14038_v41, %v5454_v25  ;;  %v5419_v26 = vmul.f32 %v13981_v33, %v16306_v44  ;;  %vm14270_vm0 = vmor %vm5481_vm11, %vm5482_vm1 }
 0x935   :  { %v6527_v24 = vmul.f32 -1.442695, %v4977_v53  ;;  %7830 = vpow2.f32 %v6526_v3  ;;  %v5570_v29 = vmul.f32 %v5459_v55, %v13442_v38  ;;  %v16305_v53 = vld [vmem:[#allocation23_spill] sm:$0xff]  ;;  %v5532_v7 = vand.u32 2147483648, %v14032_v45  ;;  %vm14285_vm1 = vmor %vm5421_vm10, %vm5422_vm7 }
 0x936   :  { %vm14305_vm7 = vcmp.eq.f32.partialorder %v5425_v31, 8.507059e+37  ;;  %vm5437_vm11 = vweird.f32 %v13991_v35 }
 0x937   :  { %v5330_v1 = vpop.f32.mrf.mxu1 }
 0x938   :  { %v7825_v0 = vpop.eup %7824  ;;  %v5331_v61 = vadd.f32 %v5330_v1, %v16174_v50  ;;  %v5510_v50 = vadd.f32 %v14058_v5, %v5509_v37  ;;  %v5469_v1 = vsel %vm14186_vm5, %v13996_v20, %v5465_v34  ;;  %v5530_v20 = vand.u32 2147483647, %v14032_v45 }
 0x939   :  { %v4981_v8 = vpop.f32.mrf.mxu2  ;;  %v5574_v39 = vmul.f32 %v7825_v0, %v5399_v60  ;;  %v14197_v15 = vpop.eup %7826  ;;  %v4980_v60 = vadd.f32 %v14082_v46, %v16305_v53  ;;  %v5414_v46 = vsel %vm14148_vm8, %v14115_v56, %v5409_v10  ;;  %v5474_v37 = vsel %vm5471_vm2, %v14047_v59, %v5469_v1  ;;  %vm14253_vm8 = vmor %vm5526_vm4, %vm5527_vm13 }
 0x93a   :  { %7832 = vtanh.f32 %v5331_v61  ;;  %v14221_v38 = vpop.eup %7828  ;;  %v5514_v13 = vsel %vm14214_vm14, %v14058_v5, %v5510_v50  ;;  %v14232_v0 = vadd.f32 %v14099_v40, %v5524_v23  ;;  %v5420_v56 = vadd.f32 %v13981_v33, %v5419_v26 }
 0x93b   :  { %7834 = vrcp.f32 %v14166_v6  ;;  %v5578_v27 = vadd.f32 %v5574_v39, %v5570_v29  ;;  %v7831_v34 = vpop.eup %7830  ;;  %v6528_v12 = vmul.f32 -1.442695, %v4980_v60  ;;  %v5480_v59 = vadd.f32 %v14025_v16, %v14102_v17 }
 0x93c   :  { %7836 = vpow2.f32 %v6527_v24  ;;  %v4982_v24 = vadd.f32 %v4981_v8, %v16171_v19  ;;  %v14246_v51 = vmul.f32 %v14221_v38, %v14127_v42  ;;  %v5571_v8 = vmul.f32 %v5474_v37, %v13471_v14 }
 0x93d   :  { %7838 = vrcp.f32 %v14177_v4  ;;  %vm14257_vm12 = vcmp.eq.f32.partialorder %v5530_v20, 8.507059e+37  ;;  %v5533_v23 = vor.u32 1.1754944e-38, %v5532_v7  ;;  %v14261_v1 = vadd.f32 1.0, %v7831_v34 }
 0x93e   :  { %v5485_v14 = vand.u32 2147483647, %v13987_v52  ;;  %v5529_v60 = vsel %vm14253_vm8, %v14099_v40, %v14232_v0  ;;  %v5519_v44 = vsel %vm14193_vm15, %v14145_v18, %v5514_v13  ;;  %v6529_v3 = vmul.f32 -1.442695, %v4982_v24 }
 0x93f   :  { %v5333_v25 = vpop.f32.mrf.mxu1  ;;  %v5484_v20 = vsel %vm14270_vm0, %v14025_v16, %v5480_v59  ;;  %v16317_v7 = vsub.f32 1.0, %v14017_v58  ;;  %v5538_v41 = vsub.f32 1.0, %v14246_v51  ;;  %v16320_v58 = vand.u32 2147483648, %v13962_v63 }
 0x940   :  { %v5334_v55 = vadd.f32 %v5333_v25, %v15567_v47  ;;  %v7833_v5 = vpop.eup %7832  ;;  %vm5486_vm5 = vcmp.eq.f32.partialorder %v5485_v14, 8.507059e+37  ;;  %v5495_v24 = vadd.f32 %v14051_v28, %v14143_v32  ;;  %v5500_v63 = vand.u32 2147483647, %v14000_v9 }
 0x941   :  { %v4984_v61 = vpop.f32.mrf.mxu2  ;;  %v14242_v10 = vpop.eup %7834  ;;  %v5575_v47 = vmul.f32 %v7833_v5, %v5414_v46  ;;  %v5434_v18 = vmul.f32 %v13991_v35, %v16317_v7  ;;  %v5428_v37 = vor.u32 1.1754944e-38, %v16320_v58  ;;  %v5489_v0 = vsel %vm5486_vm5, %v14054_v57, %v5484_v20 }
 0x942   :  { %v4985_v2 = vadd.f32 %v4984_v61, %v16177_v43  ;;  %7840 = vtanh.f32 %v5334_v55  ;;  %v7837_v50 = vpop.eup %7836  ;;  %vm5436_vm15 = vweird.f32 %v13970_v62  ;;  %v5442_v57 = vand.u32 2147483648, %v13970_v62 }
 0x943   :  { %7842 = vtanh.f32 %v5578_v27  ;;  %v14264_v29 = vpop.eup %7838  ;;  %v5579_v26 = vadd.f32 %v5575_v47, %v5571_v8  ;;  %v14296_v13 = vadd.f32 1.0, %v7837_v50  ;;  %v5424_v27 = vsel %vm14285_vm1, %v13981_v33, %v5420_v56  ;;  %vm14340_vm4 = vmor %vm5436_vm15, %vm5437_vm11 }
 0x944   :  { %7844 = vpow2.f32 %v6528_v12  ;;  %v6530_v40 = vmul.f32 -1.442695, %v4985_v2  ;;  %v5552_v46 = vmul.f32 %v14264_v29, %v14177_v4  ;;  %v5435_v31 = vadd.f32 %v13991_v35, %v5434_v18 }
 0x945   :  { %7846 = vtanh.f32 %v5579_v26  ;;  %v5440_v56 = vand.u32 2147483647, %v13970_v62  ;;  %v5499_v9 = vsel %vm14322_vm6, %v14051_v28, %v5495_v24  ;;  %v5534_v47 = vsel %vm14257_vm12, %v5533_v23, %v5529_v60 }
 0x946   :  { %7848 = vpow2.f32 %v6529_v3  ;;  %v5553_v51 = vsub.f32 1.0, %v5552_v46  ;;  %v5572_v50 = vmul.f32 %v5489_v0, %v13572_v54  ;;  %v5439_v28 = vsel %vm14340_vm4, %v13991_v35, %v5435_v31 }
 0x947   :  { %v5335_v25 = vpop.f32.mrf.mxu1  ;;  %7850 = vpow2.f32 %v6530_v40  ;;  %vm5501_vm10 = vcmp.eq.f32.partialorder %v5500_v63, 8.507059e+37  ;;  %v5443_v23 = vor.u32 1.1754944e-38, %v5442_v57  ;;  %vm5441_vm14 = vcmp.eq.f32.partialorder %v5440_v56, 8.507059e+37  ;;  %v16330_v56 = vld [vmem:[#allocation30_spill] sm:$0xff] }
 0x948   :  { %v7841_v34 = vpop.eup %7840  ;;  %v5336_v33 = vadd.f32 %v5335_v25, %v15906_v22  ;;  %v5429_v22 = vsel %vm14305_vm7, %v5428_v37, %v5424_v27  ;;  %v5504_v54 = vsel %vm5501_vm10, %v14086_v48, %v5499_v9  ;;  %v5539_v20 = vmul.f32 %v14221_v38, %v5538_v41  ;;  %v16325_v27 = vld [vmem:[#allocation57_spill] sm:$0xff] }
 0x949   :  { %v4986_v61 = vpop.f32.mrf.mxu2  ;;  %v7843_v55 = vpop.eup %7842  ;;  %v5576_v12 = vmul.f32 %v7841_v34, %v5429_v22  ;;  %v5554_v35 = vmul.f32 %v14264_v29, %v5553_v51  ;;  %v5444_v40 = vsel %vm5441_vm14, %v5443_v23, %v5439_v28  ;;  %v5573_v7 = vmul.f32 %v5504_v54, %v13614_v30 }
 0x94a   :  { %7852 = vtanh.f32 %v5336_v33  ;;  %v7845_v32 = vpop.eup %7844  ;;  %v4987_v59 = vadd.f32 %v4986_v61, %v16186_v36  ;;  %v5586_v8 = vmul.f32 %v7843_v55, %v5519_v44  ;;  %v5054_v48 = vsub.f32 1.0, %v14078_v21 }
 0x94b   :  { %v7847_v2 = vpop.eup %7846  ;;  %7854 = vrcp.f32 %v14261_v1  ;;  %v14348_v17 = vadd.f32 1.0, %v7845_v32  ;;  %v5580_v26 = vadd.f32 %v5576_v12, %v5572_v50  ;;  %v14358_v46 = vmul.f32 %v14132_v49, %v16325_v27 }
 0x94c   :  { %v5587_v62 = vmul.f32 %v7847_v2, %v5534_v47  ;;  %v6531_v14 = vmul.f32 -1.442695, %v4987_v59  ;;  %v7849_v45 = vpop.eup %7848  ;;  %7856 = vrcp.f32 %v14296_v13  ;;  %vm5542_vm2 = vweird.f32 %v14221_v38  ;;  %v16331_v47 = vld [vmem:[#allocation33_spill] sm:$0xff] }
 0x94d   :  { %v7851_v60 = vpop.eup %7850  ;;  %v5540_v30 = vadd.f32 %v14221_v38, %v5539_v20  ;;  %v5555_v37 = vadd.f32 %v14264_v29, %v5554_v35  ;;  %vm5557_vm9 = vweird.f32 %v14264_v29  ;;  %v14369_v21 = vadd.f32 1.0, %v7849_v45 }
 0x94e   :  { %v6879_v44 = vpack.c.bf16 %v5587_v62, %v5586_v8  ;;  %7858 = vpow2.f32 %v6531_v14  ;;  %v14362_v41 = vadd.f32 1.0, %v7851_v60  ;;  %vm5541_vm13 = vweird.f32 %v14127_v42 }
 0x94f   :  { %7860 = vrcp.f32 %v14348_v17  ;;  %v5547_v25 = vand.u32 2147483648, %v14127_v42  ;;  %v5562_v61 = vand.u32 2147483648, %v14177_v4  ;;  %v14378_v0 = vmul.f32 %v14197_v15, %v14110_v11  ;;  %vm14382_vm3 = vmor %vm5541_vm13, %vm5542_vm2 }
 0x950   :  { %v7853_v52 = vpop.eup %7852  ;;  %6880 = vst [vmem:[#allocation3] sm:$0xff] %v6879_v44   ;;  %7862 = vtanh.f32 %v5580_v26  ;;  %v5545_v24 = vand.u32 2147483647, %v14127_v42  ;;  %vm5556_vm8 = vweird.f32 %v14177_v4  ;;  %v5560_v55 = vand.u32 2147483647, %v14177_v4 }
 0x951   :  { %v4989_v3 = vpop.f32.mrf.mxu2  ;;  %v5577_v18 = vmul.f32 %v7853_v52, %v5444_v40  ;;  %v14364_v58 = vpop.eup %7854  ;;  %v5069_v63 = vsub.f32 1.0, %v14358_v46  ;;  %v14392_v5 = vmul.f32 %v14242_v10, %v14166_v6  ;;  %vm14398_vm12 = vmor %vm5556_vm8, %vm5557_vm9  ;;  %v5544_v32 = vsel %vm14382_vm3, %v14221_v38, %v5540_v30 }
 0x952   :  { %v14374_v34 = vpop.eup %7856  ;;  %v5113_v22 = vmul.f32 %v14364_v58, %v14261_v1  ;;  %v5559_v12 = vsel %vm14398_vm12, %v14264_v29, %v5555_v37  ;;  %v4990_v9 = vadd.f32 %v4989_v3, %v16330_v56  ;;  %v5548_v2 = vor.u32 1.1754944e-38, %v5547_v25 }
 0x953   :  { %v5581_v16 = vadd.f32 %v5577_v18, %v5573_v7  ;;  %v5123_v51 = vand.u32 2147483648, %v14261_v1  ;;  %v5563_v8 = vor.u32 1.1754944e-38, %v5562_v61  ;;  %v5084_v39 = vsub.f32 1.0, %v14378_v0  ;;  %v16332_v18 = vld [vmem:[#allocation44_spill] sm:$0xff] }
 0x954   :  { %v7859_v31 = vpop.eup %7858  ;;  %vm5546_vm0 = vcmp.eq.f32.partialorder %v5545_v24, 8.507059e+37  ;;  %vm5561_vm1 = vcmp.eq.f32.partialorder %v5560_v55, 8.507059e+37  ;;  %v5114_v28 = vsub.f32 1.0, %v5113_v22  ;;  %v5128_v29 = vmul.f32 %v14374_v34, %v14296_v13 }
 0x955   :  { %7864 = vtanh.f32 %v5581_v16  ;;  %v14403_v4 = vpop.eup %7860  ;;  %v14416_v38 = vadd.f32 1.0, %v7859_v31  ;;  %v5549_v14 = vsel %vm5546_vm0, %v5548_v2, %v5544_v32  ;;  %v5564_v45 = vsel %vm5561_vm1, %v5563_v8, %v5559_v12  ;;  %v16333_v31 = vld [vmem:[#allocation35_spill] sm:$0xff] }
 0x956   :  { %7866 = vrcp.f32 %v14362_v41  ;;  %v7863_v59 = vpop.eup %7862  ;;  %v5143_v23 = vmul.f32 %v14403_v4, %v14348_v17  ;;  %v6532_v44 = vmul.f32 -1.442695, %v4990_v9  ;;  %v5099_v3 = vsub.f32 1.0, %v14392_v5  ;;  %v16334_v32 = vld [vmem:[#allocation43_spill] sm:$0xff] }
 0x957   :  { %7868 = vrcp.f32 %v14369_v21  ;;  %v5588_v54 = vmul.f32 %v7863_v59, %v5549_v14  ;;  %vm5117_vm7 = vweird.f32 %v14261_v1  ;;  %v14426_v52 = vor.u32 1.1754944e-38, %v5123_v51 }
 0x958   :  { %v5138_v20 = vand.u32 2147483648, %v14296_v13  ;;  %vm5118_vm5 = vweird.f32 %v14364_v58  ;;  %7870 = vrcp.f32 %v14416_v38  ;;  %v5055_v16 = vmul.f32 %v16332_v18, %v5054_v48 }
 0x959   :  { %v4991_v42 = vpop.f32.mrf.mxu2  ;;  %v5115_v30 = vmul.f32 %v14364_v58, %v5114_v28  ;;  %v5129_v37 = vsub.f32 1.0, %v5128_v29  ;;  %v5153_v25 = vand.u32 2147483648, %v14348_v17  ;;  %v5168_v61 = vand.u32 2147483648, %v14369_v21  ;;  %vm14478_vm14 = vmor %vm5117_vm7, %vm5118_vm5 }
 0x95a   :  { %v4992_v50 = vadd.f32 %v4991_v42, %v16331_v47  ;;  %v5144_v24 = vsub.f32 1.0, %v5143_v23  ;;  %7872 = vpow2.f32 %v6532_v44  ;;  %vm5132_vm11 = vweird.f32 %v14296_v13 }
 0x95b   :  { %v7865_v62 = vpop.eup %7864  ;;  %v14441_v57 = vor.u32 1.1754944e-38, %v5138_v20  ;;  %vm5058_vm6 = vweird.f32 %v16332_v18  ;;  %v5056_v42 = vadd.f32 %v16332_v18, %v5055_v16  ;;  %v5061_v12 = vand.u32 2147483647, %v16334_v32 }
 0x95c   :  { %v5589_v60 = vmul.f32 %v7865_v62, %v5564_v45  ;;  %v14422_v26 = vpop.eup %7866  ;;  %v6533_v35 = vmul.f32 -1.442695, %v4992_v50  ;;  %v5063_v9 = vand.u32 2147483648, %v16334_v32  ;;  %v5130_v59 = vmul.f32 %v14374_v34, %v5129_v37 }
 0x95d   :  { %v14429_v40 = vpop.eup %7868  ;;  %v5173_v55 = vmul.f32 %v14422_v26, %v14362_v41  ;;  %vm5133_vm15 = vweird.f32 %v14374_v34  ;;  %v14451_v2 = vor.u32 1.1754944e-38, %v5153_v25  ;;  %v5116_v51 = vadd.f32 %v14364_v58, %v5115_v30 }
 0x95e   :  { %v6884_v7 = vpack.c.bf16 %v5589_v60, %v5588_v54  ;;  %v5158_v48 = vmul.f32 %v14429_v40, %v14369_v21  ;;  %7874 = vpow2.f32 %v6533_v35  ;;  %v14454_v8 = vpop.eup %7870  ;;  %v14457_v50 = vmul.f32 %v14403_v4, %v5144_v24  ;;  %vm14503_vm12 = vmor %vm5132_vm11, %vm5133_vm15 }
 0x95f   :  { %v14459_v62 = vor.u32 1.1754944e-38, %v5168_v61  ;;  %v5174_v28 = vsub.f32 1.0, %v5173_v55  ;;  %vm5057_vm4 = vweird.f32 %v16334_v32  ;;  %v5181_v29 = vand.u32 2147483647, %v14362_v41  ;;  %v16339_v61 = vld [vmem:[#allocation36_spill] sm:$0xff] }
 0x960   :  { %6929 = vst [vmem:[#allocation3 + $0x8] sm:$0xff] %v6884_v7   ;;  %v5183_v14 = vand.u32 2147483648, %v14362_v41  ;;  %vm14466_vm10 = vmor %vm5057_vm4, %vm5058_vm6  ;;  %v5121_v23 = vand.u32 2147483647, %v14261_v1  ;;  %v5070_v54 = vmul.f32 %v14132_v49, %v5069_v63  ;;  %v7873_v60 = vpop.eup %7872  ;;  %v5159_v20 = vsub.f32 1.0, %v5158_v48 }
 0x961   :  { %v4994_v33 = vpop.f32.mrf.mxu2  ;;  %vm5177_vm2 = vweird.f32 %v14362_v41  ;;  %v5060_v35 = vsel %vm14466_vm10, %v16332_v18, %v5056_v42  ;;  %vm5062_vm9 = vcmp.eq.f32.partialorder %v5061_v12, 8.507059e+37  ;;  %v5064_v46 = vor.u32 1.1754944e-38, %v5063_v9 }
 0x962   :  { %v4995_v22 = vadd.f32 %v4994_v33, %v16333_v31  ;;  %v5188_v63 = vmul.f32 %v14454_v8, %v14416_v38  ;;  %v5120_v1 = vsel %vm14478_vm14, %v14364_v58, %v5116_v51  ;;  %vm5072_vm13 = vweird.f32 %v16325_v27 }
 0x963   :  { %v5131_v30 = vadd.f32 %v14374_v34, %v5130_v59  ;;  %v5175_v25 = vmul.f32 %v14422_v26, %v5174_v28  ;;  %vm5073_vm3 = vweird.f32 %v14132_v49  ;;  %v5076_v33 = vand.u32 2147483647, %v16325_v27 }
 0x964   :  { %7876 = vtanh.f32 %v4995_v22  ;;  %v7875_v7 = vpop.eup %7874  ;;  %v5065_v24 = vsel %vm5062_vm9, %v5064_v46, %v5060_v35  ;;  %vm5122_vm8 = vcmp.eq.f32.partialorder %v5121_v23, 8.507059e+37  ;;  %v5071_v55 = vadd.f32 %v14132_v49, %v5070_v54  ;;  %vm14525_vm5 = vmor %vm5072_vm13, %vm5073_vm3 }
 0x965   :  { %v5136_v58 = vand.u32 2147483647, %v14296_v13  ;;  %vm5148_vm0 = vweird.f32 %v14403_v4  ;;  %v14508_v48 = vadd.f32 1.0, %v7873_v60  ;;  %v5125_v42 = vsel %vm5122_vm8, %v14426_v52, %v5120_v1  ;;  %v16349_v1 = vld [vmem:[#allocation34_spill] sm:$0xff] }
 0x966   :  { %v5078_v32 = vand.u32 2147483648, %v16325_v27  ;;  %v5189_v12 = vsub.f32 1.0, %v5188_v63  ;;  %v14512_v9 = vadd.f32 1.0, %v7875_v7  ;;  %v5135_v13 = vsel %vm14503_vm12, %v14374_v34, %v5131_v30  ;;  %v16346_v34 = vld [vmem:[#allocation56_spill] sm:$0xff]  ;;  %v16350_v30 = vld [vmem:[#allocation61_spill] sm:$0xff] }
 0x967   :  { %vm5147_vm1 = vweird.f32 %v14348_v17  ;;  %v5160_v51 = vmul.f32 %v14429_v40, %v5159_v20  ;;  %v5176_v28 = vadd.f32 %v14422_v26, %v5175_v25  ;;  %vm5178_vm7 = vweird.f32 %v14422_v26 }
 0x968   :  { %vm14529_vm11 = vcmp.eq.f32.partialorder %v5076_v33, 8.507059e+37  ;;  %v5236_v23 = vmul.f32 %v5125_v42, %v16346_v34  ;;  %v5075_v54 = vsel %vm14525_vm5, %v14132_v49, %v5071_v55  ;;  %vm5137_vm6 = vcmp.eq.f32.partialorder %v5136_v58, 8.507059e+37  ;;  %vm14545_vm4 = vmor %vm5177_vm2, %vm5178_vm7 }
 0x969   :  { %v4996_v16 = vpop.f32.mrf.mxu2  ;;  %v5085_v60 = vmul.f32 %v14197_v15, %v5084_v39  ;;  %v5079_v27 = vor.u32 1.1754944e-38, %v5078_v32  ;;  %v5140_v44 = vsel %vm5137_vm6, %v14441_v57, %v5135_v13  ;;  %vm5087_vm15 = vweird.f32 %v14110_v11  ;;  %vm14594_vm12 = vmor %vm5147_vm1, %vm5148_vm0 }
 0x96a   :  { %v7877_v37 = vpop.eup %7876  ;;  %v4997_v18 = vadd.f32 %v4996_v16, %v16339_v61  ;;  %v5190_v49 = vmul.f32 %v14454_v8, %v5189_v12  ;;  %v5196_v35 = vand.u32 2147483647, %v14416_v38  ;;  %v5180_v57 = vsel %vm14545_vm4, %v14422_v26, %v5176_v28 }
 0x96b   :  { %v5240_v59 = vmul.f32 %v7877_v37, %v5065_v24  ;;  %v5198_v7 = vand.u32 2147483648, %v14416_v38  ;;  %v5080_v63 = vsel %vm14529_vm11, %v5079_v27, %v5075_v54  ;;  %vm5162_vm10 = vweird.f32 %v14369_v21  ;;  %v16359_v54 = vld [vmem:[#allocation39_spill] sm:$0xff] }
 0x96c   :  { %7878 = vtanh.f32 %v4997_v18  ;;  %v5237_v37 = vmul.f32 %v5140_v44, %v16350_v30  ;;  %v5086_v18 = vadd.f32 %v14197_v15, %v5085_v60  ;;  %vm5088_vm14 = vweird.f32 %v14197_v15 }
 0x96d   :  { %7880 = vrcp.f32 %v14508_v48  ;;  %v14552_v0 = vadd.f32 %v5240_v59, %v5236_v23  ;;  %vm5193_vm2 = vweird.f32 %v14454_v8  ;;  %v5091_v26 = vand.u32 2147483647, %v14110_v11  ;;  %vm14584_vm8 = vmor %vm5087_vm15, %vm5088_vm14 }
 0x96e   :  { %7882 = vrcp.f32 %v14512_v9  ;;  %v5093_v33 = vand.u32 2147483648, %v14110_v11  ;;  %v5191_v24 = vadd.f32 %v14454_v8, %v5190_v49  ;;  %v5146_v58 = vadd.f32 %v14403_v4, %v14457_v50 }
 0x96f   :  { %vm5163_vm9 = vweird.f32 %v14429_v40  ;;  %vm5182_vm13 = vcmp.eq.f32.partialorder %v5181_v29, 8.507059e+37  ;;  %v5184_v42 = vor.u32 1.1754944e-38, %v5183_v14  ;;  %vm5192_vm3 = vweird.f32 %v14416_v38 }
 0x970   :  { %v5090_v11 = vsel %vm14584_vm8, %v14197_v15, %v5086_v18  ;;  %v5151_v41 = vand.u32 2147483647, %v14348_v17  ;;  %v5100_v38 = vmul.f32 %v14242_v10, %v5099_v3  ;;  %vm14608_vm7 = vmor %vm5192_vm3, %vm5193_vm2  ;;  %vm14612_vm0 = vcmp.eq.f32.partialorder %v5196_v35, 8.507059e+37 }
 0x971   :  { %v4999_v39 = vpop.f32.mrf.mxu2  ;;  %v5185_v29 = vsel %vm5182_vm13, %v5184_v42, %v5180_v57  ;;  %v5199_v13 = vor.u32 1.1754944e-38, %v5198_v7  ;;  %v5094_v28 = vor.u32 1.1754944e-38, %v5093_v33  ;;  %v5195_v15 = vsel %vm14608_vm7, %v14454_v8, %v5191_v24  ;;  %vm14635_vm6 = vmor %vm5162_vm10, %vm5163_vm9  ;;  %v16363_v42 = vld [vmem:[#allocation54_spill] sm:$0xff] }
 0x972   :  { %v7879_v46 = vpop.eup %7878  ;;  %v5000_v16 = vadd.f32 %v4999_v39, %v16349_v1  ;;  %vm5092_vm1 = vcmp.eq.f32.partialorder %v5091_v26, 8.507059e+37  ;;  %v5150_v17 = vsel %vm14594_vm12, %v14403_v4, %v5146_v58  ;;  %v5161_v3 = vadd.f32 %v14429_v40, %v5160_v51  ;;  %v8060_v51 = vld [vmem:[%s15079_s3 + $0x20] sm:$0xff] }
 0x973   :  { %v5241_v25 = vmul.f32 %v7879_v46, %v5080_v63  ;;  %v14574_v22 = vpop.eup %7880  ;;  %v5095_v23 = vsel %vm5092_vm1, %v5094_v28, %v5090_v11  ;;  %vm5152_vm5 = vcmp.eq.f32.partialorder %v5151_v41, 8.507059e+37  ;;  %v5101_v8 = vadd.f32 %v14242_v10, %v5100_v38 }
 0x974   :  { %7884 = vtanh.f32 %v5000_v16  ;;  %v14588_v12 = vpop.eup %7882  ;;  %v5203_v45 = vmul.f32 %v14574_v22, %v14508_v48  ;;  %vm5103_vm11 = vweird.f32 %v14242_v10  ;;  %v5166_v4 = vand.u32 2147483647, %v14369_v21 }
 0x975   :  { %7886 = vtanh.f32 %v14552_v0  ;;  %v14570_v55 = vadd.f32 %v5241_v25, %v5237_v37  ;;  %v5218_v34 = vmul.f32 %v14588_v12, %v14512_v9  ;;  %v5200_v44 = vsel %vm14612_vm0, %v5199_v13, %v5195_v15 }
 0x976   :  { %v5155_v20 = vsel %vm5152_vm5, %v14451_v2, %v5150_v17  ;;  %v5108_v49 = vand.u32 2147483648, %v14166_v6  ;;  %vm5102_vm15 = vweird.f32 %v14166_v6  ;;  %v5106_v46 = vand.u32 2147483647, %v14166_v6  ;;  %v16362_v2 = vld [vmem:[#allocation63_spill] sm:$0xff] }
 0x977   :  { %7888 = vtanh.f32 %v14570_v55  ;;  %v5165_v21 = vsel %vm14635_vm6, %v14429_v40, %v5161_v3  ;;  %v5204_v57 = vsub.f32 1.0, %v5203_v45  ;;  %v5219_v7 = vsub.f32 1.0, %v5218_v34  ;;  %vm5104_vm4 = vmor %vm5102_vm15, %vm5103_vm11 }
 0x978   :  { %v5238_v30 = vmul.f32 %v5155_v20, %v16362_v2  ;;  %v5105_v37 = vsel %vm5104_vm4, %v14242_v10, %v5101_v8  ;;  %vm5167_vm10 = vcmp.eq.f32.partialorder %v5166_v4, 8.507059e+37  ;;  %v5109_v18 = vor.u32 1.1754944e-38, %v5108_v49  ;;  %v8058_v8 = vld [vmem:[%s15079_s3 + $0x10] sm:$0xff]  ;;  %v8059_v4 = vld [vmem:[%s15079_s3 + $0x18] sm:$0xff] }
 0x979   :  { %v5001_v5 = vpop.f32.mrf.mxu2  ;;  %v5170_v6 = vsel %vm5167_vm10, %v14459_v62, %v5165_v21  ;;  %vm5107_vm14 = vcmp.eq.f32.partialorder %v5106_v46, 8.507059e+37  ;;  %v5205_v33 = vmul.f32 %v14574_v22, %v5204_v57  ;;  %v5220_v24 = vmul.f32 %v14588_v12, %v5219_v7  ;;  %v8062_v20 = vld [vmem:[%s15079_s3 + $0x30] sm:$0xff]  ;;  %v8063_v49 = vld [vmem:[%s15079_s3 + $0x38] sm:$0xff] }
 0x97a   :  { %v7885_v52 = vpop.eup %7884  ;;  %v5002_v60 = vadd.f32 %v5001_v5, %v16359_v54  ;;  %v5110_v58 = vsel %vm5107_vm14, %v5109_v18, %v5105_v37  ;;  %v5239_v32 = vmul.f32 %v5170_v6, %v16363_v42  ;;  %vm5208_vm2 = vweird.f32 %v14574_v22  ;;  %v16376_v42 = vld [vmem:[#allocation22_spill] sm:$0xff] }
 0x97b   :  { %v7887_v27 = vpop.eup %7886  ;;  %v5242_v39 = vmul.f32 %v7885_v52, %v5095_v23  ;;  %v5206_v62 = vadd.f32 %v14574_v22, %v5205_v33  ;;  %v5221_v11 = vadd.f32 %v14588_v12, %v5220_v24  ;;  %vm5223_vm9 = vweird.f32 %v14588_v12  ;;  %v16375_v24 = vld [vmem:[#allocation26_spill] sm:$0xff] }
 0x97c   :  { %7890 = vtanh.f32 %v5002_v60  ;;  %v5252_v63 = vmul.f32 %v7887_v27, %v5185_v29  ;;  %vm5207_vm13 = vweird.f32 %v14508_v48  ;;  %v5213_v41 = vand.u32 2147483648, %v14508_v48  ;;  %v6673_v60 = vld [vmem:[#allocation3 + $0x8] sm:$0xff]  ;;  %v8057_v27 = vld [vmem:[%s15079_s3 + $0x8] sm:$0xff] }
 0x97d   :  { %v7889_v35 = vpop.eup %7888  ;;  %v14653_v26 = vadd.f32 %v5242_v39, %v5238_v30  ;;  %v5228_v38 = vand.u32 2147483648, %v14512_v9  ;;  %vm5209_vm3 = vmor %vm5207_vm13, %vm5208_vm2  ;;  %v5211_v29 = vand.u32 2147483647, %v14508_v48  ;;  %vm5222_vm8 = vweird.f32 %v14512_v9  ;;  %v16373_v30 = vld [vmem:[#allocation25_spill] sm:$0xff] }
 0x97e   :  { %v5253_v16 = vmul.f32 %v7889_v35, %v5200_v44  ;;  %v5226_v14 = vand.u32 2147483647, %v14512_v9  ;;  %vm5224_vm12 = vmor %vm5222_vm8, %vm5223_vm9  ;;  %v5210_v59 = vsel %vm5209_vm3, %v14574_v22, %v5206_v62  ;;  %v5214_v15 = vor.u32 1.1754944e-38, %v5213_v41  ;;  %v6672_v22 = vld [vmem:[#allocation3] sm:$0xff]  ;;  %v8061_v44 = vld [vmem:[%s15079_s3 + $0x28] sm:$0xff] }
 0x97f   :  { %7892 = vtanh.f32 %v14653_v26  ;;  %v5225_v13 = vsel %vm5224_vm12, %v14588_v12, %v5221_v11  ;;  %v5229_v17 = vor.u32 1.1754944e-38, %v5228_v38  ;;  %vm5212_vm7 = vcmp.eq.f32.partialorder %v5211_v29, 8.507059e+37  ;;  %v8056_v12 = vld [vmem:[%s15079_s3] sm:$0xff]  ;;  %v16377_v62 = vld [vmem:[#allocation29_spill] sm:$0xff] }
 0x980   :  { %v6889_v25 = vpack.c.bf16 %v5253_v16, %v5252_v63  ;;  %vm5227_vm0 = vcmp.eq.f32.partialorder %v5226_v14, 8.507059e+37  ;;  %v5215_v3 = vsel %vm5212_vm7, %v5214_v15, %v5210_v59  ;;  %vm16364_vm1 = vcmask 523264   ;;  %v16372_v16 = vld [vmem:[#allocation24_spill] sm:$0xff]  ;;  %v275_v59 = vpop.permute.xlu2 %274 }
 0x981   :  { %v5230_v52 = vsel %vm5227_vm0, %v5229_v17, %v5225_v13  ;;  %vm16365_vm5 = vmmov %vm16364_vm1  ;;  %v280_v17 = vpop.permute.xlu0 %279 }
 0x982   :  { %v7891_v40 = vpop.eup %7890  ;;  %6930 = vst [vmem:[#allocation3 + $0x10] sm:$0xff] %v6889_v25   ;;  %vm16366_vm11 = vmmov %vm16364_vm1  ;;  %v16374_v25 = vld [vmem:[#allocation28_spill] sm:$0xff] }
 0x983   :  { %v5243_v50 = vmul.f32 %v7891_v40, %v5110_v58  ;;  %vm16367_vm6 = vmmov %vm16364_vm1 }
 0x984   :  { %vm16368_vm15 = vmmov %vm16364_vm1 }
 0x985   :  { %v14660_v10 = vadd.f32 %v5243_v50, %v5239_v32  ;;  %v7893_v28 = vpop.eup %7892  ;;  %vm16369_vm4 = vmmov %vm16364_vm1 }
 0x986   :  { %v5254_v45 = vmul.f32 %v7893_v28, %v5215_v3  ;;  %vm16370_vm10 = vmmov %vm16364_vm1 }
 0x987   :  { %7894 = vtanh.f32 %v14660_v10  ;;  %vm16371_vm14 = vmmov %vm16364_vm1 }
 0x989   :  { %v6674_v9 = vld [vmem:[#allocation3 + $0x10] sm:$0xff] }
 0x98d   :  { %v7895_v5 = vpop.eup %7894 }
 0x98e   :  { %v5255_v34 = vmul.f32 %v7895_v5, %v5230_v52 }
 0x990   :  { %v6894_v48 = vpack.c.bf16 %v5255_v34, %v5254_v45 }
 0x992   :  { %6931 = vst [vmem:[#allocation3 + $0x18] sm:$0xff] %v6894_v48  }
 0x999   :  { %v6675_v23 = vld [vmem:[#allocation3 + $0x18] sm:$0xff] }
 0x99a   :  { %5642 = vmatpush.bf16.msrb.mxu3 %v6675_v23 }
 0x99e   :  { %5643 = vmatpush.bf16.msrb.mxu3 %v6674_v9 }
 0x9a2   :  { %5644 = vmatpush.bf16.msrb.mxu3 %v6673_v60 }
 0x9a6   :  { %5645 = vmatpush.bf16.msrb.mxu3 %v6672_v22 }
 0x9a9   :  { %6584 = vmatmul.msk.bf16.vlgmr.msrb.gmra.mxu3 %vm16364_vm1, %v8056_v12 }
 0x9b9   :  { %6585 = vmatmul.msk.bf16.gmra.mxu3 %vm16365_vm5, %v8057_v27  ;;  %v316_v27 = vpop.permute.xlu1 %315 }
 0x9c9   :  { %6586 = vmatmul.msk.bf16.gmra.mxu3 %vm16366_vm11, %v8058_v8 }
 0x9d9   :  { %6587 = vmatmul.msk.bf16.gmra.mxu3 %vm16367_vm6, %v8059_v4  ;;  %v321_v4 = vpop.permute.xlu2 %320 }
 0x9e9   :  { %6588 = vmatmul.msk.bf16.gmra.mxu3 %vm16368_vm15, %v8060_v51 }
 0x9f9   :  { %6589 = vmatmul.msk.bf16.gmra.mxu3 %vm16369_vm4, %v8061_v44  ;;  %v265_v44 = vld [vmem:[%s15080_s5 + $0x8] sm:$0xff] }
 0xa09   :  { %6590 = vmatmul.msk.bf16.gmra.mxu3 %vm16370_vm10, %v8062_v20  ;;  %v264_v20 = vld [vmem:[%s15080_s5] sm:$0xff] }
 0xa19   :  { %6591 = vmatmul.msk.bf16.gmra.mxu3 %vm16371_vm14, %v8063_v49 }
 0xa2c   :  { %v5647_v35 = vpop.f32.mrf.mxu3 }
 0xa2d   :  { %v5648_v2 = vadd.f32 %v5647_v35, %v16372_v16 }
 0xa2f   :  { %v6592_v6 = vmul.f32 -1.442695, %v5648_v2 }
 0xa31   :  { %7896 = vpow2.f32 %v6592_v6 }
 0xa34   :  { %v5649_v39 = vpop.f32.mrf.mxu3 }
 0xa35   :  { %v5650_v37 = vadd.f32 %v5649_v39, %v16373_v30  ;;  %v285_v39 = vpop.permute.xlu0 %284  ;;  %v266_v30 = vld [vmem:[%s15080_s5 + $0x10] sm:$0xff] }
 0xa37   :  { %v6593_v33 = vmul.f32 -1.442695, %v5650_v37  ;;  %v7897_v28 = vpop.eup %7896 }
 0xa38   :  { %v14714_v45 = vadd.f32 1.0, %v7897_v28 }
 0xa39   :  { %7898 = vpow2.f32 %v6593_v33 }
 0xa3a   :  { %vm5740_vm12 = vweird.f32 %v14714_v45 }
 0xa3c   :  { %v5652_v46 = vpop.f32.mrf.mxu3 }
 0xa3d   :  { %v5653_v58 = vadd.f32 %v5652_v46, %v16375_v24  ;;  %v306_v46 = vld [vmem:[%s15081_s6 + $0x8] sm:$0xff] }
 0xa3e   :  { %v334_v37 = vmul.f32 %v321_v4, %v306_v46 }
 0xa3f   :  { %v6594_v41 = vmul.f32 -1.442695, %v5653_v58  ;;  %v7899_v15 = vpop.eup %7898 }
 0xa40   :  { %v14717_v48 = vadd.f32 1.0, %v7899_v15 }
 0xa42   :  { %vm5755_vm5 = vweird.f32 %v14717_v48 }
 0xa44   :  { %v5654_v21 = vpop.f32.mrf.mxu3 }
 0xa45   :  { %v5655_v32 = vadd.f32 %v5654_v21, %v16376_v42  ;;  %v294_v42 = vmul.f32 %v285_v39, %v266_v30 }
 0xa47   :  { %v6595_v38 = vmul.f32 -1.442695, %v5655_v32  ;;  %v326_v32 = vpop.permute.xlu1 %325 }
 0xa4c   :  { %v5657_v57 = vpop.f32.mrf.mxu3 }
 0xa4d   :  { %v5658_v18 = vadd.f32 %v5657_v57, %v16374_v25 }
 0xa4f   :  { %v6596_v50 = vmul.f32 -1.442695, %v5658_v18 }
 0xa51   :  { %7900 = vpow2.f32 %v6596_v50 }
 0xa52   :  { %7902 = vpow2.f32 %v6594_v41 }
 0xa53   :  { %7904 = vpow2.f32 %v6595_v38  ;;  %v267_v38 = vld [vmem:[%s15080_s5 + $0x18] sm:$0xff] }
 0xa54   :  { %v5659_v7 = vpop.f32.mrf.mxu3 }
 0xa55   :  { %v5660_v11 = vadd.f32 %v5659_v7, %v16377_v62  ;;  %v293_v7 = vmul.f32 %v280_v17, %v265_v44 }
 0xa57   :  { %v6597_v29 = vmul.f32 -1.442695, %v5660_v11  ;;  %v7901_v3 = vpop.eup %7900 }
 0xa58   :  { %v7903_v23 = vpop.eup %7902 }
 0xa59   :  { %7906 = vpow2.f32 %v6597_v29  ;;  %v7905_v9 = vpop.eup %7904  ;;  %v290_v29 = vpop.permute.xlu2 %289 }
 0xa5a   :  { %v14726_v51 = vadd.f32 1.0, %v7905_v9 }
 0xa5c   :  { %v5662_v63 = vpop.f32.mrf.mxu3 }
 0xa5d   :  { %v5663_v14 = vadd.f32 %v5662_v63, %v16305_v53  ;;  %v14719_v53 = vadd.f32 1.0, %v7901_v3  ;;  %v292_v63 = vmul.f32 %v275_v59, %v264_v20  ;;  %v308_v59 = vld [vmem:[%s15081_s6 + $0x18] sm:$0xff]  ;;  %v331_v3 = vpop.permute.xlu0 %330 }
 0xa5f   :  { %v6598_v5 = vmul.f32 -1.442695, %v5663_v14  ;;  %v7907_v12 = vpop.eup %7906  ;;  %v296_v58 = vadd.f32 %v293_v7, %v292_v63  ;;  %vm5800_vm2 = vweird.f32 %v14719_v53 }
 0xa60   :  { %v14735_v49 = vadd.f32 1.0, %v7907_v12 }
 0xa61   :  { %7908 = vpow2.f32 %v6598_v5  ;;  %v297_v5 = vadd.f32 %v296_v58, %v294_v42 }
 0xa62   :  { %7910 = vrcp.f32 %v14714_v45  ;;  %v5821_v46 = vand.u32 2147483648, %v14735_v49  ;;  %vm5815_vm13 = vweird.f32 %v14735_v49 }
 0xa63   :  { %7912 = vrcp.f32 %v14717_v48 }
 0xa64   :  { %v5664_v40 = vpop.f32.mrf.mxu3  ;;  %7914 = vrcp.f32 %v14719_v53 }
 0xa65   :  { %v5665_v52 = vadd.f32 %v5664_v40, %v16171_v19  ;;  %v14723_v19 = vadd.f32 1.0, %v7903_v23  ;;  %v307_v40 = vld [vmem:[%s15081_s6 + $0x10] sm:$0xff] }
 0xa66   :  { %v335_v41 = vmul.f32 %v326_v32, %v307_v40  ;;  %v14822_v32 = vor.u32 1.1754944e-38, %v5821_v46 }
 0xa67   :  { %v6599_v60 = vmul.f32 -1.442695, %v5665_v52  ;;  %v7909_v35 = vpop.eup %7908  ;;  %v295_v52 = vmul.f32 %v290_v29, %v267_v38  ;;  %v5744_v29 = vand.u32 2147483647, %v14714_v45 }
 0xa68   :  { %v14744_v57 = vpop.eup %7910  ;;  %v14753_v25 = vadd.f32 1.0, %v7909_v35  ;;  %v5806_v35 = vand.u32 2147483648, %v14719_v53 }
 0xa69   :  { %7916 = vpow2.f32 %v6599_v60  ;;  %v14747_v16 = vpop.eup %7912  ;;  %v336_v60 = vmul.f32 %v331_v3, %v308_v59  ;;  %v14802_v39 = vadd.f32 %v297_v5, %v295_v52  ;;  %v5746_v3 = vand.u32 2147483648, %v14714_v45 }
 0xa6a   :  { %v14755_v6 = vpop.eup %7914  ;;  %v5836_v30 = vand.u32 2147483648, %v14753_v25  ;;  %vm5741_vm8 = vweird.f32 %v14744_v57  ;;  %vm14855_vm0 = vcmp.eq.f32.partialorder %v5744_v29, 8.507059e+37  ;;  %vm5830_vm4 = vweird.f32 %v14753_v25 }
 0xa6b   :  { %v5796_v15 = vmul.f32 %v14755_v6, %v14719_v53  ;;  %vm5801_vm9 = vweird.f32 %v14755_v6  ;;  %vm14863_vm1 = vmor %vm5740_vm12, %vm5741_vm8  ;;  %vm5756_vm10 = vweird.f32 %v14747_v16 }
 0xa6c   :  { %v5667_v13 = vpop.f32.mrf.mxu3  ;;  %vm14847_vm7 = vmor %vm5800_vm2, %vm5801_vm9 }
 0xa6d   :  { %v5668_v34 = vadd.f32 %v5667_v13, %v16177_v43  ;;  %v5797_v20 = vsub.f32 1.0, %v5796_v15  ;;  %vm14911_vm9 = vmor %vm5755_vm5, %vm5756_vm10 }
 0xa6f   :  { %v6600_v8 = vmul.f32 -1.442695, %v5668_v34  ;;  %v7917_v33 = vpop.eup %7916  ;;  %v5798_v40 = vmul.f32 %v14755_v6, %v5797_v20 }
 0xa70   :  { %v14774_v13 = vadd.f32 1.0, %v7917_v33  ;;  %v5807_v33 = vor.u32 1.1754944e-38, %v5806_v35  ;;  %v5747_v35 = vor.u32 1.1754944e-38, %v5746_v3 }
 0xa71   :  { %7918 = vpow2.f32 %v6600_v8 }
 0xa72   :  { %7920 = vrcp.f32 %v14723_v19 }
 0xa73   :  { %7922 = vrcp.f32 %v14726_v51 }
 0xa74   :  { %v5669_v22 = vpop.f32.mrf.mxu3  ;;  %7924 = vrcp.f32 %v14735_v49 }
 0xa75   :  { %v5670_v43 = vadd.f32 %v5669_v22, %v16186_v36  ;;  %v305_v36 = vld [vmem:[%s15081_s6] sm:$0xff]  ;;  %v14784_v22 = vmul.f32 %v14747_v16, %v14717_v48 }
 0xa76   :  { %v333_v2 = vmul.f32 %v316_v27, %v305_v36 }
 0xa77   :  { %v6601_v21 = vmul.f32 -1.442695, %v5670_v43  ;;  %v7919_v24 = vpop.eup %7918  ;;  %v5752_v63 = vsub.f32 1.0, %v14784_v22 }
 0xa78   :  { %v14761_v62 = vpop.eup %7920  ;;  %v337_v11 = vadd.f32 %v334_v37, %v333_v2  ;;  %v14780_v17 = vadd.f32 1.0, %v7919_v24 }
 0xa79   :  { %7926 = vpow2.f32 %v6601_v21  ;;  %v14767_v14 = vpop.eup %7922  ;;  %v14788_v12 = vmul.f32 %v14761_v62, %v14723_v19 }
 0xa7a   :  { %7928 = vrcp.f32 %v14753_v25  ;;  %v14776_v28 = vpop.eup %7924  ;;  %v338_v9 = vadd.f32 %v337_v11, %v335_v41  ;;  %v14792_v4 = vmul.f32 %v14767_v14, %v14726_v51  ;;  %v14828_v11 = vor.u32 1.1754944e-38, %v5836_v30 }
 0xa7b   :  { %v5811_v43 = vmul.f32 %v14776_v28, %v14735_v49  ;;  %7930 = vrcp.f32 %v14774_v13  ;;  %v5767_v2 = vsub.f32 1.0, %v14788_v12  ;;  %vm5816_vm3 = vweird.f32 %v14776_v28 }
 0xa7c   :  { %v5672_v18 = vpop.f32.mrf.mxu3  ;;  %7932 = vrcp.f32 %v14780_v17  ;;  %v14807_v7 = vadd.f32 %v338_v9, %v336_v60  ;;  %v5782_v37 = vsub.f32 1.0, %v14792_v4  ;;  %v5851_v41 = vand.u32 2147483648, %v14774_v13  ;;  %vm14883_vm11 = vmor %vm5815_vm13, %vm5816_vm3 }
 0xa7d   :  { %v5673_v50 = vadd.f32 %v5672_v18, %v16330_v56  ;;  %v5736_v56 = vmul.f32 %v14744_v57, %v14714_v45  ;;  %v5866_v46 = vand.u32 2147483648, %v14780_v17  ;;  %vm5860_vm14 = vweird.f32 %v14780_v17 }
 0xa7e   :  { %v14851_v60 = vor.u32 1.1754944e-38, %v5851_v41 }
 0xa7f   :  { %v6602_v34 = vmul.f32 -1.442695, %v5673_v50  ;;  %v7927_v23 = vpop.eup %7926  ;;  %v5737_v8 = vsub.f32 1.0, %v5736_v56 }
 0xa80   :  { %v14797_v44 = vpop.eup %7928  ;;  %v14805_v21 = vadd.f32 1.0, %v7927_v23 }
 0xa81   :  { %7934 = vpow2.f32 %v6602_v34  ;;  %v5826_v18 = vmul.f32 %v14797_v44, %v14753_v25  ;;  %v5738_v58 = vmul.f32 %v14744_v57, %v5737_v8  ;;  %v14818_v42 = vpop.eup %7930  ;;  %v5799_v34 = vadd.f32 %v14755_v6, %v5798_v40 }
 0xa82   :  { %7936 = vrcp.f32 %v14805_v21  ;;  %v14825_v50 = vpop.eup %7932  ;;  %v5841_v23 = vmul.f32 %v14818_v42, %v14774_v13  ;;  %v5804_v8 = vand.u32 2147483647, %v14719_v53  ;;  %vm5831_vm6 = vweird.f32 %v14797_v44 }
 0xa83   :  { %v5827_v15 = vsub.f32 1.0, %v5826_v18  ;;  %v5739_v52 = vadd.f32 %v14744_v57, %v5738_v58  ;;  %v5856_v9 = vmul.f32 %v14825_v50, %v14780_v17  ;;  %v5803_v53 = vsel %vm14847_vm7, %v14755_v6, %v5799_v34 }
 0xa84   :  { %v5674_v27 = vpop.f32.mrf.mxu3  ;;  %v5842_v18 = vsub.f32 1.0, %v5841_v23  ;;  %v5819_v58 = vand.u32 2147483647, %v14735_v49  ;;  %vm5805_vm15 = vcmp.eq.f32.partialorder %v5804_v8, 8.507059e+37  ;;  %vm5861_vm3 = vweird.f32 %v14825_v50 }
 0xa85   :  { %v5675_v36 = vadd.f32 %v5674_v27, %v16331_v47  ;;  %v5812_v47 = vsub.f32 1.0, %v5811_v43  ;;  %v5828_v43 = vmul.f32 %v14797_v44, %v5827_v15  ;;  %v5743_v30 = vsel %vm14863_vm1, %v14744_v57, %v5739_v52  ;;  %vm14952_vm5 = vmor %vm5860_vm14, %vm5861_vm3 }
 0xa86   :  { %v5857_v40 = vsub.f32 1.0, %v5856_v9  ;;  %v5808_v49 = vsel %vm5805_vm15, %v5807_v33, %v5803_v53  ;;  %vm5820_vm2 = vcmp.eq.f32.partialorder %v5819_v58, 8.507059e+37  ;;  %v5843_v9 = vmul.f32 %v14818_v42, %v5842_v18 }
 0xa87   :  { %v6603_v24 = vmul.f32 -1.442695, %v5675_v36  ;;  %v7935_v59 = vpop.eup %7934  ;;  %v5813_v56 = vmul.f32 %v14776_v28, %v5812_v47  ;;  %v5753_v47 = vmul.f32 %v14747_v16, %v5752_v63  ;;  %v5761_v63 = vand.u32 2147483648, %v14717_v48 }
 0xa88   :  { %v14853_v22 = vadd.f32 1.0, %v7935_v59  ;;  %v14860_v45 = vpop.eup %7936  ;;  %v5748_v59 = vsel %vm14855_vm0, %v5747_v35, %v5743_v30  ;;  %v5858_v34 = vmul.f32 %v14825_v50, %v5857_v40  ;;  %v5879_v30 = vand.u32 2147483647, %v14805_v21 }
 0xa89   :  { %7938 = vpow2.f32 %v6603_v24  ;;  %v5814_v36 = vadd.f32 %v14776_v28, %v5813_v56  ;;  %v5759_v24 = vand.u32 2147483647, %v14717_v48  ;;  %v5871_v57 = vmul.f32 %v14860_v45, %v14805_v21 }
 0xa8a   :  { %v5754_v52 = vadd.f32 %v14747_v16, %v5753_v47  ;;  %v5762_v20 = vor.u32 1.1754944e-38, %v5761_v63  ;;  %v5881_v53 = vand.u32 2147483648, %v14805_v21  ;;  %vm5846_vm12 = vweird.f32 %v14818_v42 }
 0xa8b   :  { %v5818_v15 = vsel %vm14883_vm11, %v14776_v28, %v5814_v36  ;;  %v5919_v28 = vmul.f32 %v5808_v49, %v14552_v0  ;;  %vm14915_vm13 = vcmp.eq.f32.partialorder %v5759_v24, 8.507059e+37  ;;  %v5768_v36 = vmul.f32 %v14761_v62, %v5767_v2  ;;  %vm14962_vm11 = vmor %vm5830_vm4, %vm5831_vm6 }
 0xa8c   :  { %v5677_v38 = vpop.f32.mrf.mxu3  ;;  %v5823_v23 = vsel %vm5820_vm2, %v14822_v32, %v5818_v15  ;;  %v5758_v48 = vsel %vm14911_vm9, %v14747_v16, %v5754_v52  ;;  %vm5770_vm7 = vweird.f32 %v14723_v19  ;;  %v5829_v16 = vadd.f32 %v14797_v44, %v5828_v43 }
 0xa8d   :  { %v5678_v5 = vadd.f32 %v5677_v38, %v16333_v31  ;;  %v5867_v31 = vor.u32 1.1754944e-38, %v5866_v46  ;;  %v5859_v46 = vadd.f32 %v14825_v50, %v5858_v34  ;;  %v5920_v47 = vmul.f32 %v5823_v23, %v14570_v55 }
 0xa8e   :  { %v5763_v24 = vsel %vm14915_vm13, %v5762_v20, %v5758_v48  ;;  %vm5771_vm0 = vweird.f32 %v14761_v62  ;;  %vm5845_vm1 = vweird.f32 %v14774_v13  ;;  %v5834_v38 = vand.u32 2147483647, %v14753_v25 }
 0xa8f   :  { %7940 = vtanh.f32 %v5678_v5  ;;  %v7939_v41 = vpop.eup %7938  ;;  %v5864_v5 = vand.u32 2147483647, %v14780_v17  ;;  %v5863_v17 = vsel %vm14952_vm5, %v14825_v50, %v5859_v46  ;;  %vm5876_vm15 = vweird.f32 %v14860_v45  ;;  %vm14985_vm10 = vmor %vm5770_vm7, %vm5771_vm0 }
 0xa90   :  { %7942 = vrcp.f32 %v14853_v22  ;;  %v14904_v33 = vadd.f32 1.0, %v7939_v41  ;;  %v5769_v41 = vadd.f32 %v14761_v62, %v5768_v36  ;;  %v5833_v25 = vsel %vm14962_vm11, %v14797_v44, %v5829_v16  ;;  %v5951_v16 = vpop.permute.xlu2 %5950 }
 0xa91   :  { %vm14922_vm8 = vcmp.eq.f32.partialorder %v5864_v5, 8.507059e+37  ;;  %vm5875_vm6 = vweird.f32 %v14805_v21  ;;  %vm14977_vm4 = vcmp.eq.f32.partialorder %v5879_v30, 8.507059e+37  ;;  %v5882_v50 = vor.u32 1.1754944e-38, %v5881_v53 }
 0xa92   :  { %v5773_v44 = vsel %vm14985_vm10, %v14761_v62, %v5769_v41  ;;  %vm5835_vm14 = vcmp.eq.f32.partialorder %v5834_v38, 8.507059e+37  ;;  %v5783_v21 = vmul.f32 %v14767_v14, %v5782_v37  ;;  %vm14999_vm2 = vmor %vm5875_vm6, %vm5876_vm15  ;;  %vm5890_vm9 = vweird.f32 %v14853_v22 }
 0xa93   :  { %v5894_v5 = vand.u32 2147483647, %v14853_v22  ;;  %v5838_v62 = vsel %vm5835_vm14, %v14828_v11, %v5833_v25  ;;  %vm5786_vm3 = vweird.f32 %v14767_v14  ;;  %v5849_v0 = vand.u32 2147483647, %v14774_v13 }
 0xa94   :  { %v5679_v6 = vpop.f32.mrf.mxu3  ;;  %v5921_v8 = vmul.f32 %v5838_v62, %v14653_v26  ;;  %vm5785_vm7 = vweird.f32 %v14726_v51  ;;  %v5789_v46 = vand.u32 2147483647, %v14726_v51  ;;  %v340_v58 = vrot.slane %v14807_v7, 4 }
 0xa95   :  { %v7941_v29 = vpop.eup %7940  ;;  %v5680_v56 = vadd.f32 %v5679_v6, %v16339_v61  ;;  %v5872_v61 = vsub.f32 1.0, %v5871_v57  ;;  %v5776_v57 = vand.u32 2147483648, %v14723_v19  ;;  %vm15040_vm0 = vmor %vm5785_vm7, %vm5786_vm3  ;;  %vm5895_vm15 = vcmp.eq.f32.partialorder %v5894_v5, 8.507059e+37 }
 0xa96   :  { %v5923_v3 = vmul.f32 %v7941_v29, %v5748_v59  ;;  %v14919_v35 = vpop.eup %7942  ;;  %v5774_v29 = vand.u32 2147483647, %v14723_v19  ;;  %vm5790_vm11 = vcmp.eq.f32.partialorder %v5789_v46, 8.507059e+37 }
 0xa97   :  { %7944 = vtanh.f32 %v5680_v56  ;;  %v5873_v18 = vmul.f32 %v14860_v45, %v5872_v61  ;;  %v5886_v2 = vmul.f32 %v14919_v35, %v14853_v22  ;;  %v5777_v52 = vor.u32 1.1754944e-38, %v5776_v57 }
 0xa98   :  { %v5927_v32 = vadd.f32 %v5923_v3, %v5919_v28  ;;  %7946 = vrcp.f32 %v14904_v33  ;;  %v5868_v3 = vsel %vm14922_vm8, %v5867_v31, %v5863_v17  ;;  %vm5775_vm13 = vcmp.eq.f32.partialorder %v5774_v29, 8.507059e+37  ;;  %vm15024_vm8 = vmor %vm5845_vm1, %vm5846_vm12 }
 0xa99   :  { %v5874_v6 = vadd.f32 %v14860_v45, %v5873_v18  ;;  %v5887_v49 = vsub.f32 1.0, %v5886_v2  ;;  %v5844_v61 = vadd.f32 %v14818_v42, %v5843_v9  ;;  %v5778_v27 = vsel %vm5775_vm13, %v5777_v52, %v5773_v44 }
 0xa9a   :  { %7948 = vtanh.f32 %v5927_v32  ;;  %vm5891_vm12 = vweird.f32 %v14919_v35  ;;  %vm5850_vm1 = vcmp.eq.f32.partialorder %v5849_v0, 8.507059e+37  ;;  %v5911_v56 = vand.u32 2147483648, %v14904_v33 }
 0xa9b   :  { %v5878_v4 = vsel %vm14999_vm2, %v14860_v45, %v5874_v6  ;;  %v5888_v23 = vmul.f32 %v14919_v35, %v5887_v49  ;;  %v5784_v45 = vadd.f32 %v14767_v14, %v5783_v21  ;;  %v5848_v13 = vsel %vm15024_vm8, %v14818_v42, %v5844_v61  ;;  %vm5892_vm5 = vmor %vm5890_vm9, %vm5891_vm12  ;;  %v5956_v49 = vpop.permute.xlu0 %5955 }
 0xa9c   :  { %v5682_v40 = vpop.f32.mrf.mxu3  ;;  %v5883_v48 = vsel %vm14977_vm4, %v5882_v50, %v5878_v4  ;;  %vm5905_vm4 = vweird.f32 %v14904_v33  ;;  %v5912_v5 = vor.u32 1.1754944e-38, %v5911_v56  ;;  %v348_v0 = vstv %s15082_s10 }
 0xa9d   :  { %v7945_v12 = vpop.eup %7944  ;;  %v5683_v55 = vadd.f32 %v5682_v40, %v16349_v1  ;;  %v5889_v30 = vadd.f32 %v14919_v35, %v5888_v23  ;;  %v5946_v40 = vpop.permute.xlu1 %5945  ;;  %v5788_v42 = vsel %vm15040_vm0, %v14767_v14, %v5784_v45 }
 0xa9e   :  { %v5924_v43 = vmul.f32 %v7945_v12, %v5763_v24  ;;  %v14989_v15 = vpop.eup %7946 }
 0xa9f   :  { %7950 = vtanh.f32 %v5683_v55  ;;  %v5901_v31 = vmul.f32 %v14989_v15, %v14904_v33  ;;  %v5853_v55 = vsel %vm5850_vm1, %v14851_v60, %v5848_v13  ;;  %v5893_v38 = vsel %vm5892_vm5, %v14919_v35, %v5889_v30 }
 0xaa0   :  { %v5928_v63 = vadd.f32 %v5924_v43, %v5920_v47  ;;  %v7949_v34 = vpop.eup %7948  ;;  %v299_v43 = vrot.slane %v14802_v39, 4  ;;  %v5922_v60 = vmul.f32 %v5853_v55, %v14660_v10  ;;  %vm5906_vm6 = vweird.f32 %v14989_v15 }
 0xaa1   :  { %v5935_v32 = vmul.f32 %v7949_v34, %v5868_v3  ;;  %v5902_v53 = vsub.f32 1.0, %v5901_v31  ;;  %v5909_v10 = vand.u32 2147483647, %v14904_v33  ;;  %vm5907_vm10 = vmor %vm5905_vm4, %vm5906_vm6 }
 0xaa2   :  { %7952 = vtanh.f32 %v5928_v63  ;;  %v300_v29 = vadd.f32 %v299_v43, %v14802_v39 }
 0xaa3   :  { %v5963_v12 = vmul.f32 %v5946_v40, %v5935_v32  ;;  %v5903_v14 = vmul.f32 %v14989_v15, %v5902_v53  ;;  %vm5910_vm14 = vcmp.eq.f32.partialorder %v5909_v10, 8.507059e+37 }
 0xaa4   :  { %v5684_v37 = vpop.f32.mrf.mxu3  ;;  %v301_v21 = vrot.slane %v300_v29, 2 }
 0xaa5   :  { %v7951_v28 = vpop.eup %7950  ;;  %v5685_v11 = vadd.f32 %v5684_v37, %v16359_v54  ;;  %v5791_v54 = vand.u32 2147483648, %v14726_v51  ;;  %v5896_v51 = vand.u32 2147483648, %v14853_v22  ;;  %v341_v22 = vadd.f32 %v340_v58, %v14807_v7  ;;  %v5961_v37 = vpop.permute.xlu1 %5960 }
 0xaa6   :  { %v5925_v20 = vmul.f32 %v7951_v28, %v5778_v27  ;;  %v5904_v50 = vadd.f32 %v14989_v15, %v5903_v14  ;;  %v302_v34 = vadd.f32 %v301_v21, %v300_v29 }
 0xaa7   :  { %7954 = vtanh.f32 %v5685_v11  ;;  %v5792_v24 = vor.u32 1.1754944e-38, %v5791_v54  ;;  %v5897_v57 = vor.u32 1.1754944e-38, %v5896_v51  ;;  %v342_v39 = vrot.slane %v341_v22, 2 }
 0xaa8   :  { %v7953_v26 = vpop.eup %7952  ;;  %v5929_v36 = vadd.f32 %v5925_v20, %v5921_v8  ;;  %v5908_v19 = vsel %vm5907_vm10, %v14989_v15, %v5904_v50  ;;  %v303_v23 = vrot.slane %v302_v34, 1 }
 0xaa9   :  { %v5936_v47 = vmul.f32 %v7953_v26, %v5883_v48  ;;  %v5793_v17 = vsel %vm5790_vm11, %v5792_v24, %v5788_v42  ;;  %v5898_v25 = vsel %vm5895_vm15, %v5897_v57, %v5893_v38  ;;  %v5913_v52 = vsel %vm5910_vm14, %v5912_v5, %v5908_v19 }
 0xaaa   :  { %7956 = vtanh.f32 %v5929_v36  ;;  %v343_v62 = vadd.f32 %v342_v39, %v341_v22  ;;  %v304_v11 = vadd.f32 %v303_v23, %v302_v34 }
 0xaab   :  { %v5964_v2 = vmul.f32 %v5951_v16, %v5936_v47 }
 0xaac   :  { %v344_v28 = vrot.slane %v343_v62, 1 }
 0xaad   :  { %v7955_v41 = vpop.eup %7954  ;;  %v5967_v1 = vadd.f32 %v5964_v2, %v5963_v12 }
 0xaae   :  { %v5926_v6 = vmul.f32 %v7955_v41, %v5793_v17  ;;  %v345_v27 = vadd.f32 %v344_v28, %v343_v62 }
 0xab0   :  { %v7957_v63 = vpop.eup %7956  ;;  %v5930_v59 = vadd.f32 %v5926_v6, %v5922_v60  ;;  %v346_v45 = vadd.f32 %v345_v27, %v304_v11 }
 0xab1   :  { %v5937_v35 = vmul.f32 %v7957_v63, %v5898_v25 }
 0xab2   :  { %7958 = vtanh.f32 %v5930_v59  ;;  %v349_v32 = vadd.f32 %v348_v0, %v346_v45 }
 0xab3   :  { %v5965_v44 = vmul.f32 %v5956_v49, %v5937_v35 }
 0xab5   :  { %v5968_v7 = vadd.f32 %v5967_v1, %v5965_v44 }
 0xab8   :  { %v7959_v3 = vpop.eup %7958 }
 0xab9   :  { %v5938_v4 = vmul.f32 %v7959_v3, %v5913_v52 }
 0xabb   :  { %v5966_v61 = vmul.f32 %v5961_v37, %v5938_v4 }
 0xabd   :  { %v5969_v31 = vadd.f32 %v5968_v7, %v5966_v61 }
 0xabf   :  { %v5970_v33 = vrot.slane %v5969_v31, 4 }
 0xac1   :  { %v5971_v8 = vadd.f32 %v5970_v33, %v5969_v31 }
 0xac3   :  { %v5972_v20 = vrot.slane %v5971_v8, 2 }
 0xac5   :  { %v5973_v15 = vadd.f32 %v5972_v20, %v5971_v8 }
 0xac7   :  { %v5974_v9 = vrot.slane %v5973_v15, 1 }
 0xac9   :  { %v5975_v54 = vadd.f32 %v5974_v9, %v5973_v15 }
 0xacb   :  { %v5976_v26 = vadd.f32 %v5975_v54, %v349_v32 }
 0xacd   :  { %5977 = vst [vmem:[%s15083_s11] sm:$0x1] %v5976_v26 }

</bundles_post_ra>
